<compile_context>
chip_gen: v6e
topology: v6e:2x2x1
jax: 0.10.0
libtpu: 0.0.40
codegen_flags: <defaults>
</compile_context>

<pallas_src>
import functools

import jax
import jax.numpy as jnp
import numpy as np
from jax.experimental import pallas as pl
from jax.experimental.pallas import tpu as pltpu

LEAKY_ALPHA = 0.2
_HP = jax.lax.Precision.HIGHEST


# ----------------------------------------------------------------------------
# Fused kernel: gc1 -> (dropout: identity, eval) -> gc2 -> gc6
# ----------------------------------------------------------------------------
def _gat_fused_kernel(xnei_ref, xnei2_ref, xfeat_ref,
                      w1n_ref, w1s_ref, w2n_ref, w2s_ref, bl_ref,
                      out_ref, *, S0, S1, K1, H1, K2, train_attention):
    TB = xfeat_ref.shape[0]          # center nodes in this tile
    N1 = TB * S0                     # 1-hop neighbors in this tile

    # ---------------- gc1: K1 heads over S1 sampled 2-hop neighbors ---------
    # ONE MXU matmul yields every head's value projection AND the a_nei-folded
    # logit columns (last K1 lanes). Values stay 2D (N1*S1, K1*H1).
    hh1 = jnp.dot(xnei2_ref[...], w1n_ref[...],
                  preferred_element_type=jnp.float32)          # (N1*S1, K1*H1+K1)
    e1_self = jnp.dot(xnei_ref[...], w1s_ref[...],
                      preferred_element_type=jnp.float32)      # (N1, K1)

    head_outs = []
    for k in range(K1):              # K1 in {1, 2}: static unroll
        h_k = hh1[:, k * H1:(k + 1) * H1]                      # (N1*S1, H1)  2D
        e_nei = hh1[:, K1 * H1 + k:K1 * H1 + k + 1]            # (N1*S1, 1)
        e = e_nei.reshape(N1, S1, 1) + e1_self[:, k:k + 1].reshape(N1, 1, 1)
        e = jnp.where(e > 0, e, LEAKY_ALPHA * e)               # LeakyReLU
        if train_attention:
            m = jnp.max(e, axis=1, keepdims=True)              # (N1, 1, 1)
            p = jnp.exp(e - m)                                 # (N1, S1, 1)
            num = (h_k * p.reshape(N1 * S1, 1)).reshape(N1, S1, H1).sum(axis=1)
            inv = pl.reciprocal(jnp.sum(p, axis=1), approx=True)   # (N1, 1)
            agg = num * inv                                    # (N1, H1)
        else:
            agg = h_k.reshape(N1, S1, H1).sum(axis=1) * (1.0 / S1)
        # ELU (concat layer); exp clamped so the unselected branch can't overflow.
        agg = jnp.where(agg > 0, agg, jnp.exp(jnp.minimum(agg, 0.0)) - 1.0)
        head_outs.append(agg)
    x_1 = jnp.concatenate(head_outs, axis=1) if K1 > 1 else head_outs[0]
    # TODO(synk): training-mode dropout not implemented (module runs in eval).

    # ------------- gc2 (+ gc6 folded): K2 heads over S0 1-hop neighbors -----
    # concat=False and no activation before gc6, so Wl folds into the value
    # column: hh2 = [x_1 @ (W2_k a_nei_k) | x_1 @ (W2_k Wl)] per head.
    hh2 = jnp.dot(x_1, w2n_ref[...],
                  preferred_element_type=jnp.float32)          # (N1, 2*K2)
    e2_self = jnp.dot(xfeat_ref[...], w2s_ref[...],
                      preferred_element_type=jnp.float32)      # (TB, K2)

    z = jnp.zeros((TB, 1), jnp.float32)
    for k in range(K2):              # K2 = 1 here: static unroll
        e = hh2[:, k:k + 1].reshape(TB, S0, 1) \
            + e2_self[:, k:k + 1].reshape(TB, 1, 1)
        e = jnp.where(e > 0, e, LEAKY_ALPHA * e)
        v = hh2[:, K2 + k:K2 + k + 1].reshape(TB, S0, 1)
        if train_attention:
            m = jnp.max(e, axis=1, keepdims=True)
            p = jnp.exp(e - m)
            z = z + jnp.sum(p * v, axis=1) * pl.reciprocal(jnp.sum(p, axis=1),
                                                           approx=True)
        else:
            z = z + jnp.sum(v, axis=1) * (1.0 / S0)
    z = z * (1.0 / K2) + bl_ref[0, 0]
    out_ref[...] = (1.0 / (1.0 + jnp.exp(-z))).astype(out_ref.dtype)


# ----------------------------------------------------------------------------
# pallas_call wrapper
# ----------------------------------------------------------------------------
def _pick_node_tile(B):
    """Center-node tile: full batch when small, else the largest multiple-of-8
    divisor (keeps every BlockSpec (8,128)-legal and per-tile VMEM tiny —
    well under the 16/32 MiB default scoped limits on v5e / v6e+v7x)."""
    if B <= 256:
        return B
    for t in (256, 128, 64, 32, 16, 8):
        if B % t == 0:
            return t
    return B


def gat_forward(params, x, x_nei, x_nei2, train_attention=True):
    """GAT.forward(x, x_nei, x_nei2) — inference mode (dropout = identity)."""
    W1, a1 = params["W1"], params["a1"]
    W2, a2 = params["W2"], params["a2"]
    Wl, bl = params["Wl"], params["bl"]
    K1, F1, H1 = W1.shape
    K2, F2, H2 = W2.shape
    N1, S1, _ = x_nei2.shape
    B = x.shape[0]
    S0 = N1 // B

    # ---- fold attention vectors (and Wl) into the projection matrices ------
    w1_heads = jnp.transpose(W1, (1, 0, 2)).reshape(F1, K1 * H1)        # (F1, K1*H1)
    w1_anei = jnp.einsum("kfh,kh->fk", W1, a1[:, H1:], precision=_HP)   # (F1, K1)
    w1n = jnp.concatenate([w1_heads, w1_anei], axis=1)                  # (F1, K1*H1+K1)
    w1s = jnp.einsum("kfh,kh->fk", W1, a1[:, :H1], precision=_HP)       # (F1, K1)

    w2_anei = jnp.einsum("kfh,kh->fk", W2, a2[:, H2:], precision=_HP)   # (F2, K2)
    w2_val = jnp.einsum("kfh,ho->fk", W2, Wl, precision=_HP)            # (F2, K2)
    w2n = jnp.concatenate([w2_anei, w2_val], axis=1)                    # (F2, 2*K2)
    w2s = jnp.einsum("kfh,kh->fk", W2, a2[:, :H2], precision=_HP)       # (F2, K2)

    x_nei2_flat = x_nei2.reshape(N1 * S1, F1)   # contiguous reshape: no HBM copy
    x_feat = x[:, :K1 * H1]                     # torch.index_select(x, 1, arange(K1*nhid))

    tile_b = _pick_node_tile(B)
    grid = (B // tile_b,)

    kernel = functools.partial(_gat_fused_kernel, S0=S0, S1=S1, K1=K1, H1=H1,
                               K2=K2, train_attention=train_attention)

    return pl.pallas_call(
        kernel,
        out_shape=jax.ShapeDtypeStruct((B, 1), jnp.float32),
        grid=grid,
        in_specs=[
            pl.BlockSpec((tile_b * S0, F1), lambda i: (i, 0)),           # x_nei
            pl.BlockSpec((tile_b * S0 * S1, F1), lambda i: (i, 0)),      # x_nei2 flat
            pl.BlockSpec((tile_b, F2), lambda i: (i, 0)),                # x_feat
            pl.BlockSpec((F1, K1 * H1 + K1), lambda i: (0, 0)),          # w1n
            pl.BlockSpec((F1, K1), lambda i: (0, 0)),                    # w1s
            pl.BlockSpec((F2, 2 * K2), lambda i: (0, 0)),                # w2n
            pl.BlockSpec((F2, K2), lambda i: (0, 0)),                    # w2s
            pl.BlockSpec(memory_space=pltpu.MemorySpace.SMEM),           # bl (1,1)
        ],
        out_specs=pl.BlockSpec((tile_b, 1), lambda i: (i, 0)),
        compiler_params=pltpu.CompilerParams(
            dimension_semantics=("parallel",)),
    )(x_nei, x_nei2_flat, x_feat, w1n, w1s, w2n, w2s, bl)


# ----------------------------------------------------------------------------
# Pure-JAX reference (same math) for correctness check
# ----------------------------------------------------------------------------
def _gat_layer_ref(x_self, x_nei, W, a, concat):
    K, _, H = W.shape
    outs = []
    for k in range(K):
        h_self = jnp.matmul(x_self, W[k], precision=_HP)
        h_nei = jnp.einsum("nsf,fh->nsh", x_nei, W[k], precision=_HP)
        e = (h_self * a[k, :H]).sum(-1, keepdims=True)[:, :, None] \
            + (h_nei * a[k, H:]).sum(-1, keepdims=True)
        e = jnp.where(e > 0, e, LEAKY_ALPHA * e)
        att = jax.nn.softmax(e, axis=1)
        ho = jnp.sum(att * h_nei, axis=1)
        if concat:
            ho = jnp.where(ho > 0, ho, jnp.exp(jnp.minimum(ho, 0.0)) - 1.0)
        outs.append(ho)
    return jnp.concatenate(outs, axis=1) if concat else sum(outs) / float(K)


def gat_forward_ref(params, x, x_nei, x_nei2):
    x_1 = _gat_layer_ref(x_nei, x_nei2, params["W1"], params["a1"], concat=True)
    nei_, fs = x_1.shape
    xf = x[:, :fs]
    x_1n = x_1.reshape(xf.shape[0], nei_ // xf.shape[0], fs)
    x_2 = _gat_layer_ref(xf, x_1n, params["W2"], params["a2"], concat=False)
    z = jnp.matmul(x_2, params["Wl"], precision=_HP) + params["bl"]
    return 1.0 / (1.0 + jnp.exp(-z))


# ----------------------------------------------------------------------------
if __name__ == "__main__":
    # GAT(K, node_num, nfeat, nhid, nclass, sampleSize, dropout, trainAttention)
    K, nfeat, nhid, nclass = 2, 20, 8, 1
    sampleSize = (4, 3)          # (S0 first-hop samples, S1 second-hop samples)
    S0, S1 = sampleSize
    batch = 8                    # number of center nodes

    key = jax.random.PRNGKey(0)
    ks = jax.random.split(key, 10)

    # inputs
    x = jax.random.normal(ks[0], (batch, nfeat), jnp.float32)                # center nodes
    x_nei = jax.random.normal(ks[1], (batch * S0, nfeat), jnp.float32)       # 1-hop neighbors
    x_nei2 = jax.random.normal(ks[2], (batch * S0, S1, nfeat), jnp.float32)  # 2-hop neighbors

    # deterministic parameter init (synthetic)
    scale = 0.3
    params = {
        # gc1 = GraphConvolution(K, node_num, nfeat, nhid, S1, bias=False, concat=True)
        "W1": scale * jax.random.normal(ks[3], (K, nfeat, nhid), jnp.float32),
        "a1": scale * jax.random.normal(ks[4], (K, 2 * nhid), jnp.float32),
        # gc2 = GraphConvolution(1, node_num, K*nhid, 14*nclass, S0, bias=False, concat=False)
        "W2": scale * jax.random.normal(ks[5], (1, K * nhid, 14 * nclass), jnp.float32),
        "a2": scale * jax.random.normal(ks[6], (1, 2 * 14 * nclass), jnp.float32),
        # gc6 = LogisticRegression(14*nclass, 1): stored as W^T (D,1) + bias (1,1)
        "Wl": scale * jax.random.normal(ks[7], (14 * nclass, 1), jnp.float32),
        "bl": jnp.zeros((1, 1), jnp.float32),
    }

    fwd = jax.jit(gat_forward)
    out = jax.block_until_ready(fwd(params, x, x_nei, x_nei2))
    assert out.shape == (batch, 1), out.shape

    ref = np.asarray(gat_forward_ref(params, x, x_nei, x_nei2))
    np.testing.assert_allclose(np.asarray(out), ref, rtol=2e-3, atol=2e-3)

    print("KERNEL_OK")
</pallas_src>

<mosaic_0001>
module attributes {stable_mosaic.version = 11 : i64} {
  func.func @_gat_fused_kernel(%arg0: i32, %arg1: memref<32x20xf32, #tpu.memory_space<vmem>>, %arg2: memref<96x20xf32, #tpu.memory_space<vmem>>, %arg3: memref<8x16xf32, #tpu.memory_space<vmem>>, %arg4: memref<20x18xf32, #tpu.memory_space<vmem>>, %arg5: memref<20x2xf32, #tpu.memory_space<vmem>>, %arg6: memref<16x2xf32, #tpu.memory_space<vmem>>, %arg7: memref<16x1xf32, #tpu.memory_space<vmem>>, %arg8: memref<1x1xf32, #tpu.memory_space<smem>>, %arg9: memref<8x1xf32, #tpu.memory_space<vmem>>) attributes {dimension_semantics = [#tpu.dimension_semantics<parallel>], iteration_bounds = array<i64: 1>, scalar_prefetch = 0 : i64, scratch_operands = 0 : i64, tpu.core_type = #tpu.core_type<tc>, window_params = [{transform_indices = @transform_0, window_bounds = array<i64: 32, 20>}, {transform_indices = @transform_1, window_bounds = array<i64: 96, 20>}, {transform_indices = @transform_2, window_bounds = array<i64: 8, 16>}, {pipeline_mode = #tpu.pipeline_mode<synchronous>, transform_indices = @transform_3, window_bounds = array<i64: 20, 18>}, {pipeline_mode = #tpu.pipeline_mode<synchronous>, transform_indices = @transform_4, window_bounds = array<i64: 20, 2>}, {pipeline_mode = #tpu.pipeline_mode<synchronous>, transform_indices = @transform_5, window_bounds = array<i64: 16, 2>}, {pipeline_mode = #tpu.pipeline_mode<synchronous>, transform_indices = @transform_6, window_bounds = array<i64: 16, 1>}, {transform_indices = @transform_7, window_bounds = array<i64: 1, 1>}, {transform_indices = @transform_8, window_bounds = array<i64: 8, 1>}]} {
    %c0 = arith.constant 0 : index
    %c0_0 = arith.constant 0 : index
    %0 = vector.load %arg2[%c0, %c0_0] : memref<96x20xf32, #tpu.memory_space<vmem>>, vector<96x20xf32>
    %c0_1 = arith.constant 0 : index
    %c0_2 = arith.constant 0 : index
    %1 = vector.load %arg4[%c0_1, %c0_2] : memref<20x18xf32, #tpu.memory_space<vmem>>, vector<20x18xf32>
    %cst = arith.constant dense<0.000000e+00> : vector<96x18xf32>
    %2 = tpu.matmul %0, %1, %cst {dimension_numbers = #tpu.dot_dimension_numbers<[1], [0], [0], [1], [0, 0, 1, 1], [], []>} : vector<96x20xf32>, vector<20x18xf32>, vector<96x18xf32> -> vector<96x18xf32>
    %c0_3 = arith.constant 0 : index
    %c0_4 = arith.constant 0 : index
    %3 = vector.load %arg1[%c0_3, %c0_4] : memref<32x20xf32, #tpu.memory_space<vmem>>, vector<32x20xf32>
    %c0_5 = arith.constant 0 : index
    %c0_6 = arith.constant 0 : index
    %4 = vector.load %arg5[%c0_5, %c0_6] : memref<20x2xf32, #tpu.memory_space<vmem>>, vector<20x2xf32>
    %cst_7 = arith.constant dense<0.000000e+00> : vector<32x2xf32>
    %5 = tpu.matmul %3, %4, %cst_7 {dimension_numbers = #tpu.dot_dimension_numbers<[1], [0], [0], [1], [0, 0, 1, 1], [], []>} : vector<32x20xf32>, vector<20x2xf32>, vector<32x2xf32> -> vector<32x2xf32>
    %6 = vector.extract_strided_slice %2 {offsets = [0, 0], sizes = [96, 8], strides = [1, 1]} : vector<96x18xf32> to vector<96x8xf32>
    %7 = vector.extract_strided_slice %2 {offsets = [0, 16], sizes = [96, 1], strides = [1, 1]} : vector<96x18xf32> to vector<96x1xf32>
    %8 = vector.shape_cast %7 : vector<96x1xf32> to vector<32x3x1xf32>
    %9 = vector.extract_strided_slice %5 {offsets = [0, 0], sizes = [32, 1], strides = [1, 1]} : vector<32x2xf32> to vector<32x1xf32>
    %10 = vector.shape_cast %9 : vector<32x1xf32> to vector<32x1x1xf32>
    %11 = vector.broadcast %10 : vector<32x1x1xf32> to vector<32x3x1xf32>
    %12 = arith.addf %8, %11 : vector<32x3x1xf32>
    %cst_8 = arith.constant 0.000000e+00 : f32
    %13 = vector.broadcast %cst_8 : f32 to vector<32x3x1xf32>
    %14 = arith.cmpf ogt, %12, %13 : vector<32x3x1xf32>
    %cst_9 = arith.constant 2.000000e-01 : f32
    %15 = vector.broadcast %cst_9 : f32 to vector<32x3x1xf32>
    %16 = arith.mulf %15, %12 : vector<32x3x1xf32>
    %17 = arith.select %14, %12, %16 : vector<32x3x1xi1>, vector<32x3x1xf32>
    %cst_10 = arith.constant dense<0xFF800000> : vector<32x1xf32>
    %18 = vector.multi_reduction <maximumf>, %17, %cst_10 [1] : vector<32x3x1xf32> to vector<32x1xf32>
    %19 = vector.shape_cast %18 : vector<32x1xf32> to vector<32x1x1xf32>
    %20 = vector.broadcast %19 : vector<32x1x1xf32> to vector<32x3x1xf32>
    %21 = arith.subf %17, %20 : vector<32x3x1xf32>
    %22 = math.exp %21 : vector<32x3x1xf32>
    %23 = vector.shape_cast %22 : vector<32x3x1xf32> to vector<96x1xf32>
    %24 = vector.broadcast %23 : vector<96x1xf32> to vector<96x8xf32>
    %25 = arith.mulf %6, %24 : vector<96x8xf32>
    %26 = vector.shape_cast %25 : vector<96x8xf32> to vector<32x3x8xf32>
    %cst_11 = arith.constant dense<0.000000e+00> : vector<32x8xf32>
    %27 = vector.multi_reduction <add>, %26, %cst_11 [1] : vector<32x3x8xf32> to vector<32x8xf32>
    %cst_12 = arith.constant dense<0.000000e+00> : vector<32x1xf32>
    %28 = vector.multi_reduction <add>, %22, %cst_12 [1] : vector<32x3x1xf32> to vector<32x1xf32>
    %29 = tpu.reciprocal %28 {approx = true} : vector<32x1xf32> -> vector<32x1xf32>
    %30 = vector.broadcast %29 : vector<32x1xf32> to vector<32x8xf32>
    %31 = arith.mulf %27, %30 : vector<32x8xf32>
    %cst_13 = arith.constant 0.000000e+00 : f32
    %32 = vector.broadcast %cst_13 : f32 to vector<32x8xf32>
    %33 = arith.cmpf ogt, %31, %32 : vector<32x8xf32>
    %cst_14 = arith.constant 0.000000e+00 : f32
    %34 = vector.broadcast %cst_14 : f32 to vector<32x8xf32>
    %35 = arith.minimumf %31, %34 : vector<32x8xf32>
    %36 = math.exp %35 : vector<32x8xf32>
    %cst_15 = arith.constant 1.000000e+00 : f32
    %37 = vector.broadcast %cst_15 : f32 to vector<32x8xf32>
    %38 = arith.subf %36, %37 : vector<32x8xf32>
    %39 = arith.select %33, %31, %38 : vector<32x8xi1>, vector<32x8xf32>
    %40 = vector.extract_strided_slice %2 {offsets = [0, 8], sizes = [96, 8], strides = [1, 1]} : vector<96x18xf32> to vector<96x8xf32>
    %41 = vector.extract_strided_slice %2 {offsets = [0, 17], sizes = [96, 1], strides = [1, 1]} : vector<96x18xf32> to vector<96x1xf32>
    %42 = vector.shape_cast %41 : vector<96x1xf32> to vector<32x3x1xf32>
    %43 = vector.extract_strided_slice %5 {offsets = [0, 1], sizes = [32, 1], strides = [1, 1]} : vector<32x2xf32> to vector<32x1xf32>
    %44 = vector.shape_cast %43 : vector<32x1xf32> to vector<32x1x1xf32>
    %45 = vector.broadcast %44 : vector<32x1x1xf32> to vector<32x3x1xf32>
    %46 = arith.addf %42, %45 : vector<32x3x1xf32>
    %cst_16 = arith.constant 0.000000e+00 : f32
    %47 = vector.broadcast %cst_16 : f32 to vector<32x3x1xf32>
    %48 = arith.cmpf ogt, %46, %47 : vector<32x3x1xf32>
    %cst_17 = arith.constant 2.000000e-01 : f32
    %49 = vector.broadcast %cst_17 : f32 to vector<32x3x1xf32>
    %50 = arith.mulf %49, %46 : vector<32x3x1xf32>
    %51 = arith.select %48, %46, %50 : vector<32x3x1xi1>, vector<32x3x1xf32>
    %cst_18 = arith.constant dense<0xFF800000> : vector<32x1xf32>
    %52 = vector.multi_reduction <maximumf>, %51, %cst_18 [1] : vector<32x3x1xf32> to vector<32x1xf32>
    %53 = vector.shape_cast %52 : vector<32x1xf32> to vector<32x1x1xf32>
    %54 = vector.broadcast %53 : vector<32x1x1xf32> to vector<32x3x1xf32>
    %55 = arith.subf %51, %54 : vector<32x3x1xf32>
    %56 = math.exp %55 : vector<32x3x1xf32>
    %57 = vector.shape_cast %56 : vector<32x3x1xf32> to vector<96x1xf32>
    %58 = vector.broadcast %57 : vector<96x1xf32> to vector<96x8xf32>
    %59 = arith.mulf %40, %58 : vector<96x8xf32>
    %60 = vector.shape_cast %59 : vector<96x8xf32> to vector<32x3x8xf32>
    %cst_19 = arith.constant dense<0.000000e+00> : vector<32x8xf32>
    %61 = vector.multi_reduction <add>, %60, %cst_19 [1] : vector<32x3x8xf32> to vector<32x8xf32>
    %cst_20 = arith.constant dense<0.000000e+00> : vector<32x1xf32>
    %62 = vector.multi_reduction <add>, %56, %cst_20 [1] : vector<32x3x1xf32> to vector<32x1xf32>
    %63 = tpu.reciprocal %62 {approx = true} : vector<32x1xf32> -> vector<32x1xf32>
    %64 = vector.broadcast %63 : vector<32x1xf32> to vector<32x8xf32>
    %65 = arith.mulf %61, %64 : vector<32x8xf32>
    %cst_21 = arith.constant 0.000000e+00 : f32
    %66 = vector.broadcast %cst_21 : f32 to vector<32x8xf32>
    %67 = arith.cmpf ogt, %65, %66 : vector<32x8xf32>
    %cst_22 = arith.constant 0.000000e+00 : f32
    %68 = vector.broadcast %cst_22 : f32 to vector<32x8xf32>
    %69 = arith.minimumf %65, %68 : vector<32x8xf32>
    %70 = math.exp %69 : vector<32x8xf32>
    %cst_23 = arith.constant 1.000000e+00 : f32
    %71 = vector.broadcast %cst_23 : f32 to vector<32x8xf32>
    %72 = arith.subf %70, %71 : vector<32x8xf32>
    %73 = arith.select %67, %65, %72 : vector<32x8xi1>, vector<32x8xf32>
    %74 = tpu.concatenate %39, %73 in 1 : vector<32x8xf32>, vector<32x8xf32> -> vector<32x16xf32>
    %c0_24 = arith.constant 0 : index
    %c0_25 = arith.constant 0 : index
    %75 = vector.load %arg6[%c0_24, %c0_25] : memref<16x2xf32, #tpu.memory_space<vmem>>, vector<16x2xf32>
    %cst_26 = arith.constant dense<0.000000e+00> : vector<32x2xf32>
    %76 = tpu.matmul %74, %75, %cst_26 {dimension_numbers = #tpu.dot_dimension_numbers<[1], [0], [0], [1], [0, 0, 1, 1], [], []>} : vector<32x16xf32>, vector<16x2xf32>, vector<32x2xf32> -> vector<32x2xf32>
    %c0_27 = arith.constant 0 : index
    %c0_28 = arith.constant 0 : index
    %77 = vector.load %arg3[%c0_27, %c0_28] : memref<8x16xf32, #tpu.memory_space<vmem>>, vector<8x16xf32>
    %c0_29 = arith.constant 0 : index
    %c0_30 = arith.constant 0 : index
    %78 = vector.load %arg7[%c0_29, %c0_30] : memref<16x1xf32, #tpu.memory_space<vmem>>, vector<16x1xf32>
    %cst_31 = arith.constant dense<0.000000e+00> : vector<8x1xf32>
    %79 = tpu.matmul %77, %78, %cst_31 {dimension_numbers = #tpu.dot_dimension_numbers<[1], [0], [0], [1], [0, 0, 1, 1], [], []>} : vector<8x16xf32>, vector<16x1xf32>, vector<8x1xf32> -> vector<8x1xf32>
    %cst_32 = arith.constant 0.000000e+00 : f32
    %80 = vector.broadcast %cst_32 : f32 to vector<8x1xf32>
    %81 = vector.extract_strided_slice %76 {offsets = [0, 0], sizes = [32, 1], strides = [1, 1]} : vector<32x2xf32> to vector<32x1xf32>
    %82 = vector.shape_cast %81 : vector<32x1xf32> to vector<8x4x1xf32>
    %83 = vector.shape_cast %79 : vector<8x1xf32> to vector<8x1x1xf32>
    %84 = vector.broadcast %83 : vector<8x1x1xf32> to vector<8x4x1xf32>
    %85 = arith.addf %82, %84 : vector<8x4x1xf32>
    %cst_33 = arith.constant 0.000000e+00 : f32
    %86 = vector.broadcast %cst_33 : f32 to vector<8x4x1xf32>
    %87 = arith.cmpf ogt, %85, %86 : vector<8x4x1xf32>
    %cst_34 = arith.constant 2.000000e-01 : f32
    %88 = vector.broadcast %cst_34 : f32 to vector<8x4x1xf32>
    %89 = arith.mulf %88, %85 : vector<8x4x1xf32>
    %90 = arith.select %87, %85, %89 : vector<8x4x1xi1>, vector<8x4x1xf32>
    %91 = vector.extract_strided_slice %76 {offsets = [0, 1], sizes = [32, 1], strides = [1, 1]} : vector<32x2xf32> to vector<32x1xf32>
    %92 = vector.shape_cast %91 : vector<32x1xf32> to vector<8x4x1xf32>
    %cst_35 = arith.constant dense<0xFF800000> : vector<8x1xf32>
    %93 = vector.multi_reduction <maximumf>, %90, %cst_35 [1] : vector<8x4x1xf32> to vector<8x1xf32>
    %94 = vector.shape_cast %93 : vector<8x1xf32> to vector<8x1x1xf32>
    %95 = vector.broadcast %94 : vector<8x1x1xf32> to vector<8x4x1xf32>
    %96 = arith.subf %90, %95 : vector<8x4x1xf32>
    %97 = math.exp %96 : vector<8x4x1xf32>
    %98 = arith.mulf %97, %92 : vector<8x4x1xf32>
    %cst_36 = arith.constant dense<0.000000e+00> : vector<8x1xf32>
    %99 = vector.multi_reduction <add>, %98, %cst_36 [1] : vector<8x4x1xf32> to vector<8x1xf32>
    %cst_37 = arith.constant dense<0.000000e+00> : vector<8x1xf32>
    %100 = vector.multi_reduction <add>, %97, %cst_37 [1] : vector<8x4x1xf32> to vector<8x1xf32>
    %101 = tpu.reciprocal %100 {approx = true} : vector<8x1xf32> -> vector<8x1xf32>
    %102 = arith.mulf %99, %101 : vector<8x1xf32>
    %103 = arith.addf %80, %102 : vector<8x1xf32>
    %cst_38 = arith.constant 1.000000e+00 : f32
    %104 = vector.broadcast %cst_38 : f32 to vector<8x1xf32>
    %105 = arith.mulf %103, %104 : vector<8x1xf32>
    %c0_39 = arith.constant 0 : index
    %c0_40 = arith.constant 0 : index
    %106 = memref.load %arg8[%c0_39, %c0_40] : memref<1x1xf32, #tpu.memory_space<smem>>
    %107 = vector.broadcast %106 : f32 to vector<8x1xf32>
    %108 = arith.addf %105, %107 : vector<8x1xf32>
    %cst_41 = arith.constant 0.000000e+00 : f32
    %109 = vector.broadcast %cst_41 : f32 to vector<8x1xf32>
    %110 = arith.subf %109, %108 : vector<8x1xf32>
    %111 = math.exp %110 : vector<8x1xf32>
    %cst_42 = arith.constant 1.000000e+00 : f32
    %112 = vector.broadcast %cst_42 : f32 to vector<8x1xf32>
    %113 = arith.addf %112, %111 : vector<8x1xf32>
    %cst_43 = arith.constant 1.000000e+00 : f32
    %114 = vector.broadcast %cst_43 : f32 to vector<8x1xf32>
    %115 = arith.divf %114, %113 : vector<8x1xf32>
    %c0_44 = arith.constant 0 : index
    %c0_45 = arith.constant 0 : index
    %116 = vector.load %arg9[%c0_44, %c0_45] : memref<8x1xf32, #tpu.memory_space<vmem>>, vector<8x1xf32>
    tpu.vector_store %arg9[%c0_44, %c0_45], %115 {strides = array<i32>} : memref<8x1xf32, #tpu.memory_space<vmem>>, vector<8x1xf32>,
    return
  }
  func.func @transform_0(%arg0: i32) -> (i32, i32) {
    %c0_i32 = arith.constant 0 : i32
    %c0_i32_0 = arith.constant 0 : i32
    return %arg0, %c0_i32 : i32, i32
  }
  func.func @transform_1(%arg0: i32) -> (i32, i32) {
    %c0_i32 = arith.constant 0 : i32
    %c0_i32_0 = arith.constant 0 : i32
    return %arg0, %c0_i32 : i32, i32
  }
  func.func @transform_2(%arg0: i32) -> (i32, i32) {
    %c0_i32 = arith.constant 0 : i32
    %c0_i32_0 = arith.constant 0 : i32
    return %arg0, %c0_i32 : i32, i32
  }
  func.func @transform_3(%arg0: i32) -> (i32, i32) {
    %c0_i32 = arith.constant 0 : i32
    %c0_i32_0 = arith.constant 0 : i32
    %c0_i32_1 = arith.constant 0 : i32
    return %c0_i32, %c0_i32_0 : i32, i32
  }
  func.func @transform_4(%arg0: i32) -> (i32, i32) {
    %c0_i32 = arith.constant 0 : i32
    %c0_i32_0 = arith.constant 0 : i32
    %c0_i32_1 = arith.constant 0 : i32
    return %c0_i32, %c0_i32_0 : i32, i32
  }
  func.func @transform_5(%arg0: i32) -> (i32, i32) {
    %c0_i32 = arith.constant 0 : i32
    %c0_i32_0 = arith.constant 0 : i32
    %c0_i32_1 = arith.constant 0 : i32
    return %c0_i32, %c0_i32_0 : i32, i32
  }
  func.func @transform_6(%arg0: i32) -> (i32, i32) {
    %c0_i32 = arith.constant 0 : i32
    %c0_i32_0 = arith.constant 0 : i32
    %c0_i32_1 = arith.constant 0 : i32
    return %c0_i32, %c0_i32_0 : i32, i32
  }
  func.func @transform_7(%arg0: i32) -> (i32, i32) {
    %c0_i32 = arith.constant 0 : i32
    %c0_i32_0 = arith.constant 0 : i32
    %c0_i32_1 = arith.constant 0 : i32
    return %c0_i32, %c0_i32_0 : i32, i32
  }
  func.func @transform_8(%arg0: i32) -> (i32, i32) {
    %c0_i32 = arith.constant 0 : i32
    %c0_i32_0 = arith.constant 0 : i32
    return %arg0, %c0_i32 : i32, i32
  }
}

</mosaic_0001>

<bundles_post_ra>
// kernel: gat_forward.1
= control target key start
LH: loop header
LB: loop body
LE: loop exit
PB: predicated region body
PF: predicated region fallthrough
CT: control target
= control target key end

     0   :  { %vm82_vm0 = vcmask 1043456   ;;  %vm45_vm1 = vcmask 162816   ;;  %v17220_v22 = vmov 1966171168   ;;  %v334_v24 = vlaneseq  ;;  %s17224_s23 = smov 8   ;;  %s17227_s9 = smov 127   ;;  %s24298_s4 = inlined_call_operand.vmem [shape: f32[20,2], index: 4, kind: input, shape index: {}]   ;;  %s24299_s0 = inlined_call_operand.vmem [shape: f32[32,20], index: 0, kind: input, shape index: {}]   ;;  %s24300_s3 = inlined_call_operand.vmem [shape: f32[20,18], index: 3, kind: input, shape index: {}]   ;;  %s24301_s1 = inlined_call_operand.vmem [shape: f32[96,20], index: 1, kind: input, shape index: {}]   ;;  %s24302_s5 = inlined_call_operand.vmem [shape: f32[16,2], index: 5, kind: input, shape index: {}]   ;;  %s24303_s6 = inlined_call_operand.vmem [shape: f32[16,1], index: 6, kind: input, shape index: {}]   ;;  %s24304_s2 = inlined_call_operand.vmem [shape: f32[8,16], index: 2, kind: input, shape index: {}]   ;;  %s24305_s7 = inlined_call_operand.<no memory space> [shape: f32[1,1], index: 7, kind: input, shape index: {}]   ;;  %s24306_s8 = inlined_call_operand.vmem [shape: f32[8,1], index: 8, kind: output, shape index: {}]  }
   0x1   :  { %v217_v0 = vld [vmem:[%s24298_s4 + $0x10] sm:$0xf]  ;;  %v216_v1 = vld [vmem:[%s24298_s4 + $0x8] sm:$0xff]  ;;  %v211_v2 = vld [vmem:[%s24299_s0] sm:$0xff]  ;;  %v332_v23 = vunpack.c.l.s4 %v17220_v22  ;;  %vm9564_vm5 = vcmask 141448  }
   0x2   :  { %16475 = vmatprep.subr.msk.mxu1 %vm82_vm0, %v217_v0  ;;  %v215_v3 = vld [vmem:[%s24298_s4] sm:$0xff]  ;;  %16481 = vmatprep.mubr.msk.f32.mxu1 %vm45_vm1, %v211_v2  ;;  %v44_v4 = vld [vmem:[%s24300_s3 + $0x10] sm:$0xf]  ;;  %v43_v5 = vld [vmem:[%s24300_s3 + $0x8] sm:$0xff]  ;;  %v335_v26 = vshrl.u32 %v334_v24, 7 }
   0x3   :  { %16476 = vmatpush3.msk.msra.mxu1 %vm82_vm0, %v217_v0  ;;  %16451 = vmatprep.subr.msk.mxu0 %vm82_vm0, %v44_v4  ;;  %v212_v6 = vld [vmem:[%s24299_s0 + $0x8] sm:$0xff]  ;;  %v42_v7 = vld [vmem:[%s24300_s3] sm:$0xff]  ;;  %v213_v8 = vld [vmem:[%s24299_s0 + $0x10] sm:$0xff]  ;;  %v333_v25 = vunpack.c.0.s8 %v332_v23 }
   0x4   :  { %16477 = vmatprep.subr.mxu1 %v216_v1  ;;  %16452 = vmatpush3.msk.msra.mxu0 %vm82_vm0, %v44_v4  ;;  %v30_v9 = vld [vmem:[%s24301_s1] sm:$0xff]  ;;  %v31_v10 = vld [vmem:[%s24301_s1 + $0x8] sm:$0xff]  ;;  %v214_v11 = vld [vmem:[%s24299_s0 + $0x18] sm:$0xff]  ;;  %v17362_v30 = vsub.s32 0, %v335_v26 }
   0x5   :  { %16478 = vmatpush3.msra.mxu1 %v216_v1  ;;  %16453 = vmatprep.subr.mxu0 %v43_v5  ;;  %v32_v12 = vld [vmem:[%s24301_s1 + $0x10] sm:$0xff]  ;;  %v33_v13 = vld [vmem:[%s24301_s1 + $0x18] sm:$0xff]  ;;  %v34_v14 = vld [vmem:[%s24301_s1 + $0x20] sm:$0xff]  ;;  %v17359_v27 = vsub.s32 %v333_v25, %v335_v26 }
   0x6   :  { %16479 = vmatprep.subr.mxu1 %v215_v3  ;;  %16454 = vmatpush3.msra.mxu0 %v43_v5  ;;  %v35_v15 = vld [vmem:[%s24301_s1 + $0x28] sm:$0xff]  ;;  %v36_v16 = vld [vmem:[%s24301_s1 + $0x30] sm:$0xff]  ;;  %v37_v17 = vld [vmem:[%s24301_s1 + $0x38] sm:$0xff]  ;;  %24647 = vst [vmem:[#allocation3_spill] sm:$0xff] %v17362_v30 }
   0x7   :  { %16480 = vmatpush3.msra.mxu1 %v215_v3  ;;  %16455 = vmatprep.subr.mxu0 %v42_v7  ;;  %v38_v18 = vld [vmem:[%s24301_s1 + $0x40] sm:$0xff]  ;;  %v39_v19 = vld [vmem:[%s24301_s1 + $0x48] sm:$0xff]  ;;  %v40_v20 = vld [vmem:[%s24301_s1 + $0x50] sm:$0xff] }
   0x8   :  { %16482 = vmatmul.mubr.msk.f32.vlgmr.msra.gmra.mxu1 %vm45_vm1, %v212_v6  ;;  %16456 = vmatpush3.msra.mxu0 %v42_v7  ;;  %v41_v21 = vld [vmem:[%s24301_s1 + $0x58] sm:$0xff]  ;;  %s17221_s1 = smov 16  }
   0x9   :  { %16484 = vmatprep.mubr.msk.f32.mxu1 %vm45_vm1, %v213_v8  ;;  %16457 = vmatprep.mubr.msk.f32.mxu0 %vm45_vm1, %v30_v9 }
   0xa   :  { %16458 = vmatmul.mubr.msk.f32.vlgmr.msra.gmra.mxu0 %vm45_vm1, %v31_v10 }
   0xb   :  { %16460 = vmatprep.mubr.msk.f32.mxu0 %vm45_vm1, %v32_v12 }
   0xc   :  { %16485 = vmatmul.mubr.msk.f32.gmra.mxu1 %vm45_vm1, %v214_v11 }
   0xe   :  { %16461 = vmatmul.mubr.msk.f32.gmra.mxu0 %vm45_vm1, %v33_v13 }
   0xf   :  { %16463 = vmatprep.mubr.msk.f32.mxu0 %vm45_vm1, %v34_v14 }
  0x12   :  { %16464 = vmatmul.mubr.msk.f32.gmra.mxu0 %vm45_vm1, %v35_v15 }
  0x13   :  { %16466 = vmatprep.mubr.msk.f32.mxu0 %vm45_vm1, %v36_v16 }
  0x16   :  { %16467 = vmatmul.mubr.msk.f32.gmra.mxu0 %vm45_vm1, %v37_v17 }
  0x17   :  { %16469 = vmatprep.mubr.msk.f32.mxu0 %vm45_vm1, %v38_v18 }
  0x1a   :  { %16470 = vmatmul.mubr.msk.f32.gmra.mxu0 %vm45_vm1, %v39_v19 }
  0x1b   :  { %16472 = vmatprep.mubr.msk.f32.mxu0 %vm45_vm1, %v40_v20 }
  0x1e   :  { %16473 = vmatmul.mubr.msk.f32.gmra.mxu0 %vm45_vm1, %v41_v21 }
  0xc8   :  { %v16483_v28 = vpop.f32.mrf.mxu1 }
  0xc9   :  { %v1074_v29 = vrot.slane %v16483_v28, %v17359_v27  ;;  %v1067_v38 = vcombine.high %v16483_v28, %v16483_v28 }
  0xca   :  { %v299_v31 = vpop.f32.mrf.mxu1 }
  0xcb   :  { %v1082_v32 = vcombine.high %v1074_v29, %v1074_v29  ;;  %v1090_v33 = vrot.slane %v1074_v29, %v17359_v27  ;;  %v1025_v34 = vrot.slane %v299_v31, %v17359_v27  ;;  %v1081_v43 = vrot.slane %v1067_v38, %v17359_v27 }
  0xcc   :  { %v1018_v57 = vcombine.high %v299_v31, %v299_v31  ;;  %v17437_v25 = vpop.f32.mrf.mxu1 }
  0xcd   :  { %v1104_v35 = vrot.slane %v1082_v32, %v17359_v27  ;;  %v1041_v36 = vrot.slane %v1025_v34, %v17359_v27  ;;  %v1249_v37 = vrot.slane %v1090_v33, %v17362_v30  ;;  %v1033_v41 = vcombine.high %v1025_v34, %v1025_v34 }
  0xce   :  { %v1112_v44 = vcombine.high %v1090_v33, %v1090_v33  ;;  %v17382_v51 = vrot.slane %v1081_v43, %v17359_v27  ;;  %v1032_v62 = vrot.slane %v1018_v57, %v17359_v27  ;;  %v1083_v8 = vcombine.high %v1081_v43, %v1081_v43 }
  0xcf   :  { %v1217_v39 = vrot.slane %v1041_v36, %v17362_v30  ;;  %v1253_v40 = vrot.slane %v1104_v35, %v17362_v30  ;;  %v1532_v42 = vrot.slane %v1249_v37, %v17359_v27  ;;  %v17376_v48 = vrot.slane %v1033_v41, %v17359_v27 }
  0xd0   :  { %v1257_v52 = vrot.slane %v1112_v44, %v17362_v30  ;;  %v1265_v56 = vrot.slane %v17382_v51, %v17362_v30  ;;  %v1063_v63 = vcombine.high %v1041_v36, %v1041_v36  ;;  %v1114_v2 = vcombine.high %v1104_v35, %v1104_v35 }
  0xd1   :  { %v1540_v45 = vrot.slane %v1532_v42, %v17359_v27  ;;  %v1533_v46 = vcombine.high %v1532_v42, %v1532_v42  ;;  %v1348_v47 = vrot.slane %v1217_v39, %v17359_v27  ;;  %v1555_v50 = vrot.slane %v1253_v40, %v17359_v27 }
  0xd2   :  { %v1221_v54 = vrot.slane %v17376_v48, %v17362_v30  ;;  %v1578_v59 = vrot.slane %v1257_v52, %v17359_v27  ;;  %v1624_v1 = vrot.slane %v1265_v56, %v17359_v27  ;;  %v17407_v4 = vrot.slane %v1032_v62, %v17359_v27 }
  0xd3   :  { %2126 = vrot.lane.b32.xlu0 %v1540_v45, %s17221_s1  ;;  %v1547_v49 = vrot.slane %v1533_v46, %v17359_v27  ;;  %v1356_v53 = vrot.slane %v1348_v47, %v17359_v27  ;;  %v1563_v55 = vrot.slane %v1555_v50, %v17359_v27  ;;  %v1548_v58 = vcombine.high %v1540_v45, %v1540_v45 }
  0xd4   :  { %v17397_v61 = vrot.slane %v1221_v54, %v17359_v27  ;;  %v1586_v0 = vrot.slane %v1578_v59, %v17359_v27  ;;  %v1225_v5 = vrot.slane %v1063_v63, %v17362_v30  ;;  %v1632_v6 = vrot.slane %v1624_v1, %v17359_v27 }
  0xd5   :  { %2128 = vrot.lane.b32.xlu1 %v1547_v49, %s17221_s1  ;;  %v1364_v60 = vcombine.high %v1356_v53, %v1356_v53  ;;  %v1349_v7 = vcombine.high %v1348_v47, %v1348_v47  ;;  %v1571_v9 = vcombine.high %v1563_v55, %v1563_v55  ;;  %v1579_v10 = vcombine.high %v1578_v59, %v1578_v59 }
  0xd6   :  { %v1379_v3 = vrot.slane %v17397_v61, %v17359_v27  ;;  %v1261_v11 = vrot.slane %v1114_v2, %v17362_v30  ;;  %v1233_v12 = vrot.slane %v17407_v4, %v17362_v30  ;;  %v1394_v14 = vrot.slane %v1225_v5, %v17359_v27  ;;  %v17511_v2 = vpop.f32.mrf.mxu1 }
  0xd7   :  { %2078 = vrot.lane.b32.xlu0 %v1356_v53, %s17221_s1  ;;  %v1363_v13 = vrot.slane %v1349_v7, %v17359_v27  ;;  %v17420_v15 = vrot.slane %v1083_v8, %v17359_v27  ;;  %v1593_v16 = vrot.slane %v1579_v10, %v17359_v27  ;;  %v1625_v21 = vcombine.high %v1624_v1, %v1624_v1 }
  0xd8   :  { %v17425_v17 = vrot.slane %v1261_v11, %v17359_v27  ;;  %v1402_v18 = vrot.slane %v1394_v14, %v17359_v27  ;;  %v1440_v19 = vrot.slane %v1233_v12, %v17359_v27  ;;  %v1556_v24 = vcombine.high %v1555_v50, %v1555_v50 }
  0xd9   :  { %2132 = vrot.lane.b32.xlu1 %v1563_v55, %s17221_s1  ;;  %v1269_v22 = vrot.slane %v17420_v15, %v17362_v30  ;;  %v1639_v26 = vrot.slane %v1625_v21, %v17359_v27  ;;  %v1172_v29 = vrot.slane %v17437_v25, %v17359_v27  ;;  %v1113_v31 = vcombine.high %v17382_v51, %v17382_v51 }
  0xda   :  { %v1609_v20 = vrot.slane %v17425_v17, %v17359_v27  ;;  %v1448_v23 = vrot.slane %v1440_v19, %v17359_v27  ;;  %v1570_v32 = vrot.slane %v1556_v24, %v17359_v27  ;;  %v1065_v33 = vcombine.high %v17376_v48, %v17376_v48 }
  0xdb   :  { %2130 = vrot.lane.b32.xlu0 %v1548_v58, %s17221_s1  ;;  %v17442_v28 = vrot.slane %v1269_v22, %v17359_v27  ;;  %v17456_v35 = vrot.slane %v1172_v29, %v17359_v27  ;;  %v1594_v36 = vcombine.high %v1586_v0, %v1586_v0  ;;  %v1273_v37 = vrot.slane %v1113_v31, %v17362_v30 }
  0xdc   :  { %v1034_v38 = vcombine.high %v1032_v62, %v1032_v62  ;;  %v1387_v40 = vcombine.high %v1379_v3, %v1379_v3  ;;  %v1395_v41 = vcombine.high %v1394_v14, %v1394_v14  ;;  %v1229_v42 = vrot.slane %v1065_v33, %v17362_v30 }
  0xdd   :  { %2082 = vrot.lane.b32.xlu1 %v1364_v60, %s17221_s1  ;;  %v1655_v34 = vrot.slane %v17442_v28, %v17359_v27  ;;  %v1313_v39 = vrot.slane %v17456_v35, %v17362_v30  ;;  %v1640_v43 = vcombine.high %v1632_v6, %v1632_v6  ;;  %v1670_v44 = vrot.slane %v1273_v37, %v17359_v27 }
  0xde   :  { %v17467_v45 = vrot.slane %v1034_v38, %v17359_v27  ;;  %v1409_v46 = vrot.slane %v1395_v41, %v17359_v27  ;;  %v17472_v47 = vrot.slane %v1229_v42, %v17359_v27  ;;  %v1441_v52 = vcombine.high %v1440_v19, %v1440_v19 }
  0xdf   :  { %2138 = vrot.lane.b32.xlu0 %v1586_v0, %s17221_s1  ;;  %v1900_v48 = vrot.slane %v1313_v39, %v17359_v27  ;;  %v1678_v49 = vrot.slane %v1670_v44, %v17359_v27  ;;  %v1372_v54 = vcombine.high %v17397_v61, %v17397_v61  ;;  %v1064_v57 = vcombine.high %v17407_v4, %v17407_v4 }
  0xe0   :  { %v17480_v50 = vrot.slane %v17472_v47, %v17359_v27  ;;  %v1237_v53 = vrot.slane %v17467_v45, %v17362_v30  ;;  %v1455_v55 = vrot.slane %v1441_v52, %v17359_v27  ;;  %v1410_v60 = vcombine.high %v1402_v18, %v1402_v18 }
  0xe1   :  { %2084 = vrot.lane.b32.xlu1 %v1379_v3, %s17221_s1  ;;  %v17483_v51 = vrot.slane %v1900_v48, %v17359_v27  ;;  %v1386_v58 = vrot.slane %v1372_v54, %v17359_v27  ;;  %v1241_v61 = vrot.slane %v1064_v57, %v17362_v30  ;;  %v1115_v62 = vcombine.high %v17420_v15, %v17420_v15  ;;  %v17625_v54 = vpop.f32.mrf.mxu0 }
  0xe2   :  { %v17495_v56 = vrot.slane %v1237_v53, %v17359_v27  ;;  %v1617_v63 = vcombine.high %v1609_v20, %v1609_v20  ;;  %v1456_v0 = vcombine.high %v1448_v23, %v1448_v23  ;;  %v1180_v3 = vcombine.high %v1172_v29, %v1172_v29  ;;  %24648 = vst [vmem:[#allocation4_spill] sm:$0xff] %v17625_v54 }
  0xe3   :  { %2150 = vrot.lane.b32.xlu0 %v1632_v6, %s17221_s1  ;;  %v1486_v1 = vrot.slane %v1241_v61, %v17359_v27  ;;  %v1663_v4 = vcombine.high %v1655_v34, %v1655_v34  ;;  %v1671_v5 = vcombine.high %v1670_v44, %v1670_v44  ;;  %v1277_v6 = vrot.slane %v1115_v62, %v17362_v30 }
  0xe4   :  { %v1471_v59 = vrot.slane %v17495_v56, %v17359_v27  ;;  %v1123_v7 = vrot.slane %v17511_v2, %v17359_v27  ;;  %v17524_v10 = vrot.slane %v1180_v3, %v17359_v27  ;;  %v1648_v15 = vcombine.high %v17442_v28, %v17442_v28 }
  0xe5   :  { %2136 = vrot.lane.b32.xlu1 %v1571_v9, %s17221_s1  ;;  %v17519_v8 = vrot.slane %v1486_v1, %v17359_v27  ;;  %v1602_v9 = vcombine.high %v17425_v17, %v17425_v17  ;;  %v1685_v11 = vrot.slane %v1671_v5, %v17359_v27  ;;  %v17530_v12 = vrot.slane %v1277_v6, %v17359_v27 }
  0xe6   :  { %v1165_v19 = vcombine.high %v17437_v25, %v17437_v25  ;;  %v1662_v21 = vrot.slane %v1648_v15, %v17359_v27  ;;  %v1210_v25 = vcombine.high %v17456_v35, %v17456_v35  ;;  %v1433_v35 = vcombine.high %v17480_v50, %v17480_v50 }
  0xe7   :  { %2080 = vrot.lane.b32.xlu0 %v1363_v13, %s17221_s1  ;;  %v17533_v13 = vrot.slane %v1123_v7, %v17359_v27  ;;  %v1616_v14 = vrot.slane %v1602_v9, %v17359_v27  ;;  %v1701_v17 = vrot.slane %v17530_v12, %v17359_v27  ;;  %v1916_v37 = vcombine.high %v17483_v51, %v17483_v51 }
  0xe8   :  { %v17556_v24 = vrot.slane %v1165_v19, %v17359_v27  ;;  %v1479_v39 = vcombine.high %v1471_v59, %v1471_v59  ;;  %v1131_v44 = vcombine.high %v1123_v7, %v1123_v7  ;;  %v1464_v53 = vcombine.high %v17495_v56, %v17495_v56 }
  0xe9   :  { %2140 = vrot.lane.b32.xlu1 %v1593_v16, %s17221_s1  ;;  %v1317_v16 = vrot.slane %v17524_v10, %v17362_v30  ;;  %v1212_v3 = vcombine.high %v17524_v10, %v17524_v10 }
  0xea   :  { %v17569_v31 = vrot.slane %v17556_v24, %v17359_v27  ;;  %v1181_v9 = vcombine.high %v17556_v24, %v17556_v24 }
  0xeb   :  { %2090 = vrot.lane.b32.xlu0 %v1402_v18, %s17221_s1  ;;  %v1901_v18 = vcombine.high %v1900_v48, %v1900_v48 }
  0xed   :  { %2144 = vrot.lane.b32.xlu1 %v1609_v20, %s17221_s1  ;;  %v1281_v20 = vrot.slane %v17533_v13, %v17362_v30  ;;  %v1915_v22 = vrot.slane %v1901_v18, %v17359_v27  ;;  %v17686_v18 = vrot.slane %v1181_v9, %v17359_v27 }
  0xef   :  { %2102 = vrot.lane.b32.xlu0 %v1448_v23, %s17221_s1  ;;  %v17553_v23 = vrot.slane %v1317_v16, %v17359_v27  ;;  %v1716_v28 = vrot.slane %v1281_v20, %v17359_v27 }
  0xf1   :  { %2152 = vrot.lane.b32.xlu1 %v1639_v26, %s17221_s1  ;;  %v1686_v26 = vcombine.high %v1678_v49, %v1678_v49  ;;  %v17565_v29 = vrot.slane %v17553_v23, %v17359_v27  ;;  %v17575_v33 = vrot.slane %v1716_v28, %v17359_v27  ;;  %v1717_v57 = vcombine.high %v1716_v28, %v1716_v28 }
  0xf3   :  { %2134 = vrot.lane.b32.xlu0 %v1570_v32, %s17221_s1  ;;  %v1321_v32 = vrot.slane %v1210_v25, %v17362_v30  ;;  %v1731_v56 = vrot.slane %v1717_v57, %v17359_v27  ;;  %v1939_v10 = vcombine.high %v17565_v29, %v17565_v29  ;;  %v1732_v15 = vcombine.high %v17575_v33, %v17575_v33 }
  0xf5   :  { %2156 = vrot.lane.b32.xlu1 %v1655_v34, %s17221_s1  ;;  %v1066_v34 = vcombine.high %v17467_v45, %v17467_v45  ;;  %v1946_v38 = vrot.slane %v1321_v32, %v17359_v27 }
  0xf7   :  { %2142 = vrot.lane.b32.xlu0 %v1594_v36, %s17221_s1  ;;  %v1329_v36 = vrot.slane %v17569_v31, %v17362_v30  ;;  %v1245_v41 = vrot.slane %v1066_v34, %v17362_v30  ;;  %v17593_v42 = vrot.slane %v1946_v38, %v17359_v27 }
  0xf9   :  { %2088 = vrot.lane.b32.xlu1 %v1387_v40, %s17221_s1  ;;  %v1487_v40 = vcombine.high %v1486_v1, %v1486_v1  ;;  %v1694_v1 = vcombine.high %v17530_v12, %v17530_v12  ;;  %v1325_v12 = vrot.slane %v1212_v3, %v17362_v30 }
  0xfb   :  { %2154 = vrot.lane.b32.xlu0 %v1640_v43, %s17221_s1  ;;  %v17596_v43 = vrot.slane %v1329_v36, %v17359_v27  ;;  %v1501_v45 = vrot.slane %v1487_v40, %v17359_v27  ;;  %v17691_v20 = vrot.slane %v1325_v12, %v17359_v27 }
  0xfd   :  { %2092 = vrot.lane.b32.xlu1 %v1409_v46, %s17221_s1  ;;  %v17602_v46 = vrot.slane %v1245_v41, %v17359_v27  ;;  %v17607_v48 = vrot.slane %v17596_v43, %v17359_v27  ;;  %v1993_v32 = vcombine.high %v17596_v43, %v17596_v43 }
  0xff   :  { %2162 = vrot.lane.b32.xlu0 %v1678_v49, %s17221_s1  ;;  %v1418_v49 = vcombine.high %v17472_v47, %v17472_v47  ;;  %v2007_v41 = vrot.slane %v1993_v32, %v17359_v27 }
 0x101   :  { %2096 = vrot.lane.b32.xlu1 %v17480_v50, %s17221_s1  ;;  %v17612_v50 = vrot.slane %v1131_v44, %v17359_v27  ;;  %v1432_v52 = vrot.slane %v1418_v49, %v17359_v27 }
 0x103   :  { %2222 = vrot.lane.b32.xlu0 %v17483_v51, %s17221_s1  ;;  %v17618_v51 = vrot.slane %v17602_v46, %v17359_v27  ;;  %v1285_v47 = vrot.slane %v17612_v50, %v17362_v30 }
 0x105   :  { %2104 = vrot.lane.b32.xlu1 %v1455_v55, %s17221_s1  ;;  %v1709_v55 = vcombine.high %v1701_v17, %v1701_v17  ;;  %v17639_v61 = vrot.slane %v1285_v47, %v17359_v27  ;;  %v1525_v9 = vcombine.high %v17618_v51, %v17618_v51 }
 0x107   :  { %2086 = vrot.lane.b32.xlu0 %v1386_v58, %s17221_s1  ;;  %v1116_v58 = vcombine.high %v17511_v2, %v17511_v2 }
 0x109   :  { %2108 = vrot.lane.b32.xlu1 %v1471_v59, %s17221_s1  ;;  %v1478_v59 = vrot.slane %v1464_v53, %v17359_v27  ;;  %v17642_v62 = vrot.slane %v1116_v58, %v17359_v27 }
 0x10b   :  { %2094 = vrot.lane.b32.xlu0 %v1410_v60, %s17221_s1  ;;  %v17634_v60 = vpop.f32.mrf.mxu0  ;;  %v17664_v6 = vrot.slane %v17642_v62, %v17359_v27 }
 0x10c   :  { %24649 = vst [vmem:[#allocation5_spill] sm:$0xff] %v17634_v60 }
 0x10d   :  { %2148 = vrot.lane.b32.xlu1 %v1617_v63, %s17221_s1  ;;  %v1161_v63 = vcombine.high %v17533_v13, %v17533_v13  ;;  %v17651_v2 = vpop.f32.mrf.mxu0 }
 0x10e   :  { %24650 = vst [vmem:[#allocation6_spill] sm:$0xff] %v17651_v2  ;;  %v484_v5 = vrot.slane %v17651_v2, %v17359_v27 }
 0x10f   :  { %2106 = vrot.lane.b32.xlu0 %v1456_v0, %s17221_s1  ;;  %v1502_v0 = vcombine.high %v17519_v8, %v17519_v8  ;;  %v1289_v7 = vrot.slane %v1161_v63, %v17362_v30  ;;  %v1962_v63 = vcombine.high %v17593_v42, %v17593_v42 }
 0x110   :  { %v492_v13 = vcombine.high %v484_v5, %v484_v5 }
 0x111   :  { %2160 = vrot.lane.b32.xlu1 %v1663_v4, %s17221_s1  ;;  %v17658_v4 = vrot.slane %v17639_v61, %v17359_v27  ;;  %v17682_v16 = vrot.slane %v1289_v7, %v17359_v27 }
 0x113   :  { %2114 = vrot.lane.b32.xlu0 %v17519_v8, %s17221_s1  ;;  %v1708_v8 = vrot.slane %v1694_v1, %v17359_v27  ;;  %v17699_v24 = vrot.slane %v17682_v16, %v17359_v27  ;;  %v1163_v1 = vcombine.high %v17612_v50, %v17612_v50  ;;  %v2008_v50 = vcombine.high %v17607_v48, %v17607_v48 }
 0x115   :  { %2164 = vrot.lane.b32.xlu1 %v1685_v11, %s17221_s1  ;;  %v1947_v11 = vcombine.high %v1946_v38, %v1946_v38 }
 0x117   :  { %2146 = vrot.lane.b32.xlu0 %v1616_v14, %s17221_s1  ;;  %v1297_v14 = vrot.slane %v17664_v6, %v17362_v30  ;;  %v1961_v19 = vrot.slane %v1947_v11, %v17359_v27 }
 0x119   :  { %2168 = vrot.lane.b32.xlu1 %v1701_v17, %s17221_s1  ;;  %v500_v17 = vrot.slane %v484_v5, %v17359_v27  ;;  %v17702_v25 = vrot.slane %v1297_v14, %v17359_v27  ;;  %v1132_v14 = vcombine.high %v17642_v62, %v17642_v62 }
 0x11b   :  { %2158 = vrot.lane.b32.xlu0 %v1662_v21, %s17221_s1  ;;  %v17694_v21 = vrot.slane %v492_v13, %v17359_v27  ;;  %v17719_v36 = vrot.slane %v17702_v25, %v17359_v27  ;;  %v522_v40 = vcombine.high %v500_v17, %v500_v17  ;;  %v17798_v32 = vrot.slane %v1132_v14, %v17359_v27 }
 0x11d   :  { %2224 = vrot.lane.b32.xlu1 %v1915_v22, %s17221_s1 }
 0x11f   :  { %2166 = vrot.lane.b32.xlu0 %v1686_v26, %s17221_s1 }
 0x121   :  { %2228 = vrot.lane.b32.xlu1 %v17565_v29, %s17221_s1  ;;  %v17708_v29 = vrot.slane %v17691_v20, %v17359_v27 }
 0x123   :  { %2174 = vrot.lane.b32.xlu0 %v17575_v33, %s17221_s1  ;;  %v1333_v33 = vrot.slane %v17686_v18, %v17362_v30 }
 0x125   :  { %2100 = vrot.lane.b32.xlu1 %v1433_v35, %s17221_s1  ;;  %v17727_v43 = vrot.slane %v1333_v33, %v17359_v27 }
 0x127   :  { %2226 = vrot.lane.b32.xlu0 %v1916_v37, %s17221_s1  ;;  %v1924_v37 = vcombine.high %v17553_v23, %v17553_v23  ;;  %v337_v23 = vrot.slane %v17634_v60, %v17359_v27 }
 0x129   :  { %2112 = vrot.lane.b32.xlu1 %v1479_v39, %s17221_s1  ;;  %v345_v11 = vcombine.high %v337_v23, %v337_v23 }
 0x12b   :  { %2234 = vrot.lane.b32.xlu0 %v17593_v42, %s17221_s1  ;;  %v17788_v62 = vrot.slane %v345_v11, %v17359_v27 }
 0x12d   :  { %2116 = vrot.lane.b32.xlu1 %v1501_v45, %s17221_s1  ;;  %v1211_v45 = vcombine.high %v17569_v31, %v17569_v31  ;;  %v17746_v31 = vrot.slane %v17727_v43, %v17359_v27 }
 0x12f   :  { %2246 = vrot.lane.b32.xlu0 %v17607_v48, %s17221_s1  ;;  %v1293_v48 = vrot.slane %v1163_v1, %v17362_v30 }
 0x131   :  { %2120 = vrot.lane.b32.xlu1 %v17618_v51, %s17221_s1  ;;  %v1755_v51 = vcombine.high %v17658_v4, %v17658_v4 }
 0x133   :  { %2098 = vrot.lane.b32.xlu0 %v1432_v52, %s17221_s1  ;;  %v1938_v52 = vrot.slane %v1924_v37, %v17359_v27 }
 0x135   :  { %2172 = vrot.lane.b32.xlu1 %v1709_v55, %s17221_s1 }
 0x137   :  { %2110 = vrot.lane.b32.xlu0 %v1478_v59, %s17221_s1  ;;  %v353_v59 = vrot.slane %v337_v23, %v17359_v27 }
 0x139   :  { %2176 = vrot.lane.b32.xlu1 %v1731_v56, %s17221_s1 }
 0x13b   :  { %2118 = vrot.lane.b32.xlu0 %v1502_v0, %s17221_s1  ;;  %v1337_v0 = vrot.slane %v1211_v45, %v17362_v30 }
 0x13d   :  { %2180 = vrot.lane.b32.xlu1 %v17658_v4, %s17221_s1  ;;  %v17772_v13 = vrot.slane %v1337_v0, %v17359_v27 }
 0x13f   :  { %2170 = vrot.lane.b32.xlu0 %v1708_v8, %s17221_s1  ;;  %v375_v8 = vcombine.high %v353_v59, %v353_v59  ;;  %v17793_v4 = vrot.slane %v17772_v13, %v17359_v27 }
 0x141   :  { %2232 = vrot.lane.b32.xlu1 %v1939_v10, %s17221_s1 }
 0x143   :  { %2178 = vrot.lane.b32.xlu0 %v1732_v15, %s17221_s1  ;;  %v1763_v15 = vcombine.high %v17682_v16, %v17682_v16  ;;  %v1510_v16 = vcombine.high %v17602_v46, %v17602_v46  ;;  %v17809_v46 = vpop.f32.mrf.mxu0 }
 0x144   :  { %24651 = vst [vmem:[#allocation7_spill] sm:$0xff] %v17809_v46 }
 0x145   :  { %v2127_v22 = vpop.permute.xlu0 %2126  ;;  %2236 = vrot.lane.b32.xlu1 %v1961_v19, %s17221_s1 }
 0x146   :  { %v2390_v26 = vadd.f32 %v2127_v22, %v500_v17 }
 0x147   :  { %v2129_v28 = vpop.permute.xlu1 %2128  ;;  %2186 = vrot.lane.b32.xlu0 %v17699_v24, %s17221_s1 }
 0x148   :  { %v2391_v34 = vadd.f32 %v2129_v28, %v17694_v21  ;;  %v2582_v38 = vmul.f32 0.2, %v2390_v26  ;;  %vm2486_vm3 = vcmp.gt.f32.partialorder %v2390_v26, 0.0 }
 0x149   :  { %v2079_v35 = vpop.permute.xlu0 %2078  ;;  %2240 = vrot.lane.b32.xlu1 %v17708_v29, %s17221_s1 }
 0x14a   :  { %vm2487_vm2 = vcmp.gt.f32.partialorder %v2391_v34, 0.0  ;;  %v2583_v39 = vmul.f32 0.2, %v2391_v34  ;;  %v17737_v53 = vsel %vm2486_vm3, %v2390_v26, %v2582_v38  ;;  %v2366_v17 = vadd.f32 %v2079_v35, %v353_v59 }
 0x14b   :  { %2198 = vrot.lane.b32.xlu0 %v17719_v36, %s17221_s1  ;;  %v17739_v47 = vpop.permute.xlu1 %2132 }
 0x14c   :  { %v17729_v44 = vsel %vm2487_vm2, %v2391_v34, %v2583_v39  ;;  %v1777_v34 = vrot.slane %v1763_v15, %v17359_v27  ;;  %v2558_v35 = vmul.f32 0.2, %v2366_v17  ;;  %v17805_v39 = vrot.slane %v1293_v48, %v17359_v27 }
 0x14d   :  { %v2131_v49 = vpop.permute.xlu0 %2130  ;;  %2248 = vrot.lane.b32.xlu1 %v2007_v41, %s17221_s1  ;;  %v3030_v57 = vcombine.low %v17737_v53, %v17729_v44  ;;  %vm2462_vm6 = vcmp.gt.f32.partialorder %v2366_v17, 0.0 }
 0x14e   :  { %v2392_v55 = vadd.f32 %v2131_v49, %v522_v40  ;;  %v477_v40 = vcombine.high %v17651_v2, %v17651_v2  ;;  %v1524_v49 = vrot.slane %v1510_v16, %v17359_v27  ;;  %v17821_v59 = vsel %vm2462_vm6, %v2366_v17, %v2558_v35 }
 0x14f   :  { %2230 = vrot.lane.b32.xlu0 %v1938_v52, %s17221_s1  ;;  %v3037_v5 = vrot.slane %v3030_v57, %v17359_v27  ;;  %v2083_v10 = vpop.permute.xlu1 %2082  ;;  %v1740_v52 = vcombine.high %v17639_v61, %v17639_v61  ;;  %v1809_v57 = vcombine.high %v17702_v25, %v17702_v25  ;;  %24652 = vst [vmem:[#allocation8_spill] sm:$0xff] %v17821_v59 }
 0x150   :  { %vm2488_vm4 = vcmp.gt.f32.partialorder %v2392_v55, 0.0  ;;  %v2584_v58 = vmul.f32 0.2, %v2392_v55  ;;  %v2368_v22 = vadd.f32 %v2083_v10, %v375_v8  ;;  %v17832_v61 = vrot.slane %v17805_v39, %v17359_v27 }
 0x151   :  { %v17749_v56 = vpop.permute.xlu0 %2138  ;;  %2252 = vrot.lane.b32.xlu1 %v17746_v31, %s17221_s1  ;;  %v1754_v10 = vrot.slane %v1740_v52, %v17359_v27  ;;  %v1823_v15 = vrot.slane %v1809_v57, %v17359_v27  ;;  %v1778_v16 = vcombine.high %v17699_v24, %v17699_v24 }
 0x152   :  { %v17758_v3 = vsel %vm2488_vm4, %v2392_v55, %v2584_v58  ;;  %v2560_v37 = vmul.f32 0.2, %v2368_v22  ;;  %vm2464_vm7 = vcmp.gt.f32.partialorder %v2368_v22, 0.0  ;;  %v1301_v58 = vrot.slane %v17798_v32, %v17362_v30 }
 0x153   :  { %v3044_v7 = vrot.slane %v17758_v3, %v17359_v27  ;;  %2238 = vrot.lane.b32.xlu0 %v1962_v63, %s17221_s1  ;;  %v17825_v0 = vpop.permute.xlu1 %2084 }
 0x154   :  { %v17823_v63 = vsel %vm2464_vm7, %v2368_v22, %v2560_v37 }
 0x155   :  { %v3045_v42 = vcombine.low %v3037_v5, %v3044_v7  ;;  %v17766_v12 = vpop.permute.xlu0 %2150  ;;  %2124 = vrot.lane.b32.xlu1 %v1525_v9, %s17221_s1  ;;  %v17834_v5 = vpop.f32.mrf.mxu0  ;;  %v491_v7 = vrot.slane %v477_v40, %v17359_v27  ;;  %v1162_v9 = vcombine.high %v17664_v6, %v17664_v6  ;;  %v2860_v11 = vrot.slane %v17823_v63, %v17359_v27 }
 0x156   :  { %24653 = vst [vmem:[#allocation9_spill] sm:$0xff] %v17834_v5  ;;  %v17852_v6 = vrot.slane %v1301_v58, %v17359_v27  ;;  %v1213_v40 = vcombine.high %v17686_v18, %v17686_v18  ;;  %v1824_v58 = vcombine.high %v17719_v36, %v17719_v36 }
 0x157   :  { %v17781_v19 = vrot.slane %v3045_v42, %v17359_v27  ;;  %2250 = vrot.lane.b32.xlu0 %v2008_v50, %s17221_s1  ;;  %v493_v50 = vcombine.high %v491_v7, %v491_v7  ;;  %v17854_v22 = vpop.f32.mrf.mxu0  ;;  %v507_v48 = vrot.slane %v491_v7, %v17359_v27 }
 0x158   :  { %24654 = vst [vmem:[#allocation10_spill] sm:$0xff] %v17854_v22  ;;  %v17875_v24 = vrot.slane %v17852_v6, %v17359_v27 }
 0x159   :  { %v9621_v26 = vsel %vm9564_vm5, %v17781_v19, -inf  ;;  %v2081_v28 = vpop.permute.xlu0 %2080  ;;  %2184 = vrot.lane.b32.xlu1 %v1755_v51, %s17221_s1  ;;  %v521_v37 = vrot.slane %v493_v50, %v17359_v27  ;;  %v523_v52 = vcombine.high %v507_v48, %v507_v48 }
 0x15a   :  { %v9622_v33 = vrot.slane %v9621_v26, 4  ;;  %v2367_v38 = vadd.f32 %v2081_v28, %v17788_v62  ;;  %v2137_v28 = vpop.permute.xlu1 %2136 }
 0x15b   :  { %2258 = vrot.lane.b32.xlu0 %v17793_v4, %s17221_s1  ;;  %v525_v57 = vcombine.high %v521_v37, %v521_v37 }
 0x15c   :  { %v9623_v41 = vmax.f32 %v9621_v26, %v9622_v33  ;;  %vm2463_vm8 = vcmp.gt.f32.partialorder %v2367_v38, 0.0  ;;  %v2559_v45 = vmul.f32 0.2, %v2367_v38  ;;  %v1305_v33 = vrot.slane %v1162_v9, %v17362_v30 }
 0x15d   :  { %v17811_v23 = vpop.permute.xlu0 %2090  ;;  %2188 = vrot.lane.b32.xlu1 %v1777_v34, %s17221_s1  ;;  %v524_v34 = vcombine.high %v17694_v21, %v17694_v21  ;;  %v2395_v9 = vadd.f32 %v2137_v28, %v521_v37  ;;  %v2396_v37 = vadd.f32 %v17749_v56, %v523_v52 }
 0x15e   :  { %v9624_v55 = vrot.slane %v9623_v41, 2  ;;  %v17827_v1 = vsel %vm2463_vm8, %v2367_v38, %v2559_v45  ;;  %v2141_v36 = vpop.permute.xlu1 %2140 }
 0x15f   :  { %2122 = vrot.lane.b32.xlu0 %v1524_v49, %s17221_s1  ;;  %v2846_v8 = vcombine.low %v17821_v59, %v17827_v1  ;;  %v17882_v49 = vrot.slane %v17854_v22, %v17359_v27  ;;  %v2393_v7 = vadd.f32 %v17739_v47, %v524_v34  ;;  %vm2491_vm10 = vcmp.gt.f32.partialorder %v2395_v9, 0.0 }
 0x160   :  { %v9625_v25 = vmax.f32 %v9623_v41, %v9624_v55  ;;  %v526_v41 = vcombine.high %v17854_v22, %v17854_v22  ;;  %vm2492_vm13 = vcmp.gt.f32.partialorder %v2396_v37, 0.0 }
 0x161   :  { %2192 = vrot.lane.b32.xlu1 %v17832_v61, %s17221_s1  ;;  %v2853_v14 = vrot.slane %v2846_v8, %v17359_v27  ;;  %v17847_v51 = vpop.permute.xlu0 %2102  ;;  %vm2489_vm9 = vcmp.gt.f32.partialorder %v2393_v7, 0.0 }
 0x162   :  { %v9626_v42 = vrot.slane %v9625_v25, 1 }
 0x163   :  { %2182 = vrot.lane.b32.xlu0 %v1754_v10, %s17221_s1  ;;  %v2861_v26 = vcombine.low %v2853_v14, %v2860_v11  ;;  %v1985_v10 = vcombine.high %v17708_v29, %v17708_v29  ;;  %v1970_v29 = vcombine.high %v17691_v20, %v17691_v20  ;;  %v2397_v20 = vadd.f32 %v2141_v36, %v525_v57 }
 0x164   :  { %v9627_v17 = vmax.f32 %v9625_v25, %v9626_v42  ;;  %v17891_v25 = vrot.slane %v1305_v33, %v17359_v27  ;;  %v2587_v33 = vmul.f32 0.2, %v2395_v9 }
 0x165   :  { %2200 = vrot.lane.b32.xlu1 %v1823_v15, %s17221_s1  ;;  %v17866_v38 = vrot.slane %v2861_v26, %v17359_v27  ;;  %v2135_v55 = vpop.permute.xlu0 %2134  ;;  %v2031_v15 = vcombine.high %v17746_v31, %v17746_v31  ;;  %v2585_v31 = vmul.f32 0.2, %v2393_v7  ;;  %v2589_v56 = vmul.f32 0.2, %v2397_v20 }
 0x166   :  { %v10011_v35 = vrot.slane %v9627_v17, %v17359_v27  ;;  %v2394_v14 = vadd.f32 %v2135_v55, %v507_v48  ;;  %v2039_v17 = vcombine.high %v17772_v13, %v17772_v13  ;;  %v17917_v48 = vrot.slane %v17882_v49, %v17359_v27 }
 0x167   :  { %2190 = vrot.lane.b32.xlu0 %v1778_v16, %s17221_s1  ;;  %v9565_v18 = vsel %vm9564_vm5, %v17866_v38, -inf  ;;  %v17922_v16 = vrot.slane %v17891_v25, %v17359_v27  ;;  %v1341_v13 = vrot.slane %v1213_v40, %v17362_v30  ;;  %v1984_v40 = vrot.slane %v1970_v29, %v17359_v27 }
 0x168   :  { %v10012_v21 = vcombine.high %v10011_v35, %v10011_v35  ;;  %v17878_v45 = vrot.slane %v10011_v35, %v17359_v27  ;;  %v9566_v50 = vrot.slane %v9565_v18, 4  ;;  %vm2490_vm11 = vcmp.gt.f32.partialorder %v2394_v14, 0.0 }
 0x169   :  { %2204 = vrot.lane.b32.xlu1 %v17875_v24, %s17221_s1  ;;  %v2143_v34 = vpop.permute.xlu0 %2142  ;;  %v2586_v55 = vmul.f32 0.2, %v2394_v14  ;;  %vm2493_vm12 = vcmp.gt.f32.partialorder %v2397_v20, 0.0  ;;  %v17945_v36 = vrot.slane %v1341_v13, %v17359_v27 }
 0x16a   :  { %v17895_v8 = vrot.slane %v10012_v21, %v17359_v27  ;;  %v10027_v42 = vcombine.high %v17878_v45, %v17878_v45  ;;  %v9567_v28 = vmax.f32 %v9565_v18, %v9566_v50  ;;  %v540_v21 = vrot.slane %v526_v41, %v17359_v27 }
 0x16b   :  { %2202 = vrot.lane.b32.xlu0 %v1824_v58, %s17221_s1  ;;  %v2016_v18 = vcombine.high %v17727_v43, %v17727_v43  ;;  %v2398_v57 = vadd.f32 %v2143_v34, %v17917_v48  ;;  %v17937_v50 = vsel %vm2491_vm10, %v2395_v9, %v2587_v33  ;;  %v17939_v52 = vsel %vm2490_vm11, %v2394_v14, %v2586_v55 }
 0x16c   :  { %v17913_v26 = vsub.f32 %v17758_v3, %v10027_v42  ;;  %v9568_v35 = vrot.slane %v9567_v28, 2  ;;  %v17935_v42 = vsel %vm2489_vm9, %v2393_v7, %v2585_v31  ;;  %v3067_v9 = vrot.slane %v17937_v50, %v17359_v27  ;;  %v17954_v31 = vpop.permute.xlu1 %2144 }
 0x16d   :  { %2244 = vrot.lane.b32.xlu1 %v1985_v10, %s17221_s1  ;;  %v2053_v10 = vrot.slane %v2039_v17, %v17359_v27  ;;  %v3053_v43 = vcombine.low %v17935_v42, %v17939_v52  ;;  %v2590_v29 = vmul.f32 0.2, %v2398_v57  ;;  %v2030_v7 = vrot.slane %v2016_v18, %v17359_v27 }
 0x16e   :  { %24655 = vst [vmem:[#allocation11_spill] sm:$0xff] %v17913_v26  ;;  %v9569_v58 = vmax.f32 %v9567_v28, %v9568_v35  ;;  %vm2494_vm14 = vcmp.gt.f32.partialorder %v2398_v57, 0.0  ;;  %v17952_v28 = vsel %vm2493_vm12, %v2397_v20, %v2589_v56  ;;  %v542_v33 = vcombine.high %v540_v21, %v540_v21 }
 0x16f   :  { %2210 = vrot.lane.b32.xlu0 %v17922_v16, %s17221_s1  ;;  %v3060_v17 = vrot.slane %v3053_v43, %v17359_v27  ;;  %v17960_v35 = vrot.slane %v17945_v36, %v17359_v27  ;;  %v17965_v18 = vsel %vm2494_vm14, %v2398_v57, %v2590_v29  ;;  %v2054_v20 = vcombine.high %v17793_v4, %v17793_v4 }
 0x170   :  { %v9570_v41 = vrot.slane %v9569_v58, 1  ;;  %v1786_v56 = vcombine.high %v17805_v39, %v17805_v39  ;;  %v556_v57 = vrot.slane %v540_v21, %v17359_v27  ;;  %v17982_v4 = vrot.slane %v542_v33, %v17359_v27  ;;  %v2153_v29 = vpop.permute.xlu1 %2152 }
 0x171   :  { %2256 = vrot.lane.b32.xlu1 %v2031_v15, %s17221_s1  ;;  %v2588_v15 = vmul.f32 0.2, %v2396_v37  ;;  %v3068_v13 = vcombine.low %v3060_v17, %v3067_v9  ;;  %v1801_v39 = vcombine.high %v17832_v61, %v17832_v61  ;;  %vm3614_vm11 = vcmask 133248  }
 0x172   :  { %v9571_v14 = vmax.f32 %v9569_v58, %v9570_v41  ;;  %v572_v17 = vcombine.high %v556_v57, %v556_v57  ;;  %v1800_v61 = vrot.slane %v1786_v56, %v17359_v27 }
 0x173   :  { %2242 = vrot.lane.b32.xlu0 %v1984_v40, %s17221_s1  ;;  %v17963_v55 = vsel %vm2492_vm13, %v2396_v37, %v2588_v15  ;;  %v1164_v37 = vcombine.high %v17798_v32, %v17798_v32  ;;  %v17988_v43 = vrot.slane %v3068_v13, %v17359_v27  ;;  %v3090_v15 = vrot.slane %v17965_v18, %v17359_v27 }
 0x174   :  { %v9827_v34 = vrot.slane %v9571_v14, %v17359_v27  ;;  %v1847_v13 = vcombine.high %v17875_v24, %v17875_v24 }
 0x175   :  { %2260 = vrot.lane.b32.xlu1 %v2053_v10, %s17221_s1  ;;  %v3076_v10 = vcombine.low %v17963_v55, %v17952_v28  ;;  %v1309_v56 = vrot.slane %v1164_v37, %v17362_v30 }
 0x176   :  { %v9828_v58 = vcombine.high %v9827_v34, %v9827_v34  ;;  %v17970_v40 = vrot.slane %v9827_v34, %v17359_v27  ;;  %v2155_v34 = vpop.permute.xlu0 %2154 }
 0x177   :  { %2254 = vrot.lane.b32.xlu0 %v2030_v7, %s17221_s1  ;;  %v1832_v7 = vcombine.high %v17852_v6, %v17852_v6  ;;  %v3083_v14 = vrot.slane %v3076_v10, %v17359_v27  ;;  %v1855_v6 = vcombine.high %v17891_v25, %v17891_v25 }
 0x178   :  { %24656 = vst [vmem:[#allocation12_spill] sm:$0xff] %v17970_v40  ;;  %v17985_v41 = vrot.slane %v9828_v58, %v17359_v27  ;;  %v9843_v32 = vcombine.high %v17970_v40, %v17970_v40  ;;  %v9628_v58 = vsel %vm9564_vm5, %v17988_v43, -inf }
 0x179   :  { %2264 = vrot.lane.b32.xlu1 %v17960_v35, %s17221_s1  ;;  %v3091_v10 = vcombine.low %v3083_v14, %v3090_v15  ;;  %v1846_v24 = vrot.slane %v1832_v7, %v17359_v27  ;;  %v9629_v9 = vrot.slane %v9628_v58, 4  ;;  %v1869_v15 = vrot.slane %v1855_v6, %v17359_v27 }
 0x17a   :  { %24657 = vst [vmem:[#allocation13_spill] sm:$0xff] %v17985_v41  ;;  %v18007_v33 = vsub.f32 %v17823_v63, %v9843_v32  ;;  %v2404_v32 = vadd.f32 %v2155_v34, %v572_v17  ;;  %v1870_v7 = vcombine.high %v17922_v16, %v17922_v16 }
 0x17b   :  { %2262 = vrot.lane.b32.xlu0 %v2054_v20, %s17221_s1  ;;  %v2403_v20 = vadd.f32 %v2153_v29, %v17982_v4  ;;  %v18022_v25 = vrot.slane %v3091_v10, %v17359_v27  ;;  %v1877_v29 = vrot.slane %v1309_v56, %v17359_v27  ;;  %v9630_v37 = vmax.f32 %v9628_v58, %v9629_v9 }
 0x17c   :  { %24658 = vst [vmem:[#allocation14_spill] sm:$0xff] %v18007_v33  ;;  %v2596_v14 = vmul.f32 0.2, %v2404_v32  ;;  %vm2500_vm1 = vcmp.gt.f32.partialorder %v2404_v32, 0.0 }
 0x17d   :  { %2196 = vrot.lane.b32.xlu1 %v1801_v39, %s17221_s1  ;;  %v2402_v39 = vadd.f32 %v17766_v12, %v556_v57  ;;  %v2595_v21 = vmul.f32 0.2, %v2403_v20  ;;  %vm2499_vm15 = vcmp.gt.f32.partialorder %v2403_v20, 0.0  ;;  %v2062_v12 = vcombine.high %v17945_v36, %v17945_v36 }
 0x17e   :  { %v9631_v17 = vrot.slane %v9630_v37, 2  ;;  %v1885_v9 = vrot.slane %v1877_v29, %v17359_v27  ;;  %v18041_v10 = vsel %vm2500_vm1, %v2404_v32, %v2596_v14  ;;  %v1878_v16 = vcombine.high %v1877_v29, %v1877_v29 }
 0x17f   :  { %2194 = vrot.lane.b32.xlu0 %v1800_v61, %s17221_s1  ;;  %v2594_v57 = vmul.f32 0.2, %v2402_v39  ;;  %vm2498_vm0 = vcmp.gt.f32.partialorder %v2402_v39, 0.0  ;;  %v9635_v61 = vsel %vm9564_vm5, %v18022_v25, -inf  ;;  %v18034_v34 = vsel %vm2499_vm15, %v2403_v20, %v2595_v21 }
 0x180   :  { %v9632_v36 = vmax.f32 %v9630_v37, %v9631_v17  ;;  %v9636_v58 = vrot.slane %v9635_v61, 4  ;;  %v2077_v20 = vcombine.high %v17960_v35, %v17960_v35  ;;  %v1892_v32 = vrot.slane %v1878_v16, %v17359_v27 }
 0x181   :  { %2208 = vrot.lane.b32.xlu1 %v1847_v13, %s17221_s1  ;;  %v2076_v13 = vrot.slane %v2062_v12, %v17359_v27  ;;  %v18039_v6 = vsel %vm2498_vm0, %v2402_v39, %v2594_v57  ;;  %v3136_v39 = vrot.slane %v18041_v10, %v17359_v27  ;;  %v1893_v12 = vcombine.high %v1885_v9, %v1885_v9 }
 0x182   :  { %24659 = vst [vmem:[#allocation15_spill] sm:$0xff] %v18039_v6  ;;  %v3122_v56 = vcombine.low %v18039_v6, %v18034_v34  ;;  %v9633_v21 = vrot.slane %v9632_v36, 1 }
 0x183   :  { %2206 = vrot.lane.b32.xlu0 %v1846_v24, %s17221_s1 }
 0x184   :  { %v9634_v24 = vmax.f32 %v9632_v36, %v9633_v21  ;;  %v3129_v29 = vrot.slane %v3122_v56, %v17359_v27 }
 0x185   :  { %2212 = vrot.lane.b32.xlu1 %v1869_v15, %s17221_s1  ;;  %v9637_v15 = vmax.f32 %v9635_v61, %v9636_v58 }
 0x186   :  { %v10034_v37 = vrot.slane %v9634_v24, %v17359_v27  ;;  %v3137_v57 = vcombine.low %v3129_v29, %v3136_v39 }
 0x187   :  { %2214 = vrot.lane.b32.xlu0 %v1870_v7, %s17221_s1  ;;  %v9638_v7 = vrot.slane %v9637_v15, 2 }
 0x188   :  { %v10035_v14 = vcombine.high %v10034_v37, %v10034_v37  ;;  %v18058_v35 = vrot.slane %v10034_v37, %v17359_v27  ;;  %v18061_v17 = vrot.slane %v3137_v57, %v17359_v27  ;;  %v18088_v57 = vpop.permute.xlu1 %2156 }
 0x189   :  { %2216 = vrot.lane.b32.xlu1 %v1885_v9, %s17221_s1  ;;  %v9639_v36 = vmax.f32 %v9637_v15, %v9638_v7 }
 0x18a   :  { %24660 = vst [vmem:[#allocation16_spill] sm:$0xff] %v18058_v35  ;;  %v18064_v61 = vrot.slane %v10035_v14, %v17359_v27  ;;  %v9649_v56 = vsel %vm9564_vm5, %v18061_v17, -inf }
 0x18b   :  { %2266 = vrot.lane.b32.xlu0 %v2076_v13, %s17221_s1  ;;  %v10050_v13 = vcombine.high %v18058_v35, %v18058_v35  ;;  %v9640_v21 = vrot.slane %v9639_v36, 1  ;;  %v9650_v24 = vrot.slane %v9649_v56, 4 }
 0x18c   :  { %24661 = vst [vmem:[#allocation17_spill] sm:$0xff] %v18064_v61 }
 0x18d   :  { %2268 = vrot.lane.b32.xlu1 %v2077_v20, %s17221_s1  ;;  %v18073_v16 = vsub.f32 %v17937_v50, %v10050_v13  ;;  %v9641_v20 = vmax.f32 %v9639_v36, %v9640_v21  ;;  %v9651_v15 = vmax.f32 %v9649_v56, %v9650_v24  ;;  %v330_v36 = vcombine.high %v17634_v60, %v17634_v60  ;;  %v2089_v13 = vpop.permute.xlu1 %2088  ;;  %v18095_v21 = vpop.permute.xlu0 %2162 }
 0x18f   :  { %2218 = vrot.lane.b32.xlu0 %v1892_v32, %s17221_s1  ;;  %24662 = vst [vmem:[#allocation18_spill] sm:$0xff] %v18073_v16  ;;  %v18078_v39 = vrot.slane %v9641_v20, %v17359_v27  ;;  %v344_v24 = vrot.slane %v330_v36, %v17359_v27 }
 0x191   :  { %2220 = vrot.lane.b32.xlu1 %v1893_v12, %s17221_s1  ;;  %24663 = vst [vmem:[#allocation19_spill] sm:$0xff] %v18078_v39  ;;  %v18082_v32 = vrot.slane %v18078_v39, %v17359_v27  ;;  %v9652_v12 = vrot.slane %v9651_v15, 2  ;;  %v346_v37 = vcombine.high %v344_v24, %v344_v24  ;;  %v360_v36 = vrot.slane %v344_v24, %v17359_v27 }
 0x192   :  { %v18124_v24 = vrot.slane %v17625_v54, %v17359_v27 }
 0x193   :  { %24664 = vst [vmem:[#allocation20_spill] sm:$0xff] %v18082_v32  ;;  %v10073_v29 = vcombine.high %v18082_v32, %v18082_v32  ;;  %v9653_v7 = vmax.f32 %v9651_v15, %v9652_v12  ;;  %v18105_v15 = vpop.permute.xlu0 %2222  ;;  %v377_v12 = vcombine.high %v17788_v62, %v17788_v62  ;;  %v376_v62 = vcombine.high %v360_v36, %v360_v36 }
 0x194   :  { %24670 = vst [vmem:[#allocation26_spill] sm:$0xff] %v18124_v24 }
 0x195   :  { %v18091_v14 = vsub.f32 %v17965_v18, %v10073_v29  ;;  %v9654_v56 = vrot.slane %v9653_v7, 1  ;;  %v2093_v29 = vpop.permute.xlu1 %2092  ;;  %v2369_v22 = vadd.f32 %v17825_v0, %v377_v12 }
 0x197   :  { %24665 = vst [vmem:[#allocation21_spill] sm:$0xff] %v18091_v14  ;;  %v9655_v20 = vmax.f32 %v9653_v7, %v9654_v56  ;;  %v379_v7 = vcombine.high %v17625_v54, %v17625_v54  ;;  %v374_v56 = vrot.slane %v346_v37, %v17359_v27  ;;  %v2087_v2 = vpop.permute.xlu0 %2086  ;;  %v2561_v37 = vmul.f32 0.2, %v2369_v22 }
 0x198   :  { %vm2465_vm2 = vcmp.gt.f32.partialorder %v2369_v22, 0.0  ;;  %v2370_v32 = vadd.f32 %v2087_v2, %v360_v36 }
 0x199   :  { %v18099_v58 = vrot.slane %v9655_v20, %v17359_v27  ;;  %v378_v11 = vcombine.high %v374_v56, %v374_v56  ;;  %v18119_v60 = vpop.permute.xlu1 %2096  ;;  %v393_v30 = vrot.slane %v379_v7, %v17359_v27  ;;  %v18135_v7 = vrot.slane %v18124_v24, %v17359_v27 }
 0x19a   :  { %24669 = vst [vmem:[#allocation25_spill] sm:$0xff] %v18119_v60  ;;  %vm2466_vm4 = vcmp.gt.f32.partialorder %v2370_v32, 0.0 }
 0x19b   :  { %24666 = vst [vmem:[#allocation22_spill] sm:$0xff] %v18099_v58  ;;  %v18103_v9 = vrot.slane %v18099_v58, %v17359_v27  ;;  %v2373_v14 = vadd.f32 %v2093_v29, %v378_v11  ;;  %v395_v58 = vcombine.high %v393_v30, %v393_v30  ;;  %v409_v0 = vrot.slane %v393_v30, %v17359_v27  ;;  %v2095_v16 = vpop.permute.xlu0 %2094 }
 0x19c   :  { %v2562_v11 = vmul.f32 0.2, %v2370_v32  ;;  %v18131_v29 = vsel %vm2465_vm2, %v2369_v22, %v2561_v37  ;;  %24673 = vst [vmem:[#allocation29_spill] sm:$0xff] %v18135_v7 }
 0x19d   :  { %24667 = vst [vmem:[#allocation23_spill] sm:$0xff] %v18103_v9  ;;  %v10119_v47 = vcombine.high %v18103_v9, %v18103_v9  ;;  %v2371_v9 = vadd.f32 %v2089_v13, %v374_v56  ;;  %v2105_v12 = vpop.permute.xlu1 %2104  ;;  %v2565_v61 = vmul.f32 0.2, %v2373_v14  ;;  %v18129_v13 = vrot.slane %v395_v58, %v17359_v27  ;;  %24672 = vst [vmem:[#allocation28_spill] sm:$0xff] %v18131_v29 }
 0x19e   :  { %vm2469_vm6 = vcmp.gt.f32.partialorder %v2373_v14, 0.0  ;;  %v18140_v36 = vsel %vm2466_vm4, %v2370_v32, %v2562_v11  ;;  %v2374_v56 = vadd.f32 %v2095_v16, %v18135_v7  ;;  %v2378_v22 = vadd.f32 %v17847_v51, %v409_v0 }
 0x19f   :  { %v18116_v20 = vsub.f32 %v18041_v10, %v10119_v47  ;;  %v2372_v47 = vadd.f32 %v17811_v23, %v376_v62  ;;  %vm2467_vm3 = vcmp.gt.f32.partialorder %v2371_v9, 0.0  ;;  %24671 = vst [vmem:[#allocation27_spill] sm:$0xff] %v18129_v13  ;;  %v2379_v30 = vadd.f32 %v2105_v12, %v18129_v13  ;;  %24675 = vst [vmem:[#allocation31_spill] sm:$0xff] %v18140_v36 }
 0x1a0   :  { %v2869_v58 = vcombine.low %v18131_v29, %v18140_v36  ;;  %v18146_v62 = vsel %vm2469_vm6, %v2373_v14, %v2565_v61  ;;  %vm2470_vm8 = vcmp.gt.f32.partialorder %v2374_v56, 0.0  ;;  %v2566_v11 = vmul.f32 0.2, %v2374_v56 }
 0x1a1   :  { %24668 = vst [vmem:[#allocation24_spill] sm:$0xff] %v18116_v20  ;;  %v2563_v20 = vmul.f32 0.2, %v2371_v9  ;;  %v2564_v23 = vmul.f32 0.2, %v2372_v47  ;;  %vm2468_vm7 = vcmp.gt.f32.partialorder %v2372_v47, 0.0  ;;  %v425_v54 = vcombine.high %v409_v0, %v409_v0 }
 0x1a2   :  { %24676 = vst [vmem:[#allocation32_spill] sm:$0xff] %v18146_v62  ;;  %v2571_v32 = vmul.f32 0.2, %v2379_v30  ;;  %vm2475_vm9 = vcmp.gt.f32.partialorder %v2379_v30, 0.0  ;;  %v2570_v51 = vmul.f32 0.2, %v2378_v22  ;;  %v18155_v61 = vsel %vm2470_vm8, %v2374_v56, %v2566_v11 }
 0x1a3   :  { %v18137_v2 = vsel %vm2467_vm3, %v2371_v9, %v2563_v20  ;;  %v2876_v9 = vrot.slane %v2869_v58, %v17359_v27  ;;  %v2107_v20 = vpop.permute.xlu0 %2106  ;;  %v18151_v12 = vsel %vm2468_vm7, %v2372_v47, %v2564_v23  ;;  %24678 = vst [vmem:[#allocation34_spill] sm:$0xff] %v18155_v61  ;;  %vm2474_vm10 = vcmp.gt.f32.partialorder %v2378_v22, 0.0 }
 0x1a4   :  { %24674 = vst [vmem:[#allocation30_spill] sm:$0xff] %v18137_v2  ;;  %v2883_v37 = vrot.slane %v18137_v2, %v17359_v27  ;;  %24677 = vst [vmem:[#allocation33_spill] sm:$0xff] %v18151_v12  ;;  %v2892_v35 = vcombine.low %v18151_v12, %v18146_v62  ;;  %v2380_v14 = vadd.f32 %v2107_v20, %v425_v54 }
 0x1a5   :  { %v2906_v58 = vrot.slane %v18155_v61, %v17359_v27  ;;  %v18160_v47 = vsel %vm2475_vm9, %v2379_v30, %v2571_v32 }
 0x1a6   :  { %v2884_v16 = vcombine.low %v2876_v9, %v2883_v37  ;;  %24679 = vst [vmem:[#allocation35_spill] sm:$0xff] %v18160_v47  ;;  %v2899_v0 = vrot.slane %v2892_v35, %v17359_v27  ;;  %v18165_v37 = vsel %vm2474_vm10, %v2378_v22, %v2570_v51  ;;  %vm2476_vm12 = vcmp.gt.f32.partialorder %v2380_v14, 0.0 }
 0x1a7   :  { %24680 = vst [vmem:[#allocation36_spill] sm:$0xff] %v18165_v37  ;;  %v2938_v54 = vcombine.low %v18165_v37, %v18160_v47  ;;  %v2572_v11 = vmul.f32 0.2, %v2380_v14 }
 0x1a8   :  { %v2891_v39 = vrot.slane %v2884_v16, %v17359_v27  ;;  %v2907_v20 = vcombine.low %v2899_v0, %v2906_v58 }
 0x1a9   :  { %v18172_v35 = vsel %vm2476_vm12, %v2380_v14, %v2572_v11  ;;  %v2945_v22 = vrot.slane %v2938_v54, %v17359_v27 }
 0x1aa   :  { %v3622_v23 = vsel %vm3614_vm11, %v2891_v39, -inf  ;;  %v9572_v7 = vsel %vm9564_vm5, %v2891_v39, -inf  ;;  %v18170_v30 = vrot.slane %v2907_v20, %v17359_v27  ;;  %24681 = vst [vmem:[#allocation37_spill] sm:$0xff] %v18172_v35  ;;  %v2952_v39 = vrot.slane %v18172_v35, %v17359_v27 }
 0x1ab   :  { %v3623_v56 = vrot.slane %v3622_v23, 4  ;;  %v9573_v9 = vrot.slane %v9572_v7, 4 }
 0x1ac   :  { %v9579_v51 = vsel %vm9564_vm5, %v18170_v30, -inf }
 0x1ad   :  { %v3624_v16 = vmax.f32 %v3622_v23, %v3623_v56  ;;  %v9574_v60 = vmax.f32 %v9572_v7, %v9573_v9  ;;  %v9580_v0 = vrot.slane %v9579_v51, 4  ;;  %v2953_v23 = vcombine.low %v2945_v22, %v2952_v39 }
 0x1ae   :  { %v3671_v7 = vsel %vm3614_vm11, %v17781_v19, -inf }
 0x1af   :  { %v3625_v32 = vrot.slane %v3624_v16, 2  ;;  %v9575_v13 = vrot.slane %v9574_v60, 2  ;;  %v9581_v9 = vmax.f32 %v9579_v51, %v9580_v0  ;;  %v2960_v20 = vrot.slane %v2953_v23, %v17359_v27 }
 0x1b0   :  { %v3672_v40 = vrot.slane %v3671_v7, 4 }
 0x1b1   :  { %v3626_v33 = vmax.f32 %v3624_v16, %v3625_v32  ;;  %v9576_v58 = vmax.f32 %v9574_v60, %v9575_v13  ;;  %v9582_v24 = vrot.slane %v9581_v9, 2  ;;  %v3643_v54 = vsel %vm3614_vm11, %v2960_v20, -inf }
 0x1b2   :  { %v3644_v32 = vrot.slane %v3643_v54, 4  ;;  %v3673_v39 = vmax.f32 %v3671_v7, %v3672_v40  ;;  %v541_v7 = vcombine.high %v17882_v49, %v17882_v49  ;;  %v3678_v49 = vsel %vm3614_vm11, %v17988_v43, -inf }
 0x1b3   :  { %v3627_v56 = vrot.slane %v3626_v33, 1  ;;  %v9577_v14 = vrot.slane %v9576_v58, 1  ;;  %v9583_v13 = vmax.f32 %v9581_v9, %v9582_v24  ;;  %v571_v43 = vcombine.high %v17917_v48, %v17917_v48 }
 0x1b4   :  { %v3645_v23 = vmax.f32 %v3643_v54, %v3644_v32  ;;  %v3674_v40 = vrot.slane %v3673_v39, 2  ;;  %v18211_v54 = vpop.permute.xlu0 %2114  ;;  %v3699_v48 = vsel %vm3614_vm11, %v18061_v17, -inf }
 0x1b5   :  { %v3628_v11 = vmax.f32 %v3626_v33, %v3627_v56  ;;  %v9578_v41 = vmax.f32 %v9576_v58, %v9577_v14  ;;  %v9584_v51 = vrot.slane %v9583_v13, 1  ;;  %v9593_v58 = vsel %vm9564_vm5, %v2960_v20, -inf  ;;  %24686 = vst [vmem:[#allocation42_spill] sm:$0xff] %v18211_v54 }
 0x1b6   :  { %v9594_v56 = vrot.slane %v9593_v58, 4  ;;  %v3675_v20 = vmax.f32 %v3673_v39, %v3674_v40 }
 0x1b7   :  { %v18184_v46 = vrot.slane %v3628_v11, %v17359_v27  ;;  %v9850_v60 = vrot.slane %v9578_v41, %v17359_v27  ;;  %v9585_v14 = vmax.f32 %v9583_v13, %v9584_v51  ;;  %v3646_v11 = vrot.slane %v3645_v23, 2 }
 0x1b8   :  { %v3676_v39 = vrot.slane %v3675_v20, 1 }
 0x1b9   :  { %v3901_v19 = vcombine.high %v18184_v46, %v18184_v46  ;;  %v9851_v16 = vcombine.high %v9850_v60, %v9850_v60  ;;  %v18190_v22 = vrot.slane %v9850_v60, %v17359_v27  ;;  %v9873_v9 = vrot.slane %v9585_v14, %v17359_v27 }
 0x1ba   :  { %v3615_v60 = vsel %vm3614_vm11, %v17866_v38, -inf  ;;  %v3647_v24 = vmax.f32 %v3645_v23, %v3646_v11  ;;  %v2147_v23 = vpop.permute.xlu0 %2146 }
 0x1bb   :  { %24682 = vst [vmem:[#allocation38_spill] sm:$0xff] %v18190_v22  ;;  %v18193_v33 = vrot.slane %v3901_v19, %v17359_v27  ;;  %v18197_v0 = vrot.slane %v9851_v16, %v17359_v27  ;;  %v9595_v19 = vmax.f32 %v9593_v58, %v9594_v56  ;;  %v9874_v16 = vcombine.high %v9873_v9, %v9873_v9  ;;  %v18222_v56 = vpop.permute.xlu1 %2108 }
 0x1bc   :  { %v18209_v41 = vrot.slane %v9873_v9, %v17359_v27  ;;  %v3616_v32 = vrot.slane %v3615_v60, 4  ;;  %v3648_v40 = vrot.slane %v3647_v24, 1  ;;  %24688 = vst [vmem:[#allocation44_spill] sm:$0xff] %v18222_v56  ;;  %v3677_v58 = vmax.f32 %v3675_v20, %v3676_v39 }
 0x1bd   :  { %24683 = vst [vmem:[#allocation39_spill] sm:$0xff] %v18193_v33  ;;  %24684 = vst [vmem:[#allocation40_spill] sm:$0xff] %v18197_v0  ;;  %v18216_v13 = vrot.slane %v9874_v16, %v17359_v27  ;;  %v9596_v51 = vrot.slane %v9595_v19, 2  ;;  %v3685_v0 = vsel %vm3614_vm11, %v18022_v25, -inf  ;;  %v2400_v20 = vadd.f32 %v2147_v23, %v571_v43 }
 0x1be   :  { %24685 = vst [vmem:[#allocation41_spill] sm:$0xff] %v18209_v41  ;;  %v9889_v38 = vcombine.high %v18209_v41, %v18209_v41  ;;  %v3649_v11 = vmax.f32 %v3647_v24, %v3648_v40  ;;  %v3617_v16 = vmax.f32 %v3615_v60, %v3616_v32  ;;  %v563_v41 = vrot.slane %v541_v7, %v17359_v27 }
 0x1bf   :  { %24687 = vst [vmem:[#allocation43_spill] sm:$0xff] %v18216_v13  ;;  %v9597_v14 = vmax.f32 %v9595_v19, %v9596_v51  ;;  %v3679_v19 = vrot.slane %v3678_v49, 4  ;;  %v2149_v32 = vpop.permute.xlu1 %2148  ;;  %v4061_v7 = vrot.slane %v3677_v58, %v17359_v27  ;;  %v2592_v17 = vmul.f32 0.2, %v2400_v20 }
 0x1c0   :  { %v18229_v9 = vsub.f32 %v18155_v61, %v9889_v38  ;;  %v18235_v54 = vrot.slane %v3649_v11, %v17359_v27  ;;  %v3686_v38 = vrot.slane %v3685_v0, 4  ;;  %v3618_v60 = vrot.slane %v3617_v16, 2 }
 0x1c1   :  { %v9598_v22 = vrot.slane %v9597_v14, 1  ;;  %v2399_v39 = vadd.f32 %v17954_v31, %v563_v41  ;;  %v573_v40 = vcombine.high %v563_v41, %v563_v41  ;;  %v3700_v13 = vrot.slane %v3699_v48, 4 }
 0x1c2   :  { %24689 = vst [vmem:[#allocation45_spill] sm:$0xff] %v18229_v9  ;;  %v3970_v24 = vcombine.high %v18235_v54, %v18235_v54  ;;  %v3687_v23 = vmax.f32 %v3685_v0, %v3686_v38  ;;  %v3619_v41 = vmax.f32 %v3617_v16, %v3618_v60  ;;  %vm2496_vm13 = vcmp.gt.f32.partialorder %v2400_v20, 0.0 }
 0x1c3   :  { %v9599_v51 = vmax.f32 %v9597_v14, %v9598_v22  ;;  %v3680_v22 = vmax.f32 %v3678_v49, %v3679_v19  ;;  %v2401_v43 = vadd.f32 %v2149_v32, %v573_v40  ;;  %v4062_v19 = vcombine.high %v4061_v7, %v4061_v7 }
 0x1c4   :  { %v18245_v11 = vrot.slane %v3970_v24, %v17359_v27  ;;  %v2591_v24 = vmul.f32 0.2, %v2399_v39  ;;  %v4069_v0 = vrot.slane %v4061_v7, %v17359_v27  ;;  %vm2495_vm14 = vcmp.gt.f32.partialorder %v2399_v39, 0.0 }
 0x1c5   :  { %v9919_v25 = vrot.slane %v9599_v51, %v17359_v27  ;;  %v582_v51 = vrot.slane %v17834_v5, %v17359_v27  ;;  %v3681_v38 = vrot.slane %v3680_v22, 2  ;;  %v3688_v60 = vrot.slane %v3687_v23, 2 }
 0x1c6   :  { %24690 = vst [vmem:[#allocation46_spill] sm:$0xff] %v18245_v11  ;;  %v2593_v40 = vmul.f32 0.2, %v2401_v43  ;;  %v3620_v31 = vrot.slane %v3619_v41, 1  ;;  %vm2497_vm15 = vcmp.gt.f32.partialorder %v2401_v43, 0.0  ;;  %v574_v7 = vcombine.high %v17982_v4, %v17982_v4 }
 0x1c7   :  { %v9920_v14 = vcombine.high %v9919_v25, %v9919_v25  ;;  %v18250_v9 = vrot.slane %v9919_v25, %v17359_v27  ;;  %v18261_v25 = vpop.f32.mrf.mxu0  ;;  %v3701_v11 = vmax.f32 %v3699_v48, %v3700_v13  ;;  %v18278_v32 = vrot.slane %v582_v51, %v17359_v27 }
 0x1c8   :  { %24693 = vst [vmem:[#allocation49_spill] sm:$0xff] %v18261_v25  ;;  %v18271_v25 = vsel %vm2496_vm13, %v2400_v20, %v2592_v17  ;;  %v590_v16 = vcombine.high %v582_v51, %v582_v51  ;;  %v3689_v47 = vmax.f32 %v3687_v23, %v3688_v60  ;;  %v3629_v20 = vsel %vm3614_vm11, %v18170_v30, -inf  ;;  %v2159_v30 = vpop.permute.xlu0 %2158 }
 0x1c9   :  { %24691 = vst [vmem:[#allocation47_spill] sm:$0xff] %v18250_v9  ;;  %v18257_v58 = vrot.slane %v9920_v14, %v17359_v27  ;;  %v9935_v49 = vcombine.high %v18250_v9, %v18250_v9  ;;  %v18275_v61 = vpop.f32.mrf.mxu0  ;;  %v4727_v9 = vsub.f32 %v17737_v53, %v4069_v0  ;;  %v18286_v17 = vsel %vm2497_vm15, %v2401_v43, %v2593_v40  ;;  %v2161_v40 = vpop.permute.xlu1 %2160 }
 0x1ca   :  { %24695 = vst [vmem:[#allocation51_spill] sm:$0xff] %v18275_v61  ;;  %24697 = vst [vmem:[#allocation53_spill] sm:$0xff] %v18286_v17  ;;  %v575_v13 = vcombine.high %v17834_v5, %v17834_v5  ;;  %v3621_v48 = vmax.f32 %v3619_v41, %v3620_v31  ;;  %v4077_v51 = vcombine.high %v4069_v0, %v4069_v0  ;;  %v3630_v43 = vrot.slane %v3629_v20, 4 }
 0x1cb   :  { %24692 = vst [vmem:[#allocation48_spill] sm:$0xff] %v18257_v58  ;;  %v18269_v14 = vsub.f32 %v18172_v35, %v9935_v49  ;;  %v4076_v58 = vrot.slane %v4062_v19, %v17359_v27  ;;  %v18282_v49 = vsel %vm2495_vm14, %v2399_v39, %v2591_v24  ;;  %v3702_v19 = vrot.slane %v3701_v11, 2  ;;  %v18292_v61 = vpop.f32.mrf.mxu0 }
 0x1cc   :  { %24696 = vst [vmem:[#allocation52_spill] sm:$0xff] %v18282_v49  ;;  %v3099_v4 = vcombine.low %v18282_v49, %v18271_v25  ;;  %24698 = vst [vmem:[#allocation54_spill] sm:$0xff] %v18292_v61  ;;  %v4847_v23 = vmul.f32 1.442695, %v4727_v9  ;;  %v3113_v24 = vrot.slane %v18286_v17, %v17359_v27  ;;  %v2405_v0 = vadd.f32 %v18088_v57, %v574_v7 }
 0x1cd   :  { %24694 = vst [vmem:[#allocation50_spill] sm:$0xff] %v18269_v14  ;;  %v3682_v14 = vmax.f32 %v3680_v22, %v3681_v38  ;;  %v18297_v22 = vrot.slane %v590_v16, %v17359_v27  ;;  %v4728_v31 = vsub.f32 %v17729_v44, %v4076_v58  ;;  %v3690_v60 = vrot.slane %v3689_v47, 1 }
 0x1ce   :  { %v3106_v38 = vrot.slane %v3099_v4, %v17359_v27  ;;  %v3877_v39 = vrot.slane %v3621_v48, %v17359_v27  ;;  %v18307_v16 = vrot.slane %v18292_v61, %v17359_v27  ;;  %v2406_v5 = vadd.f32 %v2159_v30, %v18278_v32 }
 0x1cf   :  { %v3683_v41 = vrot.slane %v3682_v14, 1  ;;  %v4729_v17 = vsub.f32 %v17758_v3, %v4077_v51  ;;  %v3703_v35 = vmax.f32 %v3701_v11, %v3702_v19  ;;  %v18314_v4 = vrot.slane %v575_v13, %v17359_v27 }
 0x1d0   :  { %v3114_v9 = vcombine.low %v3106_v38, %v3113_v24  ;;  %16516 = vpow2.f32 %v4847_v23  ;;  %v3631_v57 = vmax.f32 %v3629_v20, %v3630_v43  ;;  %v2407_v7 = vadd.f32 %v2161_v40, %v18297_v22 }
 0x1d1   :  { %v4849_v61 = vmul.f32 1.442695, %v4728_v31  ;;  %v3684_v33 = vmax.f32 %v3682_v14, %v3683_v41  ;;  %vm2501_vm0 = vcmp.gt.f32.partialorder %v2405_v0, 0.0  ;;  %v3691_v24 = vmax.f32 %v3689_v47, %v3690_v60 }
 0x1d2   :  { %v3121_v48 = vrot.slane %v3114_v9, %v17359_v27  ;;  %v3885_v30 = vrot.slane %v3877_v39, %v17359_v27  ;;  %v2598_v51 = vmul.f32 0.2, %v2406_v5  ;;  %v3878_v19 = vcombine.high %v3877_v39, %v3877_v39 }
 0x1d3   :  { %v2597_v13 = vmul.f32 0.2, %v2405_v0  ;;  %v3704_v38 = vrot.slane %v3703_v35, 1  ;;  %vm2502_vm1 = vcmp.gt.f32.partialorder %v2406_v5, 0.0  ;;  %v3632_v20 = vrot.slane %v3631_v57, 2 }
 0x1d4   :  { %v3692_v3 = vsel %vm3614_vm11, %v3121_v48, -inf  ;;  %v9642_v11 = vsel %vm9564_vm5, %v3121_v48, -inf  ;;  %v2599_v23 = vmul.f32 0.2, %v2407_v7  ;;  %v4851_v9 = vmul.f32 1.442695, %v4729_v17 }
 0x1d5   :  { %v3693_v43 = vrot.slane %v3692_v3, 4  ;;  %v9643_v40 = vrot.slane %v9642_v11, 4  ;;  %v18322_v14 = vrot.slane %v3684_v33, %v17359_v27  ;;  %v18325_v47 = vrot.slane %v3691_v24, %v17359_v27 }
 0x1d6   :  { %vm2503_vm2 = vcmp.gt.f32.partialorder %v2407_v7, 0.0  ;;  %v4703_v31 = vsub.f32 %v17821_v59, %v3885_v30  ;;  %v18328_v39 = vsel %vm2502_vm1, %v2406_v5, %v2598_v51  ;;  %v3892_v48 = vrot.slane %v3878_v19, %v17359_v27 }
 0x1d7   :  { %v3694_v41 = vmax.f32 %v3692_v3, %v3693_v43  ;;  %v9644_v60 = vmax.f32 %v9642_v11, %v9643_v40  ;;  %v3893_v58 = vcombine.high %v3885_v30, %v3885_v30  ;;  %v18332_v36 = vsel %vm2501_vm0, %v2405_v0, %v2597_v13  ;;  %v2165_v40 = vpop.permute.xlu1 %2164 }
 0x1d8   :  { %24699 = vst [vmem:[#allocation55_spill] sm:$0xff] %v18332_v36  ;;  %v3705_v17 = vmax.f32 %v3703_v35, %v3704_v38  ;;  %v3633_v56 = vmax.f32 %v3631_v57, %v3632_v20  ;;  %v18334_v33 = vsel %vm2503_vm2, %v2407_v7, %v2599_v23  ;;  %16518 = vpow2.f32 %v4849_v61 }
 0x1d9   :  { %v3695_v26 = vrot.slane %v3694_v41, 2  ;;  %v9645_v24 = vrot.slane %v9644_v60, 2  ;;  %v4092_v59 = vrot.slane %v18322_v14, %v17359_v27  ;;  %v18340_v5 = vrot.slane %v18325_v47, %v17359_v27 }
 0x1da   :  { %v3145_v30 = vcombine.low %v18332_v36, %v18328_v39  ;;  %16520 = vpow2.f32 %v4851_v9  ;;  %v4799_v0 = vmul.f32 1.442695, %v4703_v31  ;;  %v4704_v57 = vsub.f32 %v17827_v1, %v3892_v48 }
 0x1db   :  { %v3696_v3 = vmax.f32 %v3694_v41, %v3695_v26  ;;  %v9646_v35 = vmax.f32 %v9644_v60, %v9645_v24  ;;  %v18346_v7 = vrot.slane %v3705_v17, %v17359_v27  ;;  %v3159_v61 = vrot.slane %v18334_v33, %v17359_v27 }
 0x1dc   :  { %v3152_v11 = vrot.slane %v3145_v30, %v17359_v27  ;;  %v18352_v51 = vsub.f32 %v17823_v63, %v3893_v58  ;;  %v3634_v19 = vrot.slane %v3633_v56, 1  ;;  %v4100_v26 = vcombine.high %v4092_v59, %v4092_v59 }
 0x1dd   :  { %v3697_v13 = vrot.slane %v3696_v3, 1  ;;  %v9647_v38 = vrot.slane %v9646_v35, 1  ;;  %v18354_v20 = vpop.eup %16516  ;;  %v4730_v23 = vsub.f32 %v17935_v42, %v4092_v59  ;;  %v4733_v43 = vsub.f32 %v17963_v55, %v18340_v5 }
 0x1de   :  { %v3160_v9 = vcombine.low %v3152_v11, %v3159_v61  ;;  %16522 = vpow2.f32 %v4799_v0  ;;  %v18361_v31 = vrot.slane %v18184_v46, %v17359_v27  ;;  %v18363_v41 = vmul.f32 1.442695, %v4704_v57 }
 0x1df   :  { %v3698_v63 = vmax.f32 %v3696_v3, %v3697_v13  ;;  %v9648_v58 = vmax.f32 %v9646_v35, %v9647_v38  ;;  %v18369_v59 = vrot.slane %v18346_v7, %v17359_v27  ;;  %v3635_v17 = vmax.f32 %v3633_v56, %v3634_v19 }
 0x1e0   :  { %v3167_v48 = vrot.slane %v3160_v9, %v17359_v27  ;;  %v24700_v24 = vcombine.high %v18297_v22, %v18297_v22  ;;  %v4732_v3 = vsub.f32 %v17937_v50, %v4100_v26  ;;  %v4853_v35 = vmul.f32 1.442695, %v4730_v23 }
 0x1e1   :  { %v4130_v46 = vrot.slane %v3698_v63, %v17359_v27  ;;  %v10080_v0 = vrot.slane %v9648_v58, %v17359_v27  ;;  %v4108_v57 = vcombine.high %v18325_v47, %v18325_v47  ;;  %v4859_v61 = vmul.f32 1.442695, %v4733_v43  ;;  %v2167_v43 = vpop.permute.xlu0 %2166 }
 0x1e2   :  { %v2409_v30 = vadd.f32 %v2165_v40, %v24700_v24  ;;  %v24701_v11 = vcombine.high %v18278_v32, %v18278_v32  ;;  %v4706_v22 = vsub.f32 %v18131_v29, %v18361_v31  ;;  %v3706_v13 = vsel %vm3614_vm11, %v3167_v48, -inf }
 0x1e3   :  { %v4131_v19 = vcombine.high %v4130_v46, %v4130_v46  ;;  %v4739_v38 = vsub.f32 %v18039_v6, %v18369_v59  ;;  %v10081_v50 = vcombine.high %v10080_v0, %v10080_v0  ;;  %v18390_v26 = vrot.slane %v10080_v0, %v17359_v27 }
 0x1e4   :  { %v2408_v56 = vadd.f32 %v18095_v21, %v24701_v11  ;;  %v9656_v47 = vsel %vm9564_vm5, %v3167_v48, -inf  ;;  %v18394_v23 = vrot.slane %v3635_v17, %v17359_v27  ;;  %vm2505_vm3 = vcmp.gt.f32.partialorder %v2409_v30, 0.0 }
 0x1e5   :  { %24702 = vst [vmem:[#allocation56_spill] sm:$0xff] %v18390_v26  ;;  %v2601_v21 = vmul.f32 0.2, %v2409_v30  ;;  %v18397_v32 = vrot.slane %v4131_v19, %v17359_v27  ;;  %v18400_v40 = vrot.slane %v10081_v50, %v17359_v27  ;;  %v3707_v63 = vrot.slane %v3706_v13, 4  ;;  %v18408_v48 = vpop.eup %16518 }
 0x1e6   :  { %v18406_v58 = vrot.slane %v18314_v4, %v17359_v27  ;;  %v2600_v17 = vmul.f32 0.2, %v2408_v56  ;;  %v4805_v24 = vmul.f32 1.442695, %v4706_v22  ;;  %v9657_v11 = vrot.slane %v9656_v47, 4 }
 0x1e7   :  { %24703 = vst [vmem:[#allocation57_spill] sm:$0xff] %v18397_v32  ;;  %24704 = vst [vmem:[#allocation58_spill] sm:$0xff] %v18400_v40  ;;  %v18412_v19 = vpop.eup %16520  ;;  %v4122_v50 = vrot.slane %v4108_v57, %v17359_v27  ;;  %vm2504_vm4 = vcmp.gt.f32.partialorder %v2408_v56, 0.0  ;;  %16524 = vpow2.f32 %v4853_v35  ;;  %v4857_v26 = vmul.f32 1.442695, %v4732_v3 }
 0x1e8   :  { %v2410_v60 = vadd.f32 %v2167_v43, %v18406_v58  ;;  %v4154_v29 = vcombine.high %v18346_v7, %v18346_v7  ;;  %v18421_v22 = vsel %vm2505_vm3, %v2409_v30, %v2601_v21  ;;  %16526 = vpow2.f32 %v4859_v61 }
 0x1e9   :  { %24705 = vst [vmem:[#allocation59_spill] sm:$0xff] %v18421_v22  ;;  %v4871_v0 = vmul.f32 1.442695, %v4739_v38  ;;  %v18425_v6 = vrot.slane %v18394_v23, %v17359_v27  ;;  %v3708_v57 = vmax.f32 %v3706_v13, %v3707_v63  ;;  %v18427_v32 = vsel %vm2504_vm4, %v2408_v56, %v2600_v17 }
 0x1ea   :  { %24706 = vst [vmem:[#allocation60_spill] sm:$0xff] %v18427_v32  ;;  %16528 = vpow2.f32 %v4805_v24  ;;  %v18430_v43 = vrot.slane %v4130_v46, %v17359_v27  ;;  %v9658_v3 = vmax.f32 %v9656_v47, %v9657_v11  ;;  %v4734_v7 = vsub.f32 %v17952_v28, %v4122_v50 }
 0x1eb   :  { %v18432_v35 = vpop.eup %16522  ;;  %v3168_v30 = vcombine.low %v18427_v32, %v18421_v22  ;;  %v3709_v61 = vrot.slane %v3708_v57, 2  ;;  %vm2506_vm6 = vcmp.gt.f32.partialorder %v2410_v60, 0.0  ;;  %v4168_v38 = vrot.slane %v4154_v29, %v17359_v27 }
 0x1ec   :  { %v9659_v21 = vrot.slane %v9658_v3, 2  ;;  %v2602_v13 = vmul.f32 0.2, %v2410_v60  ;;  %16530 = vpow2.f32 %v4871_v0  ;;  %v4709_v56 = vsub.f32 %v18151_v12, %v18425_v6 }
 0x1ed   :  { %v18442_v46 = vrot.slane %v18235_v54, %v17359_v27  ;;  %v3710_v47 = vmax.f32 %v3708_v57, %v3709_v61  ;;  %v17222_v63 = vmov 16   ;;  %v4803_v17 = vmul.f32 1.442695, %v18352_v51 }
 0x1ee   :  { %16513 = vset.pattern.permute.xlu0 %v17222_v63  ;;  %16512 = vset.pattern.permute.xlu1 %v17222_v63  ;;  %v4736_v24 = vsub.f32 %v18282_v49, %v18430_v43  ;;  %v9660_v29 = vmax.f32 %v9658_v3, %v9659_v21  ;;  %v18447_v11 = vsel %vm2506_vm6, %v2410_v60, %v2602_v13  ;;  %16532 = vpow2.f32 %v4857_v26 }
 0x1ef   :  { %4993 = vperm.xlu0 %16513, %v18432_v35   ;;  %5209 = vperm.xlu1 %16512, %v18354_v20   ;;  %v24707_v54 = vcombine.high %v18322_v14, %v18322_v14  ;;  %v3175_v50 = vrot.slane %v3168_v30, %v17359_v27  ;;  %v3711_v57 = vrot.slane %v3710_v47, 1  ;;  %v3182_v51 = vrot.slane %v18447_v11, %v17359_v27 }
 0x1f0   :  { %v4861_v61 = vmul.f32 1.442695, %v4734_v7  ;;  %v4740_v60 = vsub.f32 %v18034_v34, %v4168_v38  ;;  %v9661_v3 = vrot.slane %v9660_v29, 1  ;;  %16534 = vpow2.f32 %v18363_v41 }
 0x1f1   :  { %v4099_v0 = vrot.slane %v24707_v54, %v17359_v27  ;;  %v4811_v21 = vmul.f32 1.442695, %v4709_v56  ;;  %v3712_v13 = vmax.f32 %v3710_v47, %v3711_v57  ;;  %v3183_v63 = vcombine.low %v3175_v50, %v3182_v51  ;;  %v18480_v57 = vpop.permute.xlu1 %2168 }
 0x1f2   :  { %16536 = vpow2.f32 %v4803_v17  ;;  %v4715_v14 = vsub.f32 %v18165_v37, %v18442_v46  ;;  %v4865_v54 = vmul.f32 1.442695, %v4736_v24  ;;  %v9662_v30 = vmax.f32 %v9660_v29, %v9661_v3 }
 0x1f3   :  { %5218 = vperm.xlu0 %16513, %v18408_v48   ;;  %v4731_v9 = vsub.f32 %v17939_v52, %v4099_v0  ;;  %v4123_v26 = vcombine.high %v18340_v5, %v18340_v5  ;;  %v4176_v7 = vrot.slane %v3712_v13, %v17359_v27  ;;  %v3190_v41 = vrot.slane %v3183_v63, %v17359_v27 }
 0x1f4   :  { %5227 = vperm.xlu1 %16512, %v18412_v19   ;;  %16538 = vpow2.f32 %v4861_v61  ;;  %v4873_v38 = vmul.f32 1.442695, %v4740_v60  ;;  %v3916_v56 = vcombine.high %v18361_v31, %v18361_v31  ;;  %v10126_v47 = vrot.slane %v9662_v30, %v17359_v27  ;;  %v18472_v17 = vpop.eup %16524 }
 0x1f5   :  { %16540 = vpow2.f32 %v4811_v21  ;;  %v4177_v24 = vcombine.high %v4176_v7, %v4176_v7  ;;  %v18475_v29 = vrot.slane %v4176_v7, %v17359_v27  ;;  %v3713_v5 = vsel %vm3614_vm11, %v3190_v41, -inf  ;;  %v18478_v0 = vpop.eup %16526 }
 0x1f6   :  { %v4823_v50 = vmul.f32 1.442695, %v4715_v14  ;;  %16542 = vpow2.f32 %v4865_v54  ;;  %v10127_v51 = vcombine.high %v10126_v47, %v10126_v47  ;;  %v18483_v31 = vrot.slane %v10126_v47, %v17359_v27 }
 0x1f7   :  { %5236 = vperm.xlu0 %16513, %v18472_v17   ;;  %v18486_v61 = vpop.eup %16528  ;;  %v18489_v60 = vrot.slane %v4177_v24, %v17359_v27  ;;  %v786_v3 = vcombine.high %v18307_v16, %v18307_v16  ;;  %v3714_v21 = vrot.slane %v3713_v5, 4  ;;  %v9663_v13 = vsel %vm9564_vm5, %v3190_v41, -inf }
 0x1f8   :  { %24708 = vst [vmem:[#allocation61_spill] sm:$0xff] %v18483_v31  ;;  %24709 = vst [vmem:[#allocation62_spill] sm:$0xff] %v18486_v61  ;;  %5263 = vperm.xlu1 %16512, %v18478_v0   ;;  %v3924_v63 = vcombine.high %v18394_v23, %v18394_v23  ;;  %v4742_v14 = vsub.f32 %v18332_v36, %v18475_v29  ;;  %v18500_v54 = vrot.slane %v10127_v51, %v17359_v27  ;;  %v18510_v23 = vpop.permute.xlu0 %2174 }
 0x1f9   :  { %v18506_v47 = vpop.eup %16530  ;;  %v4855_v41 = vmul.f32 1.442695, %v4731_v9  ;;  %v9664_v49 = vrot.slane %v9663_v13, 4  ;;  %v4735_v51 = vsub.f32 %v17965_v18, %v4123_v26  ;;  %16544 = vpow2.f32 %v4823_v50 }
 0x1fa   :  { %24710 = vst [vmem:[#allocation63_spill] sm:$0xff] %v18500_v54  ;;  %v18515_v40 = vrot.slane %v786_v3, %v17359_v27  ;;  %v3715_v30 = vmax.f32 %v3713_v5, %v3714_v21  ;;  %16546 = vpow2.f32 %v4873_v38  ;;  %v4708_v9 = vsub.f32 %v18137_v2, %v3916_v56  ;;  %v2225_v54 = vpop.permute.xlu1 %2224 }
 0x1fb   :  { %5020 = vperm.xlu0 %16513, %v18486_v61   ;;  %v3938_v7 = vrot.slane %v3924_v63, %v17359_v27  ;;  %v4877_v24 = vmul.f32 1.442695, %v4742_v14  ;;  %v18520_v36 = vpop.eup %16532  ;;  %v4169_v31 = vcombine.high %v18369_v59, %v18369_v59  ;;  %v794_v18 = vrot.slane %v18307_v16, %v17359_v27 }
 0x1fc   :  { %24711 = vst [vmem:[#allocation64_spill] sm:$0xff] %v18515_v40  ;;  %5317 = vperm.xlu1 %16512, %v18506_v47   ;;  %v3716_v26 = vrot.slane %v3715_v30, 2  ;;  %v9665_v5 = vmax.f32 %v9663_v13, %v9664_v49  ;;  %16548 = vpow2.f32 %v4855_v41  ;;  %v4863_v56 = vmul.f32 1.442695, %v4735_v51  ;;  %v2227_v14 = vpop.permute.xlu0 %2226 }
 0x1fd   :  { %v18526_v50 = vpop.eup %16534  ;;  %v2439_v3 = vadd.f32 %v2225_v54, %v18515_v40  ;;  %v4809_v63 = vmul.f32 1.442695, %v4708_v9  ;;  %v4710_v59 = vsub.f32 %v18146_v62, %v3938_v7  ;;  %16550 = vpow2.f32 %v4877_v24 }
 0x1fe   :  { %v3717_v21 = vmax.f32 %v3715_v30, %v3716_v26  ;;  %v9666_v16 = vrot.slane %v9665_v5, 2  ;;  %v4741_v49 = vsub.f32 %v18041_v10, %v4169_v31  ;;  %v2438_v13 = vadd.f32 %v18105_v15, %v794_v18 }
 0x1ff   :  { %5254 = vperm.xlu0 %16513, %v18520_v36   ;;  %v18529_v38 = vpop.eup %16536  ;;  %v816_v41 = vcombine.high %v794_v18, %v794_v18  ;;  %v24713_v54 = vsub.f32 %v17737_v53, %v17878_v45  ;;  %v24715_v24 = vsub.f32 %v17729_v44, %v17895_v8  ;;  %v2631_v10 = vmul.f32 0.2, %v2439_v3 }
 0x200   :  { %5002 = vperm.xlu1 %16512, %v18526_v50   ;;  %v3718_v61 = vrot.slane %v3717_v21, 1  ;;  %v9667_v9 = vmax.f32 %v9665_v5, %v9666_v16  ;;  %16552 = vpow2.f32 %v4809_v63  ;;  %v4813_v18 = vmul.f32 1.442695, %v4710_v59 }
 0x201   :  { %v18534_v37 = vpop.eup %16538  ;;  %v10797_v30 = vmul.f32 1.442695, %v24713_v54  ;;  %v10799_v26 = vmul.f32 1.442695, %v24715_v24  ;;  %v2440_v15 = vadd.f32 %v2227_v14, %v816_v41  ;;  %vm2535_vm7 = vcmp.gt.f32.partialorder %v2439_v3, 0.0 }
 0x202   :  { %v18538_v51 = vpop.eup %16540  ;;  %v3719_v31 = vmax.f32 %v3717_v21, %v3718_v61  ;;  %v9668_v62 = vrot.slane %v9667_v9, 1  ;;  %16554 = vpow2.f32 %v4863_v56  ;;  %v4875_v53 = vmul.f32 1.442695, %v4741_v49  ;;  %v24718_v21 = vld [vmem:[#allocation11_spill] sm:$0xff] }
 0x203   :  { %24712 = vst [vmem:[#allocation65_spill] sm:$0xff] %v18538_v51  ;;  %5272 = vperm.xlu0 %16513, %v18534_v37   ;;  %v18544_v7 = vpop.eup %16542  ;;  %v2630_v45 = vmul.f32 0.2, %v2438_v13  ;;  %vm2534_vm8 = vcmp.gt.f32.partialorder %v2438_v13, 0.0  ;;  %vm2536_vm9 = vcmp.gt.f32.partialorder %v2440_v15, 0.0  ;;  %16556 = vpow2.f32 %v10799_v26 }
 0x204   :  { %24714 = vst [vmem:[#allocation66_spill] sm:$0xff] %v18544_v7  ;;  %5011 = vperm.xlu1 %16512, %v18529_v38   ;;  %v18551_v5 = vrot.slane %v3719_v31, %v17359_v27  ;;  %v9669_v16 = vmax.f32 %v9667_v9, %v9668_v62  ;;  %v2632_v44 = vmul.f32 0.2, %v2440_v15  ;;  %v18554_v8 = vsel %vm2535_vm7, %v2439_v3, %v2631_v10 }
 0x205   :  { %24716 = vst [vmem:[#allocation67_spill] sm:$0xff] %v18554_v8  ;;  %v10801_v63 = vmul.f32 1.442695, %v24718_v21  ;;  %16558 = vpow2.f32 %v4813_v18  ;;  %v18567_v14 = vsel %vm2534_vm8, %v2438_v13, %v2630_v45  ;;  %v8340_v21 = vcombine.low %v18354_v20, %v18408_v48 }
 0x206   :  { %v4207_v61 = vrot.slane %v18551_v5, %v17359_v27  ;;  %v18559_v56 = vpop.eup %16544  ;;  %v18563_v59 = vrot.slane %v9669_v16, %v17359_v27  ;;  %16560 = vpow2.f32 %v4875_v53  ;;  %24720 = vst [vmem:[#allocation69_spill] sm:$0xff] %v18567_v14  ;;  %v18569_v49 = vsel %vm2536_vm9, %v2440_v15, %v2632_v44 }
 0x207   :  { %5290 = vperm.xlu0 %16513, %v18544_v7   ;;  %24717 = vst [vmem:[#allocation68_spill] sm:$0xff] %v18559_v56  ;;  %v18565_v62 = vpop.eup %16546  ;;  %16562 = vpow2.f32 %v10797_v30  ;;  %v3398_v41 = vcombine.low %v18567_v14, %v18554_v8  ;;  %v3412_v30 = vrot.slane %v18569_v49, %v17359_v27  ;;  %v8347_v20 = vrot.slane %v8340_v21, %v17359_v27 }
 0x208   :  { %5047 = vperm.xlu1 %16512, %v18538_v51   ;;  %24719 = vst [vmem:[#allocation11_spill] sm:$0xff] %v18563_v59  ;;  %v4215_v3 = vcombine.high %v4207_v61, %v4207_v61  ;;  %v4745_v54 = vsub.f32 %v18427_v32, %v4207_v61  ;;  %v18577_v9 = vrot.slane %v18563_v59, %v17359_v27  ;;  %16564 = vpow2.f32 %v10801_v63  ;;  %v24732_v59 = vld [vmem:[#allocation7_spill] sm:$0xff] }
 0x209   :  { %v18580_v24 = vpop.eup %16548  ;;  %v3405_v31 = vrot.slane %v3398_v41, %v17359_v27 }
 0x20a   :  { %24721 = vst [vmem:[#allocation70_spill] sm:$0xff] %v18577_v9  ;;  %v18583_v13 = vsub.f32 %v18447_v11, %v4215_v3  ;;  %v4883_v26 = vmul.f32 1.442695, %v4745_v54  ;;  %v18587_v10 = vpop.eup %16550  ;;  %v10165_v15 = vcombine.high %v18577_v9, %v18577_v9 }
 0x20b   :  { %5326 = vperm.xlu0 %16513, %v18565_v62   ;;  %24722 = vst [vmem:[#allocation71_spill] sm:$0xff] %v18587_v10  ;;  %v3413_v18 = vcombine.low %v3405_v31, %v3412_v30 }
 0x20c   :  { %5101 = vperm.xlu1 %16512, %v18559_v56   ;;  %16566 = vpow2.f32 %v4883_v26  ;;  %v18597_v45 = vsub.f32 %v18447_v11, %v10165_v15 }
 0x20d   :  { %v18594_v53 = vpop.eup %16552  ;;  %v3420_v44 = vrot.slane %v3413_v18, %v17359_v27  ;;  %v18621_v18 = vpop.permute.xlu0 %2234 }
 0x20e   :  { %24723 = vst [vmem:[#allocation72_spill] sm:$0xff] %v18594_v53  ;;  %24724 = vst [vmem:[#allocation73_spill] sm:$0xff] %v18597_v45 }
 0x20f   :  { %5344 = vperm.xlu0 %16513, %v18587_v10   ;;  %v18599_v16 = vpop.eup %16554  ;;  %v3783_v63 = vsel %vm3614_vm11, %v3420_v44, -inf  ;;  %v9733_v3 = vsel %vm9564_vm5, %v3420_v44, -inf  ;;  %24729 = vst [vmem:[#allocation78_spill] sm:$0xff] %v18621_v18  ;;  %v18623_v44 = vpop.permute.xlu1 %2228  ;;  %v435_v10 = vrot.slane %v24732_v59, %v17359_v27  ;;  %v24736_v18 = vld [vmem:[#allocation12_spill] sm:$0xff] }
 0x210   :  { %5245 = vperm.xlu1 %16512, %v18580_v24   ;;  %v18604_v61 = vpop.eup %16556  ;;  %v3784_v11 = vrot.slane %v3783_v63, 4  ;;  %v9734_v54 = vrot.slane %v9733_v3, 4  ;;  %24730 = vst [vmem:[#allocation79_spill] sm:$0xff] %v18623_v44 }
 0x211   :  { %24725 = vst [vmem:[#allocation74_spill] sm:$0xff] %v18604_v61 }
 0x212   :  { %v18610_v41 = vpop.eup %16558  ;;  %v3785_v31 = vmax.f32 %v3783_v63, %v3784_v11  ;;  %v9735_v15 = vmax.f32 %v9733_v3, %v9734_v54  ;;  %v8354_v63 = vrot.slane %v18412_v19, %v17359_v27 }
 0x213   :  { %5038 = vperm.xlu0 %16513, %v18594_v53   ;;  %24726 = vst [vmem:[#allocation75_spill] sm:$0xff] %v18610_v41  ;;  %v18612_v26 = vpop.eup %16560  ;;  %v24735_v53 = vld [vmem:[#allocation8_spill] sm:$0xff] }
 0x214   :  { %5281 = vperm.xlu1 %16512, %v18599_v16   ;;  %24727 = vst [vmem:[#allocation76_spill] sm:$0xff] %v18612_v26  ;;  %v18615_v30 = vpop.eup %16562  ;;  %v3786_v45 = vrot.slane %v3785_v31, 2  ;;  %v9736_v32 = vrot.slane %v9735_v15, 2  ;;  %v8355_v54 = vcombine.low %v8347_v20, %v8354_v63  ;;  %v24737_v19 = vsub.f32 %v24735_v53, %v24736_v18 }
 0x215   :  { %24728 = vst [vmem:[#allocation77_spill] sm:$0xff] %v18615_v30  ;;  %v14314_v48 = vcombine.low %v18615_v30, %v18604_v61  ;;  %v18625_v9 = vpop.eup %16564  ;;  %v24734_v30 = vld [vmem:[#allocation26_spill] sm:$0xff] }
 0x216   :  { %24731 = vst [vmem:[#allocation80_spill] sm:$0xff] %v18625_v9  ;;  %v3787_v21 = vmax.f32 %v3785_v31, %v3786_v45  ;;  %v9737_v11 = vmax.f32 %v9735_v15, %v9736_v32  ;;  %v394_v7 = vcombine.high %v24734_v30, %v24734_v30  ;;  %v10749_v44 = vmul.f32 1.442695, %v24737_v19  ;;  %v18645_v32 = vpop.permute.xlu0 %2246  ;;  %v24739_v31 = vld [vmem:[#allocation13_spill] sm:$0xff] }
 0x217   :  { %5056 = vperm.xlu0 %16513, %v18610_v41   ;;  %v14321_v61 = vrot.slane %v14314_v48, %v17359_v27  ;;  %v14328_v41 = vrot.slane %v18625_v9, %v17359_v27  ;;  %v18643_v45 = vrot.slane %v435_v10, %v17359_v27  ;;  %24738 = vst [vmem:[#allocation26_spill] sm:$0xff] %v18645_v32  ;;  %v2101_v48 = vpop.permute.xlu1 %2100  ;;  %v24741_v32 = vld [vmem:[#allocation14_spill] sm:$0xff] }
 0x218   :  { %5335 = vperm.xlu1 %16512, %v18612_v26   ;;  %v3788_v56 = vrot.slane %v3787_v21, 1  ;;  %v9738_v51 = vrot.slane %v9737_v11, 1  ;;  %v24740_v15 = vsub.f32 %v17827_v1, %v24739_v31  ;;  %v428_v9 = vcombine.high %v24732_v59, %v24732_v59  ;;  %v24742_v1 = vld [vmem:[#allocation27_spill] sm:$0xff] }
 0x219   :  { %v18631_v3 = vpop.eup %16566  ;;  %v14329_v40 = vcombine.low %v14321_v61, %v14328_v41  ;;  %v416_v53 = vrot.slane %v394_v7, %v17359_v27  ;;  %16568 = vpow2.f32 %v10749_v44  ;;  %v10753_v12 = vmul.f32 1.442695, %v24741_v32  ;;  %v24744_v32 = vld [vmem:[#allocation25_spill] sm:$0xff] }
 0x21a   :  { %24733 = vst [vmem:[#allocation81_spill] sm:$0xff] %v18631_v3  ;;  %v10751_v20 = vmul.f32 1.442695, %v24740_v15  ;;  %v3789_v30 = vmax.f32 %v3787_v21, %v3788_v56  ;;  %v9739_v63 = vmax.f32 %v9737_v11, %v9738_v51  ;;  %v427_v31 = vcombine.high %v24742_v1, %v24742_v1 }
 0x21b   :  { %v473_v51 = vcombine.high %v18643_v45, %v18643_v45  ;;  %v14336_v21 = vrot.slane %v14329_v40, %v17359_v27  ;;  %v443_v11 = vcombine.high %v435_v10, %v435_v10  ;;  %v2375_v15 = vadd.f32 %v24744_v32, %v416_v53 }
 0x21c   :  { %5371 = vperm.xlu1 %16512, %v18631_v3   ;;  %v8362_v3 = vrot.slane %v8355_v54, %v17359_v27  ;;  %v4429_v18 = vrot.slane %v3789_v30, %v17359_v27  ;;  %v10379_v19 = vrot.slane %v9739_v63, %v17359_v27  ;;  %16570 = vpow2.f32 %v10751_v20  ;;  %v2099_v54 = vpop.permute.xlu0 %2098 }
 0x21d   :  { %v465_v26 = vrot.slane %v443_v11, %v17359_v27  ;;  %16572 = vpow2.f32 %v10753_v12  ;;  %v8156_v11 = vcombine.low %v18432_v35, %v18526_v50  ;;  %vm2471_vm10 = vcmp.gt.f32.partialorder %v2375_v15, 0.0 }
 0x21e   :  { %v4430_v56 = vcombine.high %v4429_v18, %v4429_v18  ;;  %v4437_v61 = vrot.slane %v4429_v18, %v17359_v27  ;;  %v10380_v41 = vcombine.high %v10379_v19, %v10379_v19  ;;  %v18663_v7 = vsel %vm3614_vm11, %v8362_v3, 0.0  ;;  %v2113_v18 = vpop.permute.xlu1 %2112 }
 0x21f   :  { %v18667_v44 = vrot.slane %v10379_v19, %v17359_v27  ;;  %v3939_v3 = vcombine.high %v18425_v6, %v18425_v6  ;;  %v24747_v19 = vld [vmem:[#allocation44_spill] sm:$0xff]  ;;  %v8981_v10 = vrot.slane %v18663_v7, 4  ;;  %v24753_v6 = vld [vmem:[#allocation34_spill] sm:$0xff]  ;;  %v2383_v12 = vadd.f32 %v2113_v18, %v465_v26 }
 0x220   :  { %v18671_v30 = vrot.slane %v4430_v56, %v17359_v27  ;;  %v4445_v20 = vcombine.high %v4437_v61, %v4437_v61  ;;  %v4775_v63 = vsub.f32 %v18567_v14, %v4437_v61  ;;  %v18677_v1 = vrot.slane %v10380_v41, %v17359_v27  ;;  %v24755_v14 = vld [vmem:[#allocation37_spill] sm:$0xff] }
 0x221   :  { %24743 = vst [vmem:[#allocation8_spill] sm:$0xff] %v18667_v44  ;;  %v10395_v40 = vcombine.high %v18667_v44, %v18667_v44  ;;  %v2381_v32 = vadd.f32 %v24747_v19, %v427_v31  ;;  %v426_v56 = vcombine.high %v416_v53, %v416_v53  ;;  %v3985_v53 = vcombine.high %v18442_v46, %v18442_v46 }
 0x222   :  { %24745 = vst [vmem:[#allocation12_spill] sm:$0xff] %v18671_v30  ;;  %24746 = vst [vmem:[#allocation13_spill] sm:$0xff] %v18677_v1  ;;  %v18687_v61 = vsub.f32 %v18569_v49, %v4445_v20  ;;  %v4943_v2 = vmul.f32 1.442695, %v4775_v63  ;;  %v18699_v19 = vsel %vm9564_vm5, %v14336_v21, 0.0  ;;  %v24750_v20 = vld [vmem:[#allocation31_spill] sm:$0xff]  ;;  %v4711_v1 = vsub.f32 %v24753_v6, %v3939_v3 }
 0x223   :  { %v18692_v41 = vsub.f32 %v18569_v49, %v10395_v40  ;;  %v2377_v31 = vadd.f32 %v2101_v48, %v426_v56  ;;  %v24751_v63 = vld [vmem:[#allocation39_spill] sm:$0xff]  ;;  %v2111_v49 = vpop.permute.xlu0 %2110  ;;  %v2117_v40 = vpop.permute.xlu1 %2116  ;;  %v2567_v48 = vmul.f32 0.2, %v2375_v15  ;;  %vm2477_vm12 = vcmp.gt.f32.partialorder %v2381_v32, 0.0 }
 0x224   :  { %24748 = vst [vmem:[#allocation14_spill] sm:$0xff] %v18687_v61  ;;  %v24752_v59 = vsub.f32 %v24750_v20, %v24751_v63  ;;  %16574 = vpow2.f32 %v4943_v2  ;;  %v2573_v21 = vmul.f32 0.2, %v2381_v32  ;;  %v475_v56 = vcombine.high %v465_v26, %v465_v26  ;;  %v24760_v26 = vld [vmem:[#allocation42_spill] sm:$0xff] }
 0x225   :  { %24749 = vst [vmem:[#allocation27_spill] sm:$0xff] %v18692_v41  ;;  %v24754_v41 = vld [vmem:[#allocation29_spill] sm:$0xff]  ;;  %v4717_v63 = vsub.f32 %v24755_v14, %v3985_v53  ;;  %v2382_v2 = vadd.f32 %v2111_v49, %v18643_v45  ;;  %v4815_v3 = vmul.f32 1.442695, %v4711_v1  ;;  %vm2473_vm13 = vcmp.gt.f32.partialorder %v2377_v31, 0.0 }
 0x226   :  { %v4807_v44 = vmul.f32 1.442695, %v24752_v59  ;;  %v424_v46 = vcombine.high %v24754_v41, %v24754_v41  ;;  %v2569_v59 = vmul.f32 0.2, %v2377_v31  ;;  %v2385_v35 = vadd.f32 %v2117_v40, %v475_v56  ;;  %v18711_v50 = vpop.eup %16568 }
 0x227   :  { %24756 = vst [vmem:[#allocation25_spill] sm:$0xff] %v18711_v50  ;;  %v2575_v18 = vmul.f32 0.2, %v2383_v12  ;;  %v18714_v6 = vrot.slane %v428_v9, %v17359_v27  ;;  %v18719_v14 = vsel %vm2471_vm10, %v2375_v15, %v2567_v48  ;;  %vm2479_vm15 = vcmp.gt.f32.partialorder %v2383_v12, 0.0  ;;  %v2119_v15 = vpop.permute.xlu0 %2118 }
 0x228   :  { %v2376_v61 = vadd.f32 %v2099_v54, %v424_v46  ;;  %16576 = vpow2.f32 %v4807_v44  ;;  %24759 = vst [vmem:[#allocation34_spill] sm:$0xff] %v18719_v14  ;;  %v2384_v54 = vadd.f32 %v24760_v26, %v473_v51  ;;  %vm2478_vm0 = vcmp.gt.f32.partialorder %v2382_v2, 0.0 }
 0x229   :  { %24757 = vst [vmem:[#allocation44_spill] sm:$0xff] %v18714_v6  ;;  %v18716_v20 = vpop.eup %16570  ;;  %v4827_v45 = vmul.f32 1.442695, %v4717_v63  ;;  %v18722_v44 = vsel %vm2473_vm13, %v2377_v31, %v2569_v59  ;;  %v2574_v53 = vmul.f32 0.2, %v2382_v2  ;;  %v18727_v9 = vsel %vm2477_vm12, %v2381_v32, %v2573_v21 }
 0x22a   :  { %vm2472_vm14 = vcmp.gt.f32.partialorder %v2376_v61, 0.0  ;;  %v2568_v41 = vmul.f32 0.2, %v2376_v61  ;;  %24758 = vst [vmem:[#allocation39_spill] sm:$0xff] %v18716_v20  ;;  %24761 = vst [vmem:[#allocation29_spill] sm:$0xff] %v18722_v44  ;;  %16578 = vpow2.f32 %v4815_v3  ;;  %v18731_v46 = vsel %vm2479_vm15, %v2383_v12, %v2575_v18  ;;  %v18746_v63 = vpop.eup %16572 }
 0x22b   :  { %24762 = vst [vmem:[#allocation37_spill] sm:$0xff] %v18727_v9  ;;  %v2577_v49 = vmul.f32 0.2, %v2385_v35  ;;  %vm2481_vm1 = vcmp.gt.f32.partialorder %v2385_v35, 0.0  ;;  %v18733_v51 = vsel %vm2478_vm0, %v2382_v2, %v2574_v53  ;;  %v18737_v31 = vrot.slane %v18714_v6, %v17359_v27  ;;  %24764 = vst [vmem:[#allocation82_spill] sm:$0xff] %v18746_v63 }
 0x22c   :  { %v18724_v1 = vsel %vm2472_vm14, %v2376_v61, %v2568_v41  ;;  %v2576_v61 = vmul.f32 0.2, %v2384_v54  ;;  %v2929_v32 = vrot.slane %v18722_v44, %v17359_v27  ;;  %v2961_v21 = vcombine.low %v18727_v9, %v18733_v51 }
 0x22d   :  { %v2915_v40 = vcombine.low %v18719_v14, %v18724_v1  ;;  %24763 = vst [vmem:[#allocation42_spill] sm:$0xff] %v18737_v31  ;;  %v8982_v56 = vadd.f32 %v8981_v10, %v18663_v7  ;;  %16580 = vpow2.f32 %v4827_v45  ;;  %vm2480_vm2 = vcmp.gt.f32.partialorder %v2384_v54, 0.0 }
 0x22e   :  { %v2386_v12 = vadd.f32 %v2119_v15, %v18737_v31  ;;  %v2975_v59 = vrot.slane %v18731_v46, %v17359_v27  ;;  %v18750_v2 = vsel %vm2481_vm1, %v2385_v35, %v2577_v49  ;;  %v2968_v18 = vrot.slane %v2961_v21, %v17359_v27 }
 0x22f   :  { %v2922_v48 = vrot.slane %v2915_v40, %v17359_v27  ;;  %24765 = vst [vmem:[#allocation83_spill] sm:$0xff] %v18750_v2  ;;  %v8163_v26 = vrot.slane %v8156_v11, %v17359_v27  ;;  %v14955_v10 = vrot.slane %v18699_v19, 4  ;;  %v18757_v45 = vsel %vm2480_vm2, %v2384_v54, %v2576_v61 }
 0x230   :  { %vm2482_vm3 = vcmp.gt.f32.partialorder %v2386_v12, 0.0  ;;  %v2578_v7 = vmul.f32 0.2, %v2386_v12  ;;  %24767 = vst [vmem:[#allocation85_spill] sm:$0xff] %v18757_v45  ;;  %v2976_v40 = vcombine.low %v2968_v18, %v2975_v59  ;;  %v8170_v35 = vrot.slane %v18529_v38, %v17359_v27 }
 0x231   :  { %v2930_v3 = vcombine.low %v2922_v48, %v2929_v32  ;;  %v18753_v41 = vpop.eup %16574  ;;  %v14130_v49 = vcombine.low %v18711_v50, %v18716_v20  ;;  %v2984_v11 = vcombine.low %v18757_v45, %v18750_v2  ;;  %v8983_v32 = vrot.slane %v8982_v56, 2 }
 0x232   :  { %24766 = vst [vmem:[#allocation84_spill] sm:$0xff] %v18753_v41  ;;  %5641 = vperm.xlu1 %16512, %v18753_v41   ;;  %v18767_v15 = vsel %vm2482_vm3, %v2386_v12, %v2578_v7  ;;  %v2983_v48 = vrot.slane %v2976_v40, %v17359_v27  ;;  %v8171_v59 = vcombine.low %v8163_v26, %v8170_v35 }
 0x233   :  { %v2937_v53 = vrot.slane %v2930_v3, %v17359_v27  ;;  %v14956_v18 = vadd.f32 %v14955_v10, %v18699_v19  ;;  %v2998_v12 = vrot.slane %v18767_v15, %v17359_v27  ;;  %v14137_v7 = vrot.slane %v14130_v49, %v17359_v27 }
 0x234   :  { %v3650_v20 = vsel %vm3614_vm11, %v2983_v48, -inf  ;;  %v9600_v50 = vsel %vm9564_vm5, %v2983_v48, -inf  ;;  %v18782_v26 = vadd.f32 %v8983_v32, %v8982_v56  ;;  %v14144_v19 = vrot.slane %v18746_v63, %v17359_v27 }
 0x235   :  { %v3636_v54 = vsel %vm3614_vm11, %v2937_v53, -inf  ;;  %v9586_v61 = vsel %vm9564_vm5, %v2937_v53, -inf  ;;  %v18772_v21 = vpop.eup %16576  ;;  %v2991_v53 = vrot.slane %v2984_v11, %v17359_v27  ;;  %v3651_v10 = vrot.slane %v3650_v20, 4 }
 0x236   :  { %24768 = vst [vmem:[#allocation86_spill] sm:$0xff] %v18772_v21  ;;  %v3637_v3 = vrot.slane %v3636_v54, 4  ;;  %v9587_v38 = vrot.slane %v9586_v61, 4  ;;  %5029 = vperm.xlu1 %16512, %v18772_v21   ;;  %v9601_v35 = vrot.slane %v9600_v50, 4  ;;  %v8178_v48 = vrot.slane %v8171_v59, %v17359_v27  ;;  %v24769_v21 = vld [vmem:[#allocation19_spill] sm:$0xff]  ;;  %v24770_v59 = vld [vmem:[#allocation16_spill] sm:$0xff] }
 0x237   :  { %v18786_v31 = vpop.eup %16578  ;;  %v2999_v44 = vcombine.low %v2991_v53, %v2998_v12  ;;  %v10058_v49 = vcombine.high %v24769_v21, %v24769_v21  ;;  %v3652_v11 = vmax.f32 %v3650_v20, %v3651_v10  ;;  %v14957_v56 = vrot.slane %v14956_v18, 2 }
 0x238   :  { %v3638_v40 = vmax.f32 %v3636_v54, %v3637_v3  ;;  %v9588_v41 = vmax.f32 %v9586_v61, %v9587_v38  ;;  %v9602_v54 = vmax.f32 %v9600_v50, %v9601_v35  ;;  %v18792_v32 = vcombine.low %v14137_v7, %v14144_v19 }
 0x239   :  { %v24771_v30 = vsub.f32 %v17935_v42, %v24770_v59  ;;  %v3653_v53 = vrot.slane %v3652_v11, 2  ;;  %v18801_v20 = vsel %vm3614_vm11, %v8178_v48, 0.0  ;;  %v3006_v7 = vrot.slane %v2999_v44, %v17359_v27 }
 0x23a   :  { %v3639_v6 = vrot.slane %v3638_v40, 2  ;;  %v9589_v2 = vrot.slane %v9588_v41, 2  ;;  %5065 = vperm.xlu1 %16512, %v18786_v31   ;;  %v18794_v38 = vpop.eup %16580  ;;  %v9603_v8 = vrot.slane %v9602_v54, 2  ;;  %v18809_v42 = vadd.f32 %v14957_v56, %v14956_v18 }
 0x23b   :  { %v10803_v12 = vmul.f32 1.442695, %v24771_v30  ;;  %v3654_v19 = vmax.f32 %v3652_v11, %v3653_v53  ;;  %v3657_v11 = vsel %vm3614_vm11, %v3006_v7, -inf  ;;  %v9607_v56 = vsel %vm9564_vm5, %v3006_v7, -inf }
 0x23c   :  { %v3640_v61 = vmax.f32 %v3638_v40, %v3639_v6  ;;  %v9590_v3 = vmax.f32 %v9588_v41, %v9589_v2  ;;  %v24772_v6 = vld [vmem:[#allocation17_spill] sm:$0xff]  ;;  %v10072_v40 = vrot.slane %v10058_v49, %v17359_v27  ;;  %v9604_v10 = vmax.f32 %v9602_v54, %v9603_v8 }
 0x23d   :  { %v24773_v2 = vsub.f32 %v17939_v52, %v24772_v6  ;;  %16582 = vpow2.f32 %v10803_v12  ;;  %v3655_v44 = vrot.slane %v3654_v19, 1  ;;  %v24774_v52 = vld [vmem:[#allocation18_spill] sm:$0xff]  ;;  %v591_v7 = vcombine.high %v18314_v4, %v18314_v4 }
 0x23e   :  { %v3641_v50 = vrot.slane %v3640_v61, 1  ;;  %v9591_v21 = vrot.slane %v9590_v3, 1  ;;  %5119 = vperm.xlu1 %16512, %v18794_v38   ;;  %v9605_v63 = vrot.slane %v9604_v10, 1  ;;  %v10807_v6 = vmul.f32 1.442695, %v24774_v52 }
 0x23f   :  { %v10805_v41 = vmul.f32 1.442695, %v24773_v2  ;;  %v10684_v18 = vsub.f32 %v17952_v28, %v10072_v40  ;;  %v3656_v54 = vmax.f32 %v3654_v19, %v3655_v44  ;;  %v24776_v2 = vld [vmem:[#allocation46_spill] sm:$0xff]  ;;  %v3658_v28 = vrot.slane %v3657_v11, 4 }
 0x240   :  { %v3642_v35 = vmax.f32 %v3640_v61, %v3641_v50  ;;  %v9592_v48 = vmax.f32 %v9590_v3, %v9591_v21  ;;  %v9606_v53 = vmax.f32 %v9604_v10, %v9605_v63  ;;  %v8363_v50 = vcombine.low %v18472_v17, %v18580_v24  ;;  %v24775_v21 = vld [vmem:[#allocation35_spill] sm:$0xff] }
 0x241   :  { %16584 = vpow2.f32 %v10805_v41  ;;  %v9608_v19 = vrot.slane %v9607_v56, 4  ;;  %v4146_v17 = vcombine.high %v18430_v43, %v18430_v43  ;;  %v3992_v44 = vrot.slane %v3656_v54, %v17359_v27  ;;  %v24780_v43 = vld [vmem:[#allocation20_spill] sm:$0xff] }
 0x242   :  { %v3946_v49 = vrot.slane %v3642_v35, %v17359_v27  ;;  %v9896_v8 = vrot.slane %v9592_v48, %v17359_v27  ;;  %v24777_v35 = vsub.f32 %v24775_v21, %v24776_v2  ;;  %16586 = vpow2.f32 %v10807_v6 }
 0x243   :  { %v18859_v6 = vrot.slane %v8363_v50, %v17359_v27  ;;  %v10811_v54 = vmul.f32 1.442695, %v10684_v18  ;;  %v619_v4 = vrot.slane %v591_v7, %v17359_v27  ;;  %v3993_v59 = vcombine.high %v3992_v44, %v3992_v44  ;;  %v2171_v7 = vpop.permute.xlu0 %2170 }
 0x244   :  { %v3947_v61 = vcombine.high %v3946_v49, %v3946_v49  ;;  %v18821_v3 = vrot.slane %v3946_v49, %v17359_v27  ;;  %v9897_v12 = vcombine.high %v9896_v8, %v9896_v8  ;;  %v4825_v48 = vmul.f32 1.442695, %v24777_v35 }
 0x245   :  { %v18829_v41 = vrot.slane %v9896_v8, %v17359_v27  ;;  %v9942_v49 = vrot.slane %v9606_v53, %v17359_v27  ;;  %v3659_v35 = vmax.f32 %v3657_v11, %v3658_v28  ;;  %v24782_v53 = vld [vmem:[#allocation53_spill] sm:$0xff]  ;;  %v4200_v18 = vcombine.high %v18551_v5, %v18551_v5 }
 0x246   :  { %v18834_v40 = vrot.slane %v3947_v61, %v17359_v27  ;;  %v4712_v63 = vsub.f32 %v18719_v14, %v18821_v3  ;;  %v18841_v24 = vrot.slane %v9897_v12, %v17359_v27  ;;  %v24781_v61 = vsub.f32 %v17963_v55, %v24780_v43  ;;  %v18865_v43 = vpop.permute.xlu1 %2120 }
 0x247   :  { %24778 = vst [vmem:[#allocation19_spill] sm:$0xff] %v18829_v41  ;;  %v4738_v10 = vsub.f32 %v24782_v53, %v4146_v17  ;;  %v4192_v55 = vcombine.high %v18475_v29, %v18475_v29  ;;  %v9943_v11 = vcombine.high %v9942_v49, %v9942_v49  ;;  %v18869_v50 = vrot.slane %v9942_v49, %v17359_v27  ;;  %v24831_v41 = vld [vmem:[#allocation12_spill] sm:$0xff] }
 0x248   :  { %24779 = vst [vmem:[#allocation16_spill] sm:$0xff] %v18841_v24  ;;  %v4817_v52 = vmul.f32 1.442695, %v4712_v63  ;;  %v18854_v12 = vmul.f32 1.442695, %v24781_v61  ;;  %v9609_v63 = vmax.f32 %v9607_v56, %v9608_v19  ;;  %v4000_v61 = vrot.slane %v3992_v44, %v17359_v27 }
 0x249   :  { %24783 = vst [vmem:[#allocation17_spill] sm:$0xff] %v18869_v50  ;;  %v18874_v56 = vrot.slane %v3993_v59, %v17359_v27  ;;  %v621_v28 = vcombine.high %v18406_v58, %v18406_v58  ;;  %v18882_v44 = vrot.slane %v9943_v11, %v17359_v27  ;;  %v2411_v49 = vadd.f32 %v18480_v57, %v619_v4 }
 0x24a   :  { %16588 = vpow2.f32 %v4817_v52  ;;  %v18878_v29 = vpop.eup %16582  ;;  %v4008_v19 = vcombine.high %v4000_v61, %v4000_v61  ;;  %v4718_v17 = vsub.f32 %v18727_v9, %v4000_v61  ;;  %v9610_v52 = vrot.slane %v9609_v63, 2 }
 0x24b   :  { %16590 = vpow2.f32 %v4825_v48  ;;  %v3660_v48 = vrot.slane %v3659_v35, 2  ;;  %24784 = vst [vmem:[#allocation18_spill] sm:$0xff] %v18878_v29  ;;  %24785 = vst [vmem:[#allocation35_spill] sm:$0xff] %v18882_v44  ;;  %v9958_v59 = vcombine.high %v18869_v50, %v18869_v50  ;;  %v2412_v30 = vadd.f32 %v2171_v7, %v621_v28  ;;  %v2173_v50 = vpop.permute.xlu1 %2172 }
 0x24c   :  { %v18894_v8 = vsub.f32 %v18731_v46, %v4008_v19  ;;  %v4829_v61 = vmul.f32 1.442695, %v4718_v17  ;;  %16592 = vpow2.f32 %v10811_v54  ;;  %v4744_v57 = vsub.f32 %v18334_v33, %v4192_v55  ;;  %v24788_v17 = vld [vmem:[#allocation22_spill] sm:$0xff] }
 0x24d   :  { %v18900_v5 = vsub.f32 %v18731_v46, %v9958_v59  ;;  %v3661_v24 = vmax.f32 %v3659_v35, %v3660_v48  ;;  %v4869_v14 = vmul.f32 1.442695, %v4738_v10  ;;  %v4214_v58 = vrot.slane %v4200_v18, %v17359_v27  ;;  %v24790_v35 = vld [vmem:[#allocation51_spill] sm:$0xff] }
 0x24e   :  { %v18891_v2 = vpop.eup %16584  ;;  %16594 = vpow2.f32 %v4829_v61  ;;  %v9611_v9 = vmax.f32 %v9609_v63, %v9610_v52  ;;  %v10104_v11 = vcombine.high %v24788_v17, %v24788_v17  ;;  %v623_v28 = vcombine.high %v619_v4, %v619_v4  ;;  %v24792_v4 = vld [vmem:[#allocation21_spill] sm:$0xff] }
 0x24f   :  { %24786 = vst [vmem:[#allocation46_spill] sm:$0xff] %v18891_v2  ;;  %24787 = vst [vmem:[#allocation20_spill] sm:$0xff] %v18900_v5  ;;  %v14337_v19 = vcombine.low %v18878_v29, %v18891_v2  ;;  %v3662_v54 = vrot.slane %v3661_v24, 1  ;;  %v2603_v7 = vmul.f32 0.2, %v2411_v49  ;;  %vm2508_vm4 = vcmp.gt.f32.partialorder %v2412_v30, 0.0  ;;  %v18907_v59 = vpop.eup %16586 }
 0x250   :  { %v9612_v55 = vrot.slane %v9611_v9, 1  ;;  %v2604_v46 = vmul.f32 0.2, %v2412_v30  ;;  %24789 = vst [vmem:[#allocation53_spill] sm:$0xff] %v18907_v59  ;;  %v4881_v10 = vmul.f32 1.442695, %v4744_v57  ;;  %v631_v18 = vrot.slane %v24790_v35, %v17359_v27 }
 0x251   :  { %v2413_v48 = vadd.f32 %v2173_v50, %v623_v28  ;;  %v3663_v63 = vmax.f32 %v3661_v24, %v3662_v54  ;;  %16596 = vpow2.f32 %v4869_v14  ;;  %vm2507_vm6 = vcmp.gt.f32.partialorder %v2411_v49, 0.0  ;;  %v2177_v54 = vpop.permute.xlu1 %2176 }
 0x252   :  { %v4746_v52 = vsub.f32 %v18421_v22, %v4214_v58  ;;  %v9613_v61 = vmax.f32 %v9611_v9, %v9612_v55  ;;  %v10813_v2 = vmul.f32 1.442695, %v24792_v4  ;;  %v639_v29 = vcombine.high %v631_v18, %v631_v18  ;;  %v24834_v22 = vld [vmem:[#allocation40_spill] sm:$0xff] }
 0x253   :  { %v18916_v5 = vrot.slane %v3663_v63, %v17359_v27  ;;  %v18918_v44 = vsel %vm2508_vm4, %v2412_v30, %v2604_v46  ;;  %v14344_v50 = vrot.slane %v14337_v19, %v17359_v27  ;;  %16598 = vpow2.f32 %v18854_v12 }
 0x254   :  { %24793 = vst [vmem:[#allocation21_spill] sm:$0xff] %v18918_v44  ;;  %v10118_v14 = vrot.slane %v10104_v11, %v17359_v27  ;;  %v18926_v9 = vrot.slane %v9613_v61, %v17359_v27  ;;  %v18929_v24 = vsel %vm2507_vm6, %v2411_v49, %v2603_v7  ;;  %16600 = vpow2.f32 %v4881_v10 }
 0x255   :  { %24795 = vst [vmem:[#allocation88_spill] sm:$0xff] %v18929_v24  ;;  %v2605_v58 = vmul.f32 0.2, %v2413_v48  ;;  %v4023_v30 = vrot.slane %v18916_v5, %v17359_v27  ;;  %v4885_v28 = vmul.f32 1.442695, %v4746_v52  ;;  %vm2509_vm7 = vcmp.gt.f32.partialorder %v2413_v48, 0.0 }
 0x256   :  { %24794 = vst [vmem:[#allocation87_spill] sm:$0xff] %v18926_v9  ;;  %v18935_v12 = vrot.slane %v18926_v9, %v17359_v27  ;;  %v3191_v11 = vcombine.low %v18929_v24, %v18918_v44  ;;  %v647_v19 = vrot.slane %v631_v18, %v17359_v27  ;;  %v18941_v49 = vrot.slane %v639_v29, %v17359_v27 }
 0x257   :  { %v18912_v17 = vpop.eup %16588  ;;  %v4031_v7 = vcombine.high %v4023_v30, %v4023_v30  ;;  %v4721_v55 = vsub.f32 %v18757_v45, %v4023_v30  ;;  %v24797_v46 = vrot.slane %v18792_v32, %v17359_v27  ;;  %v24798_v63 = vrot.slane %v18520_v36, %v17359_v27  ;;  %v24803_v45 = vld [vmem:[#allocation57_spill] sm:$0xff] }
 0x258   :  { %24791 = vst [vmem:[#allocation22_spill] sm:$0xff] %v18912_v17  ;;  %v18920_v57 = vpop.eup %16590  ;;  %5074 = vperm.xlu0 %16513, %v18912_v17   ;;  %24796 = vst [vmem:[#allocation89_spill] sm:$0xff] %v18935_v12  ;;  %16602 = vpow2.f32 %v10813_v2  ;;  %v9981_v29 = vcombine.high %v18935_v12, %v18935_v12  ;;  %v14351_v18 = vrot.slane %v18907_v59, %v17359_v27  ;;  %v24830_v17 = vld [vmem:[#allocation67_spill] sm:$0xff] }
 0x259   :  { %v18948_v10 = vsel %vm9564_vm5, %v24797_v46, 0.0  ;;  %v18954_v52 = vcombine.low %v18859_v6, %v24798_v63  ;;  %v18961_v61 = vsel %vm2509_vm7, %v2413_v48, %v2605_v58  ;;  %v2415_v32 = vadd.f32 %v2177_v54, %v18941_v49  ;;  %v18967_v36 = vpop.eup %16592  ;;  %v2179_v46 = vpop.permute.xlu0 %2178 }
 0x25a   :  { %24799 = vst [vmem:[#allocation90_spill] sm:$0xff] %v18961_v61  ;;  %v18965_v4 = vsub.f32 %v18767_v15, %v4031_v7  ;;  %24800 = vst [vmem:[#allocation91_spill] sm:$0xff] %v18967_v36  ;;  %16604 = vpow2.f32 %v4885_v28  ;;  %v4835_v6 = vmul.f32 1.442695, %v4721_v55  ;;  %v18970_v2 = vsub.f32 %v18767_v15, %v9981_v29 }
 0x25b   :  { %v3198_v30 = vrot.slane %v3191_v11, %v17359_v27  ;;  %v18973_v63 = vpop.eup %16594  ;;  %v14352_v59 = vcombine.low %v14344_v50, %v14351_v18  ;;  %v10690_v48 = vsub.f32 %v18034_v34, %v10118_v14  ;;  %v2414_v58 = vadd.f32 %v18510_v23, %v647_v19  ;;  %v24805_v11 = vld [vmem:[#allocation23_spill] sm:$0xff] }
 0x25c   :  { %5110 = vperm.xlu0 %16513, %v18920_v57   ;;  %24801 = vst [vmem:[#allocation92_spill] sm:$0xff] %v18970_v2  ;;  %24802 = vst [vmem:[#allocation93_spill] sm:$0xff] %v18973_v63  ;;  %v669_v54 = vcombine.high %v647_v19, %v647_v19  ;;  %v24804_v28 = vsub.f32 %v18271_v25, %v24803_v45  ;;  %v3205_v15 = vrot.slane %v18961_v61, %v17359_v27  ;;  %v24806_v34 = vld [vmem:[#allocation15_spill] sm:$0xff] }
 0x25d   :  { %16606 = vpow2.f32 %v4835_v6  ;;  %v8386_v50 = vcombine.low %v18478_v0, %v18534_v37  ;;  %v10689_v14 = vsub.f32 %v24806_v34, %v24805_v11  ;;  %v2607_v23 = vmul.f32 0.2, %v2415_v32 }
 0x25e   :  { %v4867_v55 = vmul.f32 1.442695, %v24804_v28  ;;  %v2416_v19 = vadd.f32 %v2179_v46, %v669_v54  ;;  %v24807_v29 = vrot.slane %v18801_v20, 4  ;;  %v14899_v45 = vrot.slane %v18948_v10, 4  ;;  %v18992_v7 = vpop.eup %16596 }
 0x25f   :  { %vm2511_vm8 = vcmp.gt.f32.partialorder %v2415_v32, 0.0  ;;  %v3206_v28 = vcombine.low %v3198_v30, %v3205_v15  ;;  %v8385_v6 = vrot.slane %v18954_v52, %v17359_v27  ;;  %v14359_v37 = vrot.slane %v14352_v59, %v17359_v27 }
 0x260   :  { %5128 = vperm.xlu0 %16513, %v18973_v63   ;;  %v8926_v18 = vadd.f32 %v24807_v29, %v18801_v20  ;;  %v10823_v0 = vmul.f32 1.442695, %v10690_v48  ;;  %v2606_v2 = vmul.f32 0.2, %v2414_v58  ;;  %16608 = vpow2.f32 %v4867_v55  ;;  %v19002_v30 = vpop.eup %16598 }
 0x261   :  { %v24808_v46 = vsub.f32 %v18328_v39, %v18489_v60  ;;  %vm2510_vm9 = vcmp.gt.f32.partialorder %v2414_v58, 0.0  ;;  %v3213_v20 = vrot.slane %v3206_v28, %v17359_v27  ;;  %24809 = vst [vmem:[#allocation57_spill] sm:$0xff] %v19002_v30  ;;  %v8393_v15 = vrot.slane %v8386_v50, %v17359_v27  ;;  %v19007_v48 = vpop.eup %16600 }
 0x262   :  { %v10821_v11 = vmul.f32 1.442695, %v10689_v14  ;;  %v19005_v52 = vsel %vm2511_vm8, %v2415_v32, %v2607_v23  ;;  %v2608_v59 = vmul.f32 0.2, %v2416_v19  ;;  %24811 = vst [vmem:[#allocation15_spill] sm:$0xff] %v19007_v48  ;;  %v8400_v55 = vrot.slane %v18599_v16, %v17359_v27 }
 0x263   :  { %v4879_v54 = vmul.f32 1.442695, %v24808_v46  ;;  %24810 = vst [vmem:[#allocation23_spill] sm:$0xff] %v19005_v52  ;;  %v14360_v60 = vcombine.low %v19002_v30, %v18967_v36  ;;  %v3720_v34 = vsel %vm3614_vm11, %v3213_v20, -inf  ;;  %vm2512_vm10 = vcmp.gt.f32.partialorder %v2416_v19, 0.0  ;;  %v24814_v46 = vld [vmem:[#allocation24_spill] sm:$0xff] }
 0x264   :  { %5308 = vperm.xlu0 %16513, %v18992_v7   ;;  %16610 = vpow2.f32 %v10823_v0  ;;  %v19014_v29 = vsel %vm2510_vm9, %v2414_v58, %v2606_v2  ;;  %v3721_v28 = vrot.slane %v3720_v34, 4  ;;  %v9670_v50 = vsel %vm9564_vm5, %v3213_v20, -inf }
 0x265   :  { %24812 = vst [vmem:[#allocation94_spill] sm:$0xff] %v19014_v29  ;;  %16612 = vpow2.f32 %v4879_v54  ;;  %v4887_v32 = vmul.f32 1.442695, %v18583_v13  ;;  %v3214_v14 = vcombine.low %v19014_v29, %v19005_v52  ;;  %v9671_v23 = vrot.slane %v9670_v50, 4  ;;  %v19021_v16 = vpop.eup %16602 }
 0x266   :  { %24813 = vst [vmem:[#allocation95_spill] sm:$0xff] %v19021_v16  ;;  %16614 = vpow2.f32 %v10821_v11  ;;  %v10825_v36 = vmul.f32 1.442695, %v24814_v46  ;;  %v3722_v0 = vmax.f32 %v3720_v34, %v3721_v28  ;;  %v19024_v2 = vsel %vm2512_vm10, %v2416_v19, %v2608_v59 }
 0x267   :  { %v8927_v58 = vrot.slane %v8926_v18, 2  ;;  %v8987_v20 = vsel %vm3614_vm11, %v8385_v6, 0.0  ;;  %v8401_v54 = vcombine.low %v8393_v15, %v8400_v55  ;;  %v14367_v13 = vrot.slane %v14360_v60, %v17359_v27  ;;  %v19028_v30 = vpop.eup %16604 }
 0x268   :  { %5362 = vperm.xlu0 %16513, %v19007_v48   ;;  %24815 = vst [vmem:[#allocation24_spill] sm:$0xff] %v19028_v30  ;;  %v8432_v63 = vcombine.low %v18506_v47, %v18565_v62  ;;  %v3723_v12 = vrot.slane %v3722_v0, 2  ;;  %v9672_v9 = vmax.f32 %v9670_v50, %v9671_v23  ;;  %v3228_v11 = vrot.slane %v19024_v2, %v17359_v27 }
 0x269   :  { %v14900_v34 = vadd.f32 %v14899_v45, %v18948_v10  ;;  %v14961_v19 = vsel %vm9564_vm5, %v14359_v37, 0.0  ;;  %16616 = vpow2.f32 %v4887_v32  ;;  %v3221_v6 = vrot.slane %v3214_v14, %v17359_v27 }
 0x26a   :  { %v19038_v15 = vpop.eup %16606  ;;  %v14374_v59 = vrot.slane %v19021_v16, %v17359_v27  ;;  %16618 = vpow2.f32 %v10825_v36  ;;  %v3724_v47 = vmax.f32 %v3722_v0, %v3723_v12  ;;  %v9673_v62 = vrot.slane %v9672_v9, 2 }
 0x26b   :  { %24816 = vst [vmem:[#allocation96_spill] sm:$0xff] %v19038_v15  ;;  %v8928_v55 = vadd.f32 %v8927_v58, %v8926_v18  ;;  %v8988_v60 = vrot.slane %v8987_v20, 4  ;;  %v8408_v28 = vrot.slane %v8401_v54, %v17359_v27  ;;  %v3229_v10 = vcombine.low %v3221_v6, %v3228_v11  ;;  %5155 = vperm.xlu1 %16512, %v19038_v15   ;;  %v24819_v58 = vld [vmem:[#allocation76_spill] sm:$0xff] }
 0x26c   :  { %5380 = vperm.xlu0 %16513, %v19028_v30   ;;  %v14375_v45 = vcombine.low %v14367_v13, %v14374_v59  ;;  %v8439_v37 = vrot.slane %v8432_v63, %v17359_v27  ;;  %v3725_v50 = vrot.slane %v3724_v47, 1  ;;  %v9674_v32 = vmax.f32 %v9672_v9, %v9673_v62 }
 0x26d   :  { %v24817_v14 = vrot.slane %v18782_v26, 1  ;;  %v14901_v46 = vrot.slane %v14900_v34, 2  ;;  %v14962_v36 = vrot.slane %v14961_v19, 4  ;;  %v19048_v12 = vpop.eup %16608  ;;  %v24818_v18 = vrot.slane %v18809_v42, 1 }
 0x26e   :  { %v8446_v54 = vrot.slane %v24819_v58, %v17359_v27  ;;  %v3726_v13 = vmax.f32 %v3724_v47, %v3725_v50  ;;  %v9675_v11 = vrot.slane %v9674_v32, 1  ;;  %v8929_v63 = vrot.slane %v8928_v55, 1 }
 0x26f   :  { %v8986_v23 = vadd.f32 %v24817_v14, %v18782_v26  ;;  %v14960_v0 = vadd.f32 %v24818_v18, %v18809_v42  ;;  %v8989_v6 = vadd.f32 %v8988_v60, %v8987_v20  ;;  %v8994_v9 = vsel %vm3614_vm11, %v8408_v28, 0.0  ;;  %5299 = vperm.xlu1 %16512, %v19048_v12   ;;  %v24820_v14 = vld [vmem:[#allocation54_spill] sm:$0xff] }
 0x270   :  { %v3236_v59 = vrot.slane %v3229_v10, %v17359_v27  ;;  %v14382_v26 = vrot.slane %v14375_v45, %v17359_v27  ;;  %v8447_v62 = vcombine.low %v8439_v37, %v8446_v54  ;;  %v4222_v42 = vrot.slane %v3726_v13, %v17359_v27 }
 0x271   :  { %v19062_v18 = vpop.eup %16610  ;;  %16620 = vrcp.f32 %v8986_v23  ;;  %v14902_v47 = vadd.f32 %v14901_v46, %v14900_v34  ;;  %v14963_v50 = vadd.f32 %v14962_v36, %v14961_v19  ;;  %v9676_v20 = vmax.f32 %v9674_v32, %v9675_v11 }
 0x272   :  { %24821 = vst [vmem:[#allocation76_spill] sm:$0xff] %v19062_v18  ;;  %v19064_v60 = vpop.eup %16612  ;;  %16622 = vrcp.f32 %v14960_v0  ;;  %v8995_v28 = vrot.slane %v8994_v9, 4  ;;  %v4223_v10 = vcombine.high %v4222_v42, %v4222_v42  ;;  %v19067_v58 = vrot.slane %v4222_v42, %v17359_v27 }
 0x273   :  { %v19069_v45 = vpop.eup %16614  ;;  %v8930_v37 = vadd.f32 %v8929_v63, %v8928_v55  ;;  %v8990_v54 = vrot.slane %v8989_v6, 2  ;;  %v10172_v13 = vrot.slane %v9676_v20, %v17359_v27  ;;  %v3727_v16 = vsel %vm3614_vm11, %v3236_v59, -inf  ;;  %5353 = vperm.xlu1 %16512, %v19064_v60  }
 0x274   :  { %24822 = vst [vmem:[#allocation97_spill] sm:$0xff] %v19067_v58  ;;  %24823 = vst [vmem:[#allocation98_spill] sm:$0xff] %v19069_v45  ;;  %v14968_v34 = vsel %vm9564_vm5, %v14382_v26, 0.0  ;;  %v8454_v19 = vrot.slane %v8447_v62, %v17359_v27  ;;  %v14406_v32 = vcombine.low %v19069_v45, %v19062_v18  ;;  %v19079_v23 = vrot.slane %v4223_v10, %v17359_v27  ;;  %v24829_v26 = vld [vmem:[#allocation38_spill] sm:$0xff] }
 0x275   :  { %v14903_v46 = vrot.slane %v14902_v47, 1  ;;  %v14964_v36 = vrot.slane %v14963_v50, 2  ;;  %v4748_v55 = vsub.f32 %v18929_v24, %v19067_v58  ;;  %v10173_v0 = vcombine.high %v10172_v13, %v10172_v13  ;;  %v24833_v58 = vld [vmem:[#allocation31_spill] sm:$0xff] }
 0x276   :  { %24824 = vst [vmem:[#allocation99_spill] sm:$0xff] %v19079_v23  ;;  %v19083_v11 = vpop.eup %16616  ;;  %v8996_v63 = vadd.f32 %v8995_v28, %v8994_v9  ;;  %v19088_v62 = vrot.slane %v10172_v13, %v17359_v27  ;;  %v3728_v42 = vrot.slane %v3727_v16, 4  ;;  %v8991_v10 = vadd.f32 %v8990_v54, %v8989_v6 }
 0x277   :  { %24825 = vst [vmem:[#allocation100_spill] sm:$0xff] %v19083_v11  ;;  %v19090_v20 = vpop.eup %16618  ;;  %v14969_v18 = vrot.slane %v14968_v34, 4  ;;  %v4889_v45 = vmul.f32 1.442695, %v4748_v55  ;;  %v19093_v15 = vrot.slane %v10173_v0, %v17359_v27  ;;  %5389 = vperm.xlu1 %16512, %v19083_v11   ;;  %16624 = vrcp.f32 %v8930_v37 }
 0x278   :  { %24826 = vst [vmem:[#allocation101_spill] sm:$0xff] %v19088_v62  ;;  %24827 = vst [vmem:[#allocation102_spill] sm:$0xff] %v19090_v20  ;;  %v9008_v9 = vsel %vm3614_vm11, %v8454_v19, 0.0  ;;  %v14413_v28 = vrot.slane %v14406_v32, %v17359_v27  ;;  %v9866_v13 = vcombine.high %v24829_v26, %v24829_v26  ;;  %v24832_v30 = vsub.f32 %v24830_v17, %v24831_v41 }
 0x279   :  { %24828 = vst [vmem:[#allocation103_spill] sm:$0xff] %v19093_v15  ;;  %16626 = vpow2.f32 %v4889_v45  ;;  %v14965_v55 = vadd.f32 %v14964_v36, %v14963_v50  ;;  %v8997_v37 = vrot.slane %v8996_v63, 2  ;;  %v14420_v19 = vrot.slane %v19090_v20, %v17359_v27  ;;  %v19112_v45 = vpop.permute.xlu1 %2180  ;;  %v24836_v50 = vld [vmem:[#allocation30_spill] sm:$0xff]  ;;  %v24837_v15 = vld [vmem:[#allocation28_spill] sm:$0xff] }
 0x27a   :  { %v4945_v52 = vmul.f32 1.442695, %v24832_v30  ;;  %v3729_v32 = vmax.f32 %v3727_v16, %v3728_v42  ;;  %v14904_v0 = vadd.f32 %v14903_v46, %v14902_v47  ;;  %v8992_v11 = vrot.slane %v8991_v10, 1 }
 0x27b   :  { %v14970_v61 = vadd.f32 %v14969_v18, %v14968_v34  ;;  %v24835_v41 = vsub.f32 %v24833_v58, %v24834_v22  ;;  %v9009_v17 = vrot.slane %v9008_v9, 4  ;;  %v14421_v6 = vcombine.low %v14413_v28, %v14420_v19  ;;  %v19125_v28 = vpop.permute.xlu0 %2186 }
 0x27c   :  { %v3730_v62 = vrot.slane %v3729_v32, 2  ;;  %v9677_v54 = vsel %vm9564_vm5, %v3236_v59, -inf  ;;  %v10658_v36 = vsub.f32 %v24836_v50, %v9866_v13  ;;  %v24838_v20 = vsub.f32 %v24837_v15, %v24829_v26  ;;  %24841 = vst [vmem:[#allocation12_spill] sm:$0xff] %v19125_v28  ;;  %v24899_v28 = vld [vmem:[#allocation26_spill] sm:$0xff] }
 0x27d   :  { %v10757_v30 = vmul.f32 1.442695, %v24835_v41  ;;  %16628 = vpow2.f32 %v4945_v52  ;;  %v9678_v47 = vrot.slane %v9677_v54, 4  ;;  %v14966_v34 = vrot.slane %v14965_v55, 1 }
 0x27e   :  { %v10755_v16 = vmul.f32 1.442695, %v24838_v20  ;;  %v19119_v18 = vpop.eup %16620  ;;  %v8998_v22 = vadd.f32 %v8997_v37, %v8996_v63  ;;  %v24840_v58 = vcombine.high %v24820_v14, %v24820_v14  ;;  %v3731_v42 = vmax.f32 %v3729_v32, %v3730_v62  ;;  %v2233_v37 = vpop.permute.xlu1 %2232 }
 0x27f   :  { %24839 = vst [vmem:[#allocation38_spill] sm:$0xff] %v19119_v18  ;;  %v19127_v59 = vpop.eup %16622  ;;  %v8993_v13 = vadd.f32 %v8992_v11, %v8991_v10  ;;  %16630 = vpow2.f32 %v10757_v30  ;;  %v9679_v15 = vmax.f32 %v9677_v54, %v9678_v47  ;;  %v14971_v26 = vrot.slane %v14970_v61, 2  ;;  %v19131_v10 = vpop.f32.mrf.mxu0 }
 0x280   :  { %v785_v46 = vrot.slane %v24840_v58, %v17359_v27  ;;  %24842 = vst [vmem:[#allocation31_spill] sm:$0xff] %v19127_v59  ;;  %v14428_v52 = vrot.slane %v14421_v6, %v17359_v27  ;;  %v3732_v19 = vrot.slane %v3731_v42, 1  ;;  %v9010_v41 = vadd.f32 %v9009_v17, %v9008_v9  ;;  %24843 = vst [vmem:[#allocation40_spill] sm:$0xff] %v19131_v10  ;;  %v19138_v9 = vpop.permute.xlu0 %2198 }
 0x281   :  { %16632 = vpow2.f32 %v10755_v16  ;;  %v10759_v63 = vmul.f32 1.442695, %v10658_v36  ;;  %v9680_v50 = vrot.slane %v9679_v15, 2  ;;  %v14967_v58 = vadd.f32 %v14966_v34, %v14965_v55  ;;  %24845 = vst [vmem:[#allocation28_spill] sm:$0xff] %v19138_v9  ;;  %v24848_v34 = vld [vmem:[#allocation49_spill] sm:$0xff] }
 0x282   :  { %v787_v20 = vcombine.high %v785_v46, %v785_v46  ;;  %16634 = vrcp.f32 %v14904_v0  ;;  %v8999_v62 = vrot.slane %v8998_v22, 1  ;;  %v3733_v32 = vmax.f32 %v3731_v42, %v3732_v19 }
 0x283   :  { %16636 = vrcp.f32 %v8993_v13  ;;  %v9681_v14 = vmax.f32 %v9679_v15, %v9680_v50  ;;  %v14982_v11 = vsel %vm9564_vm5, %v14428_v52, 0.0  ;;  %v801_v54 = vrot.slane %v785_v46, %v17359_v27  ;;  %v24849_v15 = vld [vmem:[#allocation33_spill] sm:$0xff]  ;;  %v2237_v50 = vpop.permute.xlu1 %2236 }
 0x284   :  { %v815_v6 = vrot.slane %v787_v20, %v17359_v27  ;;  %v19136_v17 = vrot.slane %v3733_v32, %v17359_v27  ;;  %v19140_v30 = vpop.eup %16624  ;;  %v19142_v55 = vadd.f32 %v14971_v26, %v14970_v61  ;;  %v9011_v0 = vrot.slane %v9010_v41, 2  ;;  %v24850_v52 = vld [vmem:[#allocation41_spill] sm:$0xff]  ;;  %v24852_v26 = vld [vmem:[#allocation64_spill] sm:$0xff]  ;;  %v2231_v59 = vpop.permute.xlu0 %2230 }
 0x285   :  { %24846 = vst [vmem:[#allocation104_spill] sm:$0xff] %v19140_v30  ;;  %16638 = vpow2.f32 %v10759_v63  ;;  %v9682_v36 = vrot.slane %v9681_v14, 1  ;;  %v19146_v47 = vadd.f32 %v8999_v62, %v8998_v22  ;;  %v14983_v13 = vrot.slane %v14982_v11, 4  ;;  %v19158_v22 = vpop.f32.mrf.mxu0 }
 0x286   :  { %24844 = vst [vmem:[#allocation30_spill] sm:$0xff] %v19136_v17  ;;  %v19144_v16 = vpop.eup %16626  ;;  %16640 = vrcp.f32 %v14967_v58  ;;  %v4253_v42 = vrot.slane %v19136_v17, %v17359_v27  ;;  %v24851_v20 = vsub.f32 %v24849_v15, %v24850_v52  ;;  %v818_v19 = vcombine.high %v24852_v26, %v24852_v26  ;;  %24853 = vst [vmem:[#allocation33_spill] sm:$0xff] %v19158_v22  ;;  %v24854_v15 = vld [vmem:[#allocation32_spill] sm:$0xff]  ;;  %v24855_v52 = vld [vmem:[#allocation43_spill] sm:$0xff] }
 0x287   :  { %24847 = vst [vmem:[#allocation105_spill] sm:$0xff] %v19144_v16  ;;  %v9683_v63 = vmax.f32 %v9681_v14, %v9682_v36  ;;  %5398 = vperm.xlu0 %16513, %v19144_v16   ;;  %v817_v58 = vcombine.high %v801_v54, %v801_v54  ;;  %v819_v46 = vcombine.high %v815_v6, %v815_v6  ;;  %v24859_v26 = vld [vmem:[#allocation86_spill] sm:$0xff] }
 0x288   :  { %v10761_v61 = vmul.f32 1.442695, %v24851_v20  ;;  %v4261_v62 = vcombine.high %v4253_v42, %v4253_v42  ;;  %v4751_v32 = vsub.f32 %v19014_v29, %v4253_v42  ;;  %v19162_v30 = vadd.f32 %v9011_v0, %v9010_v41  ;;  %v24860_v16 = vld [vmem:[#allocation62_spill] sm:$0xff]  ;;  %v24862_v0 = vld [vmem:[#allocation79_spill] sm:$0xff] }
 0x289   :  { %v24856_v20 = vsub.f32 %v24854_v15, %v24855_v52  ;;  %v19168_v14 = vrot.slane %v9683_v63, %v17359_v27  ;;  %v8179_v24 = vcombine.low %v24860_v16, %v24859_v26  ;;  %v2445_v29 = vadd.f32 %v2237_v50, %v819_v46  ;;  %v24865_v16 = vld [vmem:[#allocation14_spill] sm:$0xff] }
 0x28a   :  { %v19170_v36 = vpop.eup %16628  ;;  %v19175_v10 = vsub.f32 %v19024_v2, %v4261_v62  ;;  %v4895_v42 = vmul.f32 1.442695, %v4751_v32  ;;  %v19177_v41 = vadd.f32 %v14983_v13, %v14982_v11  ;;  %16642 = vpow2.f32 %v10761_v61  ;;  %v19188_v62 = vpop.f32.mrf.mxu0  ;;  %v24867_v32 = vld [vmem:[#allocation78_spill] sm:$0xff]  ;;  %v24868_v11 = vld [vmem:[#allocation45_spill] sm:$0xff] }
 0x28b   :  { %v10763_v18 = vmul.f32 1.442695, %v24856_v20  ;;  %24857 = vst [vmem:[#allocation41_spill] sm:$0xff] %v19168_v14  ;;  %24858 = vst [vmem:[#allocation64_spill] sm:$0xff] %v19170_v36  ;;  %v2441_v15 = vadd.f32 %v24862_v0, %v818_v19  ;;  %v19182_v63 = vrot.slane %v19168_v14, %v17359_v27  ;;  %5650 = vperm.xlu0 %16513, %v19170_v36   ;;  %v4947_v20 = vmul.f32 1.442695, %v24865_v16 }
 0x28c   :  { %24861 = vst [vmem:[#allocation32_spill] sm:$0xff] %v19175_v10  ;;  %v19185_v52 = vpop.eup %16630  ;;  %24866 = vst [vmem:[#allocation62_spill] sm:$0xff] %v19188_v62  ;;  %v2444_v46 = vadd.f32 %v24867_v32, %v817_v58  ;;  %v2443_v50 = vadd.f32 %v2233_v37, %v815_v6  ;;  %16644 = vpow2.f32 %v4895_v42  ;;  %v10765_v13 = vmul.f32 1.442695, %v24868_v11  ;;  %v24871_v14 = vld [vmem:[#allocation72_spill] sm:$0xff]  ;;  %v2239_v32 = vpop.permute.xlu0 %2238 }
 0x28d   :  { %24863 = vst [vmem:[#allocation43_spill] sm:$0xff] %v19182_v63  ;;  %24864 = vst [vmem:[#allocation86_spill] sm:$0xff] %v19185_v52  ;;  %v19194_v61 = vrot.slane %v19188_v62, %v17359_v27  ;;  %v10211_v19 = vcombine.high %v19182_v63, %v19182_v63  ;;  %v2442_v26 = vadd.f32 %v2231_v59, %v801_v54  ;;  %16646 = vpow2.f32 %v10763_v18 }
 0x28e   :  { %v19198_v0 = vpop.eup %16632  ;;  %v8186_v16 = vrot.slane %v8179_v24, %v17359_v27  ;;  %v8193_v22 = vrot.slane %v24871_v14, %v17359_v27  ;;  %v2637_v37 = vmul.f32 0.2, %v2445_v29  ;;  %vm2541_vm12 = vcmp.gt.f32.partialorder %v2445_v29, 0.0 }
 0x28f   :  { %24869 = vst [vmem:[#allocation79_spill] sm:$0xff] %v19194_v61  ;;  %24870 = vst [vmem:[#allocation14_spill] sm:$0xff] %v19198_v0  ;;  %v19203_v6 = vpop.eup %16634  ;;  %v14153_v58 = vcombine.low %v19198_v0, %v19185_v52  ;;  %v19208_v42 = vsub.f32 %v19024_v2, %v10211_v19  ;;  %v19212_v59 = vrot.slane %v19194_v61, %v17359_v27  ;;  %v2633_v24 = vmul.f32 0.2, %v2441_v15 }
 0x290   :  { %24872 = vst [vmem:[#allocation78_spill] sm:$0xff] %v19203_v6  ;;  %v19214_v54 = vpop.eup %16636  ;;  %16648 = vpow2.f32 %v4947_v20  ;;  %v2636_v14 = vmul.f32 0.2, %v2444_v46  ;;  %v2635_v18 = vmul.f32 0.2, %v2443_v50  ;;  %vm2537_vm13 = vcmp.gt.f32.partialorder %v2441_v15, 0.0 }
 0x291   :  { %24873 = vst [vmem:[#allocation45_spill] sm:$0xff] %v19208_v42  ;;  %24874 = vst [vmem:[#allocation72_spill] sm:$0xff] %v19212_v59  ;;  %vm2540_vm14 = vcmp.gt.f32.partialorder %v2444_v46, 0.0  ;;  %vm2539_vm15 = vcmp.gt.f32.partialorder %v2443_v50, 0.0  ;;  %vm2538_vm0 = vcmp.gt.f32.partialorder %v2442_v26, 0.0  ;;  %v8194_v2 = vcombine.low %v8186_v16, %v8193_v22 }
 0x292   :  { %24875 = vst [vmem:[#allocation106_spill] sm:$0xff] %v19214_v54  ;;  %v19216_v11 = vpop.eup %16638  ;;  %v820_v19 = vcombine.high %v19188_v62, %v19188_v62  ;;  %v19220_v6 = vsel %vm2541_vm12, %v2445_v29, %v2637_v37  ;;  %v2634_v52 = vmul.f32 0.2, %v2442_v26  ;;  %v9013_v20 = vrot.slane %v19162_v30, 1 }
 0x293   :  { %24876 = vst [vmem:[#allocation107_spill] sm:$0xff] %v19216_v11  ;;  %24877 = vst [vmem:[#allocation108_spill] sm:$0xff] %v19220_v6  ;;  %v19222_v0 = vpop.eup %16640  ;;  %v14160_v54 = vrot.slane %v14153_v58, %v17359_v27  ;;  %16650 = vpow2.f32 %v10765_v13  ;;  %v2446_v42 = vadd.f32 %v2239_v32, %v19212_v59  ;;  %v19227_v63 = vsel %vm2537_vm13, %v2441_v15, %v2633_v24  ;;  %v19247_v58 = vpop.permute.xlu1 %2240  ;;  %v24886_v32 = vld [vmem:[#allocation65_spill] sm:$0xff] }
 0x294   :  { %24878 = vst [vmem:[#allocation109_spill] sm:$0xff] %v19222_v0  ;;  %24879 = vst [vmem:[#allocation110_spill] sm:$0xff] %v19227_v63  ;;  %v19229_v61 = vsel %vm2540_vm14, %v2444_v46, %v2636_v14  ;;  %v19231_v22 = vsel %vm2539_vm15, %v2443_v50, %v2635_v18  ;;  %v19233_v16 = vsel %vm2538_vm0, %v2442_v26, %v2634_v52  ;;  %v14985_v29 = vrot.slane %v19177_v41, 2  ;;  %v24885_v18 = vld [vmem:[#allocation75_spill] sm:$0xff] }
 0x295   :  { %24880 = vst [vmem:[#allocation111_spill] sm:$0xff] %v19229_v61  ;;  %24881 = vst [vmem:[#allocation112_spill] sm:$0xff] %v19231_v22  ;;  %v14167_v37 = vrot.slane %v19216_v11, %v17359_v27  ;;  %v3444_v0 = vcombine.low %v19229_v61, %v19220_v6  ;;  %v3421_v13 = vcombine.low %v19227_v63, %v19233_v16  ;;  %vm2542_vm1 = vcmp.gt.f32.partialorder %v2446_v42, 0.0  ;;  %v24888_v11 = vld [vmem:[#allocation47_spill] sm:$0xff] }
 0x296   :  { %24882 = vst [vmem:[#allocation113_spill] sm:$0xff] %v19233_v16  ;;  %v8201_v15 = vrot.slane %v8194_v2, %v17359_v27  ;;  %v834_v46 = vrot.slane %v820_v19, %v17359_v27  ;;  %v2638_v50 = vmul.f32 0.2, %v2446_v42  ;;  %16652 = vrcp.f32 %v19146_v47  ;;  %24883 = vst [vmem:[#allocation114_spill] sm:$0xff] %v19247_v58  ;;  %v24887_v2 = vld [vmem:[#allocation36_spill] sm:$0xff] }
 0x297   :  { %v14168_v52 = vcombine.low %v14160_v54, %v14167_v37  ;;  %v3435_v26 = vrot.slane %v19231_v22, %v17359_v27  ;;  %v3428_v24 = vrot.slane %v3421_v13, %v17359_v27  ;;  %v19250_v14 = vpop.eup %16642  ;;  %v8202_v62 = vcombine.low %v24886_v32, %v24885_v18  ;;  %v24891_v54 = vld [vmem:[#allocation48_spill] sm:$0xff] }
 0x298   :  { %24884 = vst [vmem:[#allocation115_spill] sm:$0xff] %v19250_v14  ;;  %v24889_v19 = vsub.f32 %v24887_v2, %v24888_v11  ;;  %v836_v36 = vcombine.high %v834_v46, %v834_v46  ;;  %v19257_v9 = vsel %vm2542_vm1, %v2446_v42, %v2638_v50  ;;  %v24892_v37 = vsub.f32 %v24775_v21, %v24891_v54 }
 0x299   :  { %v19259_v47 = vpop.eup %16644  ;;  %v3451_v13 = vrot.slane %v3444_v0, %v17359_v27  ;;  %v3436_v22 = vcombine.low %v3428_v24, %v3435_v26  ;;  %v3458_v17 = vrot.slane %v19257_v9, %v17359_v27  ;;  %v24893_v18 = vrot.slane %v19142_v55, 1  ;;  %v24895_v24 = vld [vmem:[#allocation50_spill] sm:$0xff] }
 0x29a   :  { %v10773_v59 = vmul.f32 1.442695, %v24889_v19  ;;  %24890 = vst [vmem:[#allocation75_spill] sm:$0xff] %v19259_v47  ;;  %v10775_v58 = vmul.f32 1.442695, %v24892_v37  ;;  %v19273_v42 = vadd.f32 %v9013_v20, %v19162_v30  ;;  %v19276_v50 = vadd.f32 %v14985_v29, %v19177_v41  ;;  %5425 = vperm.xlu1 %16512, %v19259_v47   ;;  %v19280_v0 = vpop.eup %16646 }
 0x29b   :  { %v19270_v11 = vadd.f32 %v24893_v18, %v19142_v55  ;;  %v8931_v21 = vsel %vm3614_vm11, %v8201_v15, 0.0  ;;  %24894 = vst [vmem:[#allocation65_spill] sm:$0xff] %v19280_v0  ;;  %v14175_v26 = vrot.slane %v14168_v52, %v17359_v27  ;;  %v10777_v32 = vmul.f32 1.442695, %v24895_v24  ;;  %v2249_v52 = vpop.permute.xlu1 %2248 }
 0x29c   :  { %v3443_v2 = vrot.slane %v3436_v22, %v17359_v27  ;;  %v3459_v55 = vcombine.low %v3451_v13, %v3458_v17  ;;  %v8216_v30 = vrot.slane %v18786_v31, %v17359_v27  ;;  %16654 = vpow2.f32 %v10773_v59 }
 0x29d   :  { %v850_v41 = vrot.slane %v834_v46, %v17359_v27  ;;  %v19289_v20 = vrot.slane %v836_v36, %v17359_v27  ;;  %v19291_v29 = vpop.eup %16648  ;;  %v8932_v15 = vrot.slane %v8931_v21, 4  ;;  %v8209_v19 = vrot.slane %v8202_v62, %v17359_v27  ;;  %v2251_v62 = vpop.permute.xlu0 %2250 }
 0x29e   :  { %24897 = vst [vmem:[#allocation47_spill] sm:$0xff] %v19291_v29  ;;  %16656 = vpow2.f32 %v10775_v58  ;;  %v3790_v54 = vsel %vm3614_vm11, %v3443_v2, -inf  ;;  %v9740_v17 = vsel %vm9564_vm5, %v3443_v2, -inf  ;;  %v3466_v31 = vrot.slane %v3459_v55, %v17359_v27  ;;  %5659 = vperm.xlu1 %16512, %v19291_v29  }
 0x29f   :  { %24896 = vst [vmem:[#allocation36_spill] sm:$0xff] %v19289_v20  ;;  %v3791_v22 = vrot.slane %v3790_v54, 4  ;;  %v866_v59 = vcombine.high %v850_v41, %v850_v41  ;;  %v14905_v36 = vsel %vm9564_vm5, %v14175_v26, 0.0  ;;  %v14176_v46 = vcombine.low %v19250_v14, %v19280_v0 }
 0x2a0   :  { %16658 = vpow2.f32 %v10777_v32  ;;  %v9741_v37 = vrot.slane %v9740_v17, 4  ;;  %v19301_v58 = vpop.eup %16650  ;;  %v2451_v13 = vadd.f32 %v2249_v52, %v19289_v20  ;;  %v3797_v24 = vsel %vm3614_vm11, %v3466_v31, -inf }
 0x2a1   :  { %24898 = vst [vmem:[#allocation48_spill] sm:$0xff] %v19301_v58  ;;  %v3792_v18 = vmax.f32 %v3790_v54, %v3791_v22  ;;  %v9747_v2 = vsel %vm9564_vm5, %v3466_v31, -inf  ;;  %v19306_v55 = vadd.f32 %v8932_v15, %v8931_v21  ;;  %v8217_v47 = vcombine.low %v8209_v19, %v8216_v30 }
 0x2a2   :  { %v9742_v29 = vmax.f32 %v9740_v17, %v9741_v37  ;;  %v3798_v26 = vrot.slane %v3797_v24, 4  ;;  %v2450_v10 = vadd.f32 %v24899_v28, %v850_v41  ;;  %v9748_v32 = vrot.slane %v9747_v2, 4 }
 0x2a3   :  { %v3793_v0 = vrot.slane %v3792_v18, 2  ;;  %v2452_v14 = vadd.f32 %v2251_v62, %v866_v59  ;;  %v14906_v48 = vrot.slane %v14905_v36, 4  ;;  %v14190_v23 = vrot.slane %v19301_v58, %v17359_v27  ;;  %v19311_v22 = vpop.eup %16652 }
 0x2a4   :  { %v9743_v52 = vrot.slane %v9742_v29, 2  ;;  %v3799_v54 = vmax.f32 %v3797_v24, %v3798_v26  ;;  %24900 = vst [vmem:[#allocation50_spill] sm:$0xff] %v19311_v22  ;;  %v14183_v31 = vrot.slane %v14176_v46, %v17359_v27  ;;  %v2643_v21 = vmul.f32 0.2, %v2451_v13 }
 0x2a5   :  { %v3794_v15 = vmax.f32 %v3792_v18, %v3793_v0  ;;  %v9749_v30 = vmax.f32 %v9747_v2, %v9748_v32  ;;  %v8224_v19 = vrot.slane %v8217_v47, %v17359_v27  ;;  %vm2547_vm2 = vcmp.gt.f32.partialorder %v2451_v13, 0.0 }
 0x2a6   :  { %v9744_v28 = vmax.f32 %v9742_v29, %v9743_v52  ;;  %v3800_v41 = vrot.slane %v3799_v54, 2  ;;  %v2642_v17 = vmul.f32 0.2, %v2450_v10  ;;  %v2644_v62 = vmul.f32 0.2, %v2452_v14  ;;  %v24904_v52 = vld [vmem:[#allocation68_spill] sm:$0xff] }
 0x2a7   :  { %v3795_v59 = vrot.slane %v3794_v15, 1  ;;  %v9750_v37 = vrot.slane %v9749_v30, 2  ;;  %vm2546_vm3 = vcmp.gt.f32.partialorder %v2450_v10, 0.0  ;;  %vm2548_vm4 = vcmp.gt.f32.partialorder %v2452_v14, 0.0 }
 0x2a8   :  { %v9745_v58 = vrot.slane %v9744_v28, 1  ;;  %v3801_v20 = vmax.f32 %v3799_v54, %v3800_v41  ;;  %v14191_v24 = vcombine.low %v14183_v31, %v14190_v23  ;;  %v19315_v26 = vsel %vm2547_vm2, %v2451_v13, %v2643_v21 }
 0x2a9   :  { %24901 = vst [vmem:[#allocation26_spill] sm:$0xff] %v19315_v26  ;;  %v3796_v46 = vmax.f32 %v3794_v15, %v3795_v59  ;;  %v9751_v22 = vmax.f32 %v9749_v30, %v9750_v37  ;;  %v19317_v0 = vpop.eup %16654  ;;  %v19319_v18 = vadd.f32 %v14906_v48, %v14905_v36  ;;  %v3962_v47 = vcombine.high %v18821_v3, %v18821_v3  ;;  %v24907_v30 = vld [vmem:[#allocation29_spill] sm:$0xff] }
 0x2aa   :  { %24902 = vst [vmem:[#allocation116_spill] sm:$0xff] %v19317_v0  ;;  %v9746_v29 = vmax.f32 %v9744_v28, %v9745_v58  ;;  %v3802_v2 = vrot.slane %v3801_v20, 1  ;;  %v8248_v54 = vcombine.low %v24904_v52, %v18920_v57  ;;  %v19327_v41 = vsel %vm2546_vm3, %v2450_v10, %v2642_v17 }
 0x2ab   :  { %v19323_v32 = vpop.eup %16656  ;;  %24905 = vst [vmem:[#allocation68_spill] sm:$0xff] %v19327_v41  ;;  %v4452_v23 = vrot.slane %v3796_v46, %v17359_v27  ;;  %v19330_v13 = vsel %vm2548_vm4, %v2452_v14, %v2644_v62  ;;  %v8938_v31 = vsel %vm3614_vm11, %v8224_v19, 0.0  ;;  %v3490_v48 = vcombine.low %v19327_v41, %v19315_v26 }
 0x2ac   :  { %24903 = vst [vmem:[#allocation117_spill] sm:$0xff] %v19323_v32  ;;  %v10402_v3 = vrot.slane %v9746_v29, %v17359_v27  ;;  %v3803_v36 = vmax.f32 %v3801_v20, %v3802_v2  ;;  %v14198_v21 = vrot.slane %v14191_v24, %v17359_v27  ;;  %v9752_v10 = vrot.slane %v9751_v22, 1 }
 0x2ad   :  { %v19336_v58 = vpop.eup %16658  ;;  %v4453_v15 = vcombine.high %v4452_v23, %v4452_v23  ;;  %v19340_v57 = vrot.slane %v4452_v23, %v17359_v27  ;;  %v4714_v14 = vsub.f32 %v24907_v30, %v3962_v47  ;;  %v3504_v17 = vrot.slane %v19330_v13, %v17359_v27 }
 0x2ae   :  { %24906 = vst [vmem:[#allocation118_spill] sm:$0xff] %v19336_v58  ;;  %v10403_v28 = vcombine.high %v10402_v3, %v10402_v3  ;;  %v19344_v19 = vrot.slane %v10402_v3, %v17359_v27  ;;  %v8255_v20 = vrot.slane %v8248_v54, %v17359_v27  ;;  %v4016_v59 = vcombine.high %v18916_v5, %v18916_v5 }
 0x2af   :  { %v19352_v37 = vrot.slane %v4453_v15, %v17359_v27  ;;  %v4778_v62 = vsub.f32 %v19227_v63, %v19340_v57  ;;  %v3497_v24 = vrot.slane %v3490_v48, %v17359_v27  ;;  %v4475_v29 = vrot.slane %v3803_v36, %v17359_v27  ;;  %v24911_v48 = vld [vmem:[#allocation58_spill] sm:$0xff] }
 0x2b0   :  { %24908 = vst [vmem:[#allocation29_spill] sm:$0xff] %v19344_v19  ;;  %v19358_v46 = vrot.slane %v10403_v28, %v17359_v27  ;;  %v14987_v2 = vrot.slane %v19276_v50, 1  ;;  %v9753_v54 = vmax.f32 %v9751_v22, %v9752_v10  ;;  %v8262_v23 = vrot.slane %v18794_v38, %v17359_v27  ;;  %v24910_v10 = vld [vmem:[#allocation56_spill] sm:$0xff] }
 0x2b1   :  { %v4949_v52 = vmul.f32 1.442695, %v4778_v62  ;;  %v4821_v3 = vmul.f32 1.442695, %v4714_v14  ;;  %v3505_v15 = vcombine.low %v3497_v24, %v3504_v17  ;;  %v8934_v28 = vrot.slane %v19306_v55, 2 }
 0x2b2   :  { %24909 = vst [vmem:[#allocation119_spill] sm:$0xff] %v19358_v46  ;;  %v14908_v47 = vrot.slane %v19319_v18, 2  ;;  %v8939_v36 = vrot.slane %v8938_v31, 4  ;;  %v14912_v63 = vsel %vm9564_vm5, %v14198_v21, 0.0  ;;  %v8263_v19 = vcombine.low %v8255_v20, %v8262_v23  ;;  %v24913_v46 = vld [vmem:[#allocation83_spill] sm:$0xff] }
 0x2b3   :  { %16660 = vpow2.f32 %v4949_v52  ;;  %v4030_v62 = vrot.slane %v4016_v59, %v17359_v27  ;;  %v4476_v22 = vcombine.high %v4475_v29, %v4475_v29  ;;  %v14222_v38 = vcombine.low %v19317_v0, %v19323_v32 }
 0x2b4   :  { %v10096_v14 = vcombine.high %v24910_v10, %v24910_v10  ;;  %v4483_v17 = vrot.slane %v4475_v29, %v17359_v27  ;;  %v10425_v24 = vrot.slane %v9753_v54, %v17359_v27  ;;  %v24912_v5 = vsub.f32 %v18271_v25, %v24911_v48 }
 0x2b5   :  { %16662 = vpow2.f32 %v4821_v3  ;;  %v19384_v21 = vrot.slane %v4476_v22, %v17359_v27  ;;  %v3512_v20 = vrot.slane %v3505_v15, %v17359_v27  ;;  %v4833_v59 = vmul.f32 1.442695, %v18894_v8  ;;  %v24915_v3 = vld [vmem:[#allocation52_spill] sm:$0xff] }
 0x2b6   :  { %v10817_v52 = vmul.f32 1.442695, %v24912_v5  ;;  %v4491_v23 = vcombine.high %v4483_v17, %v4483_v17  ;;  %v4781_v32 = vsub.f32 %v19229_v61, %v4483_v17  ;;  %v10426_v0 = vcombine.high %v10425_v24, %v10425_v24 }
 0x2b7   :  { %v4722_v29 = vsub.f32 %v24913_v46, %v4030_v62  ;;  %v19393_v25 = vrot.slane %v10425_v24, %v17359_v27  ;;  %v3811_v5 = vsel %vm3614_vm11, %v3512_v20, -inf  ;;  %v24916_v48 = vsub.f32 %v24915_v3, %v24910_v10 }
 0x2b8   :  { %v19400_v8 = vsub.f32 %v19257_v9, %v4491_v23  ;;  %v4955_v22 = vmul.f32 1.442695, %v4781_v32  ;;  %v19403_v17 = vrot.slane %v10426_v0, %v17359_v27  ;;  %16664 = vpow2.f32 %v10817_v52 }
 0x2b9   :  { %24914 = vst [vmem:[#allocation56_spill] sm:$0xff] %v19393_v25  ;;  %v10815_v15 = vmul.f32 1.442695, %v24916_v48  ;;  %v10441_v62 = vcombine.high %v19393_v25, %v19393_v25  ;;  %v3812_v54 = vrot.slane %v3811_v5, 4  ;;  %v8940_v46 = vadd.f32 %v8939_v36, %v8938_v31 }
 0x2ba   :  { %24917 = vst [vmem:[#allocation58_spill] sm:$0xff] %v19400_v8  ;;  %24918 = vst [vmem:[#allocation52_spill] sm:$0xff] %v19403_v17  ;;  %16666 = vpow2.f32 %v4955_v22  ;;  %v9761_v23 = vsel %vm9564_vm5, %v3512_v20, -inf  ;;  %v4837_v32 = vmul.f32 1.442695, %v4722_v29  ;;  %v14913_v3 = vrot.slane %v14912_v63, 4 }
 0x2bb   :  { %16668 = vpow2.f32 %v4833_v59  ;;  %v19413_v0 = vsub.f32 %v19257_v9, %v10441_v62  ;;  %v3813_v52 = vmax.f32 %v3811_v5, %v3812_v54  ;;  %v8270_v48 = vrot.slane %v8263_v19, %v17359_v27 }
 0x2bc   :  { %16670 = vpow2.f32 %v10815_v15  ;;  %v9762_v8 = vrot.slane %v9761_v23, 4  ;;  %v14229_v31 = vrot.slane %v14222_v38, %v17359_v27  ;;  %v10688_v36 = vsub.f32 %v24782_v53, %v10096_v14  ;;  %v19431_v53 = vpop.permute.xlu0 %2258 }
 0x2bd   :  { %24919 = vst [vmem:[#allocation120_spill] sm:$0xff] %v19413_v0  ;;  %16672 = vrcp.f32 %v19270_v11  ;;  %v3814_v22 = vrot.slane %v3813_v52, 2  ;;  %v14988_v20 = vadd.f32 %v14987_v2, %v19276_v50  ;;  %v19422_v9 = vadd.f32 %v8934_v28, %v19306_v55 }
 0x2be   :  { %16674 = vrcp.f32 %v19273_v42  ;;  %v9763_v59 = vmax.f32 %v9761_v23, %v9762_v8  ;;  %v19427_v19 = vadd.f32 %v14908_v47, %v19319_v18  ;;  %v14236_v11 = vrot.slane %v19336_v58, %v17359_v27  ;;  %v24921_v47 = vld [vmem:[#allocation44_spill] sm:$0xff]  ;;  %v19451_v8 = vpop.permute.xlu1 %2252 }
 0x2bf   :  { %16676 = vpow2.f32 %v4837_v32  ;;  %v3815_v38 = vmax.f32 %v3813_v52, %v3814_v22  ;;  %v8941_v14 = vrot.slane %v8940_v46, 2  ;;  %v19433_v42 = vadd.f32 %v14913_v3, %v14912_v63  ;;  %v24922_v52 = vld [vmem:[#allocation61_spill] sm:$0xff] }
 0x2c0   :  { %v19424_v29 = vpop.eup %16660  ;;  %v19436_v50 = vsel %vm3614_vm11, %v8270_v48, 0.0  ;;  %v9764_v55 = vrot.slane %v9763_v59, 2  ;;  %v19439_v2 = vcombine.low %v14229_v31, %v14236_v11  ;;  %v10819_v18 = vmul.f32 1.442695, %v10688_v36  ;;  %v24927_v36 = vld [vmem:[#allocation42_spill] sm:$0xff] }
 0x2c1   :  { %24920 = vst [vmem:[#allocation121_spill] sm:$0xff] %v19424_v29  ;;  %5668 = vperm.xlu0 %16513, %v19424_v29   ;;  %v444_v28 = vcombine.high %v24921_v47, %v24921_v47  ;;  %v3816_v54 = vrot.slane %v3815_v38, 1  ;;  %v19447_v15 = vrot.slane %v24848_v34, %v17359_v27  ;;  %16678 = vrcp.f32 %v14988_v20  ;;  %v2123_v47 = vpop.permute.xlu0 %2122 }
 0x2c2   :  { %v19443_v5 = vpop.eup %16662  ;;  %v624_v63 = vcombine.high %v24790_v35, %v24790_v35  ;;  %v9765_v62 = vmax.f32 %v9763_v59, %v9764_v55  ;;  %v10142_v3 = vcombine.high %v24922_v52, %v24922_v52  ;;  %v19457_v31 = vadd.f32 %v8941_v14, %v8940_v46  ;;  %v24924_v46 = vld [vmem:[#allocation66_spill] sm:$0xff]  ;;  %v24925_v14 = vld [vmem:[#allocation55_spill] sm:$0xff] }
 0x2c3   :  { %v3817_v48 = vmax.f32 %v3815_v38, %v3816_v54  ;;  %16680 = vpow2.f32 %v10819_v18  ;;  %v472_v11 = vrot.slane %v444_v28, %v17359_v27  ;;  %v8409_v38 = vcombine.low %v24924_v46, %v19048_v12  ;;  %v24929_v12 = vld [vmem:[#allocation63_spill] sm:$0xff] }
 0x2c4   :  { %v9766_v20 = vrot.slane %v9765_v62, 1  ;;  %v24926_v54 = vsub.f32 %v24925_v14, %v24922_v52  ;;  %v474_v32 = vcombine.high %v24927_v36, %v24927_v36  ;;  %v8423_v18 = vrot.slane %v18992_v7, %v17359_v27 }
 0x2c5   :  { %5092 = vperm.xlu0 %16513, %v19443_v5   ;;  %v4521_v55 = vrot.slane %v3817_v48, %v17359_v27  ;;  %v19466_v10 = vpop.eup %16664  ;;  %v10694_v28 = vsub.f32 %v18334_v33, %v10142_v3  ;;  %v24930_v52 = vsub.f32 %v18328_v39, %v24929_v12  ;;  %v638_v33 = vrot.slane %v624_v63, %v17359_v27 }
 0x2c6   :  { %24923 = vst [vmem:[#allocation44_spill] sm:$0xff] %v19466_v10  ;;  %v10827_v24 = vmul.f32 1.442695, %v24926_v54  ;;  %v9767_v22 = vmax.f32 %v9765_v62, %v9766_v20  ;;  %v2387_v62 = vadd.f32 %v18865_v43, %v472_v11  ;;  %v2125_v20 = vpop.permute.xlu1 %2124  ;;  %v2388_v14 = vadd.f32 %v2123_v47, %v474_v32 }
 0x2c7   :  { %v19475_v59 = vpop.eup %16666  ;;  %v4522_v48 = vcombine.high %v4521_v55, %v4521_v55  ;;  %v4529_v23 = vrot.slane %v4521_v55, %v17359_v27  ;;  %v10829_v46 = vmul.f32 1.442695, %v24930_v52  ;;  %v476_v3 = vcombine.high %v472_v11, %v472_v11 }
 0x2c8   :  { %24928 = vst [vmem:[#allocation61_spill] sm:$0xff] %v19475_v59  ;;  %v19481_v35 = vpop.eup %16668  ;;  %v10471_v36 = vrot.slane %v9767_v22, %v17359_v27  ;;  %5695 = vperm.xlu1 %16512, %v19475_v59   ;;  %v8416_v43 = vrot.slane %v8409_v38, %v17359_v27  ;;  %16682 = vpow2.f32 %v10827_v24  ;;  %v10831_v63 = vmul.f32 1.442695, %v10694_v28 }
 0x2c9   :  { %v19489_v7 = vpop.eup %16670  ;;  %v19493_v55 = vrot.slane %v4522_v48, %v17359_v27  ;;  %v4537_v54 = vcombine.high %v4529_v23, %v4529_v23  ;;  %5146 = vperm.xlu0 %16513, %v19481_v35   ;;  %v4787_v22 = vsub.f32 %v19327_v41, %v4529_v23  ;;  %v2389_v11 = vadd.f32 %v2125_v20, %v476_v3 }
 0x2ca   :  { %24931 = vst [vmem:[#allocation66_spill] sm:$0xff] %v19489_v7  ;;  %v19496_v39 = vpop.eup %16672  ;;  %v14383_v32 = vcombine.low %v19489_v7, %v19466_v10  ;;  %v10472_v12 = vcombine.high %v10471_v36, %v10471_v36  ;;  %v19512_v58 = vrot.slane %v10471_v36, %v17359_v27  ;;  %v2580_v24 = vmul.f32 0.2, %v2388_v14 }
 0x2cb   :  { %24932 = vst [vmem:[#allocation55_spill] sm:$0xff] %v19496_v39  ;;  %v19502_v47 = vpop.eup %16674  ;;  %v19509_v39 = vsub.f32 %v19330_v13, %v4537_v54  ;;  %v4967_v38 = vmul.f32 1.442695, %v4787_v22  ;;  %16684 = vpow2.f32 %v10829_v46  ;;  %v2579_v23 = vmul.f32 0.2, %v2387_v62 }
 0x2cc   :  { %24933 = vst [vmem:[#allocation42_spill] sm:$0xff] %v19502_v47  ;;  %v19506_v52 = vpop.eup %16676  ;;  %24935 = vst [vmem:[#allocation122_spill] sm:$0xff] %v19512_v58  ;;  %v640_v10 = vcombine.high %v638_v33, %v638_v33  ;;  %vm2484_vm6 = vcmp.gt.f32.partialorder %v2388_v14, 0.0  ;;  %v8424_v28 = vcombine.low %v8416_v43, %v8423_v18  ;;  %vm2483_vm7 = vcmp.gt.f32.partialorder %v2387_v62, 0.0  ;;  %v2185_v43 = vpop.permute.xlu1 %2184 }
 0x2cd   :  { %24934 = vst [vmem:[#allocation63_spill] sm:$0xff] %v19506_v52  ;;  %5164 = vperm.xlu0 %16513, %v19506_v52   ;;  %v24936_v20 = vsub.f32 %v18724_v1, %v18834_v40  ;;  %16686 = vpow2.f32 %v4967_v38  ;;  %v671_v36 = vcombine.high %v18941_v49, %v18941_v49  ;;  %v2581_v22 = vmul.f32 0.2, %v2389_v11 }
 0x2ce   :  { %v19518_v54 = vpop.eup %16678  ;;  %16688 = vpow2.f32 %v10831_v63  ;;  %v19523_v46 = vrot.slane %v10472_v12, %v17359_v27  ;;  %v14390_v48 = vrot.slane %v14383_v32, %v17359_v27  ;;  %vm2485_vm8 = vcmp.gt.f32.partialorder %v2389_v11, 0.0 }
 0x2cf   :  { %v4819_v3 = vmul.f32 1.442695, %v24936_v20  ;;  %24937 = vst [vmem:[#allocation123_spill] sm:$0xff] %v19518_v54  ;;  %v10487_v18 = vcombine.high %v19512_v58, %v19512_v58  ;;  %v19528_v40 = vsel %vm2484_vm6, %v2388_v14, %v2580_v24  ;;  %v19530_v38 = vsel %vm2483_vm7, %v2387_v62, %v2579_v23 }
 0x2d0   :  { %24938 = vst [vmem:[#allocation124_spill] sm:$0xff] %v19523_v46  ;;  %24939 = vst [vmem:[#allocation125_spill] sm:$0xff] %v19528_v40  ;;  %v2417_v63 = vadd.f32 %v19112_v45, %v671_v36  ;;  %v19536_v20 = vrot.slane %v640_v10, %v17359_v27  ;;  %v19538_v12 = vpop.eup %16680  ;;  %v24942_v32 = vsub.f32 %v18733_v51, %v18874_v56  ;;  %v2183_v45 = vpop.permute.xlu0 %2182  ;;  %v24945_v56 = vrot.slane %v19422_v9, 1 }
 0x2d1   :  { %24940 = vst [vmem:[#allocation126_spill] sm:$0xff] %v19530_v38  ;;  %24941 = vst [vmem:[#allocation127_spill] sm:$0xff] %v19538_v12  ;;  %16690 = vpow2.f32 %v4819_v3  ;;  %v19544_v14 = vrot.slane %v638_v33, %v17359_v27  ;;  %v19548_v24 = vsel %vm2485_vm8, %v2389_v11, %v2581_v22  ;;  %v19551_v23 = vsub.f32 %v19330_v13, %v10487_v18  ;;  %v2189_v41 = vpop.permute.xlu1 %2188 }
 0x2d2   :  { %v4831_v54 = vmul.f32 1.442695, %v24942_v32  ;;  %24943 = vst [vmem:[#allocation128_spill] sm:$0xff] %v19548_v24  ;;  %v2419_v10 = vadd.f32 %v2185_v43, %v19536_v20  ;;  %v3007_v3 = vcombine.low %v19530_v38, %v19528_v40  ;;  %v19559_v36 = vadd.f32 %v24945_v56, %v19422_v9 }
 0x2d3   :  { %24944 = vst [vmem:[#allocation129_spill] sm:$0xff] %v19551_v23  ;;  %v24946_v33 = vrot.slane %v19427_v19, 1  ;;  %v24947_v13 = vrot.slane %v19433_v42, 2  ;;  %v24948_v18 = vrot.slane %v19439_v2, %v17359_v27  ;;  %v8431_v9 = vrot.slane %v8424_v28, %v17359_v27 }
 0x2d4   :  { %v14397_v56 = vrot.slane %v19538_v12, %v17359_v27  ;;  %16692 = vpow2.f32 %v4831_v54  ;;  %v24950_v2 = vrot.slane %v19436_v50, 4  ;;  %v2609_v49 = vmul.f32 0.2, %v2417_v63  ;;  %v24951_v54 = vld [vmem:[#allocation71_spill] sm:$0xff] }
 0x2d5   :  { %v19564_v32 = vadd.f32 %v24946_v33, %v19427_v19  ;;  %v19570_v22 = vadd.f32 %v24947_v13, %v19433_v42  ;;  %v19576_v43 = vsel %vm9564_vm5, %v24948_v18, 0.0  ;;  %v2418_v19 = vadd.f32 %v2183_v45, %v19544_v14  ;;  %v19586_v62 = vpop.eup %16682 }
 0x2d6   :  { %v4839_v33 = vmul.f32 1.442695, %v18965_v4  ;;  %v3021_v42 = vrot.slane %v19548_v24, %v17359_v27  ;;  %v3014_v13 = vrot.slane %v3007_v3, %v17359_v27  ;;  %24949 = vst [vmem:[#allocation130_spill] sm:$0xff] %v19586_v62  ;;  %v19591_v18 = vadd.f32 %v24950_v2, %v19436_v50  ;;  %v24952_v3 = vld [vmem:[#allocation11_spill] sm:$0xff] }
 0x2d7   :  { %v19593_v28 = vcombine.low %v14390_v48, %v14397_v56  ;;  %v2611_v11 = vmul.f32 0.2, %v2419_v10  ;;  %v8455_v45 = vcombine.low %v24951_v54, %v19064_v60  ;;  %vm2513_vm9 = vcmp.gt.f32.partialorder %v2417_v63, 0.0  ;;  %v24954_v48 = vld [vmem:[#allocation99_spill] sm:$0xff] }
 0x2d8   :  { %vm2515_vm10 = vcmp.gt.f32.partialorder %v2419_v10, 0.0  ;;  %v3022_v4 = vcombine.low %v3014_v13, %v3021_v42  ;;  %v10150_v7 = vcombine.high %v24952_v3, %v24952_v3  ;;  %vm2514_vm12 = vcmp.gt.f32.partialorder %v2418_v19, 0.0  ;;  %v19600_v23 = vpop.eup %16684 }
 0x2d9   :  { %v2610_v47 = vmul.f32 0.2, %v2418_v19  ;;  %24953 = vst [vmem:[#allocation71_spill] sm:$0xff] %v19600_v23  ;;  %v19603_v50 = vsel %vm3614_vm11, %v8431_v9, 0.0  ;;  %16694 = vpow2.f32 %v4839_v33  ;;  %v24955_v56 = vsub.f32 %v18918_v44, %v24954_v48 }
 0x2da   :  { %v3029_v2 = vrot.slane %v3022_v4, %v17359_v27  ;;  %v19609_v42 = vpop.eup %16686  ;;  %v19613_v54 = vsel %vm2513_vm9, %v2417_v63, %v2609_v49  ;;  %v19615_v3 = vsel %vm2515_vm10, %v2419_v10, %v2611_v11  ;;  %v8462_v33 = vrot.slane %v8455_v45, %v17359_v27  ;;  %v24961_v63 = vld [vmem:[#allocation15_spill] sm:$0xff] }
 0x2db   :  { %v4891_v60 = vmul.f32 1.442695, %v24955_v56  ;;  %24956 = vst [vmem:[#allocation11_spill] sm:$0xff] %v19609_v42  ;;  %24957 = vst [vmem:[#allocation99_spill] sm:$0xff] %v19613_v54  ;;  %v19617_v12 = vsel %vm2514_vm12, %v2418_v19, %v2610_v47  ;;  %v19619_v9 = vpop.eup %16688  ;;  %5749 = vperm.xlu1 %16512, %v19609_v42   ;;  %v8469_v49 = vrot.slane %v24961_v63, %v17359_v27  ;;  %v24962_v19 = vld [vmem:[#allocation32_spill] sm:$0xff]  ;;  %v24965_v42 = vld [vmem:[#allocation59_spill] sm:$0xff] }
 0x2dc   :  { %24958 = vst [vmem:[#allocation131_spill] sm:$0xff] %v19615_v3  ;;  %24959 = vst [vmem:[#allocation132_spill] sm:$0xff] %v19617_v12  ;;  %v3664_v48 = vsel %vm3614_vm11, %v3029_v2, -inf  ;;  %v9614_v56 = vsel %vm9564_vm5, %v3029_v2, -inf  ;;  %v3237_v4 = vcombine.low %v19613_v54, %v19617_v12  ;;  %v10164_v10 = vrot.slane %v10150_v7, %v17359_v27 }
 0x2dd   :  { %24960 = vst [vmem:[#allocation133_spill] sm:$0xff] %v19619_v9  ;;  %v3665_v47 = vrot.slane %v3664_v48, 4  ;;  %v9615_v11 = vrot.slane %v9614_v56, 4  ;;  %16696 = vpow2.f32 %v4891_v60  ;;  %v4899_v13 = vmul.f32 1.442695, %v24962_v19  ;;  %v24963_v60 = vld [vmem:[#allocation70_spill] sm:$0xff] }
 0x2de   :  { %v3251_v45 = vrot.slane %v19615_v3, %v17359_v27  ;;  %v3244_v2 = vrot.slane %v3237_v4, %v17359_v27  ;;  %v19634_v46 = vpop.eup %16690  ;;  %v14429_v58 = vcombine.low %v19586_v62, %v19600_v23  ;;  %v19640_v17 = vcombine.low %v8462_v33, %v8469_v49  ;;  %v24964_v19 = vld [vmem:[#allocation60_spill] sm:$0xff] }
 0x2df   :  { %v3666_v7 = vmax.f32 %v3664_v48, %v3665_v47  ;;  %v9616_v0 = vmax.f32 %v9614_v56, %v9615_v11  ;;  %v10695_v25 = vsub.f32 %v24964_v19, %v24963_v60  ;;  %v672_v61 = vcombine.high %v19536_v20, %v19536_v20  ;;  %5083 = vperm.xlu1 %16512, %v19634_v46   ;;  %v2191_v48 = vpop.permute.xlu0 %2190 }
 0x2e0   :  { %v3252_v4 = vcombine.low %v3244_v2, %v3251_v45  ;;  %v10696_v59 = vsub.f32 %v24965_v42, %v10164_v10  ;;  %v670_v23 = vcombine.high %v19544_v14, %v19544_v14  ;;  %16698 = vpow2.f32 %v4899_v13  ;;  %v24967_v42 = vld [vmem:[#allocation12_spill] sm:$0xff]  ;;  %v24968_v45 = vld [vmem:[#allocation30_spill] sm:$0xff] }
 0x2e1   :  { %v3667_v63 = vrot.slane %v3666_v7, 2  ;;  %v9617_v62 = vrot.slane %v9616_v0, 2  ;;  %v2421_v33 = vadd.f32 %v2189_v41, %v672_v61  ;;  %v19653_v49 = vrot.slane %v19447_v15, %v17359_v27  ;;  %v19655_v20 = vpop.eup %16692 }
 0x2e2   :  { %v3259_v56 = vrot.slane %v3252_v4, %v17359_v27  ;;  %v19658_v47 = vrot.slane %v14429_v58, %v17359_v27  ;;  %v2420_v10 = vadd.f32 %v24967_v42, %v670_v23  ;;  %v4246_v2 = vcombine.high %v24968_v45, %v24968_v45  ;;  %v24969_v23 = vld [vmem:[#allocation97_spill] sm:$0xff] }
 0x2e3   :  { %24966 = vst [vmem:[#allocation15_spill] sm:$0xff] %v19653_v49  ;;  %v3668_v11 = vmax.f32 %v3666_v7, %v3667_v63  ;;  %v9618_v14 = vmax.f32 %v9616_v0, %v9617_v62  ;;  %v2422_v13 = vadd.f32 %v2191_v48, %v19653_v49  ;;  %5137 = vperm.xlu1 %16512, %v19655_v20   ;;  %v10833_v29 = vmul.f32 1.442695, %v10695_v25 }
 0x2e4   :  { %v3734_v61 = vsel %vm3614_vm11, %v3259_v56, -inf  ;;  %v9684_v41 = vsel %vm9564_vm5, %v3259_v56, -inf  ;;  %v10835_v44 = vmul.f32 1.442695, %v10696_v59  ;;  %v4238_v0 = vcombine.high %v24969_v23, %v24969_v23  ;;  %v24971_v23 = vld [vmem:[#allocation73_spill] sm:$0xff] }
 0x2e5   :  { %v3669_v60 = vrot.slane %v3668_v11, 1  ;;  %v9619_v19 = vrot.slane %v9618_v14, 1  ;;  %v3735_v4 = vrot.slane %v3734_v61, 4  ;;  %v9685_v58 = vrot.slane %v9684_v41, 4 }
 0x2e6   :  { %v2613_v62 = vmul.f32 0.2, %v2421_v33  ;;  %v19669_v63 = vpop.eup %16694  ;;  %vm2517_vm13 = vcmp.gt.f32.partialorder %v2421_v33, 0.0  ;;  %vm2516_vm14 = vcmp.gt.f32.partialorder %v2420_v10, 0.0  ;;  %v2612_v48 = vmul.f32 0.2, %v2420_v10 }
 0x2e7   :  { %24970 = vst [vmem:[#allocation32_spill] sm:$0xff] %v19669_v63  ;;  %v3670_v7 = vmax.f32 %v3668_v11, %v3669_v60  ;;  %v9620_v42 = vmax.f32 %v9618_v14, %v9619_v19  ;;  %v3736_v56 = vmax.f32 %v3734_v61, %v3735_v4  ;;  %v9686_v45 = vmax.f32 %v9684_v41, %v9685_v58 }
 0x2e8   :  { %v2614_v52 = vmul.f32 0.2, %v2422_v13  ;;  %5173 = vperm.xlu1 %16512, %v19669_v63   ;;  %v4260_v49 = vrot.slane %v4246_v2, %v17359_v27  ;;  %vm2518_vm15 = vcmp.gt.f32.partialorder %v2422_v13, 0.0  ;;  %v10837_v3 = vmul.f32 1.442695, %v24971_v23  ;;  %v19693_v23 = vpop.permute.xlu1 %2192 }
 0x2e9   :  { %v4038_v25 = vrot.slane %v3670_v7, %v17359_v27  ;;  %v9988_v59 = vrot.slane %v9620_v42, %v17359_v27  ;;  %v24972_v11 = vcombine.high %v24848_v34, %v24848_v34  ;;  %v19680_v61 = vsel %vm2517_vm13, %v2421_v33, %v2613_v62  ;;  %24977 = vst [vmem:[#allocation30_spill] sm:$0xff] %v19693_v23  ;;  %v24978_v62 = vld [vmem:[#allocation90_spill] sm:$0xff]  ;;  %v24979_v34 = vld [vmem:[#allocation23_spill] sm:$0xff] }
 0x2ea   :  { %24973 = vst [vmem:[#allocation70_spill] sm:$0xff] %v19680_v61  ;;  %v3737_v41 = vrot.slane %v3736_v56, 2  ;;  %v19682_v60 = vpop.eup %16696  ;;  %v9687_v58 = vrot.slane %v9686_v45, 2  ;;  %16700 = vpow2.f32 %v10835_v44  ;;  %v19688_v7 = vsel %vm2516_vm14, %v2420_v10, %v2612_v48 }
 0x2eb   :  { %v687_v14 = vrot.slane %v24972_v11, %v17359_v27  ;;  %24974 = vst [vmem:[#allocation60_spill] sm:$0xff] %v19682_v60  ;;  %v4039_v19 = vcombine.high %v4038_v25, %v4038_v25  ;;  %v19685_v2 = vrot.slane %v4038_v25, %v17359_v27  ;;  %v9989_v4 = vcombine.high %v9988_v59, %v9988_v59 }
 0x2ec   :  { %24975 = vst [vmem:[#allocation59_spill] sm:$0xff] %v19688_v7  ;;  %v19691_v42 = vrot.slane %v9988_v59, %v17359_v27  ;;  %v19695_v33 = vsel %vm2518_vm15, %v2422_v13, %v2614_v52  ;;  %5407 = vperm.xlu1 %16512, %v19682_v60   ;;  %v4750_v11 = vsub.f32 %v24978_v62, %v4238_v0  ;;  %v24983_v60 = vld [vmem:[#allocation24_spill] sm:$0xff]  ;;  %v24984_v62 = vld [vmem:[#allocation81_spill] sm:$0xff]  ;;  %16702 = vpow2.f32 %v10833_v29 }
 0x2ed   :  { %v4752_v25 = vsub.f32 %v24979_v34, %v4260_v49  ;;  %v3260_v63 = vcombine.low %v19688_v7, %v19680_v61  ;;  %v19703_v44 = vrot.slane %v4039_v19, %v17359_v27  ;;  %v4724_v10 = vsub.f32 %v19530_v38, %v19685_v2  ;;  %v19712_v59 = vpop.eup %16698 }
 0x2ee   :  { %24976 = vst [vmem:[#allocation12_spill] sm:$0xff] %v19691_v42  ;;  %v19708_v48 = vrot.slane %v9989_v4, %v17359_v27  ;;  %v3738_v13 = vmax.f32 %v3736_v56, %v3737_v41  ;;  %24982 = vst [vmem:[#allocation134_spill] sm:$0xff] %v19712_v59  ;;  %v9688_v0 = vmax.f32 %v9686_v45, %v9687_v58  ;;  %16704 = vpow2.f32 %v10837_v3 }
 0x2ef   :  { %24980 = vst [vmem:[#allocation97_spill] sm:$0xff] %v19703_v44  ;;  %v689_v34 = vcombine.high %v687_v14, %v687_v14  ;;  %v3274_v19 = vrot.slane %v19695_v33, %v17359_v27  ;;  %v8478_v61 = vcombine.low %v24984_v62, %v24983_v60  ;;  %v4841_v4 = vmul.f32 1.442695, %v4724_v10  ;;  %v2201_v10 = vpop.permute.xlu1 %2200 }
 0x2f0   :  { %24981 = vst [vmem:[#allocation73_spill] sm:$0xff] %v19708_v48  ;;  %5443 = vperm.xlu1 %16512, %v19712_v59   ;;  %v24985_v45 = vrot.slane %v19619_v9, %v17359_v27  ;;  %v3267_v58 = vrot.slane %v3260_v63, %v17359_v27  ;;  %v4893_v60 = vmul.f32 1.442695, %v4750_v11  ;;  %v4897_v29 = vmul.f32 1.442695, %v4752_v25  ;;  %v24988_v25 = vld [vmem:[#allocation69_spill] sm:$0xff] }
 0x2f1   :  { %16706 = vpow2.f32 %v4841_v4  ;;  %v3739_v62 = vrot.slane %v3738_v13, 1  ;;  %v4468_v23 = vcombine.high %v19340_v57, %v19340_v57  ;;  %v9689_v52 = vrot.slane %v9688_v0, 1  ;;  %v24989_v4 = vld [vmem:[#allocation8_spill] sm:$0xff]  ;;  %v24992_v59 = vld [vmem:[#allocation13_spill] sm:$0xff] }
 0x2f2   :  { %v19729_v41 = vcombine.low %v19658_v47, %v24985_v45  ;;  %v19735_v49 = vrot.slane %v689_v34, %v17359_v27  ;;  %v3275_v56 = vcombine.low %v3267_v58, %v3274_v19  ;;  %v8485_v9 = vrot.slane %v8478_v61, %v17359_v27  ;;  %v24987_v47 = vld [vmem:[#allocation100_spill] sm:$0xff]  ;;  %v24991_v34 = vld [vmem:[#allocation67_spill] sm:$0xff] }
 0x2f3   :  { %v8492_v3 = vrot.slane %v24987_v47, %v17359_v27  ;;  %v703_v63 = vrot.slane %v687_v14, %v17359_v27  ;;  %v3740_v11 = vmax.f32 %v3738_v13, %v3739_v62  ;;  %v24990_v45 = vsub.f32 %v24988_v25, %v24989_v4  ;;  %v24994_v61 = vld [vmem:[#allocation28_spill] sm:$0xff] }
 0x2f4   :  { %24986 = vst [vmem:[#allocation24_spill] sm:$0xff] %v19735_v49  ;;  %v9690_v38 = vmax.f32 %v9688_v0, %v9689_v52  ;;  %v2427_v57 = vadd.f32 %v2201_v10, %v19735_v49  ;;  %v3282_v42 = vrot.slane %v3275_v56, %v17359_v27  ;;  %v24993_v19 = vsub.f32 %v24991_v34, %v24992_v59  ;;  %v24995_v14 = vld [vmem:[#allocation112_spill] sm:$0xff]  ;;  %v2203_v59 = vpop.permute.xlu0 %2202 }
 0x2f5   :  { %v10893_v48 = vmul.f32 1.442695, %v24990_v45  ;;  %16708 = vpow2.f32 %v4893_v60  ;;  %v2426_v44 = vadd.f32 %v24994_v61, %v703_v63  ;;  %v4268_v47 = vrot.slane %v3740_v11, %v17359_v27 }
 0x2f6   :  { %v10895_v58 = vmul.f32 1.442695, %v24993_v19  ;;  %16710 = vpow2.f32 %v4897_v29  ;;  %v4780_v13 = vsub.f32 %v24995_v14, %v4468_v23  ;;  %v10218_v62 = vrot.slane %v9690_v38, %v17359_v27 }
 0x2f7   :  { %v3741_v52 = vsel %vm3614_vm11, %v3282_v42, -inf  ;;  %v4269_v0 = vcombine.high %v4268_v47, %v4268_v47  ;;  %v19755_v10 = vrot.slane %v4268_v47, %v17359_v27  ;;  %v719_v25 = vcombine.high %v703_v63, %v703_v63  ;;  %v19757_v4 = vpop.eup %16700 }
 0x2f8   :  { %v3742_v56 = vrot.slane %v3741_v52, 4  ;;  %24996 = vst [vmem:[#allocation81_spill] sm:$0xff] %v19757_v4  ;;  %v10219_v60 = vcombine.high %v10218_v62, %v10218_v62  ;;  %v19760_v45 = vrot.slane %v10218_v62, %v17359_v27  ;;  %vm2523_vm0 = vcmp.gt.f32.partialorder %v2427_v57, 0.0 }
 0x2f9   :  { %v9691_v23 = vsel %vm9564_vm5, %v3282_v42, -inf  ;;  %v19764_v38 = vrot.slane %v4269_v0, %v17359_v27  ;;  %v4754_v29 = vsub.f32 %v19613_v54, %v19755_v10  ;;  %v2619_v11 = vmul.f32 0.2, %v2427_v57  ;;  %v19775_v49 = vpop.eup %16702  ;;  %v25003_v42 = vld [vmem:[#allocation27_spill] sm:$0xff] }
 0x2fa   :  { %24997 = vst [vmem:[#allocation100_spill] sm:$0xff] %v19760_v45  ;;  %v3743_v34 = vmax.f32 %v3741_v52, %v3742_v56  ;;  %v19769_v63 = vrot.slane %v10219_v60, %v17359_v27  ;;  %v9692_v61 = vrot.slane %v9691_v23, 4  ;;  %v2428_v47 = vadd.f32 %v2203_v59, %v719_v25  ;;  %24999 = vst [vmem:[#allocation8_spill] sm:$0xff] %v19775_v49 }
 0x2fb   :  { %v2618_v62 = vmul.f32 0.2, %v2426_v44  ;;  %v4901_v14 = vmul.f32 1.442695, %v4754_v29  ;;  %16712 = vpow2.f32 %v10895_v58  ;;  %vm2522_vm1 = vcmp.gt.f32.partialorder %v2426_v44, 0.0  ;;  %v19779_v60 = vpop.eup %16704 }
 0x2fc   :  { %24998 = vst [vmem:[#allocation69_spill] sm:$0xff] %v19769_v63  ;;  %v3744_v0 = vrot.slane %v3743_v34, 2  ;;  %v9693_v56 = vmax.f32 %v9691_v23, %v9692_v61  ;;  %25000 = vst [vmem:[#allocation67_spill] sm:$0xff] %v19779_v60  ;;  %v4953_v40 = vmul.f32 1.442695, %v4780_v13  ;;  %v19782_v25 = vsel %vm2523_vm0, %v2427_v57, %v2619_v11  ;;  %v25012_v63 = vld [vmem:[#allocation84_spill] sm:$0xff] }
 0x2fd   :  { %16714 = vpow2.f32 %v4901_v14  ;;  %25001 = vst [vmem:[#allocation13_spill] sm:$0xff] %v19782_v25  ;;  %v14452_v29 = vcombine.low %v19775_v49, %v19757_v4  ;;  %v10897_v58 = vmul.f32 1.442695, %v25003_v42  ;;  %vm2524_vm2 = vcmp.gt.f32.partialorder %v2428_v47, 0.0  ;;  %v25011_v49 = vld [vmem:[#allocation64_spill] sm:$0xff] }
 0x2fe   :  { %v3745_v59 = vmax.f32 %v3743_v34, %v3744_v0  ;;  %v19784_v19 = vpop.eup %16706  ;;  %v9694_v54 = vrot.slane %v9693_v56, 2  ;;  %16716 = vpow2.f32 %v10893_v48  ;;  %v19789_v52 = vsel %vm2522_vm1, %v2426_v44, %v2618_v62 }
 0x2ff   :  { %25002 = vst [vmem:[#allocation28_spill] sm:$0xff] %v19784_v19  ;;  %25004 = vst [vmem:[#allocation27_spill] sm:$0xff] %v19789_v52  ;;  %v2620_v61 = vmul.f32 0.2, %v2428_v47  ;;  %5182 = vperm.xlu0 %16513, %v19784_v19   ;;  %v14451_v57 = vrot.slane %v19729_v41, %v17359_v27  ;;  %v8493_v14 = vcombine.low %v8485_v9, %v8492_v3  ;;  %16718 = vpow2.f32 %v4953_v40 }
 0x300   :  { %v3746_v23 = vrot.slane %v3745_v59, 1  ;;  %v3306_v13 = vcombine.low %v19789_v52, %v19782_v25  ;;  %v9695_v11 = vmax.f32 %v9693_v56, %v9694_v54  ;;  %v25005_v34 = vsub.f32 %v19220_v6, %v19384_v21 }
 0x301   :  { %v19799_v44 = vsel %vm2524_vm2, %v2428_v47, %v2620_v61  ;;  %v9002_v0 = vrot.slane %v19603_v50, 4  ;;  %v25006_v41 = vrot.slane %v19593_v28, %v17359_v27  ;;  %v25008_v21 = vrot.slane %v19640_v17, %v17359_v27 }
 0x302   :  { %v4957_v42 = vmul.f32 1.442695, %v25005_v34  ;;  %v3747_v48 = vmax.f32 %v3745_v59, %v3746_v23  ;;  %v19801_v62 = vpop.eup %16708  ;;  %v9696_v3 = vrot.slane %v9695_v11, 1  ;;  %v3320_v40 = vrot.slane %v19799_v44, %v17359_v27 }
 0x303   :  { %v14975_v9 = vsel %vm9564_vm5, %v25006_v41, 0.0  ;;  %v19810_v54 = vpop.eup %16710  ;;  %v9015_v47 = vsel %vm3614_vm11, %v25008_v21, 0.0  ;;  %v14459_v56 = vrot.slane %v14452_v29, %v17359_v27  ;;  %16720 = vpow2.f32 %v10897_v58  ;;  %5416 = vperm.xlu0 %16513, %v19801_v62  }
 0x304   :  { %25007 = vst [vmem:[#allocation135_spill] sm:$0xff] %v19810_v54  ;;  %v19818_v59 = vrot.slane %v3747_v48, %v17359_v27  ;;  %v14989_v28 = vsel %vm9564_vm5, %v14451_v57, 0.0  ;;  %v8500_v23 = vrot.slane %v8493_v14, %v17359_v27  ;;  %v3313_v61 = vrot.slane %v3306_v13, %v17359_v27 }
 0x305   :  { %v9697_v34 = vmax.f32 %v9695_v11, %v9696_v3  ;;  %v14976_v41 = vrot.slane %v14975_v9, 4  ;;  %v14466_v17 = vrot.slane %v19779_v60, %v17359_v27  ;;  %16722 = vpow2.f32 %v4957_v42 }
 0x306   :  { %v4299_v29 = vrot.slane %v19818_v59, %v17359_v27  ;;  %v25009_v58 = vrot.slane %v19576_v43, 4  ;;  %v9016_v21 = vrot.slane %v9015_v47, 4  ;;  %v3321_v14 = vcombine.low %v3313_v61, %v3320_v40 }
 0x307   :  { %v19832_v57 = vrot.slane %v9697_v34, %v17359_v27  ;;  %v14990_v4 = vrot.slane %v14989_v28, 4  ;;  %v14467_v13 = vcombine.low %v14459_v56, %v14466_v17  ;;  %5434 = vperm.xlu0 %16513, %v19810_v54   ;;  %v9003_v42 = vadd.f32 %v9002_v0, %v19603_v50 }
 0x308   :  { %v14928_v48 = vadd.f32 %v25009_v58, %v19576_v43  ;;  %v4307_v11 = vcombine.high %v4299_v29, %v4299_v29  ;;  %v4757_v3 = vsub.f32 %v19688_v7, %v4299_v29  ;;  %v9022_v60 = vsel %vm3614_vm11, %v8500_v23, 0.0  ;;  %v19844_v34 = vpop.eup %16712 }
 0x309   :  { %25010 = vst [vmem:[#allocation136_spill] sm:$0xff] %v19832_v57  ;;  %v8708_v45 = vcombine.low %v25012_v63, %v25011_v49  ;;  %v19842_v43 = vrot.slane %v19832_v57, %v17359_v27  ;;  %25014 = vst [vmem:[#allocation84_spill] sm:$0xff] %v19844_v34  ;;  %v8955_v40 = vrot.slane %v19591_v18, 2  ;;  %v14977_v56 = vadd.f32 %v14976_v41, %v14975_v9 }
 0x30a   :  { %v19848_v61 = vsub.f32 %v19695_v33, %v4307_v11  ;;  %v4907_v17 = vmul.f32 1.442695, %v4757_v3  ;;  %v19850_v29 = vpop.eup %16714  ;;  %v14929_v50 = vrot.slane %v14928_v48, 2  ;;  %v9017_v0 = vadd.f32 %v9016_v21, %v9015_v47 }
 0x30b   :  { %25013 = vst [vmem:[#allocation64_spill] sm:$0xff] %v19842_v43  ;;  %25015 = vst [vmem:[#allocation137_spill] sm:$0xff] %v19850_v29  ;;  %v10257_v49 = vcombine.high %v19842_v43, %v19842_v43  ;;  %v3328_v63 = vrot.slane %v3321_v14, %v17359_v27  ;;  %v14991_v23 = vadd.f32 %v14990_v4, %v14989_v28  ;;  %v9023_v58 = vrot.slane %v9022_v60, 4  ;;  %v19857_v9 = vpop.eup %16716  ;;  %v25019_v43 = vld [vmem:[#allocation47_spill] sm:$0xff] }
 0x30c   :  { %v14474_v7 = vrot.slane %v14467_v13, %v17359_v27  ;;  %16724 = vpow2.f32 %v4907_v17  ;;  %5452 = vperm.xlu0 %16513, %v19850_v29   ;;  %25016 = vst [vmem:[#allocation138_spill] sm:$0xff] %v19857_v9  ;;  %v14917_v41 = vrot.slane %v19570_v22, 1  ;;  %v9004_v11 = vrot.slane %v9003_v42, 2  ;;  %v19868_v14 = vpop.eup %16718 }
 0x30d   :  { %v8715_v3 = vrot.slane %v8708_v45, %v17359_v27  ;;  %v19862_v47 = vsub.f32 %v19695_v33, %v10257_v49  ;;  %16726 = vrcp.f32 %v19559_v36  ;;  %v8956_v4 = vadd.f32 %v8955_v40, %v19591_v18  ;;  %25018 = vst [vmem:[#allocation140_spill] sm:$0xff] %v19868_v14 }
 0x30e   :  { %v14978_v28 = vrot.slane %v14977_v56, 2  ;;  %v14682_v21 = vcombine.low %v19857_v9, %v19844_v34  ;;  %v14930_v13 = vadd.f32 %v14929_v50, %v14928_v48  ;;  %v9018_v17 = vrot.slane %v9017_v0, 2 }
 0x30f   :  { %25017 = vst [vmem:[#allocation139_spill] sm:$0xff] %v19862_v47  ;;  %v8722_v57 = vrot.slane %v25019_v43, %v17359_v27  ;;  %v3755_v45 = vsel %vm3614_vm11, %v3328_v63, -inf  ;;  %16728 = vrcp.f32 %v19564_v32  ;;  %v14992_v33 = vrot.slane %v14991_v23, 2 }
 0x310   :  { %v9024_v49 = vadd.f32 %v9023_v58, %v9022_v60  ;;  %v14996_v36 = vsel %vm9564_vm5, %v14474_v7, 0.0  ;;  %5686 = vperm.xlu0 %16513, %v19868_v14   ;;  %v19876_v18 = vpop.eup %16720  ;;  %v25021_v40 = vrot.slane %v19457_v31, 1  ;;  %v14918_v50 = vadd.f32 %v14917_v41, %v19570_v22 }
 0x311   :  { %25020 = vst [vmem:[#allocation47_spill] sm:$0xff] %v19876_v18  ;;  %v9005_v34 = vadd.f32 %v9004_v11, %v9003_v42  ;;  %v8723_v43 = vcombine.low %v8715_v3, %v8722_v57  ;;  %v8957_v9 = vrot.slane %v8956_v4, 1  ;;  %v14979_v47 = vadd.f32 %v14978_v28, %v14977_v56 }
 0x312   :  { %v8944_v48 = vadd.f32 %v25021_v40, %v19457_v31  ;;  %v14689_v32 = vrot.slane %v14682_v21, %v17359_v27  ;;  %v3756_v6 = vrot.slane %v3755_v45, 4  ;;  %v19883_v60 = vpop.eup %16722  ;;  %v14931_v7 = vrot.slane %v14930_v13, 1  ;;  %v19890_v40 = vpop.permute.xlu1 %2204 }
 0x313   :  { %25022 = vst [vmem:[#allocation141_spill] sm:$0xff] %v19883_v60  ;;  %v9019_v58 = vadd.f32 %v9018_v17, %v9017_v0  ;;  %v14997_v29 = vrot.slane %v14996_v36, 4  ;;  %v9705_v19 = vsel %vm9564_vm5, %v3328_v63, -inf  ;;  %v14993_v14 = vadd.f32 %v14992_v33, %v14991_v23 }
 0x314   :  { %v9025_v54 = vrot.slane %v9024_v49, 2  ;;  %v14696_v31 = vrot.slane %v19876_v18, %v17359_v27  ;;  %v3757_v22 = vmax.f32 %v3755_v45, %v3756_v6  ;;  %5704 = vperm.xlu0 %16513, %v19883_v60   ;;  %16730 = vrcp.f32 %v8944_v48  ;;  %v25024_v18 = vld [vmem:[#allocation79_spill] sm:$0xff] }
 0x315   :  { %v9006_v57 = vrot.slane %v9005_v34, 1  ;;  %v8730_v42 = vrot.slane %v8723_v43, %v17359_v27  ;;  %v9706_v56 = vrot.slane %v9705_v19, 4  ;;  %v8958_v41 = vadd.f32 %v8957_v9, %v8956_v4 }
 0x316   :  { %v14980_v11 = vrot.slane %v14979_v47, 1  ;;  %v14697_v3 = vcombine.low %v14689_v32, %v14696_v31  ;;  %v3758_v0 = vrot.slane %v3757_v22, 2  ;;  %v14932_v28 = vadd.f32 %v14931_v7, %v14930_v13 }
 0x317   :  { %v9020_v21 = vrot.slane %v9019_v58, 1  ;;  %v14998_v63 = vadd.f32 %v14997_v29, %v14996_v36  ;;  %v9707_v23 = vmax.f32 %v9705_v19, %v9706_v56  ;;  %16732 = vrcp.f32 %v14918_v50 }
 0x318   :  { %v14994_v17 = vrot.slane %v14993_v14, 1  ;;  %v9026_v33 = vadd.f32 %v9025_v54, %v9024_v49  ;;  %v3759_v6 = vmax.f32 %v3757_v22, %v3758_v0  ;;  %v9007_v48 = vadd.f32 %v9006_v57, %v9005_v34  ;;  %v19901_v34 = vpop.permute.xlu0 %2210 }
 0x319   :  { %v19892_v45 = vpop.eup %16724  ;;  %v9092_v43 = vsel %vm3614_vm11, %v8730_v42, 0.0  ;;  %v835_v9 = vcombine.high %v25024_v18, %v25024_v18  ;;  %v9708_v4 = vrot.slane %v9707_v23, 2  ;;  %16734 = vrcp.f32 %v8958_v41 }
 0x31a   :  { %25023 = vst [vmem:[#allocation142_spill] sm:$0xff] %v19892_v45  ;;  %v14981_v13 = vadd.f32 %v14980_v11, %v14979_v47  ;;  %v14704_v29 = vrot.slane %v14697_v3, %v17359_v27  ;;  %v3760_v19 = vrot.slane %v3759_v6, 1  ;;  %5479 = vperm.xlu1 %16512, %v19892_v45   ;;  %v19899_v54 = vpop.eup %16726  ;;  %16736 = vrcp.f32 %v14932_v28  ;;  %v25027_v47 = vld [vmem:[#allocation33_spill] sm:$0xff]  ;;  %v2245_v11 = vpop.permute.xlu1 %2244 }
 0x31b   :  { %25025 = vst [vmem:[#allocation79_spill] sm:$0xff] %v19899_v54  ;;  %v9021_v49 = vadd.f32 %v9020_v21, %v9019_v58  ;;  %v14999_v36 = vrot.slane %v14998_v63, 2  ;;  %v9709_v50 = vmax.f32 %v9707_v23, %v9708_v4  ;;  %v14995_v32 = vadd.f32 %v14994_v17, %v14993_v14 }
 0x31c   :  { %v9027_v7 = vrot.slane %v9026_v33, 1  ;;  %v9093_v31 = vrot.slane %v9092_v43, 4  ;;  %v3761_v18 = vmax.f32 %v3759_v6, %v3760_v19  ;;  %v19903_v22 = vpop.eup %16728  ;;  %16738 = vrcp.f32 %v9007_v48  ;;  %v25028_v6 = vld [vmem:[#allocation114_spill] sm:$0xff] }
 0x31d   :  { %25026 = vst [vmem:[#allocation143_spill] sm:$0xff] %v19903_v22  ;;  %v876_v57 = vrot.slane %v25027_v47, %v17359_v27  ;;  %v857_v42 = vrot.slane %v835_v9, %v17359_v27  ;;  %v9710_v56 = vrot.slane %v9709_v50, 1  ;;  %16740 = vrcp.f32 %v14981_v13  ;;  %v2243_v13 = vpop.permute.xlu0 %2242  ;;  %v25035_v22 = vld [vmem:[#allocation34_spill] sm:$0xff] }
 0x31e   :  { %v15066_v58 = vsel %vm9564_vm5, %v14704_v29, 0.0  ;;  %v19910_v41 = vrot.slane %v3761_v18, %v17359_v27  ;;  %16742 = vrcp.f32 %v9021_v49  ;;  %v19912_v14 = vadd.f32 %v14999_v36, %v14998_v63  ;;  %v25030_v29 = vld [vmem:[#allocation36_spill] sm:$0xff] }
 0x31f   :  { %v9711_v0 = vmax.f32 %v9709_v50, %v9710_v56  ;;  %16744 = vrcp.f32 %v14995_v32  ;;  %v19916_v28 = vadd.f32 %v9027_v7, %v9026_v33  ;;  %v19918_v21 = vadd.f32 %v9093_v31, %v9092_v43  ;;  %v25031_v36 = vld [vmem:[#allocation72_spill] sm:$0xff]  ;;  %v25032_v32 = vld [vmem:[#allocation19_spill] sm:$0xff] }
 0x320   :  { %v4345_v23 = vrot.slane %v19910_v41, %v17359_v27  ;;  %v15067_v17 = vrot.slane %v15066_v58, 4  ;;  %v2447_v48 = vadd.f32 %v25028_v6, %v857_v42  ;;  %v867_v9 = vcombine.high %v857_v42, %v857_v42 }
 0x321   :  { %v884_v4 = vcombine.high %v876_v57, %v876_v57  ;;  %v19923_v63 = vpop.eup %16730  ;;  %v868_v19 = vcombine.high %v25030_v29, %v25030_v29  ;;  %v865_v43 = vcombine.high %v25031_v36, %v25031_v36  ;;  %v15001_v50 = vrot.slane %v19912_v14, 1  ;;  %v2257_v29 = vpop.permute.xlu1 %2256 }
 0x322   :  { %25029 = vst [vmem:[#allocation114_spill] sm:$0xff] %v19923_v63  ;;  %v4353_v49 = vcombine.high %v4345_v23, %v4345_v23  ;;  %v4763_v33 = vsub.f32 %v19789_v52, %v4345_v23  ;;  %v9912_v7 = vcombine.high %v25032_v32, %v25032_v32  ;;  %v19934_v31 = vrot.slane %v9711_v0, %v17359_v27 }
 0x323   :  { %v2449_v18 = vadd.f32 %v2245_v11, %v867_v9  ;;  %v2448_v23 = vadd.f32 %v2243_v13, %v865_v43  ;;  %v19942_v36 = vadd.f32 %v15067_v17, %v15066_v58  ;;  %v25036_v52 = vsub.f32 %v25035_v22, %v25032_v32  ;;  %v25043_v32 = vld [vmem:[#allocation58_spill] sm:$0xff] }
 0x324   :  { %25033 = vst [vmem:[#allocation36_spill] sm:$0xff] %v19934_v31  ;;  %v19938_v56 = vsub.f32 %v19799_v44, %v4353_v49  ;;  %v4919_v6 = vmul.f32 1.442695, %v4763_v33  ;;  %v19940_v3 = vpop.eup %16732  ;;  %v2639_v54 = vmul.f32 0.2, %v2447_v48  ;;  %v906_v0 = vrot.slane %v884_v4, %v17359_v27  ;;  %v25041_v4 = vld [vmem:[#allocation16_spill] sm:$0xff] }
 0x325   :  { %25034 = vst [vmem:[#allocation72_spill] sm:$0xff] %v19940_v3  ;;  %v10767_v63 = vmul.f32 1.442695, %v25036_v52  ;;  %v25037_v11 = vsub.f32 %v19233_v16, %v19352_v37  ;;  %v2453_v49 = vadd.f32 %v19451_v8, %v868_v19  ;;  %v19954_v13 = vrot.slane %v19934_v31, %v17359_v27  ;;  %v2255_v19 = vpop.permute.xlu0 %2254  ;;  %v25063_v31 = vld [vmem:[#allocation35_spill] sm:$0xff]  ;;  %v25074_v16 = vld [vmem:[#allocation20_spill] sm:$0xff] }
 0x326   :  { %16746 = vpow2.f32 %v4919_v6  ;;  %v19956_v58 = vpop.eup %16734  ;;  %v10664_v17 = vsub.f32 %v24907_v30, %v9912_v7  ;;  %vm2543_vm3 = vcmp.gt.f32.partialorder %v2447_v48, 0.0  ;;  %v2641_v52 = vmul.f32 0.2, %v2449_v18 }
 0x327   :  { %v4951_v9 = vmul.f32 1.442695, %v25037_v11  ;;  %25038 = vst [vmem:[#allocation19_spill] sm:$0xff] %v19954_v13  ;;  %25039 = vst [vmem:[#allocation34_spill] sm:$0xff] %v19956_v58  ;;  %v2455_v22 = vadd.f32 %v2257_v29, %v906_v0  ;;  %v19959_v33 = vpop.eup %16736  ;;  %v25042_v37 = vsub.f32 %v18724_v1, %v25041_v4  ;;  %v10303_v8 = vcombine.high %v19954_v13, %v19954_v13 }
 0x328   :  { %25040 = vst [vmem:[#allocation144_spill] sm:$0xff] %v19959_v33  ;;  %vm2545_vm4 = vcmp.gt.f32.partialorder %v2449_v18, 0.0  ;;  %vm2544_vm6 = vcmp.gt.f32.partialorder %v2448_v23, 0.0  ;;  %16748 = vpow2.f32 %v10767_v63  ;;  %v4959_v6 = vmul.f32 1.442695, %v25043_v32 }
 0x329   :  { %v10769_v43 = vmul.f32 1.442695, %v25042_v37  ;;  %v892_v30 = vrot.slane %v876_v57, %v17359_v27  ;;  %v2640_v7 = vmul.f32 0.2, %v2448_v23  ;;  %v19968_v11 = vpop.eup %16738  ;;  %v19970_v29 = vsel %vm2543_vm3, %v2447_v48, %v2639_v54 }
 0x32a   :  { %25044 = vst [vmem:[#allocation16_spill] sm:$0xff] %v19968_v11  ;;  %25045 = vst [vmem:[#allocation58_spill] sm:$0xff] %v19970_v29  ;;  %16750 = vpow2.f32 %v4951_v9  ;;  %v2645_v42 = vmul.f32 0.2, %v2453_v49  ;;  %v19973_v1 = vsub.f32 %v19799_v44, %v10303_v8  ;;  %v19975_v4 = vpop.eup %16740  ;;  %v19977_v37 = vsel %vm2545_vm4, %v2449_v18, %v2641_v52  ;;  %v2261_v18 = vpop.permute.xlu1 %2260 }
 0x32b   :  { %25047 = vst [vmem:[#allocation146_spill] sm:$0xff] %v19975_v4  ;;  %v2647_v33 = vmul.f32 0.2, %v2455_v22  ;;  %v19979_v63 = vsel %vm2544_vm6, %v2448_v23, %v2640_v7  ;;  %v2454_v32 = vadd.f32 %v2255_v19, %v892_v30  ;;  %v19981_v3 = vpop.eup %16742  ;;  %16752 = vpow2.f32 %v10769_v43 }
 0x32c   :  { %25046 = vst [vmem:[#allocation145_spill] sm:$0xff] %v19973_v1  ;;  %25048 = vst [vmem:[#allocation147_spill] sm:$0xff] %v19979_v63  ;;  %vm2549_vm7 = vcmp.gt.f32.partialorder %v2453_v49, 0.0  ;;  %vm2551_vm8 = vcmp.gt.f32.partialorder %v2455_v22, 0.0  ;;  %v3467_v54 = vcombine.low %v19970_v29, %v19979_v63  ;;  %v19985_v57 = vpop.eup %16744  ;;  %v10771_v44 = vmul.f32 1.442695, %v10664_v17 }
 0x32d   :  { %25049 = vst [vmem:[#allocation148_spill] sm:$0xff] %v19981_v3  ;;  %25050 = vst [vmem:[#allocation149_spill] sm:$0xff] %v19985_v57  ;;  %16754 = vpow2.f32 %v4959_v6  ;;  %v4971_v48 = vmul.f32 1.442695, %v19509_v39  ;;  %vm2550_vm9 = vcmp.gt.f32.partialorder %v2454_v32, 0.0  ;;  %v3481_v23 = vrot.slane %v19977_v37, %v17359_v27 }
 0x32e   :  { %v3474_v9 = vrot.slane %v3467_v54, %v17359_v27  ;;  %v916_v52 = vcombine.high %v906_v0, %v906_v0  ;;  %v2646_v43 = vmul.f32 0.2, %v2454_v32  ;;  %16756 = vrcp.f32 %v19916_v28  ;;  %v25054_v0 = vld [vmem:[#allocation40_spill] sm:$0xff] }
 0x32f   :  { %v15002_v8 = vadd.f32 %v15001_v50, %v19912_v14  ;;  %v19993_v19 = vsel %vm2549_vm7, %v2453_v49, %v2645_v42  ;;  %v19995_v7 = vsel %vm2551_vm8, %v2455_v22, %v2647_v33  ;;  %v25053_v57 = vcombine.high %v25027_v47, %v25027_v47 }
 0x330   :  { %25051 = vst [vmem:[#allocation150_spill] sm:$0xff] %v19993_v19  ;;  %v3482_v17 = vcombine.low %v3474_v9, %v3481_v23  ;;  %v2457_v6 = vadd.f32 %v2261_v18, %v916_v52  ;;  %v19997_v39 = vsel %vm2550_vm9, %v2454_v32, %v2646_v43  ;;  %v20007_v54 = vrot.slane %v25054_v0, %v17359_v27 }
 0x331   :  { %25052 = vst [vmem:[#allocation151_spill] sm:$0xff] %v19997_v39  ;;  %v20003_v4 = vrot.slane %v25053_v57, %v17359_v27  ;;  %16758 = vpow2.f32 %v10771_v44  ;;  %v914_v14 = vcombine.high %v892_v30, %v892_v30  ;;  %v3513_v28 = vcombine.low %v19993_v19, %v19997_v39  ;;  %v2263_v44 = vpop.permute.xlu0 %2262 }
 0x332   :  { %v25055_v50 = vrot.slane %v19918_v21, 2  ;;  %v15069_v49 = vrot.slane %v19942_v36, 2  ;;  %16760 = vpow2.f32 %v4971_v48  ;;  %v3489_v22 = vrot.slane %v3482_v17, %v17359_v27 }
 0x333   :  { %v20018_v33 = vpop.eup %16746  ;;  %16762 = vrcp.f32 %v15002_v8  ;;  %v2456_v32 = vadd.f32 %v19431_v53, %v914_v14  ;;  %v3527_v30 = vrot.slane %v19995_v7, %v17359_v27  ;;  %v3520_v57 = vrot.slane %v3513_v28, %v17359_v27  ;;  %v25058_v14 = vld [vmem:[#allocation22_spill] sm:$0xff] }
 0x334   :  { %v20014_v42 = vadd.f32 %v25055_v50, %v19918_v21  ;;  %25056 = vst [vmem:[#allocation152_spill] sm:$0xff] %v20018_v33  ;;  %v3804_v18 = vsel %vm3614_vm11, %v3489_v22, -inf  ;;  %v9754_v21 = vsel %vm9564_vm5, %v3489_v22, -inf  ;;  %v2649_v23 = vmul.f32 0.2, %v2457_v6  ;;  %5533 = vperm.xlu1 %16512, %v20018_v33  }
 0x335   :  { %v20028_v48 = vrot.slane %v20003_v4, %v17359_v27  ;;  %v3805_v9 = vrot.slane %v3804_v18, 4  ;;  %v9755_v52 = vrot.slane %v9754_v21, 4  ;;  %vm2553_vm10 = vcmp.gt.f32.partialorder %v2457_v6, 0.0  ;;  %v20031_v43 = vpop.eup %16748 }
 0x336   :  { %v3528_v53 = vcombine.low %v3520_v57, %v3527_v30  ;;  %25057 = vst [vmem:[#allocation153_spill] sm:$0xff] %v20031_v43  ;;  %v9097_v8 = vrot.slane %v20014_v42, 1  ;;  %v20035_v17 = vadd.f32 %v15069_v49, %v19942_v36  ;;  %v8225_v28 = vcombine.low %v25058_v14, %v19634_v46  ;;  %v25060_v30 = vld [vmem:[#allocation37_spill] sm:$0xff] }
 0x337   :  { %v2458_v50 = vadd.f32 %v2263_v44, %v20028_v48  ;;  %v20040_v22 = vpop.eup %16750  ;;  %v2648_v47 = vmul.f32 0.2, %v2456_v32  ;;  %v3806_v1 = vmax.f32 %v3804_v18, %v3805_v9  ;;  %v9756_v58 = vmax.f32 %v9754_v21, %v9755_v52  ;;  %v25061_v57 = vld [vmem:[#allocation17_spill] sm:$0xff] }
 0x338   :  { %25059 = vst [vmem:[#allocation22_spill] sm:$0xff] %v20040_v22  ;;  %v3535_v13 = vrot.slane %v3528_v53, %v17359_v27  ;;  %v25062_v3 = vsub.f32 %v25060_v30, %v25061_v57  ;;  %v25064_v36 = vsub.f32 %v18733_v51, %v25063_v31  ;;  %vm2552_vm12 = vcmp.gt.f32.partialorder %v2456_v32, 0.0  ;;  %5677 = vperm.xlu1 %16512, %v20040_v22   ;;  %v20052_v46 = vpop.eup %16752 }
 0x339   :  { %v20049_v33 = vsel %vm2553_vm10, %v2457_v6, %v2649_v23  ;;  %25066 = vst [vmem:[#allocation17_spill] sm:$0xff] %v20052_v46  ;;  %v3807_v44 = vrot.slane %v3806_v1, 2  ;;  %v9757_v18 = vrot.slane %v9756_v58, 2  ;;  %vm2554_vm13 = vcmp.gt.f32.partialorder %v2458_v50, 0.0 }
 0x33a   :  { %v10779_v11 = vmul.f32 1.442695, %v25062_v3  ;;  %v10781_v49 = vmul.f32 1.442695, %v25064_v36  ;;  %25065 = vst [vmem:[#allocation37_spill] sm:$0xff] %v20049_v33  ;;  %v3818_v21 = vsel %vm3614_vm11, %v3535_v13, -inf  ;;  %v20056_v52 = vpop.eup %16754  ;;  %v8232_v3 = vrot.slane %v8225_v28, %v17359_v27 }
 0x33b   :  { %v9768_v9 = vsel %vm9564_vm5, %v3535_v13, -inf  ;;  %25067 = vst [vmem:[#allocation35_spill] sm:$0xff] %v20056_v52  ;;  %v3819_v53 = vrot.slane %v3818_v21, 4  ;;  %v20059_v31 = vsel %vm2552_vm12, %v2456_v32, %v2648_v47  ;;  %v3808_v6 = vmax.f32 %v3806_v1, %v3807_v44  ;;  %v20061_v30 = vpop.eup %16756  ;;  %v25071_v44 = vld [vmem:[#allocation87_spill] sm:$0xff] }
 0x33c   :  { %v9769_v51 = vrot.slane %v9768_v9, 4  ;;  %25068 = vst [vmem:[#allocation154_spill] sm:$0xff] %v20059_v31  ;;  %v9758_v23 = vmax.f32 %v9756_v58, %v9757_v18  ;;  %v2650_v14 = vmul.f32 0.2, %v2458_v50  ;;  %25069 = vst [vmem:[#allocation155_spill] sm:$0xff] %v20061_v30  ;;  %v14199_v57 = vcombine.low %v20031_v43, %v20052_v46  ;;  %5713 = vperm.xlu1 %16512, %v20056_v52  }
 0x33d   :  { %v3536_v13 = vcombine.low %v20059_v31, %v20049_v33  ;;  %v3820_v36 = vmax.f32 %v3818_v21, %v3819_v53  ;;  %v8239_v28 = vrot.slane %v19443_v5, %v17359_v27  ;;  %v3809_v47 = vrot.slane %v3808_v6, 1 }
 0x33e   :  { %v9770_v45 = vmax.f32 %v9768_v9, %v9769_v51  ;;  %v9759_v32 = vrot.slane %v9758_v23, 1  ;;  %v20070_v1 = vsel %vm2554_vm13, %v2458_v50, %v2650_v14  ;;  %v20072_v58 = vpop.eup %16758  ;;  %v9966_v18 = vcombine.high %v25071_v44, %v25071_v44 }
 0x33f   :  { %25070 = vst [vmem:[#allocation156_spill] sm:$0xff] %v20072_v58  ;;  %v3821_v46 = vrot.slane %v3820_v36, 2  ;;  %v3550_v21 = vrot.slane %v20070_v1, %v17359_v27  ;;  %v20078_v9 = vpop.eup %16760  ;;  %v20081_v53 = vadd.f32 %v9097_v8, %v20014_v42  ;;  %v8240_v5 = vcombine.low %v8232_v3, %v8239_v28 }
 0x340   :  { %v9771_v43 = vrot.slane %v9770_v45, 2  ;;  %25072 = vst [vmem:[#allocation87_spill] sm:$0xff] %v20078_v9  ;;  %v3810_v51 = vmax.f32 %v3808_v6, %v3809_v47  ;;  %v9760_v30 = vmax.f32 %v9758_v23, %v9759_v32  ;;  %v20083_v50 = vpop.eup %16762  ;;  %v14206_v14 = vrot.slane %v14199_v57, %v17359_v27  ;;  %5767 = vperm.xlu1 %16512, %v20078_v9  }
 0x341   :  { %25073 = vst [vmem:[#allocation157_spill] sm:$0xff] %v20083_v50  ;;  %v10783_v52 = vmul.f32 1.442695, %v25074_v16  ;;  %v3543_v44 = vrot.slane %v3536_v13, %v17359_v27  ;;  %v3822_v60 = vmax.f32 %v3820_v36, %v3821_v46  ;;  %16764 = vpow2.f32 %v10779_v11  ;;  %v20165_v50 = vpop.permute.xlu1 %2264 }
 0x342   :  { %v4498_v22 = vrot.slane %v3810_v51, %v17359_v27  ;;  %v10448_v42 = vrot.slane %v9760_v30, %v17359_v27  ;;  %v9772_v8 = vmax.f32 %v9770_v45, %v9771_v43  ;;  %v14213_v3 = vrot.slane %v20072_v58, %v17359_v27 }
 0x343   :  { %16766 = vpow2.f32 %v10781_v49  ;;  %v20094_v6 = vrot.slane %v9966_v18, %v17359_v27  ;;  %v3551_v23 = vcombine.low %v3543_v44, %v3550_v21  ;;  %v8247_v16 = vrot.slane %v8240_v5, %v17359_v27 }
 0x344   :  { %v4499_v57 = vcombine.high %v4498_v22, %v4498_v22  ;;  %v4506_v46 = vrot.slane %v4498_v22, %v17359_v27  ;;  %v3823_v13 = vrot.slane %v3822_v60, 1  ;;  %v20098_v11 = vcombine.low %v14206_v14, %v14213_v3 }
 0x345   :  { %v4054_v30 = vcombine.high %v19685_v2, %v19685_v2  ;;  %v10449_v45 = vcombine.high %v10448_v42, %v10448_v42  ;;  %v20103_v43 = vrot.slane %v10448_v42, %v17359_v27  ;;  %v9773_v47 = vrot.slane %v9772_v8, 1 }
 0x346   :  { %v20106_v49 = vrot.slane %v4499_v57, %v17359_v27  ;;  %v4514_v36 = vcombine.high %v4506_v46, %v4506_v46  ;;  %v4784_v28 = vsub.f32 %v19970_v29, %v4506_v46  ;;  %v3558_v18 = vrot.slane %v3551_v23, %v17359_v27  ;;  %v25078_v57 = vld [vmem:[#allocation89_spill] sm:$0xff]  ;;  %v25088_v29 = vld [vmem:[#allocation131_spill] sm:$0xff] }
 0x347   :  { %25075 = vst [vmem:[#allocation20_spill] sm:$0xff] %v20103_v43  ;;  %v20110_v32 = vrot.slane %v10449_v45, %v17359_v27  ;;  %v10464_v22 = vcombine.high %v20103_v43, %v20103_v43  ;;  %v3824_v14 = vmax.f32 %v3822_v60, %v3823_v13  ;;  %16768 = vpow2.f32 %v10783_v52  ;;  %v25079_v23 = vld [vmem:[#allocation85_spill] sm:$0xff]  ;;  %v25080_v45 = vld [vmem:[#allocation83_spill] sm:$0xff]  ;;  %v2195_v43 = vpop.permute.xlu0 %2194 }
 0x348   :  { %v20120_v5 = vsub.f32 %v19977_v37, %v4514_v36  ;;  %v4961_v51 = vmul.f32 1.442695, %v4784_v28  ;;  %v688_v44 = vcombine.high %v19447_v15, %v19447_v15  ;;  %v25081_v36 = vsub.f32 %v19315_v26, %v19493_v55  ;;  %v25082_v15 = vld [vmem:[#allocation93_spill] sm:$0xff] }
 0x349   :  { %25076 = vst [vmem:[#allocation158_spill] sm:$0xff] %v20110_v32  ;;  %v20127_v3 = vsub.f32 %v19977_v37, %v10464_v22  ;;  %v20137_v52 = vsel %vm3614_vm11, %v8247_v16, 0.0  ;;  %v8271_v13 = vcombine.low %v25082_v15, %v19655_v20  ;;  %v4726_v28 = vsub.f32 %v19548_v24, %v4054_v30  ;;  %v25089_v24 = vld [vmem:[#allocation15_spill] sm:$0xff] }
 0x34a   :  { %v4969_v60 = vmul.f32 1.442695, %v25081_v36  ;;  %16770 = vpow2.f32 %v4961_v51  ;;  %v14221_v22 = vrot.slane %v20098_v11, %v17359_v27  ;;  %v4544_v42 = vrot.slane %v3824_v14, %v17359_v27 }
 0x34b   :  { %25077 = vst [vmem:[#allocation159_spill] sm:$0xff] %v20127_v3  ;;  %v9774_v21 = vmax.f32 %v9772_v8, %v9773_v47  ;;  %v3825_v55 = vsel %vm3614_vm11, %v3558_v18, -inf  ;;  %v710_v51 = vrot.slane %v688_v44, %v17359_v27  ;;  %v4292_v16 = vcombine.high %v19818_v59, %v19818_v59  ;;  %v25084_v8 = vld [vmem:[#allocation30_spill] sm:$0xff] }
 0x34c   :  { %v3826_v36 = vrot.slane %v3825_v55, 4  ;;  %v9775_v20 = vsel %vm9564_vm5, %v3558_v18, -inf  ;;  %16772 = vpow2.f32 %v4969_v60  ;;  %v4545_v15 = vcombine.high %v4544_v42, %v4544_v42 }
 0x34d   :  { %v4552_v30 = vrot.slane %v4544_v42, %v17359_v27  ;;  %v10494_v46 = vrot.slane %v9774_v21, %v17359_v27  ;;  %v4845_v14 = vmul.f32 1.442695, %v4726_v28  ;;  %v2423_v47 = vadd.f32 %v25084_v8, %v710_v51 }
 0x34e   :  { %v20154_v11 = vpop.eup %16764  ;;  %v3827_v37 = vmax.f32 %v3825_v55, %v3826_v36  ;;  %v9776_v2 = vrot.slane %v9775_v20, 4  ;;  %v4284_v59 = vcombine.high %v19755_v10, %v19755_v10  ;;  %v20162_v18 = vrot.slane %v4545_v15, %v17359_v27 }
 0x34f   :  { %25083 = vst [vmem:[#allocation89_spill] sm:$0xff] %v20154_v11  ;;  %v4560_v60 = vcombine.high %v4552_v30, %v4552_v30  ;;  %v4790_v42 = vsub.f32 %v19993_v19, %v4552_v30  ;;  %v4306_v21 = vrot.slane %v4292_v16, %v17359_v27  ;;  %v10495_v28 = vcombine.high %v10494_v46, %v10494_v46 }
 0x350   :  { %v20157_v44 = vpop.eup %16766  ;;  %v20169_v8 = vrot.slane %v10494_v46, %v17359_v27  ;;  %v3828_v55 = vrot.slane %v3827_v37, 2  ;;  %v9777_v58 = vmax.f32 %v9775_v20, %v9776_v2  ;;  %v4756_v32 = vsub.f32 %v25088_v29, %v4284_v59 }
 0x351   :  { %25085 = vst [vmem:[#allocation85_spill] sm:$0xff] %v20157_v44  ;;  %v20174_v10 = vsub.f32 %v19995_v7, %v4560_v60  ;;  %v4973_v15 = vmul.f32 1.442695, %v4790_v42  ;;  %v20177_v3 = vrot.slane %v10495_v28, %v17359_v27  ;;  %v718_v60 = vcombine.high %v25089_v24, %v25089_v24  ;;  %v25090_v42 = vld [vmem:[#allocation70_spill] sm:$0xff] }
 0x352   :  { %25086 = vst [vmem:[#allocation83_spill] sm:$0xff] %v20169_v8  ;;  %v10510_v30 = vcombine.high %v20169_v8, %v20169_v8  ;;  %v3829_v46 = vmax.f32 %v3827_v37, %v3828_v55  ;;  %v9778_v36 = vrot.slane %v9777_v58, 2  ;;  %v4758_v2 = vsub.f32 %v25090_v42, %v4306_v21 }
 0x353   :  { %25087 = vst [vmem:[#allocation93_spill] sm:$0xff] %v20177_v3  ;;  %16774 = vpow2.f32 %v4973_v15  ;;  %v20195_v37 = vsel %vm9564_vm5, %v14221_v22, 0.0  ;;  %v8278_v59 = vrot.slane %v8271_v13, %v17359_v27  ;;  %v2197_v15 = vpop.permute.xlu1 %2196  ;;  %v2424_v16 = vadd.f32 %v2195_v43, %v718_v60 }
 0x354   :  { %v20190_v28 = vsub.f32 %v19995_v7, %v10510_v30  ;;  %v3830_v26 = vrot.slane %v3829_v46, 1  ;;  %v20192_v9 = vpop.eup %16768  ;;  %v9779_v55 = vmax.f32 %v9777_v58, %v9778_v36  ;;  %vm2519_vm14 = vcmp.gt.f32.partialorder %v2423_v47, 0.0 }
 0x355   :  { %25092 = vst [vmem:[#allocation15_spill] sm:$0xff] %v20192_v9  ;;  %v2615_v21 = vmul.f32 0.2, %v2423_v47  ;;  %v720_v20 = vcombine.high %v710_v51, %v710_v51  ;;  %16776 = vpow2.f32 %v4845_v14  ;;  %v4905_v7 = vmul.f32 1.442695, %v4756_v32 }
 0x356   :  { %25091 = vst [vmem:[#allocation30_spill] sm:$0xff] %v20190_v28  ;;  %v3831_v8 = vmax.f32 %v3829_v46, %v3830_v26  ;;  %v9780_v30 = vrot.slane %v9779_v55, 1  ;;  %v2616_v28 = vmul.f32 0.2, %v2424_v16  ;;  %v4909_v19 = vmul.f32 1.442695, %v4758_v2 }
 0x357   :  { %v20198_v24 = vpop.eup %16770  ;;  %v2425_v3 = vadd.f32 %v2197_v15, %v720_v20  ;;  %vm2520_vm15 = vcmp.gt.f32.partialorder %v2424_v16, 0.0  ;;  %v8946_v58 = vrot.slane %v20137_v52, 4  ;;  %v14245_v43 = vcombine.low %v20154_v11, %v20157_v44 }
 0x358   :  { %5722 = vperm.xlu0 %16513, %v20198_v24   ;;  %v4567_v22 = vrot.slane %v3831_v8, %v17359_v27  ;;  %v25093_v26 = vsub.f32 %v25080_v45, %v20094_v6  ;;  %v9781_v32 = vmax.f32 %v9779_v55, %v9780_v30  ;;  %v14920_v14 = vrot.slane %v20195_v37, 4 }
 0x359   :  { %v20210_v51 = vpop.eup %16772  ;;  %v25094_v8 = vrot.slane %v19481_v35, %v17359_v27  ;;  %v20218_v2 = vsel %vm2519_vm14, %v2423_v47, %v2615_v21  ;;  %16778 = vpow2.f32 %v4905_v7  ;;  %v20221_v45 = vsel %vm2520_vm15, %v2424_v16, %v2616_v28  ;;  %v2209_v35 = vpop.permute.xlu1 %2208 }
 0x35a   :  { %v20208_v13 = vmul.f32 1.442695, %v25093_v26  ;;  %v4568_v46 = vcombine.high %v4567_v22, %v4567_v22  ;;  %v4575_v60 = vrot.slane %v4567_v22, %v17359_v27  ;;  %25095 = vst [vmem:[#allocation160_spill] sm:$0xff] %v20218_v2  ;;  %v10517_v6 = vrot.slane %v9781_v32, %v17359_v27  ;;  %25096 = vst [vmem:[#allocation161_spill] sm:$0xff] %v20221_v45 }
 0x35b   :  { %v8286_v36 = vcombine.low %v8278_v59, %v25094_v8  ;;  %16780 = vpow2.f32 %v4909_v19  ;;  %vm2521_vm0 = vcmp.gt.f32.partialorder %v2425_v3, 0.0  ;;  %v2617_v47 = vmul.f32 0.2, %v2425_v3 }
 0x35c   :  { %5758 = vperm.xlu0 %16513, %v20210_v51   ;;  %v4582_v20 = vrot.slane %v4568_v46, %v17359_v27  ;;  %v4583_v55 = vcombine.high %v4575_v60, %v4575_v60  ;;  %v4793_v59 = vsub.f32 %v20059_v31, %v4575_v60  ;;  %v10518_v15 = vcombine.high %v10517_v6, %v10517_v6  ;;  %v25100_v60 = vld [vmem:[#allocation125_spill] sm:$0xff] }
 0x35d   :  { %v20227_v30 = vrot.slane %v10517_v6, %v17359_v27  ;;  %v3283_v28 = vcombine.low %v20218_v2, %v20221_v45  ;;  %v737_v19 = vcombine.high %v20007_v54, %v20007_v54  ;;  %v8947_v46 = vadd.f32 %v8946_v58, %v20137_v52  ;;  %v25101_v6 = vld [vmem:[#allocation97_spill] sm:$0xff]  ;;  %v25104_v58 = vld [vmem:[#allocation24_spill] sm:$0xff] }
 0x35e   :  { %v4794_v21 = vsub.f32 %v20049_v33, %v4582_v20  ;;  %v4795_v16 = vsub.f32 %v20070_v1, %v4583_v55  ;;  %v4979_v7 = vmul.f32 1.442695, %v4793_v59  ;;  %v20236_v22 = vrot.slane %v10518_v15, %v17359_v27  ;;  %v2207_v59 = vpop.permute.xlu0 %2206 }
 0x35f   :  { %25097 = vst [vmem:[#allocation162_spill] sm:$0xff] %v20227_v30  ;;  %v10533_v26 = vcombine.high %v20227_v30, %v20227_v30  ;;  %v25102_v20 = vsub.f32 %v25100_v60, %v25101_v6  ;;  %v20254_v32 = vsel %vm2521_vm0, %v2425_v3, %v2617_v47  ;;  %v14252_v52 = vrot.slane %v14245_v43, %v17359_v27 }
 0x360   :  { %25098 = vst [vmem:[#allocation163_spill] sm:$0xff] %v20236_v22  ;;  %v20242_v8 = vpop.eup %16774  ;;  %v4981_v44 = vmul.f32 1.442695, %v4794_v21  ;;  %v4983_v11 = vmul.f32 1.442695, %v4795_v16  ;;  %16782 = vpow2.f32 %v4979_v7  ;;  %v721_v6 = vcombine.high %v25104_v58, %v25104_v58  ;;  %v20261_v16 = vpop.permute.xlu1 %2212 }
 0x361   :  { %25099 = vst [vmem:[#allocation164_spill] sm:$0xff] %v20242_v8  ;;  %v4843_v55 = vmul.f32 1.442695, %v25102_v20  ;;  %v20251_v42 = vsub.f32 %v20070_v1, %v10533_v26  ;;  %5776 = vperm.xlu0 %16513, %v20242_v8   ;;  %v3290_v21 = vrot.slane %v3283_v28, %v17359_v27  ;;  %v8293_v7 = vrot.slane %v8286_v36, %v17359_v27 }
 0x362   :  { %16784 = vpow2.f32 %v4981_v44  ;;  %v20266_v1 = vrot.slane %v20007_v54, %v17359_v27  ;;  %v20269_v3 = vrot.slane %v737_v19, %v17359_v27  ;;  %v20271_v47 = vpop.eup %16776  ;;  %v8948_v43 = vrot.slane %v8947_v46, 2 }
 0x363   :  { %25103 = vst [vmem:[#allocation97_spill] sm:$0xff] %v20251_v42  ;;  %16786 = vpow2.f32 %v4983_v11  ;;  %v14259_v44 = vrot.slane %v20192_v9, %v17359_v27  ;;  %v2429_v28 = vadd.f32 %v19890_v40, %v721_v6  ;;  %v3297_v26 = vrot.slane %v20254_v32, %v17359_v27  ;;  %v25107_v6 = vld [vmem:[#allocation92_spill] sm:$0xff] }
 0x364   :  { %16788 = vpow2.f32 %v4843_v55  ;;  %v25105_v54 = vsub.f32 %v19617_v12, %v19764_v38  ;;  %v2431_v11 = vadd.f32 %v2209_v35, %v20269_v3  ;;  %v2430_v19 = vadd.f32 %v2207_v59, %v20266_v1  ;;  %v20289_v55 = vpop.permute.xlu0 %2214 }
 0x365   :  { %5200 = vperm.xlu0 %16513, %v20271_v47   ;;  %v15071_v20 = vrot.slane %v20035_v17, 1  ;;  %v25106_v58 = vsub.f32 %v25079_v23, %v25078_v57  ;;  %v10789_v15 = vmul.f32 1.442695, %v25107_v6  ;;  %v3298_v9 = vcombine.low %v3290_v21, %v3297_v26  ;;  %v20298_v23 = vpop.permute.xlu1 %2216 }
 0x366   :  { %v4903_v36 = vmul.f32 1.442695, %v25105_v54  ;;  %v14921_v38 = vadd.f32 %v14920_v14, %v20195_v37  ;;  %v8959_v54 = vsel %vm3614_vm11, %v8293_v7, 0.0  ;;  %v14260_v35 = vcombine.low %v14252_v52, %v14259_v44  ;;  %v20294_v59 = vpop.eup %16778 }
 0x367   :  { %v10785_v40 = vmul.f32 1.442695, %v25106_v58  ;;  %16790 = vpow2.f32 %v20208_v13  ;;  %v8949_v42 = vadd.f32 %v8948_v43, %v8947_v46  ;;  %v4911_v22 = vmul.f32 1.442695, %v19848_v61 }
 0x368   :  { %v2621_v33 = vmul.f32 0.2, %v2429_v28  ;;  %v3305_v57 = vrot.slane %v3298_v9, %v17359_v27  ;;  %v20300_v21 = vpop.eup %16780  ;;  %16792 = vpow2.f32 %v4903_v36  ;;  %vm2525_vm1 = vcmp.gt.f32.partialorder %v2429_v28, 0.0  ;;  %v20308_v26 = vpop.permute.xlu0 %2266 }
 0x369   :  { %v2623_v37 = vmul.f32 0.2, %v2431_v11  ;;  %v2622_v14 = vmul.f32 0.2, %v2430_v19  ;;  %5470 = vperm.xlu0 %16513, %v20294_v59   ;;  %vm2527_vm2 = vcmp.gt.f32.partialorder %v2431_v11, 0.0  ;;  %vm2526_vm3 = vcmp.gt.f32.partialorder %v2430_v19, 0.0 }
 0x36a   :  { %v3748_v13 = vsel %vm3614_vm11, %v3305_v57, -inf  ;;  %v9698_v52 = vsel %vm9564_vm5, %v3305_v57, -inf  ;;  %v14922_v61 = vrot.slane %v14921_v38, 2  ;;  %v14267_v46 = vrot.slane %v14260_v35, %v17359_v27 }
 0x36b   :  { %16794 = vpow2.f32 %v10785_v40  ;;  %v3749_v9 = vrot.slane %v3748_v13, 4  ;;  %v8960_v7 = vrot.slane %v8959_v54, 4  ;;  %v20306_v43 = vsel %vm2525_vm1, %v2429_v28, %v2621_v33 }
 0x36c   :  { %16796 = vpow2.f32 %v4911_v22  ;;  %25108 = vst [vmem:[#allocation24_spill] sm:$0xff] %v20306_v43  ;;  %v9699_v44 = vrot.slane %v9698_v52, 4  ;;  %v4923_v36 = vmul.f32 1.442695, %v19938_v56  ;;  %v20311_v6 = vsel %vm2527_vm2, %v2431_v11, %v2623_v37  ;;  %v20318_v22 = vpop.permute.xlu1 %2268  ;;  %v25110_v11 = vld [vmem:[#allocation63_spill] sm:$0xff]  ;;  %v25111_v37 = vld [vmem:[#allocation96_spill] sm:$0xff]  ;;  %v20339_v60 = vpop.permute.xlu0 %2218 }
 0x36d   :  { %v3750_v58 = vmax.f32 %v3748_v13, %v3749_v9  ;;  %v20313_v57 = vsel %vm2526_vm3, %v2430_v19, %v2622_v14  ;;  %5488 = vperm.xlu0 %16513, %v20300_v21   ;;  %v16783_v30 = vpop.eup %16782  ;;  %v8950_v35 = vrot.slane %v8949_v42, 1  ;;  %16798 = vpow2.f32 %v10789_v15 }
 0x36e   :  { %25109 = vst [vmem:[#allocation92_spill] sm:$0xff] %v20313_v57  ;;  %v9700_v40 = vmax.f32 %v9698_v52, %v9699_v44  ;;  %v3329_v33 = vcombine.low %v20306_v43, %v20313_v57  ;;  %v14923_v31 = vadd.f32 %v14922_v61, %v14921_v38  ;;  %v14933_v56 = vsel %vm9564_vm5, %v14267_v46, 0.0  ;;  %5803 = vperm.xlu1 %16512, %v16783_v30  }
 0x36f   :  { %v20320_v28 = vpop.eup %16784  ;;  %v8294_v19 = vcombine.low %v25111_v37, %v25110_v11  ;;  %v3751_v14 = vrot.slane %v3750_v58, 2  ;;  %v3343_v9 = vrot.slane %v20311_v6, %v17359_v27  ;;  %v15072_v12 = vadd.f32 %v15071_v20, %v20035_v17 }
 0x370   :  { %v20325_v13 = vpop.eup %16786  ;;  %v8846_v15 = vcombine.low %v16783_v30, %v20320_v28  ;;  %v9701_v52 = vrot.slane %v9700_v40, 2  ;;  %v3336_v44 = vrot.slane %v3329_v33, %v17359_v27  ;;  %v20332_v38 = vadd.f32 %v8960_v7, %v8959_v54 }
 0x371   :  { %16800 = vpow2.f32 %v4923_v36  ;;  %v3752_v61 = vmax.f32 %v3750_v58, %v3751_v14  ;;  %v20334_v46 = vpop.eup %16788  ;;  %v8860_v37 = vrot.slane %v20325_v13, %v17359_v27  ;;  %v14934_v8 = vrot.slane %v14933_v56, 4 }
 0x372   :  { %v8853_v11 = vrot.slane %v8846_v15, %v17359_v27  ;;  %v9702_v30 = vmax.f32 %v9700_v40, %v9701_v52  ;;  %v3344_v29 = vcombine.low %v3336_v44, %v3343_v9  ;;  %v8301_v33 = vrot.slane %v8294_v19, %v17359_v27  ;;  %5191 = vperm.xlu1 %16512, %v20334_v46   ;;  %v20349_v40 = vpop.permute.xlu1 %2220  ;;  %v25113_v15 = vld [vmem:[#allocation32_spill] sm:$0xff] }
 0x373   :  { %v4338_v17 = vcombine.high %v19910_v41, %v19910_v41  ;;  %v3753_v20 = vrot.slane %v3752_v61, 1  ;;  %v8951_v7 = vadd.f32 %v8950_v35, %v8949_v42  ;;  %v14924_v36 = vrot.slane %v14923_v31, 1 }
 0x374   :  { %v20345_v54 = vpop.eup %16790  ;;  %v20347_v58 = vcombine.low %v8853_v11, %v8860_v37  ;;  %v9703_v14 = vrot.slane %v9702_v30, 1  ;;  %16802 = vrcp.f32 %v20081_v53  ;;  %v8308_v19 = vrot.slane %v25113_v15, %v17359_v27  ;;  %v20362_v11 = vpop.permute.xlu0 %4993 }
 0x375   :  { %25112 = vst [vmem:[#allocation63_spill] sm:$0xff] %v20345_v54  ;;  %v3754_v52 = vmax.f32 %v3752_v61, %v3753_v20  ;;  %v20355_v41 = vrot.slane %v3344_v29, %v17359_v27  ;;  %v20357_v9 = vpop.eup %16792  ;;  %v722_v42 = vcombine.high %v25054_v0, %v25054_v0  ;;  %16804 = vrcp.f32 %v15072_v12  ;;  %25114 = vst [vmem:[#allocation96_spill] sm:$0xff] %v20362_v11 }
 0x376   :  { %v9704_v44 = vmax.f32 %v9702_v30, %v9703_v14  ;;  %v8309_v37 = vcombine.low %v8301_v33, %v8308_v19  ;;  %v4352_v53 = vrot.slane %v4338_v17, %v17359_v27  ;;  %5461 = vperm.xlu1 %16512, %v20357_v9   ;;  %16806 = vrcp.f32 %v8951_v7  ;;  %v20376_v14 = vpop.permute.xlu1 %5209 }
 0x377   :  { %v4314_v15 = vrot.slane %v3754_v52, %v17359_v27  ;;  %v3762_v29 = vsel %vm3614_vm11, %v20355_v41, -inf  ;;  %v20371_v20 = vadd.f32 %v14924_v36, %v14923_v31  ;;  %v20373_v12 = vadd.f32 %v14934_v8, %v14933_v56  ;;  %25116 = vst [vmem:[#allocation165_spill] sm:$0xff] %v20376_v14 }
 0x378   :  { %v20369_v61 = vpop.eup %16794  ;;  %v10264_v30 = vrot.slane %v9704_v44, %v17359_v27  ;;  %v767_v19 = vcombine.high %v20266_v1, %v20266_v1  ;;  %v3763_v35 = vrot.slane %v3762_v29, 4  ;;  %v769_v56 = vcombine.high %v20269_v3, %v20269_v3  ;;  %v20390_v36 = vpop.permute.xlu0 %5218 }
 0x379   :  { %25115 = vst [vmem:[#allocation32_spill] sm:$0xff] %v20369_v61  ;;  %v20378_v33 = vpop.eup %16796  ;;  %v14268_v17 = vcombine.low %v20369_v61, %v20345_v54  ;;  %v4315_v52 = vcombine.high %v4314_v15, %v4314_v15  ;;  %v4322_v7 = vrot.slane %v4314_v15, %v17359_v27  ;;  %25118 = vst [vmem:[#allocation167_spill] sm:$0xff] %v20390_v36  ;;  %vm15570_vm1 = vcmask 1041409  }
 0x37a   :  { %v10265_v31 = vcombine.high %v10264_v30, %v10264_v30  ;;  %v20386_v8 = vrot.slane %v10264_v30, %v17359_v27  ;;  %v20392_v44 = vpop.eup %16798  ;;  %v8316_v0 = vrot.slane %v8309_v37, %v17359_v27  ;;  %v4764_v54 = vsub.f32 %v19782_v25, %v4352_v53  ;;  %5497 = vperm.xlu1 %16512, %v20378_v33   ;;  %v20404_v14 = vpop.permute.xlu1 %5227 }
 0x37b   :  { %25119 = vst [vmem:[#allocation168_spill] sm:$0xff] %v20392_v44  ;;  %v2432_v1 = vadd.f32 %v19901_v34, %v767_v19  ;;  %v4329_v61 = vrot.slane %v4315_v52, %v17359_v27  ;;  %v4330_v15 = vcombine.high %v4322_v7, %v4322_v7  ;;  %v4760_v30 = vsub.f32 %v20218_v2, %v4322_v7 }
 0x37c   :  { %25117 = vst [vmem:[#allocation166_spill] sm:$0xff] %v20386_v8  ;;  %v20401_v11 = vrot.slane %v10265_v31, %v17359_v27  ;;  %v2433_v3 = vadd.f32 %v20261_v16, %v769_v56  ;;  %25121 = vst [vmem:[#allocation170_spill] sm:$0xff] %v20404_v14  ;;  %v10280_v53 = vcombine.high %v20386_v8, %v20386_v8  ;;  %v20418_v56 = vpop.permute.xlu0 %5236  ;;  %v25162_v8 = vld [vmem:[#allocation75_spill] sm:$0xff]  ;;  %vm15572_vm3 = vcmask 1042434  }
 0x37d   :  { %v4761_v37 = vsub.f32 %v20221_v45, %v4329_v61  ;;  %v3764_v19 = vmax.f32 %v3762_v29, %v3763_v35  ;;  %v14282_v7 = vrot.slane %v20392_v44, %v17359_v27  ;;  %v4762_v31 = vsub.f32 %v20254_v32, %v4330_v15  ;;  %25122 = vst [vmem:[#allocation171_spill] sm:$0xff] %v20418_v56  ;;  %v25161_v45 = vld [vmem:[#allocation135_spill] sm:$0xff] }
 0x37e   :  { %25120 = vst [vmem:[#allocation169_spill] sm:$0xff] %v20401_v11  ;;  %v20411_v52 = vpop.eup %16800  ;;  %v4913_v36 = vmul.f32 1.442695, %v4760_v30  ;;  %v8966_v61 = vsel %vm3614_vm11, %v8316_v0, 0.0  ;;  %v14275_v14 = vrot.slane %v14268_v17, %v17359_v27  ;;  %v20423_v35 = vsub.f32 %v20254_v32, %v10280_v53  ;;  %v20429_v30 = vpop.permute.xlu1 %5263 }
 0x37f   :  { %v4915_v25 = vmul.f32 1.442695, %v4761_v37  ;;  %5551 = vperm.xlu1 %16512, %v20411_v52   ;;  %v4921_v29 = vmul.f32 1.442695, %v4764_v54  ;;  %v4917_v34 = vmul.f32 1.442695, %v4762_v31  ;;  %v20427_v15 = vrot.slane %v722_v42, %v17359_v27 }
 0x380   :  { %25123 = vst [vmem:[#allocation172_spill] sm:$0xff] %v20423_v35  ;;  %16808 = vpow2.f32 %v4913_v36  ;;  %25124 = vst [vmem:[#allocation173_spill] sm:$0xff] %v20429_v30  ;;  %v2624_v16 = vmul.f32 0.2, %v2432_v1  ;;  %v3765_v44 = vrot.slane %v3764_v19, 2  ;;  %vm2529_vm4 = vcmp.gt.f32.partialorder %v2433_v3, 0.0  ;;  %v20435_v54 = vpop.permute.xlu0 %5020 }
 0x381   :  { %16810 = vpow2.f32 %v4915_v25  ;;  %v20431_v0 = vpop.eup %16802  ;;  %vm2528_vm6 = vcmp.gt.f32.partialorder %v2432_v1, 0.0  ;;  %v9712_v32 = vsel %vm9564_vm5, %v20355_v41, -inf  ;;  %v2625_v17 = vmul.f32 0.2, %v2433_v3  ;;  %25126 = vst [vmem:[#allocation175_spill] sm:$0xff] %v20435_v54 }
 0x382   :  { %25125 = vst [vmem:[#allocation174_spill] sm:$0xff] %v20431_v0  ;;  %16812 = vpow2.f32 %v4917_v34  ;;  %v20437_v36 = vpop.eup %16804  ;;  %v25128_v42 = vrot.slane %v20332_v38, 2  ;;  %v14283_v25 = vcombine.low %v14275_v14, %v14282_v7  ;;  %v3766_v53 = vmax.f32 %v3764_v19, %v3765_v44  ;;  %v20451_v54 = vpop.permute.xlu1 %5317  ;;  %v25132_v19 = vld [vmem:[#allocation88_spill] sm:$0xff]  ;;  %v25133_v7 = vld [vmem:[#allocation101_spill] sm:$0xff] }
 0x383   :  { %25127 = vst [vmem:[#allocation176_spill] sm:$0xff] %v20437_v36  ;;  %v9713_v31 = vrot.slane %v9712_v32, 4  ;;  %16814 = vpow2.f32 %v4921_v29  ;;  %v20445_v34 = vsel %vm2529_vm4, %v2433_v3, %v2625_v17  ;;  %v20449_v41 = vrot.slane %v20427_v15, %v17359_v27  ;;  %25129 = vst [vmem:[#allocation177_spill] sm:$0xff] %v20451_v54  ;;  %v20453_v36 = vpop.eup %16806 }
 0x384   :  { %v20442_v37 = vadd.f32 %v25128_v42, %v20332_v38  ;;  %25130 = vst [vmem:[#allocation178_spill] sm:$0xff] %v20453_v36  ;;  %v8967_v56 = vrot.slane %v8966_v61, 4  ;;  %v20456_v38 = vsel %vm2528_vm6, %v2432_v1, %v2624_v16  ;;  %v3767_v14 = vrot.slane %v3766_v53, 1  ;;  %v20466_v30 = vpop.permute.xlu0 %5254 }
 0x385   :  { %25131 = vst [vmem:[#allocation179_spill] sm:$0xff] %v20456_v38  ;;  %v9714_v44 = vmax.f32 %v9712_v32, %v9713_v31  ;;  %16816 = vrcp.f32 %v20371_v20  ;;  %v25134_v3 = vsub.f32 %v25132_v19, %v25133_v7  ;;  %v3352_v17 = vcombine.low %v20456_v38, %v20445_v34  ;;  %25135 = vst [vmem:[#allocation88_spill] sm:$0xff] %v20466_v30  ;;  %v25136_v20 = vld [vmem:[#allocation21_spill] sm:$0xff]  ;;  %v25137_v31 = vld [vmem:[#allocation103_spill] sm:$0xff] }
 0x386   :  { %v2434_v42 = vadd.f32 %v20289_v55, %v20449_v41  ;;  %v14290_v54 = vrot.slane %v14283_v25, %v17359_v27  ;;  %v10188_v1 = vcombine.high %v25133_v7, %v25133_v7  ;;  %v3768_v16 = vmax.f32 %v3766_v53, %v3767_v14  ;;  %v20476_v11 = vpop.permute.xlu1 %5002 }
 0x387   :  { %v10839_v29 = vmul.f32 1.442695, %v25134_v3  ;;  %v9715_v32 = vrot.slane %v9714_v44, 2  ;;  %v25138_v0 = vsub.f32 %v25136_v20, %v25137_v31  ;;  %v885_v3 = vcombine.high %v20003_v4, %v20003_v4  ;;  %25139 = vst [vmem:[#allocation101_spill] sm:$0xff] %v20476_v11 }
 0x388   :  { %vm2530_vm7 = vcmp.gt.f32.partialorder %v2434_v42, 0.0  ;;  %v2626_v35 = vmul.f32 0.2, %v2434_v42  ;;  %v20479_v30 = vadd.f32 %v8967_v56, %v8966_v61  ;;  %v4360_v25 = vrot.slane %v3768_v16, %v17359_v27  ;;  %v20486_v20 = vpop.permute.xlu0 %5272 }
 0x389   :  { %v10841_v19 = vmul.f32 1.442695, %v25138_v0  ;;  %v9716_v7 = vmax.f32 %v9714_v44, %v9715_v32  ;;  %16818 = vpow2.f32 %v10839_v29  ;;  %v4965_v53 = vmul.f32 1.442695, %v20120_v5  ;;  %25140 = vst [vmem:[#allocation21_spill] sm:$0xff] %v20486_v20  ;;  %v25141_v44 = vld [vmem:[#allocation90_spill] sm:$0xff] }
 0x38a   :  { %v3359_v14 = vrot.slane %v3352_v17, %v17359_v27  ;;  %v20484_v0 = vsel %vm2530_vm7, %v2434_v42, %v2626_v35  ;;  %v4361_v4 = vcombine.high %v4360_v25, %v4360_v25  ;;  %v4368_v31 = vrot.slane %v4360_v25, %v17359_v27  ;;  %v20498_v35 = vpop.permute.xlu1 %5011 }
 0x38b   :  { %v9717_v11 = vrot.slane %v9716_v7, 1  ;;  %v3366_v56 = vrot.slane %v20484_v0, %v17359_v27  ;;  %v20492_v61 = vsel %vm9564_vm5, %v14290_v54, 0.0  ;;  %v20495_v29 = vsub.f32 %v25141_v44, %v10188_v1  ;;  %25142 = vst [vmem:[#allocation103_spill] sm:$0xff] %v20498_v35 }
 0x38c   :  { %16820 = vpow2.f32 %v10841_v19  ;;  %v913_v5 = vrot.slane %v885_v3, %v17359_v27  ;;  %v4375_v42 = vrot.slane %v4361_v4, %v17359_v27  ;;  %v4376_v16 = vcombine.high %v4368_v31, %v4368_v31  ;;  %v20507_v19 = vpop.permute.xlu0 %5290 }
 0x38d   :  { %v16809_v17 = vpop.eup %16808  ;;  %v4766_v32 = vsub.f32 %v20306_v43, %v4368_v31  ;;  %v9718_v25 = vmax.f32 %v9716_v7, %v9717_v11  ;;  %16822 = vpow2.f32 %v4965_v53  ;;  %v3367_v20 = vcombine.low %v3359_v14, %v3366_v56  ;;  %25143 = vst [vmem:[#allocation90_spill] sm:$0xff] %v20507_v19 }
 0x38e   :  { %v20502_v55 = vpop.eup %16810  ;;  %v2459_v54 = vadd.f32 %v20165_v50, %v913_v5  ;;  %v915_v1 = vcombine.high %v20028_v48, %v20028_v48  ;;  %5506 = vperm.xlu0 %16513, %v16809_v17   ;;  %v4767_v44 = vsub.f32 %v20313_v57, %v4375_v42  ;;  %v4768_v11 = vsub.f32 %v20311_v6, %v4376_v16  ;;  %v20519_v31 = vpop.permute.xlu1 %5047 }
 0x38f   :  { %v20509_v3 = vpop.eup %16812  ;;  %v8593_v4 = vcombine.low %v16809_v17, %v20502_v55  ;;  %v4925_v7 = vmul.f32 1.442695, %v4766_v32  ;;  %v10310_v50 = vrot.slane %v9718_v25, %v17359_v27  ;;  %v3374_v14 = vrot.slane %v3367_v20, %v17359_v27  ;;  %25144 = vst [vmem:[#allocation180_spill] sm:$0xff] %v20519_v31 }
 0x390   :  { %v8607_v53 = vrot.slane %v20509_v3, %v17359_v27  ;;  %v2460_v48 = vadd.f32 %v20308_v26, %v915_v1  ;;  %v20521_v56 = vpop.eup %16814  ;;  %v4927_v42 = vmul.f32 1.442695, %v4767_v44  ;;  %v4929_v19 = vmul.f32 1.442695, %v4768_v11  ;;  %v20529_v20 = vpop.permute.xlu0 %5326 }
 0x391   :  { %v8600_v17 = vrot.slane %v8593_v4, %v17359_v27  ;;  %16824 = vpow2.f32 %v4925_v7  ;;  %v4977_v16 = vmul.f32 1.442695, %v20174_v10  ;;  %v10311_v32 = vcombine.high %v10310_v50, %v10310_v50  ;;  %25146 = vst [vmem:[#allocation182_spill] sm:$0xff] %v20529_v20 }
 0x392   :  { %v20526_v35 = vrot.slane %v10310_v50, %v17359_v27  ;;  %v3769_v25 = vsel %vm3614_vm11, %v3374_v14, -inf  ;;  %5542 = vperm.xlu0 %16513, %v20521_v56   ;;  %v20532_v26 = vpop.eup %16816  ;;  %16826 = vpow2.f32 %v4927_v42  ;;  %v9719_v44 = vsel %vm9564_vm5, %v3374_v14, -inf  ;;  %v20540_v50 = vpop.permute.xlu1 %5101 }
 0x393   :  { %25147 = vst [vmem:[#allocation183_spill] sm:$0xff] %v20532_v26  ;;  %v20534_v1 = vcombine.low %v8600_v17, %v8607_v53  ;;  %v3770_v4 = vrot.slane %v3769_v25, 4  ;;  %16828 = vpow2.f32 %v4929_v19  ;;  %v20538_v10 = vrot.slane %v10311_v32, %v17359_v27  ;;  %25149 = vst [vmem:[#allocation185_spill] sm:$0xff] %v20540_v50 }
 0x394   :  { %25145 = vst [vmem:[#allocation181_spill] sm:$0xff] %v20526_v35  ;;  %v2652_v11 = vmul.f32 0.2, %v2460_v48  ;;  %v917_v7 = vcombine.high %v913_v5, %v913_v5  ;;  %v10326_v20 = vcombine.high %v20526_v35, %v20526_v35  ;;  %vm2556_vm8 = vcmp.gt.f32.partialorder %v2460_v48, 0.0  ;;  %v20549_v32 = vpop.permute.xlu0 %5344 }
 0x395   :  { %25148 = vst [vmem:[#allocation184_spill] sm:$0xff] %v20538_v10  ;;  %v3771_v53 = vmax.f32 %v3769_v25, %v3770_v4  ;;  %v2651_v17 = vmul.f32 0.2, %v2459_v54  ;;  %v9720_v19 = vrot.slane %v9719_v44, 4  ;;  %25150 = vst [vmem:[#allocation186_spill] sm:$0xff] %v20549_v32  ;;  %v25152_v50 = vrot.slane %v20373_v12, 2 }
 0x396   :  { %v2461_v42 = vadd.f32 %v20318_v22, %v917_v7  ;;  %v20551_v5 = vpop.eup %16818  ;;  %vm2555_vm9 = vcmp.gt.f32.partialorder %v2459_v54, 0.0  ;;  %v20557_v26 = vsub.f32 %v20311_v6, %v10326_v20  ;;  %v8969_v4 = vrot.slane %v20479_v30, 2  ;;  %v20563_v22 = vpop.permute.xlu1 %5245  ;;  %v25158_v10 = vld [vmem:[#allocation105_spill] sm:$0xff] }
 0x397   :  { %25151 = vst [vmem:[#allocation187_spill] sm:$0xff] %v20551_v5  ;;  %v14937_v31 = vadd.f32 %v25152_v50, %v20373_v12  ;;  %v3772_v25 = vrot.slane %v3771_v53, 2  ;;  %v14941_v14 = vrot.slane %v20492_v61, 4  ;;  %v9721_v35 = vmax.f32 %v9719_v44, %v9720_v19  ;;  %25154 = vst [vmem:[#allocation189_spill] sm:$0xff] %v20563_v22  ;;  %v25157_v50 = vld [vmem:[#allocation60_spill] sm:$0xff] }
 0x398   :  { %25153 = vst [vmem:[#allocation188_spill] sm:$0xff] %v20557_v26  ;;  %v20561_v43 = vsel %vm2556_vm8, %v2460_v48, %v2652_v11  ;;  %v25156_v32 = vrot.slane %v20442_v37, 1  ;;  %v8501_v6 = vcombine.low %v25158_v10, %v25157_v50  ;;  %16830 = vpow2.f32 %v4977_v16  ;;  %v20575_v48 = vpop.permute.xlu0 %5038 }
 0x399   :  { %v20565_v7 = vpop.eup %16820  ;;  %v3773_v20 = vmax.f32 %v3771_v53, %v3772_v25  ;;  %v10843_v26 = vmul.f32 1.442695, %v20495_v29  ;;  %v20573_v57 = vsel %vm2555_vm9, %v2459_v54, %v2651_v17  ;;  %v9722_v44 = vrot.slane %v9721_v35, 2  ;;  %25159 = vst [vmem:[#allocation60_spill] sm:$0xff] %v20575_v48 }
 0x39a   :  { %25155 = vst [vmem:[#allocation190_spill] sm:$0xff] %v20565_v7  ;;  %v8965_v12 = vadd.f32 %v25156_v32, %v20442_v37  ;;  %vm2557_vm10 = vcmp.gt.f32.partialorder %v2461_v42, 0.0  ;;  %v20577_v11 = vpop.eup %16822  ;;  %v738_v22 = vcombine.high %v20427_v15, %v20427_v15  ;;  %v3559_v37 = vcombine.low %v20573_v57, %v20561_v43  ;;  %v20587_v17 = vpop.permute.xlu1 %5281 }
 0x39b   :  { %v3774_v19 = vrot.slane %v3773_v20, 1  ;;  %v2653_v10 = vmul.f32 0.2, %v2461_v42  ;;  %v14938_v16 = vrot.slane %v14937_v31, 1  ;;  %v8970_v53 = vadd.f32 %v8969_v4, %v20479_v30  ;;  %25160 = vst [vmem:[#allocation105_spill] sm:$0xff] %v20587_v17 }
 0x39c   :  { %v20585_v29 = vadd.f32 %v14941_v14, %v20492_v61  ;;  %v9723_v54 = vmax.f32 %v9721_v35, %v9722_v44  ;;  %16832 = vrcp.f32 %v8965_v12  ;;  %v8508_v32 = vrot.slane %v8501_v6, %v17359_v27  ;;  %v20596_v61 = vpop.permute.xlu0 %5056 }
 0x39d   :  { %v3775_v25 = vmax.f32 %v3773_v20, %v3774_v19  ;;  %v20590_v50 = vsel %vm2557_vm10, %v2461_v42, %v2653_v10  ;;  %v8515_v48 = vrot.slane %v19801_v62, %v17359_v27  ;;  %16834 = vpow2.f32 %v10843_v26  ;;  %25163 = vst [vmem:[#allocation135_spill] sm:$0xff] %v20596_v61 }
 0x39e   :  { %v16825_v15 = vpop.eup %16824  ;;  %v8524_v30 = vcombine.low %v25162_v8, %v25161_v45  ;;  %v9724_v4 = vrot.slane %v9723_v54, 1  ;;  %v766_v14 = vrot.slane %v738_v22, %v17359_v27  ;;  %v3566_v12 = vrot.slane %v3559_v37, %v17359_v27  ;;  %v20610_v20 = vpop.permute.xlu1 %5335  ;;  %v25166_v22 = vld [vmem:[#allocation41_spill] sm:$0xff] }
 0x39f   :  { %v20599_v35 = vrot.slane %v3775_v25, %v17359_v27  ;;  %v3573_v42 = vrot.slane %v20590_v50, %v17359_v27  ;;  %5560 = vperm.xlu0 %16513, %v16825_v15   ;;  %v20605_v6 = vpop.eup %16826  ;;  %v20607_v62 = vadd.f32 %v14938_v16, %v14937_v31  ;;  %v8971_v26 = vrot.slane %v8970_v53, 1  ;;  %25165 = vst [vmem:[#allocation191_spill] sm:$0xff] %v20610_v20 }
 0x3a0   :  { %v9725_v8 = vmax.f32 %v9723_v54, %v9724_v4  ;;  %v20612_v44 = vpop.eup %16828  ;;  %v8516_v19 = vcombine.low %v8508_v32, %v8515_v48  ;;  %v10196_v37 = vcombine.high %v25166_v22, %v25166_v22  ;;  %v8639_v10 = vcombine.low %v16825_v15, %v20605_v6  ;;  %v20627_v48 = vpop.permute.xlu0 %5074 }
 0x3a1   :  { %25164 = vst [vmem:[#allocation75_spill] sm:$0xff] %v20607_v62  ;;  %v20619_v25 = vrot.slane %v20599_v35, %v17359_v27  ;;  %v14475_v31 = vcombine.low %v20551_v5, %v20565_v7  ;;  %v8531_v16 = vrot.slane %v8524_v30, %v17359_v27  ;;  %v768_v4 = vcombine.high %v20449_v41, %v20449_v41  ;;  %v25168_v7 = vld [vmem:[#allocation134_spill] sm:$0xff] }
 0x3a2   :  { %v10333_v54 = vrot.slane %v9725_v8, %v17359_v27  ;;  %25167 = vst [vmem:[#allocation41_spill] sm:$0xff] %v20627_v48  ;;  %v8646_v32 = vrot.slane %v8639_v10, %v17359_v27  ;;  %v8653_v15 = vrot.slane %v20612_v44, %v17359_v27  ;;  %v3574_v22 = vcombine.low %v3566_v12, %v3573_v42  ;;  %v20640_v48 = vpop.permute.xlu1 %5371 }
 0x3a3   :  { %v770_v45 = vcombine.high %v766_v14, %v766_v14  ;;  %5740 = vperm.xlu0 %16513, %v20577_v11   ;;  %v8538_v5 = vrot.slane %v25168_v7, %v17359_v27  ;;  %v4769_v30 = vsub.f32 %v20456_v38, %v20619_v25  ;;  %25170 = vst [vmem:[#allocation192_spill] sm:$0xff] %v20640_v48  ;;  %v25180_v48 = vld [vmem:[#allocation121_spill] sm:$0xff]  ;;  %vm15574_vm9 = vcmask 1043459  }
 0x3a4   :  { %v10334_v8 = vcombine.high %v10333_v54, %v10333_v54  ;;  %v20638_v41 = vrot.slane %v10333_v54, %v17359_v27  ;;  %v20642_v10 = vcombine.low %v8646_v32, %v8653_v15  ;;  %v2435_v17 = vadd.f32 %v20298_v23, %v766_v14  ;;  %v20656_v32 = vpop.permute.xlu0 %5110 }
 0x3a5   :  { %v2436_v12 = vadd.f32 %v20339_v60, %v768_v4  ;;  %v2437_v42 = vadd.f32 %v20349_v40, %v770_v45  ;;  %v20647_v20 = vpop.eup %16830  ;;  %v4931_v7 = vmul.f32 1.442695, %v4769_v30  ;;  %25172 = vst [vmem:[#allocation194_spill] sm:$0xff] %v20656_v32  ;;  %v8972_v15 = vadd.f32 %v8971_v26, %v8970_v53 }
 0x3a6   :  { %25169 = vst [vmem:[#allocation134_spill] sm:$0xff] %v20638_v41  ;;  %v20650_v61 = vrot.slane %v10334_v8, %v17359_v27  ;;  %v10349_v54 = vcombine.high %v20638_v41, %v20638_v41  ;;  %v8523_v23 = vrot.slane %v8516_v19, %v17359_v27  ;;  %v8539_v60 = vcombine.low %v8531_v16, %v8538_v5  ;;  %v20669_v8 = vpop.permute.xlu1 %5641 }
 0x3a7   :  { %v3581_v40 = vrot.slane %v3574_v22, %v17359_v27  ;;  %5794 = vperm.xlu0 %16513, %v20647_v20   ;;  %v25173_v14 = vsub.f32 %v19979_v63, %v20106_v49  ;;  %16836 = vpow2.f32 %v4931_v7  ;;  %25175 = vst [vmem:[#allocation196_spill] sm:$0xff] %v20669_v8  ;;  %v10210_v53 = vrot.slane %v10196_v37, %v17359_v27 }
 0x3a8   :  { %25171 = vst [vmem:[#allocation193_spill] sm:$0xff] %v20650_v61  ;;  %v20667_v30 = vsub.f32 %v20484_v0, %v10349_v54  ;;  %v2627_v5 = vmul.f32 0.2, %v2435_v17  ;;  %v2628_v26 = vmul.f32 0.2, %v2436_v12  ;;  %v14482_v22 = vrot.slane %v14475_v31, %v17359_v27  ;;  %v20675_v49 = vpop.permute.xlu0 %5128 }
 0x3a9   :  { %v4963_v45 = vmul.f32 1.442695, %v25173_v14  ;;  %v2629_v19 = vmul.f32 0.2, %v2437_v42  ;;  %v20672_v16 = vpop.eup %16832  ;;  %vm2531_vm12 = vcmp.gt.f32.partialorder %v2435_v17, 0.0  ;;  %vm2532_vm13 = vcmp.gt.f32.partialorder %v2436_v12, 0.0 }
 0x3aa   :  { %25174 = vst [vmem:[#allocation195_spill] sm:$0xff] %v20667_v30  ;;  %25176 = vst [vmem:[#allocation197_spill] sm:$0xff] %v20672_v16  ;;  %vm2533_vm14 = vcmp.gt.f32.partialorder %v2437_v42, 0.0  ;;  %v20677_v7 = vpop.eup %16834  ;;  %v9029_v54 = vsel %vm3614_vm11, %v8523_v23, 0.0  ;;  %v25179_v14 = vld [vmem:[#allocation22_spill] sm:$0xff]  ;;  %v3832_v37 = vsel %vm3614_vm11, %v3581_v40, -inf  ;;  %v8546_v31 = vrot.slane %v8539_v60, %v17359_v27  ;;  %v20689_v30 = vpop.permute.xlu1 %5029 }
 0x3ab   :  { %25177 = vst [vmem:[#allocation198_spill] sm:$0xff] %v20675_v49  ;;  %25178 = vst [vmem:[#allocation199_spill] sm:$0xff] %v20677_v7  ;;  %v8731_v4 = vcombine.low %v25180_v48, %v25179_v14  ;;  %v9782_v8 = vsel %vm9564_vm5, %v3581_v40, -inf  ;;  %5812 = vperm.xlu0 %16513, %v20320_v28   ;;  %16838 = vpow2.f32 %v4963_v45  ;;  %v25181_v32 = vsub.f32 %v19997_v39, %v20162_v18  ;;  %v25183_v14 = vld [vmem:[#allocation23_spill] sm:$0xff] }
 0x3ac   :  { %v3833_v62 = vrot.slane %v3832_v37, 4  ;;  %25182 = vst [vmem:[#allocation22_spill] sm:$0xff] %v20689_v30  ;;  %v20691_v23 = vsel %vm2531_vm12, %v2435_v17, %v2627_v5  ;;  %v9783_v41 = vrot.slane %v9782_v8, 4  ;;  %v20694_v48 = vsel %vm2532_vm13, %v2436_v12, %v2628_v26  ;;  %v25186_v26 = vld [vmem:[#allocation94_spill] sm:$0xff] }
 0x3ad   :  { %v4975_v49 = vmul.f32 1.442695, %v25181_v32  ;;  %v20697_v40 = vsel %vm2533_vm14, %v2437_v42, %v2629_v19  ;;  %v9030_v28 = vrot.slane %v9029_v54, 4  ;;  %v10702_v60 = vsub.f32 %v25183_v14, %v10210_v53  ;;  %v20702_v32 = vpop.permute.xlu0 %5308  ;;  %v25185_v42 = vld [vmem:[#allocation43_spill] sm:$0xff] }
 0x3ae   :  { %v3834_v45 = vmax.f32 %v3832_v37, %v3833_v62  ;;  %v3375_v18 = vcombine.low %v20691_v23, %v20694_v48  ;;  %25184 = vst [vmem:[#allocation121_spill] sm:$0xff] %v20702_v32  ;;  %v14489_v17 = vrot.slane %v20677_v7, %v17359_v27  ;;  %v8738_v5 = vrot.slane %v8731_v4, %v17359_v27  ;;  %v20712_v37 = vpop.permute.xlu1 %5065  ;;  %v25188_v7 = vld [vmem:[#allocation140_spill] sm:$0xff] }
 0x3af   :  { %v9784_v30 = vmax.f32 %v9782_v8, %v9783_v41  ;;  %v3389_v12 = vrot.slane %v20697_v40, %v17359_v27  ;;  %v10701_v19 = vsub.f32 %v25186_v26, %v25185_v42  ;;  %16840 = vpow2.f32 %v4975_v49  ;;  %25187 = vst [vmem:[#allocation23_spill] sm:$0xff] %v20712_v37  ;;  %v25192_v26 = vld [vmem:[#allocation61_spill] sm:$0xff] }
 0x3b0   :  { %v3835_v53 = vrot.slane %v3834_v45, 2  ;;  %v3382_v62 = vrot.slane %v3375_v18, %v17359_v27  ;;  %v20714_v14 = vcombine.low %v14482_v22, %v14489_v17  ;;  %v9036_v32 = vsel %vm3614_vm11, %v8546_v31, 0.0  ;;  %v25191_v17 = vld [vmem:[#allocation141_spill] sm:$0xff] }
 0x3b1   :  { %v8745_v4 = vrot.slane %v25188_v7, %v17359_v27  ;;  %v9785_v41 = vrot.slane %v9784_v30, 2  ;;  %v20719_v8 = vadd.f32 %v9030_v28, %v9029_v54  ;;  %v10847_v38 = vmul.f32 1.442695, %v10702_v60  ;;  %v20721_v42 = vpop.permute.xlu0 %5362 }
 0x3b2   :  { %v3836_v61 = vmax.f32 %v3834_v45, %v3835_v53  ;;  %v3390_v2 = vcombine.low %v3382_v62, %v3389_v12  ;;  %25189 = vst [vmem:[#allocation43_spill] sm:$0xff] %v20721_v42  ;;  %v25190_v49 = vrot.slane %v20585_v29, 2  ;;  %v8754_v31 = vcombine.low %v25192_v26, %v25191_v17  ;;  %v20731_v28 = vpop.permute.xlu1 %5119  ;;  %v25194_v12 = vld [vmem:[#allocation45_spill] sm:$0xff]  ;;  %v25196_v17 = vld [vmem:[#allocation11_spill] sm:$0xff] }
 0x3b3   :  { %v8746_v22 = vcombine.low %v8738_v5, %v8745_v4  ;;  %v9786_v37 = vmax.f32 %v9784_v30, %v9785_v41  ;;  %16842 = vrcp.f32 %v8972_v15  ;;  %v9037_v7 = vrot.slane %v9036_v32, 4  ;;  %25193 = vst [vmem:[#allocation94_spill] sm:$0xff] %v20731_v28 }
 0x3b4   :  { %v20726_v18 = vadd.f32 %v25190_v49, %v20585_v29  ;;  %v3837_v39 = vrot.slane %v3836_v61, 1  ;;  %v3397_v54 = vrot.slane %v3390_v2, %v17359_v27  ;;  %v20733_v60 = vpop.eup %16836  ;;  %v20735_v45 = vmul.f32 1.442695, %v10701_v19 }
 0x3b5   :  { %v20738_v53 = vmul.f32 1.442695, %v25194_v12  ;;  %v4399_v29 = vcombine.high %v20619_v25, %v20619_v25  ;;  %v9787_v5 = vrot.slane %v9786_v37, 1  ;;  %v9032_v30 = vrot.slane %v20719_v8, 2  ;;  %5587 = vperm.xlu1 %16512, %v20733_v60   ;;  %v20746_v62 = vpop.permute.xlu0 %5380 }
 0x3b6   :  { %16844 = vpow2.f32 %v10847_v38  ;;  %v3838_v2 = vmax.f32 %v3836_v61, %v3837_v39  ;;  %25195 = vst [vmem:[#allocation140_spill] sm:$0xff] %v20746_v62  ;;  %v8753_v19 = vrot.slane %v8746_v22, %v17359_v27  ;;  %v8761_v4 = vrot.slane %v8754_v31, %v17359_v27  ;;  %v20757_v38 = vpop.permute.xlu1 %5155  ;;  %v25198_v22 = vld [vmem:[#allocation35_spill] sm:$0xff] }
 0x3b7   :  { %v9788_v41 = vmax.f32 %v9786_v37, %v9787_v5  ;;  %v3776_v49 = vsel %vm3614_vm11, %v3397_v54, -inf  ;;  %v20751_v25 = vadd.f32 %v9037_v7, %v9036_v32  ;;  %v8800_v26 = vcombine.low %v25196_v17, %v20210_v51  ;;  %25197 = vst [vmem:[#allocation141_spill] sm:$0xff] %v20757_v38  ;;  %v25199_v7 = vld [vmem:[#allocation29_spill] sm:$0xff] }
 0x3b8   :  { %v4590_v12 = vrot.slane %v3838_v2, %v17359_v27  ;;  %v9726_v39 = vsel %vm9564_vm5, %v3397_v54, -inf  ;;  %v20759_v61 = vpop.eup %16838  ;;  %v8768_v15 = vrot.slane %v25198_v22, %v17359_v27  ;;  %v4384_v37 = vcombine.high %v20599_v35, %v20599_v35 }
 0x3b9   :  { %v4771_v32 = vsub.f32 %v20484_v0, %v4399_v29  ;;  %v10540_v31 = vrot.slane %v9788_v41, %v17359_v27  ;;  %v10418_v51 = vcombine.high %v25199_v7, %v25199_v7  ;;  %v3777_v2 = vrot.slane %v3776_v49, 4  ;;  %5731 = vperm.xlu1 %16512, %v20759_v61   ;;  %v20771_v17 = vpop.permute.xlu0 %5398 }
 0x3ba   :  { %v4591_v5 = vcombine.high %v4590_v12, %v4590_v12  ;;  %v4598_v54 = vrot.slane %v4590_v12, %v17359_v27  ;;  %25200 = vst [vmem:[#allocation61_spill] sm:$0xff] %v20771_v17  ;;  %v20774_v22 = vsel %vm3614_vm11, %v8753_v19, 0.0  ;;  %v8769_v38 = vcombine.low %v8761_v4, %v8768_v15  ;;  %v20779_v28 = vpop.permute.xlu1 %5299 }
 0x3bb   :  { %v10541_v35 = vcombine.high %v10540_v31, %v10540_v31  ;;  %v9727_v62 = vrot.slane %v9726_v39, 4  ;;  %v8807_v0 = vrot.slane %v8800_v26, %v17359_v27  ;;  %25201 = vst [vmem:[#allocation45_spill] sm:$0xff] %v20779_v28  ;;  %v4398_v63 = vrot.slane %v4384_v37, %v17359_v27 }
 0x3bc   :  { %v4605_v29 = vrot.slane %v4591_v5, %v17359_v27  ;;  %v4606_v41 = vcombine.high %v4598_v54, %v4598_v54  ;;  %v4796_v42 = vsub.f32 %v20573_v57, %v4598_v54  ;;  %v20781_v12 = vpop.eup %16840  ;;  %v4935_v17 = vmul.f32 1.442695, %v4771_v32 }
 0x3bd   :  { %v20785_v19 = vrot.slane %v10540_v31, %v17359_v27  ;;  %v20788_v15 = vrot.slane %v10541_v35, %v17359_v27  ;;  %v3778_v16 = vmax.f32 %v3776_v49, %v3777_v2  ;;  %5785 = vperm.xlu1 %16512, %v20781_v12   ;;  %v9728_v31 = vmax.f32 %v9726_v39, %v9727_v62  ;;  %v20799_v35 = vpop.permute.xlu0 %5650 }
 0x3be   :  { %v4797_v4 = vsub.f32 %v20561_v43, %v4605_v29  ;;  %v4798_v26 = vsub.f32 %v20590_v50, %v4606_v41  ;;  %v4985_v5 = vmul.f32 1.442695, %v4796_v42  ;;  %25202 = vst [vmem:[#allocation11_spill] sm:$0xff] %v20799_v35  ;;  %v8776_v29 = vrot.slane %v8769_v38, %v17359_v27  ;;  %v25203_v41 = vld [vmem:[#allocation87_spill] sm:$0xff]  ;;  %v20804_v2 = vpop.permute.xlu1 %5353 }
 0x3bf   :  { %v10556_v54 = vcombine.high %v20785_v19, %v20785_v19  ;;  %v8814_v42 = vrot.slane %v25203_v41, %v17359_v27  ;;  %25204 = vst [vmem:[#allocation35_spill] sm:$0xff] %v20804_v2  ;;  %v4770_v36 = vsub.f32 %v20445_v34, %v4398_v63  ;;  %v9033_v62 = vadd.f32 %v9032_v30, %v20719_v8  ;;  %v25206_v41 = vld [vmem:[#allocation112_spill] sm:$0xff] }
 0x3c0   :  { %16846 = vpow2.f32 %v4985_v5  ;;  %v4987_v49 = vmul.f32 1.442695, %v4797_v4  ;;  %v20806_v28 = vpop.eup %16842  ;;  %v4989_v37 = vmul.f32 1.442695, %v4798_v26  ;;  %v3779_v38 = vrot.slane %v3778_v16, 2 }
 0x3c1   :  { %16848 = vpow2.f32 %v4935_v17  ;;  %v20810_v32 = vsub.f32 %v20590_v50, %v10556_v54  ;;  %v8815_v39 = vcombine.low %v8807_v0, %v8814_v42  ;;  %5821 = vperm.xlu1 %16512, %v20325_v13   ;;  %v9039_v4 = vrot.slane %v20751_v25, 2  ;;  %v25207_v17 = vld [vmem:[#allocation110_spill] sm:$0xff] }
 0x3c2   :  { %16850 = vpow2.f32 %v4987_v49  ;;  %v10730_v35 = vsub.f32 %v25206_v41, %v10418_v51  ;;  %v9729_v63 = vrot.slane %v9728_v31, 2  ;;  %v9100_v50 = vrot.slane %v20774_v22, 4  ;;  %v20823_v26 = vpop.permute.xlu1 %5389  ;;  %v25212_v49 = vld [vmem:[#allocation113_spill] sm:$0xff] }
 0x3c3   :  { %v20814_v5 = vpop.eup %16844  ;;  %16852 = vpow2.f32 %v4989_v37  ;;  %v25208_v8 = vsub.f32 %v25207_v17, %v25199_v7  ;;  %v3780_v0 = vmax.f32 %v3778_v16, %v3779_v38  ;;  %25209 = vst [vmem:[#allocation87_spill] sm:$0xff] %v20823_v26  ;;  %v25210_v13 = vrot.slane %v20714_v14, %v17359_v27  ;;  %v25213_v7 = vld [vmem:[#allocation119_spill] sm:$0xff] }
 0x3c4   :  { %25205 = vst [vmem:[#allocation29_spill] sm:$0xff] %v20814_v5  ;;  %16854 = vpow2.f32 %v20735_v45  ;;  %v9106_v51 = vsel %vm3614_vm11, %v8776_v29, 0.0  ;;  %v4933_v37 = vmul.f32 1.442695, %v4770_v36  ;;  %v9730_v42 = vmax.f32 %v9728_v31, %v9729_v63  ;;  %v20832_v45 = vpop.permute.xlu0 %5668 }
 0x3c5   :  { %v10899_v30 = vmul.f32 1.442695, %v25208_v8  ;;  %v20829_v54 = vsel %vm9564_vm5, %v25210_v13, 0.0  ;;  %25211 = vst [vmem:[#allocation112_spill] sm:$0xff] %v20832_v45  ;;  %16856 = vpow2.f32 %v20738_v53  ;;  %v25214_v41 = vsub.f32 %v25212_v49, %v25213_v7  ;;  %5515 = vperm.xlu1 %16512, %v20502_v55  }
 0x3c6   :  { %v8822_v38 = vrot.slane %v8815_v39, %v17359_v27  ;;  %v3781_v17 = vrot.slane %v3780_v0, 1  ;;  %v9034_v14 = vrot.slane %v9033_v62, 1  ;;  %v20841_v8 = vadd.f32 %v9039_v4, %v20751_v25  ;;  %v20846_v13 = vpop.permute.xlu1 %5425 }
 0x3c7   :  { %v10901_v16 = vmul.f32 1.442695, %v25214_v41  ;;  %v10903_v29 = vmul.f32 1.442695, %v10730_v35  ;;  %v9731_v36 = vrot.slane %v9730_v42, 1  ;;  %v20844_v31 = vadd.f32 %v9100_v50, %v20774_v22  ;;  %25215 = vst [vmem:[#allocation110_spill] sm:$0xff] %v20846_v13 }
 0x3c8   :  { %16858 = vpow2.f32 %v10899_v30  ;;  %v9107_v53 = vrot.slane %v9106_v51, 4  ;;  %v3782_v63 = vmax.f32 %v3780_v0, %v3781_v17  ;;  %v15004_v39 = vrot.slane %v20829_v54, 4  ;;  %v25216_v35 = vld [vmem:[#allocation28_spill] sm:$0xff]  ;;  %v20857_v7 = vpop.permute.xlu0 %5092 }
 0x3c9   :  { %16860 = vpow2.f32 %v4933_v37  ;;  %v9732_v55 = vmax.f32 %v9730_v42, %v9731_v36  ;;  %v9120_v25 = vsel %vm3614_vm11, %v8822_v38, 0.0  ;;  %v8317_v4 = vcombine.low %v25216_v35, %v20334_v46  ;;  %5569 = vperm.xlu1 %16512, %v20605_v6   ;;  %25217 = vst [vmem:[#allocation113_spill] sm:$0xff] %v20857_v7  ;;  %v25219_v35 = vld [vmem:[#allocation137_spill] sm:$0xff]  ;;  %v25286_v7 = vld [vmem:[#allocation16_spill] sm:$0xff] }
 0x3ca   :  { %16862 = vpow2.f32 %v10901_v16  ;;  %v4406_v22 = vrot.slane %v3782_v63, %v17359_v27  ;;  %v9035_v50 = vadd.f32 %v9034_v14, %v9033_v62  ;;  %v9041_v30 = vrot.slane %v20841_v8, 1  ;;  %v20863_v46 = vpop.permute.xlu1 %5659 }
 0x3cb   :  { %16864 = vpow2.f32 %v10903_v29  ;;  %v10356_v0 = vrot.slane %v9732_v55, %v17359_v27  ;;  %v9102_v37 = vrot.slane %v20844_v31, 2  ;;  %v20860_v42 = vadd.f32 %v9107_v53, %v9106_v51  ;;  %25218 = vst [vmem:[#allocation119_spill] sm:$0xff] %v20863_v46 }
 0x3cc   :  { %v4407_v41 = vcombine.high %v4406_v22, %v4406_v22  ;;  %v4414_v16 = vrot.slane %v4406_v22, %v17359_v27  ;;  %v9121_v17 = vrot.slane %v9120_v25, 4  ;;  %v8331_v6 = vrot.slane %v20271_v47, %v17359_v27 }
 0x3cd   :  { %v16847_v38 = vpop.eup %16846  ;;  %v10357_v62 = vcombine.high %v10356_v0, %v10356_v0  ;;  %v20868_v14 = vrot.slane %v10356_v0, %v17359_v27  ;;  %v8324_v36 = vrot.slane %v8317_v4, %v17359_v27  ;;  %v8547_v22 = vcombine.low %v25219_v35, %v20357_v9  ;;  %v25222_v35 = vld [vmem:[#allocation142_spill] sm:$0xff] }
 0x3ce   :  { %v20870_v29 = vpop.eup %16848  ;;  %v4421_v51 = vrot.slane %v4407_v41, %v17359_v27  ;;  %v4422_v53 = vcombine.high %v4414_v16, %v4414_v16  ;;  %v4772_v63 = vsub.f32 %v20691_v23, %v4414_v16  ;;  %5830 = vperm.xlu0 %16513, %v16847_v38   ;;  %v20889_v9 = vpop.permute.xlu1 %5695  ;;  %v8570_v45 = vcombine.low %v25222_v35, %v20300_v21 }
 0x3cf   :  { %v16851_v55 = vpop.eup %16850  ;;  %v20878_v47 = vrot.slane %v10357_v62, %v17359_v27  ;;  %v10372_v0 = vcombine.high %v20868_v14, %v20868_v14  ;;  %5605 = vperm.xlu1 %16512, %v20870_v29   ;;  %25220 = vst [vmem:[#allocation28_spill] sm:$0xff] %v20889_v9  ;;  %v20909_v21 = vadd.f32 %v15004_v39, %v20829_v54  ;;  %v25228_v39 = vld [vmem:[#allocation152_spill] sm:$0xff]  ;;  %vm15576_vm10 = vcmask 1044484  }
 0x3d0   :  { %v20885_v4 = vpop.eup %16852  ;;  %v8869_v41 = vcombine.low %v16847_v38, %v16851_v55  ;;  %v4773_v16 = vsub.f32 %v20694_v48, %v4421_v51  ;;  %v4774_v13 = vsub.f32 %v20697_v40, %v4422_v53  ;;  %v4937_v46 = vmul.f32 1.442695, %v4772_v63  ;;  %v20902_v51 = vpop.permute.xlu0 %5146 }
 0x3d1   :  { %v20891_v62 = vpop.eup %16854  ;;  %v8883_v49 = vrot.slane %v20885_v4, %v17359_v27  ;;  %v20900_v38 = vsub.f32 %v20697_v40, %v10372_v0  ;;  %25224 = vst [vmem:[#allocation200_spill] sm:$0xff] %v20902_v51  ;;  %v9042_v35 = vadd.f32 %v9041_v30, %v20841_v8  ;;  %v9122_v0 = vadd.f32 %v9121_v17, %v9120_v25  ;;  %v25229_v17 = vld [vmem:[#allocation111_spill] sm:$0xff] }
 0x3d2   :  { %25221 = vst [vmem:[#allocation137_spill] sm:$0xff] %v20891_v62  ;;  %v8876_v53 = vrot.slane %v8869_v41, %v17359_v27  ;;  %16866 = vpow2.f32 %v4937_v46  ;;  %v4939_v63 = vmul.f32 1.442695, %v4773_v16  ;;  %v4941_v9 = vmul.f32 1.442695, %v4774_v13  ;;  %5524 = vperm.xlu0 %16513, %v20509_v3   ;;  %v20906_v2 = vpop.eup %16856  ;;  %v20916_v13 = vpop.permute.xlu1 %5749  ;;  %v25234_v16 = vld [vmem:[#allocation52_spill] sm:$0xff] }
 0x3d3   :  { %25223 = vst [vmem:[#allocation142_spill] sm:$0xff] %v20900_v38  ;;  %25225 = vst [vmem:[#allocation201_spill] sm:$0xff] %v20906_v2  ;;  %16868 = vrcp.f32 %v9035_v50  ;;  %v14498_v40 = vcombine.low %v20891_v62, %v20814_v5  ;;  %5839 = vperm.xlu1 %16512, %v16851_v55   ;;  %v8332_v26 = vcombine.low %v8324_v36, %v8331_v6  ;;  %v9109_v46 = vrot.slane %v20860_v42, 2  ;;  %v25230_v6 = vld [vmem:[#allocation56_spill] sm:$0xff] }
 0x3d4   :  { %v20914_v41 = vcombine.low %v8876_v53, %v8883_v49  ;;  %16870 = vpow2.f32 %v4939_v63  ;;  %25226 = vst [vmem:[#allocation202_spill] sm:$0xff] %v20916_v13  ;;  %v8554_v50 = vrot.slane %v8547_v22, %v17359_v27  ;;  %v8577_v54 = vrot.slane %v8570_v45, %v17359_v27  ;;  %v25239_v5 = vld [vmem:[#allocation68_spill] sm:$0xff]  ;;  %v25240_v13 = vld [vmem:[#allocation122_spill] sm:$0xff] }
 0x3d5   :  { %v20918_v3 = vpop.eup %16858  ;;  %v8616_v8 = vcombine.low %v25228_v39, %v20521_v56  ;;  %16872 = vpow2.f32 %v4941_v9  ;;  %v14512_v25 = vrot.slane %v20906_v2, %v17359_v27  ;;  %v9103_v49 = vadd.f32 %v9102_v37, %v20844_v31  ;;  %v25233_v56 = vld [vmem:[#allocation108_spill] sm:$0xff]  ;;  %v20942_v37 = vpop.permute.xlu0 %5164 }
 0x3d6   :  { %25227 = vst [vmem:[#allocation203_spill] sm:$0xff] %v20918_v3  ;;  %v16861_v30 = vpop.eup %16860  ;;  %v25231_v36 = vsub.f32 %v25229_v17, %v25230_v6  ;;  %5578 = vperm.xlu0 %16513, %v20612_v44   ;;  %v14505_v45 = vrot.slane %v14498_v40, %v17359_v27  ;;  %v25235_v9 = vsub.f32 %v25233_v56, %v25234_v16  ;;  %25236 = vst [vmem:[#allocation111_spill] sm:$0xff] %v20942_v37  ;;  %v25237_v44 = vld [vmem:[#allocation120_spill] sm:$0xff]  ;;  %vm15578_vm13 = vcmask 1045509  }
 0x3d7   :  { %v20932_v22 = vpop.eup %16862  ;;  %v8561_v63 = vrot.slane %v20294_v59, %v17359_v27  ;;  %v8584_v31 = vrot.slane %v20378_v33, %v17359_v27  ;;  %16874 = vrcp.f32 %v9042_v35  ;;  %v10909_v17 = vmul.f32 1.442695, %v25237_v44 }
 0x3d8   :  { %v10905_v55 = vmul.f32 1.442695, %v25231_v36  ;;  %25232 = vst [vmem:[#allocation152_spill] sm:$0xff] %v20932_v22  ;;  %v10907_v53 = vmul.f32 1.442695, %v25235_v9  ;;  %v20944_v39 = vpop.eup %16864  ;;  %v9123_v6 = vrot.slane %v9122_v0, 2  ;;  %v8339_v40 = vrot.slane %v8332_v26, %v17359_v27  ;;  %v20948_v36 = vpop.permute.xlu1 %5083 }
 0x3d9   :  { %25238 = vst [vmem:[#allocation56_spill] sm:$0xff] %v20948_v36  ;;  %v8562_v56 = vcombine.low %v8554_v50, %v8561_v63  ;;  %v8585_v16 = vcombine.low %v8577_v54, %v8584_v31  ;;  %v8623_v9 = vrot.slane %v8616_v8, %v17359_v27  ;;  %v8662_v59 = vcombine.low %v20733_v60, %v16861_v30  ;;  %v25244_v8 = vld [vmem:[#allocation124_spill] sm:$0xff]  ;;  %v25292_v36 = vld [vmem:[#allocation27_spill] sm:$0xff] }
 0x3da   :  { %v9104_v2 = vrot.slane %v9103_v49, 1  ;;  %v9110_v33 = vadd.f32 %v9109_v46, %v20860_v42  ;;  %16876 = vpow2.f32 %v10905_v55  ;;  %v25241_v35 = vsub.f32 %v25239_v5, %v25240_v13  ;;  %5596 = vperm.xlu0 %16513, %v16861_v30   ;;  %v25243_v42 = vld [vmem:[#allocation26_spill] sm:$0xff] }
 0x3db   :  { %v25242_v26 = vrot.slane %v20726_v18, 1  ;;  %v20961_v50 = vcombine.low %v14505_v45, %v14512_v25  ;;  %16878 = vpow2.f32 %v10907_v53  ;;  %v8630_v60 = vrot.slane %v20411_v52, %v17359_v27  ;;  %v20974_v53 = vpop.permute.xlu0 %5182 }
 0x3dc   :  { %v10917_v62 = vmul.f32 1.442695, %v25241_v35  ;;  %16880 = vpow2.f32 %v10909_v17  ;;  %v9124_v54 = vadd.f32 %v9123_v6, %v9122_v0  ;;  %v25245_v46 = vsub.f32 %v25243_v42, %v25244_v8  ;;  %v20972_v45 = vpop.permute.xlu1 %5137  ;;  %25247 = vst [vmem:[#allocation52_spill] sm:$0xff] %v20974_v53  ;;  %v25248_v17 = vld [vmem:[#allocation129_spill] sm:$0xff]  ;;  %v25249_v35 = vld [vmem:[#allocation12_spill] sm:$0xff] }
 0x3dd   :  { %v20959_v44 = vadd.f32 %v25242_v26, %v20726_v18  ;;  %v8973_v5 = vsel %vm3614_vm11, %v8339_v40, 0.0  ;;  %v8569_v13 = vrot.slane %v8562_v56, %v17359_v27  ;;  %v8592_v30 = vrot.slane %v8585_v16, %v17359_v27  ;;  %25246 = vst [vmem:[#allocation108_spill] sm:$0xff] %v20972_v45 }
 0x3de   :  { %v10919_v55 = vmul.f32 1.442695, %v25245_v46  ;;  %v8631_v18 = vcombine.low %v8623_v9, %v8630_v60  ;;  %v8669_v25 = vrot.slane %v8662_v59, %v17359_v27  ;;  %v9105_v0 = vadd.f32 %v9104_v2, %v9103_v49 }
 0x3df   :  { %v9111_v63 = vrot.slane %v9110_v33, 1  ;;  %16882 = vpow2.f32 %v10917_v62  ;;  %v16867_v31 = vpop.eup %16866  ;;  %v10921_v6 = vmul.f32 1.442695, %v25248_v17  ;;  %v8974_v40 = vrot.slane %v8973_v5, 4 }
 0x3e0   :  { %v10004_v56 = vcombine.high %v25249_v35, %v25249_v35  ;;  %v8676_v16 = vrot.slane %v20870_v29, %v17359_v27  ;;  %v20982_v9 = vpop.eup %16868  ;;  %v14705_v2 = vcombine.low %v20918_v3, %v20932_v22  ;;  %v9125_v49 = vrot.slane %v9124_v54, 1  ;;  %5614 = vperm.xlu0 %16513, %v16867_v31   ;;  %v20996_v3 = vpop.permute.xlu1 %5173 }
 0x3e1   :  { %16884 = vpow2.f32 %v10919_v55  ;;  %v16871_v62 = vpop.eup %16870  ;;  %v9043_v26 = vsel %vm3614_vm11, %v8569_v13, 0.0  ;;  %v9050_v60 = vsel %vm3614_vm11, %v8592_v30, 0.0  ;;  %v8638_v42 = vrot.slane %v8631_v18, %v17359_v27  ;;  %v25250_v55 = vld [vmem:[#allocation128_spill] sm:$0xff]  ;;  %25251 = vst [vmem:[#allocation120_spill] sm:$0xff] %v20996_v3  ;;  %v20998_v30 = vpop.permute.xlu0 %5416 }
 0x3e2   :  { %v8677_v8 = vcombine.low %v8669_v25, %v8676_v16  ;;  %v16873_v29 = vpop.eup %16872  ;;  %16886 = vrcp.f32 %v9105_v0  ;;  %v9112_v17 = vadd.f32 %v9111_v63, %v9110_v33  ;;  %v8685_v52 = vcombine.low %v16867_v31, %v16871_v62  ;;  %5623 = vperm.xlu1 %16512, %v16871_v62   ;;  %25252 = vst [vmem:[#allocation68_spill] sm:$0xff] %v20998_v30 }
 0x3e3   :  { %16888 = vpow2.f32 %v10921_v6  ;;  %v8975_v59 = vadd.f32 %v8974_v40, %v8973_v5  ;;  %v10676_v22 = vsub.f32 %v25250_v55, %v10004_v56  ;;  %v8615_v13 = vrot.slane %v20534_v1, %v17359_v27  ;;  %v25259_v55 = vld [vmem:[#allocation73_spill] sm:$0xff] }
 0x3e4   :  { %v9126_v18 = vadd.f32 %v9125_v49, %v9124_v54  ;;  %v9044_v25 = vrot.slane %v9043_v26, 4  ;;  %v9051_v0 = vrot.slane %v9050_v60, 4  ;;  %v8692_v16 = vrot.slane %v8685_v52, %v17359_v27  ;;  %5848 = vperm.xlu0 %16513, %v20885_v4   ;;  %v21002_v33 = vpop.eup %16874  ;;  %v25253_v54 = vld [vmem:[#allocation126_spill] sm:$0xff]  ;;  %v25255_v4 = vld [vmem:[#allocation164_spill] sm:$0xff] }
 0x3e5   :  { %v9064_v5 = vsel %vm3614_vm11, %v8638_v42, 0.0  ;;  %v8777_v63 = vcombine.low %v20198_v24, %v20759_v61  ;;  %v8684_v1 = vrot.slane %v8677_v8, %v17359_v27  ;;  %v8699_v31 = vrot.slane %v16873_v29, %v17359_v27  ;;  %v25256_v49 = vld [vmem:[#allocation38_spill] sm:$0xff] }
 0x3e6   :  { %v21010_v6 = vrot.slane %v14705_v2, %v17359_v27  ;;  %16890 = vrcp.f32 %v9112_v17  ;;  %v25254_v52 = vsub.f32 %v25253_v54, %v25249_v35  ;;  %v8823_v56 = vcombine.low %v25255_v4, %v20781_v12  ;;  %9222 = vperm.xlu1 %16512, %v25256_v49   ;;  %v25258_v17 = vld [vmem:[#allocation125_spill] sm:$0xff] }
 0x3e7   :  { %v21018_v62 = vpop.eup %16876  ;;  %v8976_v24 = vrot.slane %v8975_v59, 2  ;;  %v9057_v61 = vsel %vm3614_vm11, %v8615_v13, 0.0  ;;  %v8661_v42 = vrot.slane %v20642_v10, %v17359_v27  ;;  %v8700_v2 = vcombine.low %v8692_v16, %v8699_v31  ;;  %v21032_v10 = vpop.permute.xlu1 %5407  ;;  %v25264_v31 = vld [vmem:[#allocation100_spill] sm:$0xff] }
 0x3e8   :  { %v10791_v40 = vmul.f32 1.442695, %v25254_v52  ;;  %v21023_v8 = vpop.eup %16878  ;;  %v25260_v35 = vsub.f32 %v25258_v17, %v25259_v55  ;;  %v10795_v52 = vmul.f32 1.442695, %v10676_v22  ;;  %v9052_v46 = vadd.f32 %v9051_v0, %v9050_v60  ;;  %5632 = vperm.xlu0 %16513, %v16873_v29   ;;  %25262 = vst [vmem:[#allocation124_spill] sm:$0xff] %v21032_v10  ;;  %v21034_v16 = vpop.permute.xlu0 %5434  ;;  %v25265_v55 = vld [vmem:[#allocation136_spill] sm:$0xff] }
 0x3e9   :  { %25257 = vst [vmem:[#allocation122_spill] sm:$0xff] %v21023_v8  ;;  %v9065_v12 = vrot.slane %v9064_v5, 4  ;;  %v21028_v4 = vpop.eup %16880  ;;  %16892 = vrcp.f32 %v9126_v18  ;;  %v9045_v49 = vadd.f32 %v9044_v25, %v9043_v26  ;;  %v8784_v13 = vrot.slane %v8777_v63, %v17359_v27  ;;  %25263 = vst [vmem:[#allocation129_spill] sm:$0xff] %v21034_v16  ;;  %v25266_v0 = vld [vmem:[#allocation104_spill] sm:$0xff] }
 0x3ea   :  { %v10793_v54 = vmul.f32 1.442695, %v25260_v35  ;;  %25261 = vst [vmem:[#allocation26_spill] sm:$0xff] %v21028_v4  ;;  %v9078_v3 = vsel %vm3614_vm11, %v8684_v1, 0.0  ;;  %v10234_v17 = vcombine.high %v25264_v31, %v25264_v31  ;;  %v10242_v22 = vcombine.high %v25265_v55, %v25265_v55  ;;  %9182 = vperm.xlu1 %16512, %v25266_v0  }
 0x3eb   :  { %v8830_v60 = vrot.slane %v8823_v56, %v17359_v27  ;;  %v9058_v29 = vrot.slane %v9057_v61, 4  ;;  %v8977_v18 = vadd.f32 %v8976_v24, %v8975_v59  ;;  %v8791_v25 = vrot.slane %v20577_v11, %v17359_v27  ;;  %v25268_v56 = vld [vmem:[#allocation106_spill] sm:$0xff]  ;;  %v25270_v59 = vld [vmem:[#allocation99_spill] sm:$0xff]  ;;  %v21062_v30 = vpop.permute.xlu1 %5443 }
 0x3ec   :  { %v21042_v26 = vpop.eup %16882  ;;  %v9071_v63 = vsel %vm3614_vm11, %v8661_v42, 0.0  ;;  %v8707_v1 = vrot.slane %v8700_v2, %v17359_v27  ;;  %v9053_v35 = vrot.slane %v9052_v46, 2  ;;  %v9066_v53 = vadd.f32 %v9065_v12, %v9064_v5  ;;  %9227 = vperm.xlu0 %16513, %v25268_v56   ;;  %v25272_v5 = vld [vmem:[#allocation50_spill] sm:$0xff]  ;;  %25274 = vst [vmem:[#allocation126_spill] sm:$0xff] %v21062_v30 }
 0x3ed   :  { %25267 = vst [vmem:[#allocation12_spill] sm:$0xff] %v21042_v26  ;;  %v8837_v55 = vrot.slane %v20647_v20, %v17359_v27  ;;  %v9079_v16 = vrot.slane %v9078_v3, 4  ;;  %16894 = vpow2.f32 %v10791_v40  ;;  %v9046_v0 = vrot.slane %v9045_v49, 2  ;;  %v25273_v20 = vld [vmem:[#allocation131_spill] sm:$0xff] }
 0x3ee   :  { %v21051_v51 = vpop.eup %16884  ;;  %v25271_v24 = vsub.f32 %v25270_v59, %v25264_v31  ;;  %v8792_v45 = vcombine.low %v8784_v13, %v8791_v25  ;;  %16896 = vpow2.f32 %v10793_v54  ;;  %v9059_v2 = vadd.f32 %v9058_v29, %v9057_v61  ;;  %9232 = vperm.xlu1 %16512, %v25272_v5   ;;  %v21064_v31 = vpop.permute.xlu0 %5452  ;;  %v25277_v25 = vld [vmem:[#allocation79_spill] sm:$0xff] }
 0x3ef   :  { %25269 = vst [vmem:[#allocation128_spill] sm:$0xff] %v21051_v51  ;;  %v8838_v42 = vcombine.low %v8830_v60, %v8837_v55  ;;  %v9072_v37 = vrot.slane %v9071_v63, 4  ;;  %v21057_v12 = vpop.eup %16886  ;;  %16898 = vpow2.f32 %v10795_v52  ;;  %v10706_v56 = vsub.f32 %v25273_v20, %v10234_v17  ;;  %25275 = vst [vmem:[#allocation164_spill] sm:$0xff] %v21064_v31  ;;  %v25278_v52 = vld [vmem:[#allocation132_spill] sm:$0xff]  ;;  %v25279_v17 = vld [vmem:[#allocation69_spill] sm:$0xff] }
 0x3f0   :  { %v10851_v11 = vmul.f32 1.442695, %v25271_v24  ;;  %v10256_v10 = vrot.slane %v10242_v22, %v17359_v27  ;;  %v9085_v40 = vsel %vm3614_vm11, %v8707_v1, 0.0  ;;  %v21066_v13 = vpop.eup %16888  ;;  %v8978_v54 = vrot.slane %v8977_v18, 1  ;;  %9187 = vperm.xlu0 %16513, %v25277_v25   ;;  %v25281_v31 = vld [vmem:[#allocation42_spill] sm:$0xff]  ;;  %v25285_v25 = vld [vmem:[#allocation36_spill] sm:$0xff] }
 0x3f1   :  { %25276 = vst [vmem:[#allocation38_spill] sm:$0xff] %v21066_v13  ;;  %v9054_v61 = vadd.f32 %v9053_v35, %v9052_v46  ;;  %v9067_v60 = vrot.slane %v9066_v53, 2  ;;  %v9080_v29 = vadd.f32 %v9079_v16, %v9078_v3  ;;  %v9047_v55 = vadd.f32 %v9046_v0, %v9045_v49  ;;  %v25282_v16 = vld [vmem:[#allocation64_spill] sm:$0xff]  ;;  %v25283_v35 = vld [vmem:[#allocation59_spill] sm:$0xff]  ;;  %v25284_v0 = vld [vmem:[#allocation70_spill] sm:$0xff] }
 0x3f2   :  { %16900 = vpow2.f32 %v10851_v11  ;;  %v25280_v59 = vsub.f32 %v25278_v52, %v25279_v17  ;;  %v8799_v1 = vrot.slane %v8792_v45, %v17359_v27  ;;  %v8845_v24 = vrot.slane %v8838_v42, %v17359_v27  ;;  %9242 = vperm.xlu1 %16512, %v25281_v31   ;;  %v21086_v31 = vpop.permute.xlu1 %5479 }
 0x3f3   :  { %v9060_v5 = vrot.slane %v9059_v2, 2  ;;  %v9073_v20 = vadd.f32 %v9072_v37, %v9071_v63  ;;  %v9086_v30 = vrot.slane %v9085_v40, 4  ;;  %v21075_v46 = vpop.eup %16890  ;;  %v10855_v3 = vmul.f32 1.442695, %v10706_v56  ;;  %25287 = vst [vmem:[#allocation125_spill] sm:$0xff] %v21086_v31  ;;  %v25290_v31 = vld [vmem:[#allocation148_spill] sm:$0xff] }
 0x3f4   :  { %v10853_v22 = vmul.f32 1.442695, %v25280_v59  ;;  %v10707_v49 = vsub.f32 %v25283_v35, %v25282_v16  ;;  %v10708_v11 = vsub.f32 %v25284_v0, %v10256_v10  ;;  %v10288_v52 = vcombine.high %v25285_v25, %v25285_v25  ;;  %9237 = vperm.xlu0 %16513, %v25286_v7   ;;  %v21088_v16 = vpop.permute.xlu0 %5686  ;;  %v25289_v35 = vld [vmem:[#allocation114_spill] sm:$0xff] }
 0x3f5   :  { %v8979_v17 = vadd.f32 %v8978_v54, %v8977_v18  ;;  %v9055_v45 = vrot.slane %v9054_v61, 1  ;;  %v9068_v59 = vadd.f32 %v9067_v60, %v9066_v53  ;;  %v9081_v42 = vrot.slane %v9080_v29, 2  ;;  %25288 = vst [vmem:[#allocation73_spill] sm:$0xff] %v21088_v16  ;;  %v25291_v16 = vld [vmem:[#allocation19_spill] sm:$0xff] }
 0x3f6   :  { %v9048_v37 = vrot.slane %v9047_v55, 1  ;;  %16902 = vpow2.f32 %v10853_v22  ;;  %v9113_v63 = vsel %vm3614_vm11, %v8799_v1, 0.0  ;;  %v8868_v56 = vrot.slane %v20347_v58, %v17359_v27  ;;  %v21090_v10 = vpop.eup %16892  ;;  %9192 = vperm.xlu1 %16512, %v25289_v35  }
 0x3f7   :  { %v9127_v18 = vsel %vm3614_vm11, %v8845_v24, 0.0  ;;  %v9061_v54 = vadd.f32 %v9060_v5, %v9059_v2  ;;  %v9074_v53 = vrot.slane %v9073_v20, 2  ;;  %v9087_v60 = vadd.f32 %v9086_v30, %v9085_v40 }
 0x3f8   :  { %16904 = vpow2.f32 %v10855_v3  ;;  %v10857_v7 = vmul.f32 1.442695, %v10707_v49  ;;  %v10859_v22 = vmul.f32 1.442695, %v10708_v11  ;;  %v10302_v1 = vrot.slane %v10288_v52, %v17359_v27  ;;  %9247 = vperm.xlu0 %16513, %v25290_v31   ;;  %v25294_v52 = vld [vmem:[#allocation34_spill] sm:$0xff]  ;;  %v21108_v31 = vpop.permute.xlu1 %5533 }
 0x3f9   :  { %16906 = vrcp.f32 %v8979_v17  ;;  %v9056_v58 = vadd.f32 %v9055_v45, %v9054_v61  ;;  %v9069_v0 = vrot.slane %v9068_v59, 1  ;;  %v9082_v25 = vadd.f32 %v9081_v42, %v9080_v29  ;;  %v25296_v29 = vld [vmem:[#allocation139_spill] sm:$0xff]  ;;  %v25297_v45 = vld [vmem:[#allocation13_spill] sm:$0xff]  ;;  %25298 = vst [vmem:[#allocation104_spill] sm:$0xff] %v21108_v31 }
 0x3fa   :  { %v10713_v38 = vsub.f32 %v25292_v36, %v25291_v16  ;;  %v9114_v24 = vrot.slane %v9113_v63, 4  ;;  %v9128_v2 = vrot.slane %v9127_v18, 4  ;;  %v9134_v30 = vsel %vm3614_vm11, %v8868_v56, 0.0  ;;  %v21099_v40 = vpop.eup %16894  ;;  %9202 = vperm.xlu1 %16512, %v25294_v52   ;;  %v21110_v56 = vpop.permute.xlu0 %5704  ;;  %v25301_v31 = vld [vmem:[#allocation155_spill] sm:$0xff] }
 0x3fb   :  { %25293 = vst [vmem:[#allocation100_spill] sm:$0xff] %v21099_v40  ;;  %v9049_v5 = vadd.f32 %v9048_v37, %v9047_v55  ;;  %v9062_v3 = vrot.slane %v9061_v54, 1  ;;  %v9075_v49 = vadd.f32 %v9074_v53, %v9073_v20  ;;  %v9088_v11 = vrot.slane %v9087_v60, 2  ;;  %v21102_v61 = vpop.eup %16896  ;;  %v25300_v53 = vld [vmem:[#allocation178_spill] sm:$0xff] }
 0x3fc   :  { %25295 = vst [vmem:[#allocation136_spill] sm:$0xff] %v21102_v61  ;;  %16908 = vpow2.f32 %v10857_v7  ;;  %v10861_v17 = vmul.f32 1.442695, %v25296_v29  ;;  %v10714_v42 = vsub.f32 %v25297_v45, %v10302_v1  ;;  %v8891_v36 = vrot.slane %v20914_v41, %v17359_v27  ;;  %v21112_v55 = vpop.eup %16898  ;;  %9197 = vperm.xlu0 %16513, %v25300_v53  }
 0x3fd   :  { %25299 = vst [vmem:[#allocation106_spill] sm:$0xff] %v21112_v55  ;;  %16910 = vrcp.f32 %v9056_v58  ;;  %v9070_v20 = vadd.f32 %v9069_v0, %v9068_v59  ;;  %v9135_v37 = vrot.slane %v9134_v30, 4  ;;  %v9083_v16 = vrot.slane %v9082_v25, 1 }
 0x3fe   :  { %16912 = vpow2.f32 %v10859_v22  ;;  %v10869_v35 = vmul.f32 1.442695, %v10713_v38  ;;  %v9115_v7 = vadd.f32 %v9114_v24, %v9113_v63  ;;  %v9129_v52 = vadd.f32 %v9128_v2, %v9127_v18  ;;  %9252 = vperm.xlu1 %16512, %v25301_v31   ;;  %v25304_v22 = vld [vmem:[#allocation197_spill] sm:$0xff] }
 0x3ff   :  { %v21115_v1 = vpop.eup %16900  ;;  %16914 = vrcp.f32 %v9049_v5  ;;  %v9063_v41 = vadd.f32 %v9062_v3, %v9061_v54  ;;  %v9076_v29 = vrot.slane %v9075_v49, 1  ;;  %v9089_v45 = vadd.f32 %v9088_v11, %v9087_v60  ;;  %v21133_v3 = vpop.permute.xlu1 %5677 }
 0x400   :  { %v25302_v58 = vrot.slane %v20961_v50, %v17359_v27  ;;  %16916 = vpow2.f32 %v10861_v17  ;;  %v10871_v0 = vmul.f32 1.442695, %v10714_v42  ;;  %v9141_v38 = vsel %vm3614_vm11, %v8891_v36, 0.0  ;;  %9207 = vperm.xlu0 %16513, %v25304_v22   ;;  %v25305_v50 = vld [vmem:[#allocation145_spill] sm:$0xff]  ;;  %v21135_v11 = vpop.permute.xlu0 %5722 }
 0x401   :  { %v25303_v63 = vrot.slane %v20944_v39, %v17359_v27  ;;  %16918 = vrcp.f32 %v9070_v20  ;;  %v9136_v54 = vadd.f32 %v9135_v37, %v9134_v30  ;;  %v9084_v60 = vadd.f32 %v9083_v16, %v9082_v25  ;;  %v25307_v20 = vld [vmem:[#allocation147_spill] sm:$0xff]  ;;  %v25308_v37 = vld [vmem:[#allocation158_spill] sm:$0xff] }
 0x402   :  { %v21122_v59 = vsel %vm9564_vm5, %v25302_v58, 0.0  ;;  %16920 = vpow2.f32 %v10869_v35  ;;  %v10873_v24 = vmul.f32 1.442695, %v25305_v50  ;;  %v9116_v2 = vrot.slane %v9115_v7, 2  ;;  %9212 = vperm.xlu1 %16512, %v20806_v28   ;;  %v25313_v50 = vld [vmem:[#allocation159_spill] sm:$0xff] }
 0x403   :  { %v21129_v18 = vcombine.low %v21010_v6, %v25303_v63  ;;  %v9130_v5 = vrot.slane %v9129_v52, 2  ;;  %v21137_v17 = vpop.eup %16902  ;;  %16922 = vrcp.f32 %v9063_v41  ;;  %v9077_v42 = vadd.f32 %v9076_v29, %v9075_v49  ;;  %v25310_v41 = vld [vmem:[#allocation58_spill] sm:$0xff]  ;;  %v25311_v29 = vld [vmem:[#allocation20_spill] sm:$0xff] }
 0x404   :  { %v9142_v6 = vrot.slane %v9141_v38, 4  ;;  %v9090_v36 = vrot.slane %v9089_v45, 1  ;;  %v25306_v25 = vrot.slane %v20909_v21, 2  ;;  %v14728_v31 = vcombine.low %v21018_v62, %v21023_v8  ;;  %9257 = vperm.xlu0 %16513, %v20982_v9   ;;  %v25314_v9 = vld [vmem:[#allocation151_spill] sm:$0xff] }
 0x405   :  { %16924 = vpow2.f32 %v10871_v0  ;;  %v25309_v16 = vsub.f32 %v25307_v20, %v25308_v37  ;;  %v21150_v35 = vpop.eup %16904  ;;  %v15011_v49 = vrot.slane %v21122_v59, 4  ;;  %v25312_v28 = vsub.f32 %v25310_v41, %v25311_v29  ;;  %v25315_v29 = vld [vmem:[#allocation93_spill] sm:$0xff] }
 0x406   :  { %v21143_v30 = vadd.f32 %v25306_v25, %v20909_v21  ;;  %v9137_v63 = vrot.slane %v9136_v54, 2  ;;  %16926 = vrcp.f32 %v9084_v60  ;;  %v16907_v21 = vpop.eup %16906  ;;  %v14727_v0 = vrot.slane %v21129_v18, %v17359_v27  ;;  %9262 = vperm.xlu1 %16512, %v21002_v33   ;;  %v25317_v33 = vld [vmem:[#allocation150_spill] sm:$0xff] }
 0x407   :  { %v10913_v53 = vmul.f32 1.442695, %v25309_v16  ;;  %v10911_v58 = vmul.f32 1.442695, %v25312_v28  ;;  %16928 = vpow2.f32 %v10873_v24  ;;  %v9117_v22 = vadd.f32 %v9116_v2, %v9115_v7  ;;  %v21167_v24 = vpop.permute.xlu1 %5713  ;;  %v21169_v7 = vpop.permute.xlu0 %5758 }
 0x408   :  { %v10915_v25 = vmul.f32 1.442695, %v25313_v50  ;;  %v9131_v20 = vadd.f32 %v9130_v5, %v9129_v52  ;;  %16930 = vrcp.f32 %v9077_v42  ;;  %v9143_v37 = vadd.f32 %v9142_v6, %v9141_v38  ;;  %v25318_v38 = vld [vmem:[#allocation83_spill] sm:$0xff]  ;;  %9217 = vperm.xlu0 %16513, %v16907_v21  }
 0x409   :  { %v9091_v16 = vadd.f32 %v9090_v36, %v9089_v45  ;;  %v14735_v41 = vrot.slane %v14728_v31, %v17359_v27  ;;  %v14774_v60 = vcombine.low %v21042_v26, %v21051_v51  ;;  %16932 = vpow2.f32 %v10913_v53  ;;  %v21171_v52 = vpop.eup %16908  ;;  %v25320_v53 = vld [vmem:[#allocation30_spill] sm:$0xff] }
 0x40a   :  { %v25316_v28 = vsub.f32 %v25314_v9, %v25315_v29  ;;  %v14742_v45 = vrot.slane %v21028_v4, %v17359_v27  ;;  %16934 = vpow2.f32 %v10911_v58  ;;  %v25319_v2 = vsub.f32 %v25317_v33, %v25318_v38  ;;  %v16911_v6 = vpop.eup %16910  ;;  %v25322_v51 = vld [vmem:[#allocation162_spill] sm:$0xff]  ;;  %v25324_v33 = vld [vmem:[#allocation37_spill] sm:$0xff]  ;;  %v25325_v38 = vld [vmem:[#allocation163_spill] sm:$0xff] }
 0x40b   :  { %v9138_v42 = vadd.f32 %v9137_v63, %v9136_v54  ;;  %v14291_v36 = vcombine.low %v21099_v40, %v21102_v61  ;;  %v9118_v31 = vrot.slane %v9117_v22, 1  ;;  %16936 = vpow2.f32 %v10915_v25  ;;  %v21181_v9 = vpop.eup %16912  ;;  %9272 = vperm.xlu1 %16512, %v16911_v6   ;;  %v21203_v6 = vpop.permute.xlu0 %5776 }
 0x40c   :  { %v10925_v18 = vmul.f32 1.442695, %v25316_v28  ;;  %v10923_v5 = vmul.f32 1.442695, %v25319_v2  ;;  %v10927_v50 = vmul.f32 1.442695, %v25320_v53  ;;  %16938 = vrcp.f32 %v9091_v16  ;;  %v16915_v54 = vpop.eup %16914 }
 0x40d   :  { %v9132_v29 = vrot.slane %v9131_v20, 1  ;;  %v25321_v28 = vld [vmem:[#allocation154_spill] sm:$0xff]  ;;  %v9144_v4 = vrot.slane %v9143_v37, 2  ;;  %v14743_v63 = vcombine.low %v14735_v41, %v14742_v45  ;;  %v14781_v21 = vrot.slane %v14774_v60, %v17359_v27  ;;  %v21190_v53 = vpop.eup %16916  ;;  %9267 = vperm.xlu0 %16513, %v16915_v54   ;;  %v21201_v45 = vpop.permute.xlu1 %5767 }
 0x40e   :  { %v25323_v58 = vsub.f32 %v25321_v28, %v25322_v51  ;;  %16940 = vpow2.f32 %v10925_v18  ;;  %v25326_v25 = vsub.f32 %v25324_v33, %v25325_v38  ;;  %25327 = vst [vmem:[#allocation99_spill] sm:$0xff] %v21190_v53  ;;  %v21193_v61 = vadd.f32 %v15011_v49, %v21122_v59  ;;  %v25328_v28 = vld [vmem:[#allocation97_spill] sm:$0xff]  ;;  %v16919_v16 = vpop.eup %16918 }
 0x40f   :  { %16942 = vpow2.f32 %v10923_v5  ;;  %v9139_v51 = vrot.slane %v9138_v42, 1  ;;  %v21197_v41 = vsel %vm9564_vm5, %v14727_v0, 0.0  ;;  %v14788_v60 = vrot.slane %v21066_v13, %v17359_v27  ;;  %v21205_v59 = vpop.eup %16920  ;;  %9282 = vperm.xlu1 %16512, %v16919_v16  }
 0x410   :  { %v10929_v26 = vmul.f32 1.442695, %v25323_v58  ;;  %v10931_v2 = vmul.f32 1.442695, %v25326_v25  ;;  %v10933_v58 = vmul.f32 1.442695, %v25328_v28  ;;  %v9119_v18 = vadd.f32 %v9118_v31, %v9117_v22  ;;  %v16923_v33 = vpop.eup %16922 }
 0x411   :  { %16944 = vpow2.f32 %v10927_v50  ;;  %25329 = vst [vmem:[#allocation50_spill] sm:$0xff] %v21205_v59  ;;  %v14298_v49 = vrot.slane %v14291_v36, %v17359_v27  ;;  %v9133_v5 = vadd.f32 %v9132_v29, %v9131_v20  ;;  %v9145_v54 = vadd.f32 %v9144_v4, %v9143_v37  ;;  %v25330_v22 = vld [vmem:[#allocation160_spill] sm:$0xff]  ;;  %v25331_v31 = vld [vmem:[#allocation166_spill] sm:$0xff]  ;;  %9277 = vperm.xlu0 %16513, %v16923_v33   ;;  %v25334_v29 = vld [vmem:[#allocation161_spill] sm:$0xff] }
 0x412   :  { %16946 = vpow2.f32 %v10929_v26  ;;  %v14750_v0 = vrot.slane %v14743_v63, %v17359_v27  ;;  %v21209_v38 = vcombine.low %v14781_v21, %v14788_v60  ;;  %v25332_v50 = vsub.f32 %v25330_v22, %v25331_v31  ;;  %v21214_v28 = vpop.eup %16924  ;;  %v25335_v63 = vld [vmem:[#allocation169_spill] sm:$0xff]  ;;  %v25338_v22 = vld [vmem:[#allocation172_spill] sm:$0xff] }
 0x413   :  { %16948 = vpow2.f32 %v10931_v2  ;;  %25333 = vst [vmem:[#allocation131_spill] sm:$0xff] %v21214_v28  ;;  %v14305_v13 = vrot.slane %v21112_v55, %v17359_v27  ;;  %v14521_v26 = vcombine.low %v21115_v1, %v21137_v17  ;;  %v9140_v4 = vadd.f32 %v9139_v51, %v9138_v42  ;;  %v16927_v20 = vpop.eup %16926 }
 0x414   :  { %v10863_v25 = vmul.f32 1.442695, %v25332_v50  ;;  %16950 = vpow2.f32 %v10933_v58  ;;  %v14544_v36 = vcombine.low %v21171_v52, %v21181_v9  ;;  %v25336_v21 = vsub.f32 %v25334_v29, %v25335_v63  ;;  %v21226_v16 = vpop.eup %16928  ;;  %9292 = vperm.xlu1 %16512, %v16927_v20   ;;  %v25340_v50 = vld [vmem:[#allocation184_spill] sm:$0xff]  ;;  %v21236_v63 = vpop.permute.xlu1 %5803 }
 0x415   :  { %16952 = vrcp.f32 %v9119_v18  ;;  %25337 = vst [vmem:[#allocation79_spill] sm:$0xff] %v21226_v16  ;;  %v14306_v60 = vcombine.low %v14298_v49, %v14305_v13  ;;  %v10867_v31 = vmul.f32 1.442695, %v25338_v22  ;;  %v9146_v42 = vrot.slane %v9145_v54, 1  ;;  %v16931_v51 = vpop.eup %16930  ;;  %v25339_v18 = vld [vmem:[#allocation92_spill] sm:$0xff] }
 0x416   :  { %v10865_v2 = vmul.f32 1.442695, %v25336_v21  ;;  %16954 = vrcp.f32 %v9133_v5  ;;  %v15074_v58 = vrot.slane %v21197_v41, 4  ;;  %v21231_v33 = vsel %vm9564_vm5, %v14750_v0, 0.0  ;;  %v21238_v21 = vpop.permute.xlu0 %5200  ;;  %v21240_v13 = vpop.eup %16932  ;;  %v25343_v20 = vld [vmem:[#allocation24_spill] sm:$0xff]  ;;  %v25344_v0 = vld [vmem:[#allocation181_spill] sm:$0xff]  ;;  %9287 = vperm.xlu0 %16513, %v16931_v51  }
 0x417   :  { %16956 = vpow2.f32 %v10863_v25  ;;  %v25341_v37 = vsub.f32 %v25339_v18, %v25340_v50  ;;  %25342 = vst [vmem:[#allocation132_spill] sm:$0xff] %v21240_v13  ;;  %v14796_v49 = vrot.slane %v21209_v38, %v17359_v27  ;;  %v14528_v5 = vrot.slane %v14521_v26, %v17359_v27  ;;  %v21248_v55 = vpop.eup %16934  ;;  %v25347_v50 = vld [vmem:[#allocation193_spill] sm:$0xff] }
 0x418   :  { %16958 = vrcp.f32 %v9140_v4  ;;  %v25345_v22 = vsub.f32 %v25343_v20, %v25344_v0  ;;  %25346 = vst [vmem:[#allocation69_spill] sm:$0xff] %v21248_v55  ;;  %v14590_v18 = vcombine.low %v21205_v59, %v21214_v28  ;;  %v25348_v40 = vsub.f32 %v20445_v34, %v25347_v50  ;;  %v21256_v8 = vpop.eup %16936  ;;  %v25350_v20 = vld [vmem:[#allocation174_spill] sm:$0xff]  ;;  %v25351_v34 = vld [vmem:[#allocation179_spill] sm:$0xff] }
 0x419   :  { %v10877_v29 = vmul.f32 1.442695, %v25341_v37  ;;  %v14551_v37 = vrot.slane %v14544_v36, %v17359_v27  ;;  %16960 = vpow2.f32 %v10865_v2  ;;  %25349 = vst [vmem:[#allocation42_spill] sm:$0xff] %v21256_v8  ;;  %v14313_v26 = vrot.slane %v14306_v60, %v17359_v27  ;;  %9302 = vperm.xlu1 %16512, %v25350_v20   ;;  %v16939_v36 = vpop.eup %16938 }
 0x41a   :  { %v10875_v25 = vmul.f32 1.442695, %v25345_v22  ;;  %v10883_v38 = vmul.f32 1.442695, %v25348_v40  ;;  %v14535_v4 = vrot.slane %v21150_v35, %v17359_v27  ;;  %16962 = vpow2.f32 %v10867_v31  ;;  %v25352_v40 = vld [vmem:[#allocation134_spill] sm:$0xff]  ;;  %9297 = vperm.xlu0 %16513, %v16939_v36  }
 0x41b   :  { %v9147_v51 = vadd.f32 %v9146_v42, %v9145_v54  ;;  %v14558_v0 = vrot.slane %v21190_v53, %v17359_v27  ;;  %v14751_v2 = vcombine.low %v21248_v55, %v21240_v13  ;;  %16964 = vpow2.f32 %v10877_v29  ;;  %v21269_v60 = vpop.eup %16940  ;;  %v25356_v13 = vld [vmem:[#allocation188_spill] sm:$0xff]  ;;  %v21277_v55 = vpop.permute.xlu1 %5191 }
 0x41c   :  { %v25353_v22 = vsub.f32 %v25351_v34, %v25352_v40  ;;  %25354 = vst [vmem:[#allocation64_spill] sm:$0xff] %v21269_v60  ;;  %v15075_v28 = vadd.f32 %v15074_v58, %v21197_v41  ;;  %v15081_v54 = vrot.slane %v21231_v33, 4  ;;  %v14536_v31 = vcombine.low %v14528_v5, %v14535_v4  ;;  %v21273_v42 = vpop.eup %16942  ;;  %v21279_v34 = vpop.permute.xlu0 %5470 }
 0x41d   :  { %16966 = vpow2.f32 %v10875_v25  ;;  %25355 = vst [vmem:[#allocation59_spill] sm:$0xff] %v21273_v42  ;;  %v14559_v20 = vcombine.low %v14551_v37, %v14558_v0  ;;  %v14597_v59 = vrot.slane %v14590_v18, %v17359_v27  ;;  %v10879_v29 = vmul.f32 1.442695, %v25356_v13  ;;  %9312 = vperm.xlu1 %16512, %v21075_v46   ;;  %v25359_v18 = vld [vmem:[#allocation195_spill] sm:$0xff] }
 0x41e   :  { %v10881_v50 = vmul.f32 1.442695, %v25353_v22  ;;  %16968 = vpow2.f32 %v10883_v38  ;;  %v21281_v40 = vpop.eup %16944  ;;  %v15094_v41 = vsel %vm9564_vm5, %v14796_v49, 0.0  ;;  %v14947_v58 = vsel %vm9564_vm5, %v14313_v26, 0.0  ;;  %9307 = vperm.xlu0 %16513, %v21057_v12  }
 0x41f   :  { %25357 = vst [vmem:[#allocation70_spill] sm:$0xff] %v21281_v40  ;;  %v14604_v5 = vrot.slane %v21226_v16, %v17359_v27  ;;  %16970 = vrcp.f32 %v9147_v51  ;;  %v21288_v25 = vpop.eup %16946  ;;  %v14758_v13 = vrot.slane %v14751_v2, %v17359_v27  ;;  %v14797_v37 = vcombine.low %v21273_v42, %v21269_v60  ;;  %v25363_v60 = vld [vmem:[#allocation75_spill] sm:$0xff] }
 0x420   :  { %25358 = vst [vmem:[#allocation36_spill] sm:$0xff] %v21288_v25  ;;  %16972 = vpow2.f32 %v10881_v50  ;;  %v10885_v38 = vmul.f32 1.442695, %v25359_v18  ;;  %v21294_v4 = vpop.eup %16948  ;;  %v15008_v49 = vrot.slane %v21143_v30, 1  ;;  %v25361_v26 = vrot.slane %v21193_v61, 2 }
 0x421   :  { %25360 = vst [vmem:[#allocation16_spill] sm:$0xff] %v21294_v4  ;;  %v15076_v36 = vrot.slane %v15075_v28, 2  ;;  %v14543_v46 = vrot.slane %v14536_v31, %v17359_v27  ;;  %v21302_v0 = vpop.eup %16950  ;;  %v14566_v2 = vrot.slane %v14559_v20, %v17359_v27  ;;  %v14605_v22 = vcombine.low %v14597_v59, %v14604_v5  ;;  %9322 = vperm.xlu1 %16512, %v21090_v10   ;;  %v21311_v20 = vpop.permute.xlu1 %5461 }
 0x422   :  { %v15014_v51 = vadd.f32 %v25361_v26, %v21193_v61  ;;  %25362 = vst [vmem:[#allocation114_spill] sm:$0xff] %v21302_v0  ;;  %v14765_v50 = vrot.slane %v21256_v8, %v17359_v27  ;;  %16974 = vpow2.f32 %v10879_v29  ;;  %v16953_v18 = vpop.eup %16952  ;;  %v15082_v42 = vadd.f32 %v15081_v54, %v21231_v33  ;;  %v21313_v59 = vpop.permute.xlu0 %5488 }
 0x423   :  { %16976 = vrcp.f32 %v25363_v60  ;;  %v15095_v61 = vrot.slane %v15094_v41, 4  ;;  %v14948_v26 = vrot.slane %v14947_v58, 4  ;;  %v16955_v31 = vpop.eup %16954  ;;  %v14804_v16 = vrot.slane %v14797_v37, %v17359_v27  ;;  %9317 = vperm.xlu0 %16513, %v16953_v18  }
 0x424   :  { %v14766_v12 = vcombine.low %v14758_v13, %v14765_v50  ;;  %16978 = vpow2.f32 %v10885_v38  ;;  %v21315_v5 = vpop.eup %16956  ;;  %v15009_v60 = vadd.f32 %v15008_v49, %v21143_v30  ;;  %v15015_v33 = vrot.slane %v15014_v51, 1 }
 0x425   :  { %25364 = vst [vmem:[#allocation148_spill] sm:$0xff] %v21315_v5  ;;  %16980 = vrcp.f32 %v20959_v44  ;;  %v15077_v54 = vadd.f32 %v15076_v36, %v15075_v28  ;;  %v16959_v29 = vpop.eup %16958  ;;  %v15017_v10 = vsel %vm9564_vm5, %v14543_v46, 0.0  ;;  %v15024_v13 = vsel %vm9564_vm5, %v14566_v2, 0.0 }
 0x426   :  { %v14612_v37 = vrot.slane %v14605_v22, %v17359_v27  ;;  %v14811_v38 = vrot.slane %v21281_v40, %v17359_v27  ;;  %v21324_v50 = vpop.eup %16960  ;;  %v15083_v8 = vrot.slane %v15082_v42, 2  ;;  %v15096_v53 = vadd.f32 %v15095_v61, %v15094_v41  ;;  %9332 = vperm.xlu1 %16512, %v16959_v29  }
 0x427   :  { %25365 = vst [vmem:[#allocation19_spill] sm:$0xff] %v21324_v50  ;;  %v14949_v44 = vadd.f32 %v14948_v26, %v14947_v58  ;;  %v14820_v30 = vcombine.low %v21288_v25, %v21294_v4  ;;  %v21328_v28 = vpop.eup %16962  ;;  %v14773_v49 = vrot.slane %v14766_v12, %v17359_v27  ;;  %v25367_v46 = vsub.f32 %v20561_v43, %v20788_v15  ;;  %v21346_v12 = vpop.permute.xlu1 %5497 }
 0x428   :  { %25366 = vst [vmem:[#allocation27_spill] sm:$0xff] %v21328_v28  ;;  %v14812_v36 = vcombine.low %v14804_v16, %v14811_v38  ;;  %v21334_v22 = vpop.eup %16964  ;;  %16982 = vrcp.f32 %v15009_v60  ;;  %v21336_v18 = vadd.f32 %v15015_v33, %v15014_v51  ;;  %v15018_v41 = vrot.slane %v15017_v10, 4  ;;  %9327 = vperm.xlu0 %16513, %v16955_v31   ;;  %v21348_v60 = vpop.permute.xlu0 %5506 }
 0x429   :  { %v10937_v2 = vmul.f32 1.442695, %v25367_v46  ;;  %25368 = vst [vmem:[#allocation34_spill] sm:$0xff] %v21334_v22  ;;  %v15025_v58 = vrot.slane %v15024_v13, 4  ;;  %v15078_v26 = vrot.slane %v15077_v54, 1  ;;  %v15038_v29 = vsel %vm9564_vm5, %v14612_v37, 0.0 }
 0x42a   :  { %v21338_v61 = vpop.eup %16966  ;;  %v14567_v16 = vcombine.low %v21315_v5, %v21324_v50  ;;  %v25370_v43 = vsub.f32 %v20573_v57, %v20785_v19  ;;  %v15084_v33 = vadd.f32 %v15083_v8, %v15082_v42  ;;  %v15097_v31 = vrot.slane %v15096_v53, 2  ;;  %v25372_v19 = vld [vmem:[#allocation25_spill] sm:$0xff] }
 0x42b   :  { %25369 = vst [vmem:[#allocation139_spill] sm:$0xff] %v21338_v61  ;;  %v21350_v51 = vpop.eup %16968  ;;  %v14950_v38 = vrot.slane %v14949_v44, 2  ;;  %v14827_v46 = vrot.slane %v14820_v30, %v17359_v27  ;;  %v17223_v4 = vmov 17   ;;  %v15087_v25 = vsel %vm9564_vm5, %v14773_v49, 0.0 }
 0x42c   :  { %v10935_v15 = vmul.f32 1.442695, %v25370_v43  ;;  %25371 = vst [vmem:[#allocation13_spill] sm:$0xff] %v21350_v51  ;;  %16514 = vset.pattern.permute.xlu1 %v17223_v4  ;;  %v16971_v37 = vpop.eup %16970  ;;  %v14819_v40 = vrot.slane %v14812_v36, %v17359_v27  ;;  %v14613_v57 = vcombine.low %v21338_v61, %v21334_v22  ;;  %16984 = vpow2.f32 %v10937_v2 }
 0x42d   :  { %10943 = vperm.xlu1 %16514, %v25372_v19   ;;  %v21358_v43 = vpop.eup %16972  ;;  %v15019_v8 = vadd.f32 %v15018_v41, %v15017_v10  ;;  %v15026_v42 = vadd.f32 %v15025_v58, %v15024_v13  ;;  %v15039_v50 = vrot.slane %v15038_v29, 4  ;;  %v14834_v30 = vrot.slane %v21302_v0, %v17359_v27  ;;  %9337 = vperm.xlu0 %16513, %v16971_v37   ;;  %v25376_v0 = vld [vmem:[#allocation82_spill] sm:$0xff] }
 0x42e   :  { %25373 = vst [vmem:[#allocation178_spill] sm:$0xff] %v21358_v43  ;;  %v14574_v5 = vrot.slane %v14567_v16, %v17359_v27  ;;  %v14636_v49 = vcombine.low %v21358_v43, %v21350_v51  ;;  %16986 = vpow2.f32 %v10935_v15  ;;  %v10939_v36 = vmul.f32 1.442695, %v20810_v32  ;;  %v21375_v15 = vpop.permute.xlu1 %5551  ;;  %v21377_v32 = vpop.permute.xlu0 %5542 }
 0x42f   :  { %v21366_v2 = vpop.eup %16974  ;;  %v15079_v19 = vadd.f32 %v15078_v26, %v15077_v54  ;;  %v15098_v22 = vadd.f32 %v15097_v31, %v15096_v53  ;;  %v15088_v61 = vrot.slane %v15087_v25, 4  ;;  %v14835_v10 = vcombine.low %v14827_v46, %v14834_v30 }
 0x430   :  { %25374 = vst [vmem:[#allocation155_spill] sm:$0xff] %v21366_v2  ;;  %v21368_v13 = vpop.eup %16976  ;;  %v15085_v41 = vrot.slane %v15084_v33, 1  ;;  %v15101_v58 = vsel %vm9564_vm5, %v14819_v40, 0.0  ;;  %v14581_v16 = vrot.slane %v21328_v28, %v17359_v27  ;;  %v14620_v37 = vrot.slane %v14613_v57, %v17359_v27 }
 0x431   :  { %25375 = vst [vmem:[#allocation197_spill] sm:$0xff] %v21368_v13  ;;  %10961 = vperm.xlu1 %16514, %v25376_v0   ;;  %v21379_v54 = vpop.eup %16978  ;;  %v14951_v53 = vadd.f32 %v14950_v38, %v14949_v44  ;;  %v15020_v26 = vrot.slane %v15019_v8, 2  ;;  %v15027_v31 = vrot.slane %v15026_v42, 2  ;;  %v15040_v46 = vadd.f32 %v15039_v50, %v15038_v29  ;;  %16515 = vset.pattern.permute.xlu0 %v17223_v4  ;;  %v25379_v0 = vld [vmem:[#allocation39_spill] sm:$0xff]  ;;  %v25380_v29 = vld [vmem:[#allocation14_spill] sm:$0xff] }
 0x432   :  { %25377 = vst [vmem:[#allocation145_spill] sm:$0xff] %v21379_v54  ;;  %v21381_v30 = vpop.eup %16980  ;;  %v14582_v40 = vcombine.low %v14574_v5, %v14581_v16  ;;  %v14627_v13 = vrot.slane %v21366_v2, %v17359_v27  ;;  %v14643_v57 = vrot.slane %v14636_v49, %v17359_v27  ;;  %16988 = vpow2.f32 %v10939_v36  ;;  %10952 = vperm.xlu0 %16515, %v25379_v0   ;;  %v25408_v2 = vld [vmem:[#allocation77_spill] sm:$0xff] }
 0x433   :  { %25378 = vst [vmem:[#allocation147_spill] sm:$0xff] %v21381_v30  ;;  %v15099_v51 = vrot.slane %v15098_v22, 1  ;;  %v15089_v43 = vadd.f32 %v15088_v61, %v15087_v25  ;;  %v15102_v28 = vrot.slane %v15101_v58, 4  ;;  %v14842_v44 = vrot.slane %v14835_v10, %v17359_v27  ;;  %v25383_v10 = vld [vmem:[#allocation86_spill] sm:$0xff] }
 0x434   :  { %16990 = vrcp.f32 %v21336_v18  ;;  %v15086_v50 = vadd.f32 %v15085_v41, %v15084_v33  ;;  %v14628_v4 = vcombine.low %v14620_v37, %v14627_v13  ;;  %v14650_v5 = vrot.slane %v21379_v54, %v17359_v27  ;;  %v21399_v13 = vpop.permute.xlu1 %5587  ;;  %v21401_v41 = vpop.permute.xlu0 %5560 }
 0x435   :  { %10970 = vperm.xlu1 %16514, %v25380_v29   ;;  %v14952_v38 = vrot.slane %v14951_v53, 1  ;;  %v15021_v16 = vadd.f32 %v15020_v26, %v15019_v8  ;;  %v15028_v49 = vadd.f32 %v15027_v31, %v15026_v42  ;;  %v15041_v36 = vrot.slane %v15040_v46, 2  ;;  %v21392_v30 = vpop.eup %16982  ;;  %25384 = vst [vmem:[#allocation58_spill] sm:$0xff] %v21399_v13  ;;  %25385 = vst [vmem:[#allocation20_spill] sm:$0xff] %v21401_v41 }
 0x436   :  { %25381 = vst [vmem:[#allocation158_spill] sm:$0xff] %v21392_v30  ;;  %16992 = vrcp.f32 %v15079_v19  ;;  %v14589_v25 = vrot.slane %v14582_v40, %v17359_v27  ;;  %v14651_v61 = vcombine.low %v14643_v57, %v14650_v5  ;;  %v25382_v18 = vsub.f32 %v20694_v48, %v20878_v47  ;;  %10979 = vperm.xlu0 %16515, %v25383_v10   ;;  %v25387_v48 = vld [vmem:[#allocation107_spill] sm:$0xff] }
 0x437   :  { %v15100_v37 = vadd.f32 %v15099_v51, %v15098_v22  ;;  %v15090_v8 = vrot.slane %v15089_v43, 2  ;;  %v15103_v42 = vadd.f32 %v15102_v28, %v15101_v58  ;;  %v15108_v26 = vsel %vm9564_vm5, %v14842_v44, 0.0  ;;  %v25389_v58 = vld [vmem:[#allocation115_spill] sm:$0xff] }
 0x438   :  { %v10889_v33 = vmul.f32 1.442695, %v25382_v18  ;;  %16994 = vrcp.f32 %v15086_v50  ;;  %v14635_v19 = vrot.slane %v14628_v4, %v17359_v27  ;;  %v25386_v31 = vsub.f32 %v20691_v23, %v20868_v14  ;;  %v21414_v44 = vpop.permute.xlu1 %5731  ;;  %v25392_v4 = vld [vmem:[#allocation142_spill] sm:$0xff] }
 0x439   :  { %10988 = vperm.xlu1 %16514, %v25387_v48   ;;  %v21409_v47 = vpop.eup %16984  ;;  %v14953_v57 = vadd.f32 %v14952_v38, %v14951_v53  ;;  %v15022_v0 = vrot.slane %v15021_v16, 1  ;;  %v15029_v5 = vrot.slane %v15028_v49, 1  ;;  %v15042_v29 = vadd.f32 %v15041_v36, %v15040_v46  ;;  %25390 = vst [vmem:[#allocation151_spill] sm:$0xff] %v21414_v44  ;;  %v25393_v36 = vld [vmem:[#allocation65_spill] sm:$0xff]  ;;  %v25397_v48 = vld [vmem:[#allocation48_spill] sm:$0xff]  ;;  %v25412_v44 = vld [vmem:[#allocation74_spill] sm:$0xff] }
 0x43a   :  { %v10887_v40 = vmul.f32 1.442695, %v25386_v31  ;;  %25388 = vst [vmem:[#allocation159_spill] sm:$0xff] %v21409_v47  ;;  %v15109_v22 = vrot.slane %v15108_v26, 4  ;;  %v15031_v28 = vsel %vm9564_vm5, %v14589_v25, 0.0  ;;  %v14658_v51 = vrot.slane %v14651_v61, %v17359_v27  ;;  %10997 = vperm.xlu0 %16515, %v25389_v58   ;;  %v21423_v25 = vpop.permute.xlu0 %5740 }
 0x43b   :  { %16996 = vpow2.f32 %v10889_v33  ;;  %v21416_v23 = vpop.eup %16986  ;;  %v15091_v14 = vadd.f32 %v15090_v8, %v15089_v43  ;;  %v15104_v50 = vrot.slane %v15103_v42, 2  ;;  %v15045_v53 = vsel %vm9564_vm5, %v14635_v19, 0.0  ;;  %25394 = vst [vmem:[#allocation150_spill] sm:$0xff] %v21423_v25  ;;  %v25395_v8 = vld [vmem:[#allocation3_spill] sm:$0xff]  ;;  %v25396_v19 = vld [vmem:[#allocation189_spill] sm:$0xff] }
 0x43c   :  { %25391 = vst [vmem:[#allocation93_spill] sm:$0xff] %v21416_v23  ;;  %16998 = vrcp.f32 %v15100_v37  ;;  %v14843_v46 = vcombine.low %v21416_v23, %v21409_v47  ;;  %v10891_v38 = vmul.f32 1.442695, %v25392_v4  ;;  %v15023_v61 = vadd.f32 %v15022_v0, %v15021_v16  ;;  %v25400_v16 = vld [vmem:[#allocation171_spill] sm:$0xff]  ;;  %v25401_v0 = vld [vmem:[#allocation88_spill] sm:$0xff] }
 0x43d   :  { %17000 = vpow2.f32 %v10887_v40  ;;  %11006 = vperm.xlu1 %16514, %v25393_v36   ;;  %v15030_v18 = vadd.f32 %v15029_v5, %v15028_v49  ;;  %v15032_v33 = vrot.slane %v15031_v28, 4  ;;  %v15043_v10 = vrot.slane %v15042_v29, 1  ;;  %v21429_v40 = vpop.permute.xlu1 %5785 }
 0x43e   :  { %17002 = vrcp.f32 %v14953_v57  ;;  %v15110_v37 = vadd.f32 %v15109_v22, %v15108_v26  ;;  %v15052_v43 = vsel %vm9564_vm5, %v14658_v51, 0.0  ;;  %v5251_v31 = vrot.slane %v25396_v19, %v25395_v8  ;;  %11015 = vperm.xlu0 %16515, %v25397_v48   ;;  %25398 = vst [vmem:[#allocation83_spill] sm:$0xff] %v21429_v40  ;;  %v25402_v22 = vld [vmem:[#allocation21_spill] sm:$0xff] }
 0x43f   :  { %v21431_v58 = vpop.eup %16988  ;;  %v15092_v4 = vrot.slane %v15091_v14, 1  ;;  %v21433_v36 = vadd.f32 %v15104_v50, %v15103_v42  ;;  %v15046_v57 = vrot.slane %v15045_v53, 4  ;;  %v5242_v49 = vrot.slane %v25400_v16, %v25395_v8  ;;  %v25403_v19 = vld [vmem:[#allocation153_spill] sm:$0xff]  ;;  %v25405_v50 = vld [vmem:[#allocation167_spill] sm:$0xff]  ;;  %v25406_v16 = vld [vmem:[#allocation170_spill] sm:$0xff] }
 0x440   :  { %25399 = vst [vmem:[#allocation30_spill] sm:$0xff] %v21431_v58  ;;  %v14850_v26 = vrot.slane %v14843_v46, %v17359_v27  ;;  %17004 = vpow2.f32 %v10891_v38  ;;  %v5260_v5 = vrot.slane %v25401_v0, %v25395_v8  ;;  %v5278_v51 = vrot.slane %v25402_v22, %v25395_v8  ;;  %v25407_v0 = vld [vmem:[#allocation173_spill] sm:$0xff] }
 0x441   :  { %11024 = vperm.xlu1 %16514, %v25403_v19   ;;  %v21443_v48 = vpop.eup %16990  ;;  %v15033_v30 = vadd.f32 %v15032_v33, %v15031_v28  ;;  %v15053_v42 = vrot.slane %v15052_v43, 4  ;;  %v5224_v47 = vrot.slane %v25405_v50, %v25395_v8  ;;  %v5233_v23 = vrot.slane %v25406_v16, %v25395_v8  ;;  %v21454_v19 = vpop.permute.xlu0 %5794  ;;  %v25411_v50 = vld [vmem:[#allocation165_spill] sm:$0xff] }
 0x442   :  { %25404 = vst [vmem:[#allocation154_spill] sm:$0xff] %v21443_v48  ;;  %v15111_v46 = vrot.slane %v15110_v37, 2  ;;  %v14857_v38 = vrot.slane %v21431_v58, %v17359_v27  ;;  %v5269_v54 = vrot.slane %v25407_v0, %v25395_v8  ;;  %v6100_v22 = vcombine.low %v5251_v31, %v5260_v5  ;;  %11159 = vperm.xlu0 %16515, %v25408_v2   ;;  %v21461_v0 = vpop.permute.xlu1 %5821 }
 0x443   :  { %25409 = vst [vmem:[#allocation162_spill] sm:$0xff] %v21454_v19  ;;  %v21456_v28 = vpop.eup %16992  ;;  %17006 = vrcp.f32 %v15023_v61  ;;  %v15047_v33 = vadd.f32 %v15046_v57, %v15045_v53  ;;  %v5215_v48 = vrot.slane %v25411_v50, %v25395_v8  ;;  %v6099_v16 = vcombine.low %v5233_v23, %v5242_v49  ;;  %25413 = vst [vmem:[#allocation163_spill] sm:$0xff] %v21461_v0  ;;  %v25415_v23 = vld [vmem:[#allocation22_spill] sm:$0xff] }
 0x444   :  { %25410 = vst [vmem:[#allocation37_spill] sm:$0xff] %v21456_v28  ;;  %17008 = vrcp.f32 %v15030_v18  ;;  %v15044_v40 = vadd.f32 %v15043_v10, %v15042_v29  ;;  %v14858_v13 = vcombine.low %v14850_v26, %v14857_v38  ;;  %v6101_v58 = vcombine.low %v5269_v54, %v5278_v51  ;;  %v25416_v18 = vld [vmem:[#allocation80_spill] sm:$0xff]  ;;  %v25423_v38 = vld [vmem:[#allocation18_spill] sm:$0xff] }
 0x445   :  { %11168 = vperm.xlu1 %16514, %v25412_v44   ;;  %v21463_v31 = vpop.eup %16994  ;;  %v15093_v2 = vadd.f32 %v15092_v4, %v15091_v14  ;;  %v15034_v5 = vrot.slane %v15033_v30, 2  ;;  %v15054_v19 = vadd.f32 %v15053_v42, %v15052_v43  ;;  %v6098_v28 = vcombine.low %v5215_v48, %v5224_v47  ;;  %v25418_v14 = vld [vmem:[#allocation103_spill] sm:$0xff]  ;;  %v25421_v51 = vld [vmem:[#allocation60_spill] sm:$0xff]  ;;  %v25430_v0 = vld [vmem:[#allocation46_spill] sm:$0xff] }
 0x446   :  { %25414 = vst [vmem:[#allocation97_spill] sm:$0xff] %v21463_v31  ;;  %v15106_v53 = vrot.slane %v21433_v36, 1  ;;  %v15112_v61 = vadd.f32 %v15111_v46, %v15110_v37  ;;  %v6122_v57 = vrot.slane %v6100_v22, %v17359_v27  ;;  %v5035_v29 = vrot.slane %v25415_v23, %v25395_v8  ;;  %11177 = vperm.xlu0 %16515, %v25416_v18   ;;  %v25419_v47 = vld [vmem:[#allocation175_spill] sm:$0xff]  ;;  %v21486_v22 = vpop.permute.xlu0 %5812 }
 0x447   :  { %v15048_v44 = vrot.slane %v15047_v33, 2  ;;  %v6115_v10 = vrot.slane %v6099_v16, %v17359_v27  ;;  %v5017_v4 = vrot.slane %v25418_v14, %v25395_v8  ;;  %v5026_v43 = vrot.slane %v25419_v47, %v25395_v8  ;;  %v25422_v42 = vld [vmem:[#allocation135_spill] sm:$0xff]  ;;  %25424 = vst [vmem:[#allocation161_spill] sm:$0xff] %v21486_v22 }
 0x448   :  { %v21470_v54 = vpop.eup %16996  ;;  %v14865_v37 = vrot.slane %v14858_v13, %v17359_v27  ;;  %v6129_v26 = vrot.slane %v6101_v58, %v17359_v27  ;;  %v5044_v48 = vrot.slane %v25421_v51, %v25395_v8  ;;  %v5062_v46 = vrot.slane %v25422_v42, %v25395_v8  ;;  %v25426_v13 = vld [vmem:[#allocation101_spill] sm:$0xff]  ;;  %v25428_v51 = vld [vmem:[#allocation180_spill] sm:$0xff] }
 0x449   :  { %25417 = vst [vmem:[#allocation160_spill] sm:$0xff] %v21470_v54  ;;  %v21477_v49 = vpop.eup %16998  ;;  %11186 = vperm.xlu1 %16514, %v25423_v38   ;;  %v15035_v16 = vadd.f32 %v15034_v5, %v15033_v30  ;;  %v15055_v23 = vrot.slane %v15054_v19, 2  ;;  %v6108_v18 = vrot.slane %v6098_v28, %v17359_v27  ;;  %v5008_v14 = vrot.slane %v25426_v13, %v25395_v8  ;;  %v25431_v5 = vld [vmem:[#allocation96_spill] sm:$0xff] }
 0x44a   :  { %25420 = vst [vmem:[#allocation166_spill] sm:$0xff] %v21477_v49  ;;  %v21488_v50 = vpop.eup %17000  ;;  %v5053_v42 = vrot.slane %v25428_v51, %v25395_v8  ;;  %v6131_v38 = vcombine.low %v6122_v57, %v6129_v26  ;;  %v5953_v31 = vcombine.low %v5035_v29, %v5044_v48  ;;  %v21499_v49 = vpop.permute.xlu1 %5515  ;;  %11195 = vperm.xlu0 %16515, %v25430_v0   ;;  %17010 = vrcp.f32 %v15044_v40 }
 0x44b   :  { %25425 = vst [vmem:[#allocation169_spill] sm:$0xff] %v21488_v50  ;;  %v21493_v58 = vpop.eup %17002  ;;  %v14659_v47 = vcombine.low %v21488_v50, %v21470_v54  ;;  %25429 = vst [vmem:[#allocation92_spill] sm:$0xff] %v21499_v49  ;;  %v15113_v30 = vrot.slane %v15112_v61, 1  ;;  %v15049_v28 = vadd.f32 %v15048_v44, %v15047_v33  ;;  %v4999_v13 = vrot.slane %v25431_v5, %v25395_v8  ;;  %v25432_v50 = vld [vmem:[#allocation53_spill] sm:$0xff] }
 0x44c   :  { %25427 = vst [vmem:[#allocation172_spill] sm:$0xff] %v21493_v58  ;;  %v15115_v58 = vsel %vm9564_vm5, %v14865_v37, 0.0  ;;  %v6130_v25 = vcombine.low %v6108_v18, %v6115_v10  ;;  %v5952_v22 = vcombine.low %v5017_v4, %v5026_v43  ;;  %v5954_v54 = vcombine.low %v5053_v42, %v5062_v46  ;;  %v25434_v37 = vld [vmem:[#allocation57_spill] sm:$0xff]  ;;  %v21513_v10 = vpop.permute.xlu0 %5830  ;;  %v25441_v42 = vld [vmem:[#allocation191_spill] sm:$0xff] }
 0x44d   :  { %11204 = vperm.xlu1 %16514, %v25432_v50   ;;  %v21506_v51 = vpop.eup %17004  ;;  %17012 = vrcp.f32 %v15093_v2  ;;  %v15107_v57 = vadd.f32 %v15106_v53, %v21433_v36  ;;  %v15036_v29 = vrot.slane %v15035_v16, 1  ;;  %v15056_v0 = vadd.f32 %v15055_v23, %v15054_v19  ;;  %25435 = vst [vmem:[#allocation24_spill] sm:$0xff] %v21513_v10  ;;  %v25436_v2 = vld [vmem:[#allocation186_spill] sm:$0xff]  ;;  %v25438_v23 = vld [vmem:[#allocation91_spill] sm:$0xff] }
 0x44e   :  { %25433 = vst [vmem:[#allocation184_spill] sm:$0xff] %v21506_v51  ;;  %v14666_v40 = vrot.slane %v14659_v47, %v17359_v27  ;;  %v5951_v33 = vcombine.low %v4999_v13, %v5008_v14  ;;  %v6145_v44 = vrot.slane %v6131_v38, %v17359_v27  ;;  %v5975_v26 = vrot.slane %v5953_v31, %v17359_v27  ;;  %v21525_v18 = vpop.permute.xlu1 %5569  ;;  %v25495_v10 = vld [vmem:[#allocation11_spill] sm:$0xff] }
 0x44f   :  { %11213 = vperm.xlu0 %16515, %v25434_v37   ;;  %v15114_v4 = vadd.f32 %v15113_v30, %v15112_v61  ;;  %v15050_v43 = vrot.slane %v15049_v28, 1  ;;  %v15116_v48 = vrot.slane %v15115_v58, 4  ;;  %v5350_v46 = vrot.slane %v25436_v2, %v25395_v8  ;;  %25439 = vst [vmem:[#allocation193_spill] sm:$0xff] %v21525_v18  ;;  %v25442_v30 = vld [vmem:[#allocation182_spill] sm:$0xff] }
 0x450   :  { %v21517_v36 = vpop.eup %17006  ;;  %v14673_v19 = vrot.slane %v21506_v51, %v17359_v27  ;;  %v6138_v53 = vrot.slane %v6130_v25, %v17359_v27  ;;  %v5968_v50 = vrot.slane %v5952_v22, %v17359_v27  ;;  %v5982_v31 = vrot.slane %v5954_v54, %v17359_v27  ;;  %v25443_v54 = vld [vmem:[#allocation17_spill] sm:$0xff]  ;;  %v21535_v2 = vpop.permute.xlu0 %5524  ;;  %v25446_v51 = vld [vmem:[#allocation156_spill] sm:$0xff] }
 0x451   :  { %25437 = vst [vmem:[#allocation181_spill] sm:$0xff] %v21517_v36  ;;  %11222 = vperm.xlu1 %16514, %v25438_v23   ;;  %v21527_v61 = vpop.eup %17008  ;;  %v15037_v14 = vadd.f32 %v15036_v29, %v15035_v16  ;;  %v15057_v47 = vrot.slane %v15056_v0, 1  ;;  %v5341_v38 = vrot.slane %v25441_v42, %v25395_v8  ;;  %v5332_v5 = vrot.slane %v25442_v30, %v25395_v8  ;;  %v25445_v16 = vld [vmem:[#allocation177_spill] sm:$0xff] }
 0x452   :  { %25440 = vst [vmem:[#allocation174_spill] sm:$0xff] %v21527_v61  ;;  %v14674_v13 = vcombine.low %v14666_v40, %v14673_v19  ;;  %v5961_v25 = vrot.slane %v5951_v33, %v17359_v27  ;;  %v6146_v22 = vcombine.low %v6138_v53, %v6145_v44  ;;  %v5984_v37 = vcombine.low %v5975_v26, %v5982_v31  ;;  %v25447_v44 = vld [vmem:[#allocation121_spill] sm:$0xff]  ;;  %v25448_v53 = vld [vmem:[#allocation6_spill] sm:$0xff] }
 0x453   :  { %11033 = vperm.xlu0 %16515, %v25443_v54   ;;  %25444 = vst [vmem:[#allocation179_spill] sm:$0xff] %v21535_v2  ;;  %17014 = vrcp.f32 %v15107_v57  ;;  %v15117_v23 = vadd.f32 %v15116_v48, %v15115_v58  ;;  %v5323_v29 = vrot.slane %v25445_v16, %v25395_v8  ;;  %v6150_v61 = vcombine.low %v5341_v38, %v5350_v46  ;;  %v25449_v58 = vld [vmem:[#allocation105_spill] sm:$0xff] }
 0x454   :  { %17016 = vrcp.f32 %v15114_v4  ;;  %v15051_v42 = vadd.f32 %v15050_v43, %v15049_v28  ;;  %v5983_v36 = vcombine.low %v5961_v25, %v5968_v50  ;;  %v15058_v40 = vadd.f32 %v15057_v47, %v15056_v0  ;;  %v21547_v4 = vpop.permute.xlu1 %5605  ;;  %v25451_v28 = vld [vmem:[#allocation116_spill] sm:$0xff]  ;;  %v25453_v43 = vld [vmem:[#allocation90_spill] sm:$0xff] }
 0x455   :  { %11042 = vperm.xlu1 %16514, %v25446_v51   ;;  %17018 = vrcp.f32 %v15037_v14  ;;  %v6149_v33 = vcombine.low %v5323_v29, %v5332_v5  ;;  %v5314_v26 = vrot.slane %v25447_v44, %v25395_v8  ;;  %v14681_v19 = vrot.slane %v14674_v13, %v17359_v27  ;;  %25450 = vst [vmem:[#allocation134_spill] sm:$0xff] %v21547_v4  ;;  %v21550_v51 = vpop.permute.xlu0 %5578  ;;  %v25454_v14 = vld [vmem:[#allocation45_spill] sm:$0xff]  ;;  %v25459_v44 = vld [vmem:[#allocation56_spill] sm:$0xff]  ;;  %v25478_v4 = vld [vmem:[#allocation43_spill] sm:$0xff] }
 0x456   :  { %v6554_v57 = vmul.f32 %v25448_v53, %v6146_v22  ;;  %v5287_v48 = vrot.slane %v25449_v58, %v25395_v8  ;;  %v5998_v46 = vrot.slane %v5984_v37, %v17359_v27  ;;  %25452 = vst [vmem:[#allocation188_spill] sm:$0xff] %v21550_v51  ;;  %v15118_v0 = vrot.slane %v15117_v23, 2  ;;  %v25456_v5 = vld [vmem:[#allocation117_spill] sm:$0xff]  ;;  %v25460_v58 = vld [vmem:[#allocation118_spill] sm:$0xff] }
 0x457   :  { %11051 = vperm.xlu0 %16515, %v25451_v28   ;;  %v5296_v50 = vrot.slane %v25453_v43, %v25395_v8  ;;  %v6178_v31 = vrot.slane %v6150_v61, %v17359_v27  ;;  %v5305_v47 = vrot.slane %v25454_v14, %v25395_v8  ;;  %v21557_v38 = vpop.eup %17010  ;;  %17020 = vrcp.f32 %v15051_v42  ;;  %v25457_v13 = vld [vmem:[#allocation185_spill] sm:$0xff] }
 0x458   :  { %25455 = vst [vmem:[#allocation195_spill] sm:$0xff] %v21557_v38  ;;  %v5991_v30 = vrot.slane %v5983_v36, %v17359_v27  ;;  %17022 = vrcp.f32 %v15058_v40  ;;  %v5107_v25 = vrot.slane %v25457_v13, %v25395_v8  ;;  %v6171_v22 = vrot.slane %v6149_v33, %v17359_v27  ;;  %v25462_v33 = vld [vmem:[#allocation198_spill] sm:$0xff]  ;;  %v25472_v38 = vld [vmem:[#allocation95_spill] sm:$0xff] }
 0x459   :  { %11060 = vperm.xlu1 %16514, %v25456_v5   ;;  %v6148_v37 = vcombine.low %v5305_v47, %v5314_v26  ;;  %v15059_v61 = vsel %vm9564_vm5, %v14681_v19, 0.0  ;;  %v6722_v16 = vcombine.high %v6554_v57, %v6554_v57  ;;  %v5089_v42 = vrot.slane %v25459_v44, %v25395_v8  ;;  %v21570_v36 = vpop.permute.xlu0 %5596  ;;  %v25463_v19 = vld [vmem:[#allocation41_spill] sm:$0xff]  ;;  %v25464_v47 = vld [vmem:[#allocation194_spill] sm:$0xff] }
 0x45a   :  { %v21564_v54 = vpop.eup %17012  ;;  %v5999_v29 = vcombine.low %v5991_v30, %v5998_v46  ;;  %25461 = vst [vmem:[#allocation25_spill] sm:$0xff] %v21570_v36  ;;  %v15119_v40 = vadd.f32 %v15118_v0, %v15117_v23  ;;  %v6147_v28 = vcombine.low %v5287_v48, %v5296_v50  ;;  %v21572_v43 = vcombine.low %v6171_v22, %v6178_v31  ;;  %v25465_v5 = vld [vmem:[#allocation113_spill] sm:$0xff]  ;;  %v21586_v23 = vpop.permute.xlu1 %5839  ;;  %v25468_v0 = vld [vmem:[#allocation192_spill] sm:$0xff] }
 0x45b   :  { %25458 = vst [vmem:[#allocation75_spill] sm:$0xff] %v21564_v54  ;;  %11069 = vperm.xlu0 %16515, %v25460_v58   ;;  %v5134_v26 = vrot.slane %v25462_v33, %v25395_v8  ;;  %v21577_v14 = vrot.slane %v6554_v57, %v17359_v27  ;;  %v5080_v46 = vrot.slane %v25463_v19, %v25395_v8  ;;  %v25466_v44 = vld [vmem:[#allocation89_spill] sm:$0xff]  ;;  %25467 = vst [vmem:[#allocation82_spill] sm:$0xff] %v21586_v23  ;;  %v25469_v57 = vld [vmem:[#allocation94_spill] sm:$0xff]  ;;  %vm7931_vm5 = vcmask 59392  }
 0x45c   :  { %v5116_v30 = vrot.slane %v25464_v47, %v25395_v8  ;;  %v5098_v13 = vrot.slane %v25465_v5, %v25395_v8  ;;  %v15060_v48 = vrot.slane %v15059_v61, 4  ;;  %v5377_v50 = vrot.slane %v25468_v0, %v25395_v8  ;;  %v25470_v33 = vld [vmem:[#allocation5_spill] sm:$0xff]  ;;  %v25471_v47 = vld [vmem:[#allocation23_spill] sm:$0xff]  ;;  %v25473_v0 = vld [vmem:[#allocation196_spill] sm:$0xff] }
 0x45d   :  { %11078 = vperm.xlu1 %16514, %v25466_v44   ;;  %v5125_v31 = vrot.slane %v25469_v57, %v25395_v8  ;;  %v6164_v22 = vrot.slane %v6148_v37, %v17359_v27  ;;  %v21594_v58 = vrot.slane %v6722_v16, %v17359_v27  ;;  %v6551_v19 = vmul.f32 %v5999_v29, %v25470_v33  ;;  %v25485_v33 = vld [vmem:[#allocation61_spill] sm:$0xff] }
 0x45e   :  { %v5071_v5 = vrot.slane %v25471_v47, %v25395_v8  ;;  %v6001_v44 = vcombine.low %v5089_v42, %v5098_v13  ;;  %v15120_v54 = vrot.slane %v15119_v40, 1  ;;  %v6157_v53 = vrot.slane %v6147_v28, %v17359_v27  ;;  %v25475_v42 = vld [vmem:[#allocation66_spill] sm:$0xff] }
 0x45f   :  { %11231 = vperm.xlu0 %16515, %v25472_v38   ;;  %v6003_v57 = vcombine.low %v5125_v31, %v5134_v26  ;;  %v6194_v16 = vrot.slane %v21572_v43, %v17359_v27  ;;  %v6002_v47 = vcombine.low %v5107_v25, %v5116_v30  ;;  %v21610_v38 = vpop.permute.xlu0 %5614  ;;  %v15061_v28 = vadd.f32 %v15060_v48, %v15059_v61  ;;  %v21627_v61 = vpop.permute.xlu1 %5623  ;;  %v25482_v48 = vld [vmem:[#allocation44_spill] sm:$0xff] }
 0x460   :  { %v21603_v51 = vpop.eup %17014  ;;  %v6000_v29 = vcombine.low %v5071_v5, %v5080_v46  ;;  %25476 = vst [vmem:[#allocation14_spill] sm:$0xff] %v21610_v38  ;;  %v21616_v26 = vrot.slane %v21577_v14, %v17359_v27  ;;  %v6179_v31 = vcombine.low %v6157_v53, %v6164_v22  ;;  %v5368_v37 = vrot.slane %v25478_v4, %v25395_v8  ;;  %v25480_v46 = vld [vmem:[#allocation140_spill] sm:$0xff]  ;;  %v25483_v4 = vld [vmem:[#allocation35_spill] sm:$0xff] }
 0x461   :  { %25474 = vst [vmem:[#allocation39_spill] sm:$0xff] %v21603_v51  ;;  %11240 = vperm.xlu1 %16514, %v25475_v42   ;;  %v21612_v13 = vpop.eup %17016  ;;  %v6575_v43 = vcombine.high %v6551_v19, %v6551_v19  ;;  %v5386_v30 = vrot.slane %v25480_v46, %v25395_v8  ;;  %v6017_v5 = vrot.slane %v6001_v44, %v17359_v27  ;;  %25481 = vst [vmem:[#allocation115_spill] sm:$0xff] %v21627_v61 }
 0x462   :  { %25477 = vst [vmem:[#allocation86_spill] sm:$0xff] %v21612_v13  ;;  %v21620_v51 = vpop.eup %17018  ;;  %v15121_v42 = vadd.f32 %v15120_v54, %v15119_v40  ;;  %v6031_v53 = vrot.slane %v6003_v57, %v17359_v27  ;;  %v5359_v22 = vrot.slane %v25483_v4, %v25395_v8  ;;  %v25484_v13 = vld [vmem:[#allocation68_spill] sm:$0xff]  ;;  %v21636_v25 = vrot.slane %v6551_v19, %v17359_v27 }
 0x463   :  { %25479 = vst [vmem:[#allocation107_spill] sm:$0xff] %v21620_v51  ;;  %11249 = vperm.xlu0 %16515, %v25482_v48   ;;  %v5422_v51 = vrot.slane %v25484_v13, %v25395_v8  ;;  %v6010_v46 = vrot.slane %v6000_v29, %v17359_v27  ;;  %v6024_v44 = vrot.slane %v6002_v47, %v17359_v27  ;;  %v25486_v48 = vld [vmem:[#allocation127_spill] sm:$0xff]  ;;  %v21643_v54 = vpop.permute.xlu0 %5848  ;;  %v15062_v57 = vrot.slane %v15061_v28, 2  ;;  %v25489_v19 = vld [vmem:[#allocation124_spill] sm:$0xff]  ;;  %v21657_v23 = vpop.permute.xlu1 %9222 }
 0x464   :  { %v5404_v61 = vrot.slane %v25485_v33, %v25395_v8  ;;  %25487 = vst [vmem:[#allocation142_spill] sm:$0xff] %v21643_v54  ;;  %v21645_v40 = vpop.eup %17020  ;;  %v6187_v4 = vrot.slane %v6179_v31, %v17359_v27  ;;  %v6196_v13 = vcombine.low %v5359_v22, %v5368_v37  ;;  %v5413_v38 = vrot.slane %v25489_v19, %v25395_v8  ;;  %v25491_v33 = vld [vmem:[#allocation87_spill] sm:$0xff]  ;;  %v25494_v37 = vld [vmem:[#allocation141_spill] sm:$0xff] }
 0x465   :  { %11258 = vperm.xlu1 %16514, %v25486_v48   ;;  %25488 = vst [vmem:[#allocation65_spill] sm:$0xff] %v21645_v40  ;;  %v21650_v36 = vpop.eup %17022  ;;  %v21653_v29 = vrot.slane %v6575_v43, %v17359_v27  ;;  %v5395_v47 = vrot.slane %v25491_v33, %v25395_v8  ;;  %v6197_v48 = vcombine.low %v5377_v50, %v5386_v30  ;;  %25492 = vst [vmem:[#allocation48_spill] sm:$0xff] %v21657_v23  ;;  %v25493_v40 = vld [vmem:[#allocation98_spill] sm:$0xff]  ;;  %v25496_v50 = vld [vmem:[#allocation112_spill] sm:$0xff] }
 0x466   :  { %25490 = vst [vmem:[#allocation189_spill] sm:$0xff] %v21650_v36  ;;  %v6032_v18 = vcombine.low %v6010_v46, %v6017_v5  ;;  %17024 = vrcp.f32 %v15121_v42  ;;  %v5161_v31 = vrot.slane %v25494_v37, %v25395_v8  ;;  %v6033_v22 = vcombine.low %v6024_v44, %v6031_v53  ;;  %v25497_v5 = vld [vmem:[#allocation76_spill] sm:$0xff]  ;;  %v25499_v53 = vld [vmem:[#allocation119_spill] sm:$0xff]  ;;  %v25506_v36 = vld [vmem:[#allocation130_spill] sm:$0xff] }
 0x467   :  { %11267 = vperm.xlu0 %16515, %v25493_v40   ;;  %v6199_v19 = vcombine.low %v5413_v38, %v5422_v51  ;;  %v6198_v43 = vcombine.low %v5395_v47, %v5404_v61  ;;  %v5656_v54 = vrot.slane %v25495_v10, %v25395_v8  ;;  %v5674_v30 = vrot.slane %v25496_v50, %v25395_v8  ;;  %v21669_v46 = vpop.permute.xlu0 %5632  ;;  %v21682_v47 = vpop.permute.xlu1 %9182 }
 0x468   :  { %25498 = vst [vmem:[#allocation171_spill] sm:$0xff] %v21669_v46  ;;  %v15063_v42 = vadd.f32 %v15062_v57, %v15061_v28  ;;  %v21673_v40 = vrot.slane %v21636_v25, %v17359_v27  ;;  %v6195_v51 = vcombine.low %v6187_v4, %v6194_v16  ;;  %v6206_v38 = vrot.slane %v6196_v13, %v17359_v27  ;;  %v25501_v28 = vld [vmem:[#allocation102_spill] sm:$0xff]  ;;  %v25503_v13 = vld [vmem:[#allocation111_spill] sm:$0xff] }
 0x469   :  { %11276 = vperm.xlu1 %16514, %v25497_v5   ;;  %v6213_v10 = vrot.slane %v6197_v48, %v17359_v27  ;;  %v5665_v44 = vrot.slane %v25499_v53, %v25395_v8  ;;  %v6040_v33 = vrot.slane %v6032_v18, %v17359_v27  ;;  %25500 = vst [vmem:[#allocation88_spill] sm:$0xff] %v21682_v47  ;;  %v25502_v16 = vld [vmem:[#allocation110_spill] sm:$0xff]  ;;  %v25505_v53 = vld [vmem:[#allocation28_spill] sm:$0xff] }
 0x46a   :  { %v6047_v57 = vrot.slane %v6033_v22, %v17359_v27  ;;  %v5431_v4 = vrot.slane %v25502_v16, %v25395_v8  ;;  %v5170_v37 = vrot.slane %v25503_v13, %v25395_v8  ;;  %v6227_v50 = vrot.slane %v6199_v19, %v17359_v27  ;;  %v25508_v47 = vld [vmem:[#allocation10_spill] sm:$0xff]  ;;  %v25509_v13 = vld [vmem:[#allocation108_spill] sm:$0xff] }
 0x46b   :  { %11285 = vperm.xlu0 %16515, %v25501_v28   ;;  %v6220_v48 = vrot.slane %v6198_v43, %v17359_v27  ;;  %v25504_v5 = vrot.slane %v25473_v0, %v25395_v8  ;;  %v5701_v61 = vrot.slane %v25505_v53, %v25395_v8  ;;  %v6393_v28 = vcombine.low %v5665_v44, %v5674_v30  ;;  %v21698_v22 = vpop.permute.xlu0 %9227  ;;  %v25510_v43 = vld [vmem:[#allocation164_spill] sm:$0xff]  ;;  %v25513_v44 = vld [vmem:[#allocation137_spill] sm:$0xff] }
 0x46c   :  { %25507 = vst [vmem:[#allocation21_spill] sm:$0xff] %v21698_v22  ;;  %v15064_v16 = vrot.slane %v15063_v42, 1  ;;  %v6555_v23 = vmul.f32 %v6195_v51, %v25508_v47  ;;  %v5143_v19 = vrot.slane %v25509_v13, %v25395_v8  ;;  %v5458_v46 = vrot.slane %v25510_v43, %v25395_v8  ;;  %v25514_v47 = vld [vmem:[#allocation126_spill] sm:$0xff]  ;;  %v25515_v22 = vld [vmem:[#allocation129_spill] sm:$0xff] }
 0x46d   :  { %v6392_v18 = vcombine.low %v25504_v5, %v5656_v54  ;;  %11294 = vperm.xlu1 %16514, %v25506_v36   ;;  %v6228_v49 = vcombine.low %v6206_v38, %v6213_v10  ;;  %v6048_v0 = vcombine.low %v6040_v33, %v6047_v57  ;;  %v25511_v54 = vld [vmem:[#allocation200_spill] sm:$0xff]  ;;  %v5710_v30 = vrot.slane %v21110_v56, %v25395_v8  ;;  %v21709_v36 = vpop.permute.xlu1 %9232  ;;  %v25516_v33 = vld [vmem:[#allocation202_spill] sm:$0xff] }
 0x46e   :  { %v5152_v5 = vrot.slane %v25511_v54, %v25395_v8  ;;  %25512 = vst [vmem:[#allocation153_spill] sm:$0xff] %v21709_v36  ;;  %v6050_v53 = vcombine.low %v5161_v31, %v5170_v37  ;;  %v6229_v51 = vcombine.low %v6220_v48, %v6227_v50  ;;  %v5449_v13 = vrot.slane %v25514_v47, %v25395_v8  ;;  %v25517_v54 = vld [vmem:[#allocation29_spill] sm:$0xff] }
 0x46f   :  { %11375 = vperm.xlu0 %16515, %v25513_v44   ;;  %v5440_v43 = vrot.slane %v25515_v22, %v25395_v8  ;;  %v6402_v38 = vrot.slane %v6392_v18, %v17359_v27  ;;  %v6409_v10 = vrot.slane %v6393_v28, %v17359_v27  ;;  %v5683_v56 = vrot.slane %v21133_v3, %v25395_v8  ;;  %v21723_v31 = vpop.permute.xlu0 %9187  ;;  %v25518_v44 = vld [vmem:[#allocation4_spill] sm:$0xff]  ;;  %v25520_v28 = vld [vmem:[#allocation73_spill] sm:$0xff] }
 0x470   :  { %v15065_v37 = vadd.f32 %v15064_v16, %v15063_v42  ;;  %v6771_v50 = vcombine.high %v6555_v23, %v6555_v23  ;;  %v6049_v47 = vcombine.low %v5143_v19, %v5152_v5  ;;  %v6246_v48 = vcombine.low %v5449_v13, %v5458_v46  ;;  %v25519_v18 = vld [vmem:[#allocation52_spill] sm:$0xff]  ;;  %v25521_v3 = vld [vmem:[#allocation201_spill] sm:$0xff] }
 0x471   :  { %11384 = vperm.xlu1 %16514, %v25517_v54   ;;  %v6552_v22 = vmul.f32 %v25518_v44, %v6048_v0  ;;  %v5188_v36 = vrot.slane %v25519_v18, %v25395_v8  ;;  %v5692_v2 = vrot.slane %v25520_v28, %v25395_v8  ;;  %v6395_v57 = vcombine.low %v5701_v61, %v5710_v30  ;;  %v21730_v41 = vpop.permute.xlu1 %9242  ;;  %v25523_v61 = vld [vmem:[#allocation120_spill] sm:$0xff] }
 0x472   :  { %v6236_v54 = vrot.slane %v6228_v49, %v17359_v27  ;;  %v6066_v42 = vrot.slane %v6050_v53, %v17359_v27  ;;  %v6243_v16 = vrot.slane %v6229_v51, %v17359_v27  ;;  %v6245_v46 = vcombine.low %v5431_v4, %v5440_v43 }
 0x473   :  { %11393 = vperm.xlu0 %16515, %v25521_v3   ;;  %v21736_v19 = vpop.eup %17024  ;;  %v21739_v0 = vrot.slane %v6555_v23, %v17359_v27  ;;  %v21741_v5 = vcombine.low %v6402_v38, %v6409_v10  ;;  %v5179_v30 = vrot.slane %v25523_v61, %v25395_v8  ;;  %v6394_v13 = vcombine.low %v5683_v56, %v5692_v2  ;;  %v21746_v18 = vpop.permute.xlu0 %9237 }
 0x474   :  { %25522 = vst [vmem:[#allocation167_spill] sm:$0xff] %v21736_v19  ;;  %25524 = vst [vmem:[#allocation170_spill] sm:$0xff] %v21746_v18  ;;  %v21749_v49 = vrot.slane %v6771_v50, %v17359_v27  ;;  %v6059_v4 = vrot.slane %v6049_v47, %v17359_v27  ;;  %v6262_v53 = vrot.slane %v6246_v48, %v17359_v27  ;;  %17026 = vrcp.f32 %v15065_v37  ;;  %v25547_v19 = vld [vmem:[#allocation152_spill] sm:$0xff] }
 0x475   :  { %11402 = vperm.xlu1 %16514, %v21115_v1   ;;  %v5728_v23 = vrot.slane %v21135_v11, %v25395_v8  ;;  %v6624_v51 = vcombine.high %v6552_v22, %v6552_v22  ;;  %v21755_v43 = vcombine.low %v5179_v30, %v5188_v36  ;;  %v6423_v2 = vrot.slane %v6395_v57, %v17359_v27  ;;  %v21758_v38 = vpop.permute.xlu1 %9192  ;;  %v25530_v30 = vld [vmem:[#allocation104_spill] sm:$0xff] }
 0x476   :  { %25525 = vst [vmem:[#allocation173_spill] sm:$0xff] %v21758_v38  ;;  %v21761_v1 = vcombine.low %v6059_v4, %v6066_v42  ;;  %v6244_v10 = vcombine.low %v6236_v54, %v6243_v16  ;;  %v6255_v56 = vrot.slane %v6245_v46, %v17359_v27  ;;  %v5719_v50 = vrot.slane %v21167_v24, %v25395_v8  ;;  %v25527_v24 = vld [vmem:[#allocation125_spill] sm:$0xff]  ;;  %v25543_v46 = vld [vmem:[#allocation203_spill] sm:$0xff]  ;;  %v25644_v18 = vld [vmem:[#allocation128_spill] sm:$0xff] }
 0x477   :  { %11411 = vperm.xlu0 %16515, %v21137_v17   ;;  %v6432_v36 = vrot.slane %v21741_v5, %v17359_v27  ;;  %v21771_v57 = vrot.slane %v6552_v22, %v17359_v27  ;;  %v6416_v37 = vrot.slane %v6394_v13, %v17359_v27  ;;  %v21775_v17 = vpop.permute.xlu0 %9247  ;;  %v6787_v47 = vcombine.high %v21749_v49, %v21749_v49  ;;  %v25529_v5 = vld [vmem:[#allocation9_spill] sm:$0xff]  ;;  %v25545_v22 = vld [vmem:[#allocation54_spill] sm:$0xff] }
 0x478   :  { %25526 = vst [vmem:[#allocation77_spill] sm:$0xff] %v21775_v17  ;;  %v5485_v48 = vrot.slane %v25527_v24, %v25395_v8  ;;  %v21781_v28 = vcombine.low %v6255_v56, %v6262_v53  ;;  %v21783_v3 = vcombine.low %v5719_v50, %v5728_v23  ;;  %v21786_v54 = vrot.slane %v6624_v51, %v17359_v27 }
 0x479   :  { %11420 = vperm.xlu1 %16514, %v21150_v35   ;;  %v6425_v42 = vcombine.low %v6416_v37, %v6423_v2  ;;  %v5764_v35 = vrot.slane %v21169_v7, %v25395_v8  ;;  %v21792_v16 = vpop.permute.xlu1 %9202  ;;  %v6556_v61 = vmul.f32 %v25529_v5, %v6244_v10  ;;  %v5206_v4 = vrot.slane %v21238_v21, %v25395_v8 }
 0x47a   :  { %25528 = vst [vmem:[#allocation165_spill] sm:$0xff] %v21792_v16  ;;  %v5773_v7 = vrot.slane %v21201_v45, %v25395_v8  ;;  %v25532_v51 = vcombine.high %v21636_v25, %v21636_v25  ;;  %v5197_v56 = vrot.slane %v21277_v55, %v25395_v8  ;;  %v5467_v55 = vrot.slane %v21311_v20, %v25395_v8 }
 0x47b   :  { %11429 = vperm.xlu0 %16515, %v21171_v52   ;;  %v25531_v52 = vcombine.high %v21577_v14, %v21577_v14  ;;  %v21819_v21 = vpop.permute.xlu0 %9197  ;;  %v5782_v14 = vrot.slane %v21203_v6, %v25395_v8  ;;  %v6439_v50 = vrot.slane %v6425_v42, %v17359_v27  ;;  %v6820_v6 = vcombine.high %v6556_v61, %v6556_v61 }
 0x47c   :  { %v21816_v2 = vrot.slane %v25532_v51, %v17359_v27  ;;  %25533 = vst [vmem:[#allocation74_spill] sm:$0xff] %v21819_v21  ;;  %v25536_v51 = vld [vmem:[#allocation138_spill] sm:$0xff]  ;;  %v6052_v45 = vcombine.low %v5197_v56, %v5206_v4  ;;  %v25537_v42 = vcombine.high %v21594_v58, %v21594_v58  ;;  %v25538_v56 = vld [vmem:[#allocation84_spill] sm:$0xff]  ;;  %v5476_v11 = vrot.slane %v21279_v34, %v25395_v8 }
 0x47d   :  { %v21810_v23 = vrot.slane %v25531_v52, %v17359_v27  ;;  %11438 = vperm.xlu1 %16514, %v21181_v9   ;;  %v25534_v9 = vrot.slane %v25516_v33, %v25395_v8  ;;  %v21837_v52 = vpop.permute.xlu1 %9252  ;;  %v21849_v33 = vrot.slane %v6556_v61, %v17359_v27  ;;  %v21866_v61 = vrot.slane %v21739_v0, %v17359_v27 }
 0x47e   :  { %25535 = vst [vmem:[#allocation22_spill] sm:$0xff] %v21837_v52  ;;  %v21846_v53 = vrot.slane %v25537_v42, %v17359_v27  ;;  %v7163_v4 = vcombine.low %v21673_v40, %v21816_v2  ;;  %v21862_v42 = vrot.slane %v21594_v58, %v17359_v27  ;;  %v6440_v24 = vcombine.low %v6432_v36, %v6439_v50  ;;  %v25541_v58 = vld [vmem:[#allocation47_spill] sm:$0xff] }
 0x47f   :  { %v6443_v37 = vcombine.low %v25534_v9, %v5764_v35  ;;  %11591 = vperm.xlu0 %16515, %v25536_v51   ;;  %v5494_v35 = vrot.slane %v21313_v59, %v25395_v8  ;;  %v7347_v9 = vcombine.low %v21616_v26, %v21810_v23  ;;  %v21858_v20 = vpop.permute.xlu0 %9207  ;;  %v6444_v51 = vcombine.low %v5773_v7, %v5782_v14 }
 0x480   :  { %25539 = vst [vmem:[#allocation80_spill] sm:$0xff] %v21858_v20  ;;  %v21869_v59 = vrot.slane %v6787_v47, %v17359_v27  ;;  %v6620_v7 = vcombine.high %v21673_v40, %v21673_v40  ;;  %v6080_v47 = vrot.slane %v6052_v45, %v17359_v27  ;;  %v16337_v36 = vcombine.high %v21862_v42, %v21846_v53 }
 0x481   :  { %11600 = vperm.xlu1 %16514, %v25538_v56   ;;  %v6767_v56 = vcombine.high %v21616_v26, %v21616_v26  ;;  %v21877_v14 = vpop.permute.xlu1 %9212  ;;  %v21880_v25 = vpop.eup %17026  ;;  %v6465_v10 = vrot.slane %v6443_v37, %v17359_v27  ;;  %v6801_v34 = vrot.slane %v21749_v49, %v17359_v27  ;;  %v21889_v26 = vrot.slane %v6820_v6, %v17359_v27 }
 0x482   :  { %25540 = vst [vmem:[#allocation103_spill] sm:$0xff] %v21877_v14  ;;  %25542 = vst [vmem:[#allocation175_spill] sm:$0xff] %v21880_v25  ;;  %v6248_v40 = vcombine.low %v5485_v48, %v5494_v35  ;;  %v7354_v50 = vrot.slane %v7347_v9, %v17359_v27  ;;  %v6472_v37 = vrot.slane %v6444_v51, %v17359_v27 }
 0x483   :  { %11609 = vperm.xlu0 %16515, %v25541_v58   ;;  %v7170_v58 = vrot.slane %v7163_v4, %v17359_v27  ;;  %v21894_v13 = vpop.permute.xlu0 %9257  ;;  %v7407_v49 = vrot.slane %v21866_v61, %v17359_v27  ;;  %v7439_v6 = vcombine.low %v6801_v34, %v21869_v59  ;;  %v6560_v48 = vmul.f32 %v25545_v22, %v6440_v24 }
 0x484   :  { %25544 = vst [vmem:[#allocation60_spill] sm:$0xff] %v21894_v13  ;;  %v6247_v35 = vcombine.low %v5467_v55, %v5476_v11  ;;  %v7361_v9 = vrot.slane %v6767_v56, %v17359_v27  ;;  %v7177_v4 = vrot.slane %v6620_v7, %v17359_v27  ;;  %v25548_v45 = vrot.slane %v21755_v43, %v17359_v27 }
 0x485   :  { %11618 = vperm.xlu1 %16514, %v25543_v46   ;;  %v21905_v46 = vpop.permute.xlu1 %9262  ;;  %v5512_v5 = vrot.slane %v21348_v60, %v25395_v8  ;;  %v7400_v25 = vrot.slane %v16337_v36, %v17359_v27  ;;  %v6817_v44 = vcombine.high %v6801_v34, %v6801_v34  ;;  %v5503_v11 = vrot.slane %v21346_v12, %v25395_v8 }
 0x486   :  { %25546 = vst [vmem:[#allocation135_spill] sm:$0xff] %v21905_v46  ;;  %v6082_v51 = vcombine.low %v25548_v45, %v6080_v47  ;;  %v6276_v24 = vrot.slane %v6248_v40, %v17359_v27  ;;  %v7362_v55 = vcombine.low %v7354_v50, %v7361_v9  ;;  %v7178_v56 = vcombine.low %v7170_v58, %v7177_v4 }
 0x487   :  { %11627 = vperm.xlu0 %16515, %v25547_v19   ;;  %v21918_v19 = vpop.permute.xlu0 %9217  ;;  %v21920_v7 = vcombine.low %v6465_v10, %v6472_v37  ;;  %v7408_v43 = vcombine.low %v7400_v25, %v7407_v49  ;;  %v7446_v47 = vrot.slane %v7439_v6, %v17359_v27  ;;  %v6769_v60 = vcombine.high %v21810_v23, %v21810_v23  ;;  %v25552_v49 = vld [vmem:[#allocation122_spill] sm:$0xff] }
 0x488   :  { %25549 = vst [vmem:[#allocation18_spill] sm:$0xff] %v21918_v19  ;;  %v7016_v36 = vcombine.high %v6560_v48, %v6560_v48  ;;  %v21926_v34 = vrot.slane %v6560_v48, %v17359_v27  ;;  %v6269_v12 = vrot.slane %v6247_v35, %v17359_v27  ;;  %v5548_v40 = vrot.slane %v21377_v32, %v25395_v8 }
 0x489   :  { %11636 = vperm.xlu1 %16514, %v20944_v39   ;;  %v21931_v39 = vpop.permute.xlu1 %9272  ;;  %v21936_v10 = vrot.slane %v21849_v33, %v17359_v27  ;;  %v6096_v25 = vrot.slane %v6082_v51, %v17359_v27  ;;  %v21939_v23 = vcombine.low %v5503_v11, %v5512_v5  ;;  %v7453_v50 = vrot.slane %v6817_v44, %v17359_v27 }
 0x48a   :  { %25550 = vst [vmem:[#allocation101_spill] sm:$0xff] %v21926_v34  ;;  %25551 = vst [vmem:[#allocation180_spill] sm:$0xff] %v21931_v39  ;;  %v6278_v45 = vcombine.low %v6269_v12, %v6276_v24  ;;  %v7369_v32 = vrot.slane %v7362_v55, %v17359_v27  ;;  %v7185_v37 = vrot.slane %v7178_v56, %v17359_v27  ;;  %v25557_v24 = vld [vmem:[#allocation85_spill] sm:$0xff] }
 0x48b   :  { %11645 = vperm.xlu0 %16515, %v21018_v62   ;;  %v21947_v62 = vpop.permute.xlu0 %9267  ;;  %v7415_v6 = vrot.slane %v7408_v43, %v17359_v27  ;;  %v7454_v48 = vcombine.low %v7446_v47, %v7453_v50  ;;  %v7370_v5 = vcombine.low %v6769_v60, %v21862_v42  ;;  %v21952_v44 = vrot.slane %v7016_v36, %v17359_v27 }
 0x48c   :  { %25553 = vst [vmem:[#allocation46_spill] sm:$0xff] %v21947_v62  ;;  %v25555_v4 = vrot.slane %v25530_v30, %v25395_v8  ;;  %v21968_v42 = vrot.slane %v21926_v34, %v17359_v27  ;;  %v25559_v55 = vrot.slane %v21761_v1, %v17359_v27  ;;  %v5557_v43 = vrot.slane %v21375_v15, %v25395_v8  ;;  %v25561_v1 = vld [vmem:[#allocation15_spill] sm:$0xff] }
 0x48d   :  { %11654 = vperm.xlu1 %16514, %v25552_v49   ;;  %25554 = vst [vmem:[#allocation96_spill] sm:$0xff] %v21952_v44  ;;  %v21963_v11 = vpop.permute.xlu1 %9282  ;;  %v6292_v47 = vrot.slane %v6278_v45, %v17359_v27  ;;  %v7988_v60 = vsel %vm7931_vm5, %v7369_v32, 0.0  ;;  %v7932_v36 = vsel %vm7931_vm5, %v7185_v37, 0.0  ;;  %v25560_v12 = vcombine.high %v21653_v29, %v21653_v29  ;;  %v25570_v49 = vld [vmem:[#allocation20_spill] sm:$0xff] }
 0x48e   :  { %v21961_v51 = vcombine.low %v25555_v4, %v5548_v40  ;;  %25556 = vst [vmem:[#allocation53_spill] sm:$0xff] %v21963_v11  ;;  %25558 = vst [vmem:[#allocation57_spill] sm:$0xff] %v21968_v42  ;;  %v6097_v56 = vcombine.low %v25559_v55, %v6096_v25  ;;  %v8002_v15 = vsel %vm7931_vm5, %v7415_v6, 0.0  ;;  %v7461_v50 = vrot.slane %v7454_v48, %v17359_v27  ;;  %v25564_v48 = vld [vmem:[#allocation32_spill] sm:$0xff] }
 0x48f   :  { %11087 = vperm.xlu0 %16515, %v25557_v24   ;;  %v21984_v40 = vrot.slane %v25560_v12, %v17359_v27  ;;  %v21987_v25 = vpop.permute.xlu0 %9277  ;;  %v7377_v45 = vrot.slane %v7370_v5, %v17359_v27  ;;  %v6622_v32 = vcombine.high %v21816_v2, %v21816_v2  ;;  %v6605_v4 = vrot.slane %v21653_v29, %v17359_v27  ;;  %v25565_v5 = vld [vmem:[#allocation7_spill] sm:$0xff] }
 0x490   :  { %25562 = vst [vmem:[#allocation186_spill] sm:$0xff] %v21987_v25  ;;  %v22002_v24 = vrot.slane %v21771_v57, %v17359_v27  ;;  %v6553_v55 = vmul.f32 %v6097_v56, %v25565_v5  ;;  %v7989_v2 = vrot.slane %v7988_v60, 4  ;;  %v7933_v12 = vrot.slane %v7932_v36, 4 }
 0x491   :  { %11096 = vperm.xlu1 %16514, %v25561_v1   ;;  %v22004_v6 = vpop.permute.xlu1 %9292  ;;  %v7384_v1 = vrot.slane %v21846_v53, %v17359_v27  ;;  %v25566_v37 = vrot.slane %v21781_v28, %v17359_v27  ;;  %v8003_v29 = vrot.slane %v8002_v15, 4  ;;  %v16335_v9 = vcombine.high %v6605_v4, %v21984_v40 }
 0x492   :  { %25563 = vst [vmem:[#allocation91_spill] sm:$0xff] %v22004_v6  ;;  %v25567_v58 = vcombine.high %v21786_v54, %v21786_v54  ;;  %v5566_v53 = vrot.slane %v25570_v49, %v25395_v8  ;;  %v8016_v5 = vsel %vm7931_vm5, %v7461_v50, 0.0  ;;  %v6654_v22 = vrot.slane %v21786_v54, %v17359_v27  ;;  %v25573_v49 = vld [vmem:[#allocation168_spill] sm:$0xff] }
 0x493   :  { %11105 = vperm.xlu0 %16515, %v25564_v48   ;;  %v6293_v35 = vcombine.low %v25566_v37, %v6292_v47  ;;  %v25568_v48 = vld [vmem:[#allocation63_spill] sm:$0xff]  ;;  %v22021_v56 = vpop.permute.xlu0 %9287  ;;  %v7385_v28 = vcombine.low %v7377_v45, %v7384_v1  ;;  %v7186_v47 = vcombine.low %v6622_v32, %v6605_v4  ;;  %v7223_v37 = vrot.slane %v22002_v24, %v17359_v27 }
 0x494   :  { %v22018_v30 = vrot.slane %v25567_v58, %v17359_v27  ;;  %25569 = vst [vmem:[#allocation191_spill] sm:$0xff] %v22021_v56  ;;  %v25571_v58 = vcombine.high %v21739_v0, %v21739_v0  ;;  %v6816_v56 = vcombine.high %v21866_v61, %v21866_v61  ;;  %v6673_v50 = vcombine.high %v6553_v55, %v6553_v55  ;;  %v25574_v1 = vld [vmem:[#allocation51_spill] sm:$0xff] }
 0x495   :  { %11114 = vperm.xlu1 %16514, %v25568_v48   ;;  %v22036_v25 = vpop.permute.xlu1 %9302  ;;  %v22040_v45 = vrot.slane %v6553_v55, %v17359_v27  ;;  %v7990_v32 = vadd.f32 %v7989_v2, %v7988_v60  ;;  %v7934_v4 = vadd.f32 %v7933_v12, %v7932_v36  ;;  %v6557_v54 = vmul.f32 %v6293_v35, %v25574_v1 }
 0x496   :  { %v6808_v48 = vrot.slane %v25571_v58, %v17359_v27  ;;  %25572 = vst [vmem:[#allocation182_spill] sm:$0xff] %v22036_v25  ;;  %v8004_v6 = vadd.f32 %v8003_v29, %v8002_v15  ;;  %v7216_v62 = vrot.slane %v16335_v9, %v17359_v27  ;;  %v7255_v0 = vcombine.low %v6654_v22, %v22018_v30  ;;  %v25575_v58 = vld [vmem:[#allocation100_spill] sm:$0xff] }
 0x497   :  { %11123 = vperm.xlu0 %16515, %v25573_v49   ;;  %v22046_v61 = vpop.permute.xlu0 %9297  ;;  %v6297_v25 = vcombine.low %v5557_v43, %v5566_v53  ;;  %v8017_v19 = vrot.slane %v8016_v5, 4  ;;  %v7392_v49 = vrot.slane %v7385_v28, %v17359_v27  ;;  %v7193_v55 = vrot.slane %v7186_v47, %v17359_v27  ;;  %v25578_v15 = vld [vmem:[#allocation136_spill] sm:$0xff] }
 0x498   :  { %25576 = vst [vmem:[#allocation17_spill] sm:$0xff] %v22046_v61  ;;  %v7224_v44 = vcombine.low %v7216_v62, %v7223_v37  ;;  %v6670_v60 = vcombine.high %v6654_v22, %v6654_v22  ;;  %v6818_v36 = vcombine.high %v6808_v48, %v6808_v48  ;;  %v7416_v2 = vcombine.low %v6808_v48, %v6816_v56  ;;  %v25579_v56 = vld [vmem:[#allocation106_spill] sm:$0xff] }
 0x499   :  { %11132 = vperm.xlu1 %16514, %v25575_v58   ;;  %v22050_v35 = vpop.permute.xlu1 %9312  ;;  %v22054_v9 = vrot.slane %v6673_v50, %v17359_v27  ;;  %v7991_v12 = vrot.slane %v7990_v32, 2  ;;  %v7935_v29 = vrot.slane %v7934_v4, 2  ;;  %v7200_v43 = vrot.slane %v21984_v40, %v17359_v27 }
 0x49a   :  { %25577 = vst [vmem:[#allocation177_spill] sm:$0xff] %v22050_v35  ;;  %v6869_v53 = vcombine.high %v6557_v54, %v6557_v54  ;;  %v22059_v28 = vrot.slane %v6557_v54, %v17359_v27  ;;  %v8005_v62 = vrot.slane %v8004_v6, 2  ;;  %v7262_v22 = vrot.slane %v7255_v0, %v17359_v27  ;;  %v25582_v0 = vld [vmem:[#allocation99_spill] sm:$0xff] }
 0x49b   :  { %11141 = vperm.xlu0 %16515, %v25578_v15   ;;  %v22063_v47 = vpop.permute.xlu0 %9307  ;;  %v6325_v37 = vrot.slane %v6297_v25, %v17359_v27  ;;  %v8018_v48 = vadd.f32 %v8017_v19, %v8016_v5  ;;  %v7995_v50 = vsel %vm7931_vm5, %v7392_v49, 0.0  ;;  %v7201_v58 = vcombine.low %v7193_v55, %v7200_v43  ;;  %v25583_v19 = vld [vmem:[#allocation161_spill] sm:$0xff] }
 0x49c   :  { %25580 = vst [vmem:[#allocation156_spill] sm:$0xff] %v22063_v47  ;;  %v7231_v15 = vrot.slane %v7224_v44, %v17359_v27  ;;  %v7269_v40 = vrot.slane %v6670_v60, %v17359_v27  ;;  %v7423_v54 = vrot.slane %v7416_v2, %v17359_v27  ;;  %v7430_v1 = vrot.slane %v6818_v36, %v17359_v27  ;;  %v25584_v2 = vld [vmem:[#allocation148_spill] sm:$0xff]  ;;  %v25598_v47 = vld [vmem:[#allocation131_spill] sm:$0xff] }
 0x49d   :  { %11150 = vperm.xlu1 %16514, %v25579_v56   ;;  %v22071_v61 = vpop.permute.xlu1 %9322  ;;  %v6688_v56 = vcombine.high %v22040_v45, %v22040_v45  ;;  %v5818_v25 = vrot.slane %v25583_v19, %v25395_v8  ;;  %v7992_v5 = vadd.f32 %v7991_v12, %v7990_v32  ;;  %v7936_v49 = vadd.f32 %v7935_v29, %v7934_v4 }
 0x49e   :  { %25581 = vst [vmem:[#allocation121_spill] sm:$0xff] %v22071_v61  ;;  %v22080_v44 = vrot.slane %v22040_v45, %v17359_v27  ;;  %v22083_v55 = vrot.slane %v6869_v53, %v17359_v27  ;;  %v8006_v60 = vadd.f32 %v8005_v62, %v8004_v6  ;;  %v7270_v36 = vcombine.low %v7262_v22, %v7269_v40  ;;  %v25588_v62 = vld [vmem:[#allocation19_spill] sm:$0xff] }
 0x49f   :  { %11447 = vperm.xlu0 %16515, %v25582_v0   ;;  %v22086_v43 = vpop.permute.xlu0 %9317  ;;  %v8019_v61 = vrot.slane %v8018_v48, 2  ;;  %v7996_v19 = vrot.slane %v7995_v50, 4  ;;  %v7208_v32 = vrot.slane %v7201_v58, %v17359_v27  ;;  %v25586_v4 = vrot.slane %v21961_v51, %v17359_v27 }
 0x4a0   :  { %25585 = vst [vmem:[#allocation105_spill] sm:$0xff] %v22086_v43  ;;  %v7946_v6 = vsel %vm7931_vm5, %v7231_v15, 0.0  ;;  %v7431_v29 = vcombine.low %v7423_v54, %v7430_v1  ;;  %v22104_v22 = vrot.slane %v22059_v28, %v17359_v27  ;;  %v25589_v58 = vrot.slane %v21236_v63, %v25395_v8  ;;  %v25590_v1 = vld [vmem:[#allocation150_spill] sm:$0xff] }
 0x4a1   :  { %11456 = vperm.xlu1 %16514, %v25584_v2   ;;  %v22096_v12 = vcombine.low %v25586_v4, %v6325_v37  ;;  %v22099_v53 = vpop.permute.xlu1 %9332  ;;  %v7993_v2 = vrot.slane %v7992_v5, 1  ;;  %v7937_v51 = vrot.slane %v7936_v49, 1  ;;  %v5746_v15 = vrot.slane %v25590_v1, %v25395_v8  ;;  %v25593_v37 = vld [vmem:[#allocation179_spill] sm:$0xff] }
 0x4a2   :  { %25587 = vst [vmem:[#allocation116_spill] sm:$0xff] %v22099_v53  ;;  %v22109_v40 = vcombine.low %v25589_v58, %v5818_v25  ;;  %v8007_v54 = vrot.slane %v8006_v60, 1  ;;  %v7277_v4 = vrot.slane %v7270_v36, %v17359_v27  ;;  %v8020_v45 = vadd.f32 %v8019_v61, %v8018_v48  ;;  %v25596_v61 = vld [vmem:[#allocation162_spill] sm:$0xff] }
 0x4a3   :  { %11465 = vperm.xlu0 %16515, %v25588_v62   ;;  %v25591_v62 = vld [vmem:[#allocation27_spill] sm:$0xff]  ;;  %v22117_v0 = vpop.permute.xlu0 %9327  ;;  %v7997_v53 = vadd.f32 %v7996_v19, %v7995_v50  ;;  %v7947_v63 = vrot.slane %v7946_v6, 4  ;;  %v7939_v25 = vsel %vm7931_vm5, %v7208_v32, 0.0  ;;  %v5530_v43 = vrot.slane %v25593_v37, %v25395_v8 }
 0x4a4   :  { %25592 = vst [vmem:[#allocation90_spill] sm:$0xff] %v22117_v0  ;;  %v7438_v1 = vrot.slane %v7431_v29, %v17359_v27  ;;  %v25594_v36 = vcombine.high %v21849_v33, %v21849_v33  ;;  %v25595_v0 = vld [vmem:[#allocation50_spill] sm:$0xff]  ;;  %v5800_v48 = vrot.slane %v25596_v61, %v25395_v8  ;;  %v22136_v19 = vadd.f32 %v7993_v2, %v7992_v5  ;;  %v25597_v29 = vld [vmem:[#allocation92_spill] sm:$0xff]  ;;  %v25600_v50 = vld [vmem:[#allocation151_spill] sm:$0xff] }
 0x4a5   :  { %11474 = vperm.xlu1 %16514, %v25591_v62   ;;  %v22138_v32 = vadd.f32 %v7937_v51, %v7936_v49  ;;  %v5521_v58 = vrot.slane %v25597_v29, %v25395_v8  ;;  %v22144_v33 = vadd.f32 %v8007_v54, %v8006_v60  ;;  %v5737_v5 = vrot.slane %v25600_v50, %v25395_v8 }
 0x4a6   :  { %v22129_v62 = vrot.slane %v25594_v36, %v17359_v27  ;;  %v7940_v36 = vrot.slane %v7939_v25, 4  ;;  %v8021_v2 = vrot.slane %v8020_v45, 1  ;;  %v7998_v49 = vrot.slane %v7997_v53, 2 }
 0x4a7   :  { %11483 = vperm.xlu0 %16515, %v25595_v0   ;;  %v7960_v0 = vsel %vm7931_vm5, %v7277_v4, 0.0  ;;  %v7948_v51 = vadd.f32 %v7947_v63, %v7946_v6  ;;  %v6295_v35 = vcombine.low %v5521_v58, %v5530_v43  ;;  %v8009_v11 = vsel %vm7931_vm5, %v7438_v1, 0.0  ;;  %v25601_v4 = vld [vmem:[#allocation79_spill] sm:$0xff]  ;;  %v25602_v63 = vld [vmem:[#allocation58_spill] sm:$0xff] }
 0x4a8   :  { %v22140_v37 = vpop.permute.xlu1 %10943  ;;  %v22148_v61 = vpop.permute.xlu0 %9337  ;;  %v16338_v60 = vcombine.high %v21936_v10, %v22129_v62  ;;  %v22156_v54 = vrot.slane %v6688_v56, %v17359_v27  ;;  %v7961_v29 = vrot.slane %v7960_v0, 4  ;;  %v6819_v6 = vcombine.high %v21869_v59, %v21869_v59 }
 0x4a9   :  { %11492 = vperm.xlu1 %16514, %v25598_v47   ;;  %25599 = vst [vmem:[#allocation45_spill] sm:$0xff] %v22148_v61  ;;  %v6442_v47 = vcombine.low %v5737_v5, %v5746_v15  ;;  %v22161_v61 = vrot.slane %v21889_v26, %v17359_v27  ;;  %v7941_v1 = vadd.f32 %v7940_v36, %v7939_v25  ;;  %v25604_v5 = vld [vmem:[#allocation139_spill] sm:$0xff]  ;;  %v8010_v59 = vrot.slane %v8009_v11, 4 }
 0x4aa   :  { %v25603_v56 = vcombine.high %v21771_v57, %v21771_v57  ;;  %v6669_v15 = vcombine.high %v22002_v24, %v22002_v24  ;;  %v22178_v42 = vadd.f32 %v7998_v49, %v7997_v53  ;;  %v7462_v34 = vcombine.low %v6819_v6, %v21936_v10  ;;  %v25605_v24 = vld [vmem:[#allocation71_spill] sm:$0xff] }
 0x4ab   :  { %11501 = vperm.xlu0 %16515, %v25601_v4   ;;  %v22176_v4 = vadd.f32 %v8021_v2, %v8020_v45  ;;  %v6311_v25 = vrot.slane %v6295_v35, %v17359_v27  ;;  %v7949_v36 = vrot.slane %v7948_v51, 2  ;;  %v7492_v57 = vrot.slane %v16338_v60, %v17359_v27 }
 0x4ac   :  { %v22165_v43 = vpop.permute.xlu1 %10961  ;;  %v6661_v50 = vrot.slane %v25603_v56, %v17359_v27  ;;  %v16336_v56 = vcombine.high %v22080_v44, %v22156_v54  ;;  %v6458_v45 = vrot.slane %v6442_v47, %v17359_v27  ;;  %v7962_v2 = vadd.f32 %v7961_v29, %v7960_v0  ;;  %v25608_v47 = vld [vmem:[#allocation133_spill] sm:$0xff]  ;;  %v25609_v0 = vld [vmem:[#allocation83_spill] sm:$0xff] }
 0x4ad   :  { %11510 = vperm.xlu1 %16514, %v25604_v5   ;;  %v22181_v39 = vpop.permute.xlu0 %10952  ;;  %v7499_v53 = vrot.slane %v22161_v61, %v17359_v27  ;;  %v25606_v10 = vcombine.high %v22059_v28, %v22059_v28  ;;  %v7942_v60 = vrot.slane %v7941_v1, 2  ;;  %v22201_v6 = vrot.slane %v22054_v9, %v17359_v27 }
 0x4ae   :  { %v6671_v5 = vcombine.high %v6661_v50, %v6661_v50  ;;  %v5791_v29 = vrot.slane %v25609_v0, %v25395_v8  ;;  %v8011_v58 = vadd.f32 %v8010_v59, %v8009_v11  ;;  %v7469_v13 = vrot.slane %v7462_v34, %v17359_v27 }
 0x4af   :  { %11303 = vperm.xlu0 %16515, %v25605_v24   ;;  %v22195_v49 = vrot.slane %v25606_v10, %v17359_v27  ;;  %v7232_v24 = vcombine.low %v6661_v50, %v6669_v15  ;;  %v7476_v28 = vrot.slane %v22129_v62, %v17359_v27  ;;  %v25610_v46 = vrot.slane %v21939_v23, %v17359_v27 }
 0x4b0   :  { %v22197_v35 = vpop.permute.xlu1 %10970  ;;  %v7500_v20 = vcombine.low %v7492_v57, %v7499_v53  ;;  %v7308_v50 = vrot.slane %v16336_v56, %v17359_v27  ;;  %v6672_v15 = vcombine.high %v22018_v30, %v22018_v30  ;;  %v25612_v34 = vrot.slane %v21783_v3, %v17359_v27  ;;  %v25613_v57 = vld [vmem:[#allocation81_spill] sm:$0xff] }
 0x4b1   :  { %25607 = vst [vmem:[#allocation117_spill] sm:$0xff] %v22195_v49  ;;  %11312 = vperm.xlu1 %16514, %v25608_v47   ;;  %v22209_v10 = vpop.permute.xlu0 %10979  ;;  %v6326_v14 = vcombine.low %v25610_v46, %v6311_v25  ;;  %v25611_v47 = vld [vmem:[#allocation8_spill] sm:$0xff]  ;;  %v6490_v59 = vcombine.low %v5791_v29, %v5800_v48  ;;  %v7963_v62 = vrot.slane %v7962_v2, 2  ;;  %v7531_v0 = vcombine.low %v22104_v22, %v22195_v49 }
 0x4b2   :  { %v6473_v11 = vcombine.low %v25612_v34, %v6458_v45  ;;  %v7315_v46 = vrot.slane %v22201_v6, %v17359_v27  ;;  %v7239_v23 = vrot.slane %v7232_v24, %v17359_v27  ;;  %v7246_v30 = vrot.slane %v6671_v5, %v17359_v27  ;;  %v25614_v5 = vld [vmem:[#allocation67_spill] sm:$0xff] }
 0x4b3   :  { %11321 = vperm.xlu0 %16515, %v25611_v47   ;;  %v7278_v25 = vcombine.low %v6672_v15, %v22080_v44  ;;  %v8000_v3 = vrot.slane %v22178_v42, 1  ;;  %v7950_v48 = vadd.f32 %v7949_v36, %v7948_v51  ;;  %v7477_v56 = vcombine.low %v7469_v13, %v7476_v28 }
 0x4b4   :  { %v22223_v52 = vpop.permute.xlu1 %10988  ;;  %v6914_v45 = vcombine.high %v22104_v22, %v22104_v22  ;;  %v6334_v29 = vrot.slane %v6326_v14, %v17359_v27  ;;  %v8012_v47 = vrot.slane %v8011_v58, 2  ;;  %v7507_v24 = vrot.slane %v7500_v20, %v17359_v27  ;;  %v25615_v20 = vld [vmem:[#allocation187_spill] sm:$0xff] }
 0x4b5   :  { %11330 = vperm.xlu1 %16514, %v25613_v57   ;;  %v22234_v53 = vpop.permute.xlu0 %10997  ;;  %v7316_v34 = vcombine.low %v7308_v50, %v7315_v46  ;;  %v6481_v44 = vrot.slane %v6473_v11, %v17359_v27  ;;  %v6500_v15 = vrot.slane %v6490_v59, %v17359_v27  ;;  %v7943_v57 = vadd.f32 %v7942_v60, %v7941_v1 }
 0x4b6   :  { %v7538_v13 = vrot.slane %v7531_v0, %v17359_v27  ;;  %v7964_v22 = vadd.f32 %v7963_v62, %v7962_v2  ;;  %v7247_v36 = vcombine.low %v7239_v23, %v7246_v30  ;;  %v7285_v28 = vrot.slane %v7278_v25, %v17359_v27  ;;  %v25618_v30 = vld [vmem:[#allocation190_spill] sm:$0xff] }
 0x4b7   :  { %11339 = vperm.xlu0 %16515, %v25614_v5   ;;  %v7292_v14 = vrot.slane %v22156_v54, %v17359_v27  ;;  %v7484_v50 = vrot.slane %v7477_v56, %v17359_v27  ;;  %v7545_v11 = vrot.slane %v6914_v45, %v17359_v27  ;;  %v25616_v1 = vcombine.high %v21889_v26, %v21889_v26 }
 0x4b8   :  { %v22242_v51 = vpop.permute.xlu1 %11006  ;;  %v6866_v2 = vcombine.high %v22161_v61, %v22161_v61  ;;  %v25617_v62 = vrot.slane %v22096_v12, %v17359_v27  ;;  %v8013_v0 = vadd.f32 %v8012_v47, %v8011_v58  ;;  %v8030_v46 = vsel %vm7931_vm5, %v7507_v24, 0.0 }
 0x4b9   :  { %11348 = vperm.xlu1 %16514, %v25615_v20   ;;  %v6864_v60 = vrot.slane %v25616_v1, %v17359_v27  ;;  %v22256_v59 = vpop.permute.xlu0 %11015  ;;  %v7323_v23 = vrot.slane %v7316_v34, %v17359_v27  ;;  %v25619_v26 = vrot.slane %v21920_v7, %v17359_v27  ;;  %v22268_v56 = vadd.f32 %v8000_v3, %v22178_v42  ;;  %v25622_v34 = vld [vmem:[#allocation199_spill] sm:$0xff] }
 0x4ba   :  { %v6342_v54 = vcombine.low %v6334_v29, %v25617_v62  ;;  %v7951_v61 = vrot.slane %v7950_v48, 1  ;;  %v7546_v45 = vcombine.low %v7538_v13, %v7545_v11  ;;  %v25621_v12 = vrot.slane %v22109_v40, %v17359_v27  ;;  %v25623_v13 = vld [vmem:[#allocation49_spill] sm:$0xff]  ;;  %v25624_v62 = vld [vmem:[#allocation26_spill] sm:$0xff] }
 0x4bb   :  { %11357 = vperm.xlu0 %16515, %v25618_v30   ;;  %v6489_v25 = vcombine.low %v6481_v44, %v25619_v26  ;;  %v7944_v29 = vrot.slane %v7943_v57, 1  ;;  %v7254_v47 = vrot.slane %v7247_v36, %v17359_v27  ;;  %v7293_v24 = vcombine.low %v7285_v28, %v7292_v14  ;;  %v25625_v36 = vld [vmem:[#allocation62_spill] sm:$0xff]  ;;  %v25626_v14 = vld [vmem:[#allocation163_spill] sm:$0xff] }
 0x4bc   :  { %v22270_v5 = vpop.permute.xlu1 %11024  ;;  %v22275_v58 = vcombine.low %v6500_v15, %v25621_v12  ;;  %v8031_v7 = vrot.slane %v8030_v46, 4  ;;  %v8023_v44 = vsel %vm7931_vm5, %v7484_v50, 0.0  ;;  %v6868_v42 = vcombine.high %v6864_v60, %v6864_v60 }
 0x4bd   :  { %25620 = vst [vmem:[#allocation185_spill] sm:$0xff] %v22270_v5  ;;  %11366 = vperm.xlu1 %16514, %v25622_v34   ;;  %v7508_v3 = vcombine.low %v6864_v60, %v6866_v2  ;;  %v22280_v20 = vpop.permute.xlu0 %11159  ;;  %v22283_v11 = vmul.f32 %v25623_v13, %v6342_v54  ;;  %v7965_v1 = vrot.slane %v7964_v22, 1  ;;  %v8014_v40 = vrot.slane %v8013_v0, 1  ;;  %v25628_v34 = vld [vmem:[#allocation69_spill] sm:$0xff] }
 0x4be   :  { %v7974_v15 = vsel %vm7931_vm5, %v7323_v23, 0.0  ;;  %v6561_v28 = vmul.f32 %v6489_v25, %v25625_v36  ;;  %v5827_v30 = vrot.slane %v25626_v14, %v25395_v8  ;;  %v22290_v26 = vadd.f32 %v7951_v61, %v7950_v48 }
 0x4bf   :  { %11663 = vperm.xlu0 %16515, %v25624_v62   ;;  %v7553_v50 = vrot.slane %v7546_v45, %v17359_v27  ;;  %v22295_v2 = vadd.f32 %v7944_v29, %v7943_v57  ;;  %v8024_v54 = vrot.slane %v8023_v44, 4  ;;  %v7953_v12 = vsel %vm7931_vm5, %v7254_v47, 0.0 }
 0x4c0   :  { %25627 = vst [vmem:[#allocation56_spill] sm:$0xff] %v22290_v26  ;;  %v22293_v60 = vpop.permute.xlu1 %11168  ;;  %v7300_v23 = vrot.slane %v7293_v24, %v17359_v27  ;;  %v8032_v62 = vadd.f32 %v8031_v7, %v8030_v46  ;;  %v7975_v25 = vrot.slane %v7974_v15, 4  ;;  %v7515_v36 = vrot.slane %v7508_v3, %v17359_v27  ;;  %v25631_v24 = vld [vmem:[#allocation132_spill] sm:$0xff] }
 0x4c1   :  { %11672 = vperm.xlu1 %16514, %v25628_v34   ;;  %v7522_v48 = vrot.slane %v6868_v42, %v17359_v27  ;;  %v22302_v61 = vpop.permute.xlu0 %11177  ;;  %v22308_v57 = vrot.slane %v22283_v11, %v17359_v27  ;;  %v22310_v29 = vadd.f32 %v7965_v1, %v7964_v22  ;;  %v22312_v47 = vadd.f32 %v8014_v40, %v8013_v0  ;;  %v25633_v34 = vld [vmem:[#allocation142_spill] sm:$0xff] }
 0x4c2   :  { %v7065_v46 = vcombine.high %v6561_v28, %v6561_v28  ;;  %v22316_v7 = vrot.slane %v6561_v28, %v17359_v27  ;;  %v7954_v42 = vrot.slane %v7953_v12, 4  ;;  %v8044_v3 = vsel %vm7931_vm5, %v7553_v50, 0.0  ;;  %v25636_v40 = vld [vmem:[#allocation42_spill] sm:$0xff]  ;;  %v25637_v28 = vld [vmem:[#allocation24_spill] sm:$0xff] }
 0x4c3   :  { %25629 = vst [vmem:[#allocation118_spill] sm:$0xff] %v22310_v29  ;;  %25630 = vst [vmem:[#allocation198_spill] sm:$0xff] %v22312_v47  ;;  %11681 = vperm.xlu0 %16515, %v25631_v24   ;;  %v5854_v45 = vrot.slane %v25633_v34, %v25395_v8  ;;  %v8025_v13 = vadd.f32 %v8024_v54, %v8023_v44  ;;  %v7967_v22 = vsel %vm7931_vm5, %v7300_v23, 0.0  ;;  %v8033_v50 = vrot.slane %v8032_v62, 2  ;;  %v25638_v44 = vld [vmem:[#allocation82_spill] sm:$0xff] }
 0x4c4   :  { %25632 = vst [vmem:[#allocation41_spill] sm:$0xff] %v22316_v7  ;;  %v22319_v14 = vpop.permute.xlu1 %11186  ;;  %v25634_v0 = vcombine.high %v22083_v55, %v22083_v55  ;;  %v5836_v24 = vrot.slane %v25637_v28, %v25395_v8  ;;  %v7976_v49 = vadd.f32 %v7975_v25, %v7974_v15  ;;  %v7523_v21 = vcombine.low %v7515_v36, %v7522_v48  ;;  %v25646_v7 = vld [vmem:[#allocation25_spill] sm:$0xff] }
 0x4c5   :  { %11690 = vperm.xlu1 %16514, %v25636_v40   ;;  %v22333_v17 = vpop.permute.xlu0 %11195  ;;  %v5845_v54 = vrot.slane %v25638_v44, %v25395_v8  ;;  %v8045_v23 = vrot.slane %v8044_v3, 4  ;;  %v22339_v34 = vrot.slane %v22083_v55, %v17359_v27  ;;  %v25641_v40 = vld [vmem:[#allocation12_spill] sm:$0xff]  ;;  %v22347_v28 = vrot.slane %v7065_v46, %v17359_v27 }
 0x4c6   :  { %v22328_v1 = vrot.slane %v25634_v0, %v17359_v27  ;;  %v22343_v0 = vrot.slane %v22308_v57, %v17359_v27  ;;  %v7955_v36 = vadd.f32 %v7954_v42, %v7953_v12  ;;  %v7968_v25 = vrot.slane %v7967_v22, 4  ;;  %v25645_v12 = vld [vmem:[#allocation193_spill] sm:$0xff] }
 0x4c7   :  { %25639 = vst [vmem:[#allocation113_spill] sm:$0xff] %v22339_v34  ;;  %11699 = vperm.xlu0 %16515, %v25641_v40   ;;  %25642 = vst [vmem:[#allocation192_spill] sm:$0xff] %v22347_v28  ;;  %v6918_v55 = vcombine.high %v22283_v11, %v22283_v11  ;;  %v6493_v44 = vcombine.low %v5845_v54, %v5854_v45  ;;  %v8026_v16 = vrot.slane %v8025_v13, 2  ;;  %v7977_v47 = vrot.slane %v7976_v49, 2 }
 0x4c8   :  { %25635 = vst [vmem:[#allocation194_spill] sm:$0xff] %v22328_v1  ;;  %25640 = vst [vmem:[#allocation89_spill] sm:$0xff] %v22343_v0  ;;  %v22351_v48 = vpop.permute.xlu1 %11204  ;;  %v16339_v29 = vcombine.high %v22339_v34, %v22328_v1  ;;  %v6492_v40 = vcombine.low %v5827_v30, %v5836_v24  ;;  %v8034_v46 = vadd.f32 %v8033_v50, %v8032_v62  ;;  %v25647_v1 = vld [vmem:[#allocation38_spill] sm:$0xff]  ;;  %v25648_v30 = vld [vmem:[#allocation188_spill] sm:$0xff]  ;;  %v7956_v62 = vrot.slane %v7955_v36, 2 }
 0x4c9   :  { %25643 = vst [vmem:[#allocation94_spill] sm:$0xff] %v22351_v48  ;;  %11708 = vperm.xlu1 %16514, %v25644_v18   ;;  %v7530_v38 = vrot.slane %v7523_v21, %v17359_v27  ;;  %v5575_v42 = vrot.slane %v25645_v12, %v25395_v8  ;;  %v5602_v11 = vrot.slane %v25646_v7, %v25395_v8  ;;  %v25657_v48 = vld [vmem:[#allocation155_spill] sm:$0xff] }
 0x4ca   :  { %v22359_v15 = vpop.permute.xlu0 %11213  ;;  %v8046_v45 = vadd.f32 %v8045_v23, %v8044_v3  ;;  %v7591_v54 = vrot.slane %v22343_v0, %v17359_v27  ;;  %v5584_v21 = vrot.slane %v25648_v30, %v25395_v8  ;;  %v7969_v24 = vadd.f32 %v7968_v25, %v7967_v22  ;;  %v25649_v0 = vld [vmem:[#allocation59_spill] sm:$0xff] }
 0x4cb   :  { %11717 = vperm.xlu0 %16515, %v25647_v1   ;;  %v6932_v12 = vrot.slane %v6918_v55, %v17359_v27  ;;  %v6521_v7 = vrot.slane %v6493_v44, %v17359_v27  ;;  %v8027_v3 = vadd.f32 %v8026_v16, %v8025_v13  ;;  %v7584_v23 = vrot.slane %v16339_v29, %v17359_v27  ;;  %v25652_v55 = vld [vmem:[#allocation171_spill] sm:$0xff]  ;;  %v25653_v29 = vld [vmem:[#allocation34_spill] sm:$0xff] }
 0x4cc   :  { %v22372_v50 = vpop.permute.xlu1 %11222  ;;  %v6514_v1 = vrot.slane %v6492_v40, %v17359_v27  ;;  %v8035_v34 = vrot.slane %v8034_v46, 1  ;;  %v7978_v18 = vadd.f32 %v7977_v47, %v7976_v49  ;;  %v8037_v28 = vsel %vm7931_vm5, %v7530_v38, 0.0  ;;  %v25654_v40 = vld [vmem:[#allocation14_spill] sm:$0xff] }
 0x4cd   :  { %11726 = vperm.xlu1 %16514, %v25649_v0   ;;  %v25651_v22 = vrot.slane %v25602_v63, %v25395_v8  ;;  %v5638_v44 = vrot.slane %v25652_v55, %v25395_v8  ;;  %v8047_v16 = vrot.slane %v8046_v45, 2  ;;  %v7592_v13 = vcombine.low %v7584_v23, %v7591_v54  ;;  %v25658_v54 = vld [vmem:[#allocation134_spill] sm:$0xff] }
 0x4ce   :  { %v22380_v30 = vpop.permute.xlu0 %11033  ;;  %v6343_v0 = vcombine.low %v5575_v42, %v5584_v21  ;;  %v5620_v26 = vrot.slane %v25654_v40, %v25395_v8  ;;  %v7957_v49 = vadd.f32 %v7956_v62, %v7955_v36  ;;  %v7970_v47 = vrot.slane %v7969_v24, 2 }
 0x4cf   :  { %25650 = vst [vmem:[#allocation23_spill] sm:$0xff] %v22380_v30  ;;  %v6344_v25 = vcombine.low %v25651_v22, %v5602_v11  ;;  %11519 = vperm.xlu0 %16515, %v25653_v29   ;;  %v6934_v5 = vcombine.high %v6932_v12, %v6932_v12  ;;  %v25656_v30 = vld [vmem:[#allocation115_spill] sm:$0xff]  ;;  %v6523_v11 = vcombine.low %v6514_v1, %v6521_v7  ;;  %v8038_v22 = vrot.slane %v8037_v28, 4 }
 0x4d0   :  { %v22390_v38 = vpop.permute.xlu1 %11042  ;;  %v5629_v63 = vrot.slane %v25656_v30, %v25395_v8  ;;  %v5611_v23 = vrot.slane %v25658_v54, %v25395_v8  ;;  %v22397_v55 = vadd.f32 %v8035_v34, %v8034_v46  ;;  %v8028_v42 = vrot.slane %v8027_v3, 1  ;;  %v25661_v30 = vld [vmem:[#allocation178_spill] sm:$0xff] }
 0x4d1   :  { %25655 = vst [vmem:[#allocation95_spill] sm:$0xff] %v22390_v38  ;;  %11528 = vperm.xlu1 %16514, %v25657_v48   ;;  %v7979_v21 = vrot.slane %v7978_v18, 1  ;;  %v6360_v36 = vrot.slane %v6344_v25, %v17359_v27  ;;  %v8048_v40 = vadd.f32 %v8047_v16, %v8046_v45  ;;  %v7599_v38 = vrot.slane %v7592_v13, %v17359_v27  ;;  %v25662_v48 = vld [vmem:[#allocation48_spill] sm:$0xff] }
 0x4d2   :  { %25659 = vst [vmem:[#allocation196_spill] sm:$0xff] %v22397_v55  ;;  %v22399_v29 = vpop.permute.xlu0 %11051  ;;  %v6346_v62 = vcombine.low %v5629_v63, %v5638_v44  ;;  %v6353_v7 = vrot.slane %v6343_v0, %v17359_v27  ;;  %v22407_v1 = vmul.f32 %v25662_v48, %v22136_v19  ;;  %v7958_v34 = vrot.slane %v7957_v49, 1  ;;  %v25663_v44 = vld [vmem:[#allocation13_spill] sm:$0xff]  ;;  %v25664_v16 = vld [vmem:[#allocation88_spill] sm:$0xff] }
 0x4d3   :  { %25660 = vst [vmem:[#allocation66_spill] sm:$0xff] %v22399_v29  ;;  %11537 = vperm.xlu0 %16515, %v25661_v30   ;;  %v7971_v46 = vadd.f32 %v7970_v47, %v7969_v24  ;;  %v6345_v55 = vcombine.low %v5611_v23, %v5620_v26  ;;  %v6537_v29 = vrot.slane %v6523_v11, %v17359_v27  ;;  %v8049_v63 = vrot.slane %v8048_v40, 1  ;;  %v25665_v11 = vld [vmem:[#allocation145_spill] sm:$0xff] }
 0x4d4   :  { %v22409_v54 = vpop.permute.xlu1 %11060  ;;  %v8039_v25 = vadd.f32 %v8038_v22, %v8037_v28  ;;  %v22413_v45 = vrot.slane %v6934_v5, %v17359_v27  ;;  %v22418_v13 = vmul.f32 %v25664_v16, %v22138_v32  ;;  %v22420_v0 = vadd.f32 %v8028_v42, %v8027_v3  ;;  %v25666_v32 = vld [vmem:[#allocation21_spill] sm:$0xff] }
 0x4d5   :  { %11546 = vperm.xlu1 %16514, %v25663_v44   ;;  %v22422_v19 = vadd.f32 %v7979_v21, %v7978_v18  ;;  %v6948_v24 = vrot.slane %v6932_v12, %v17359_v27  ;;  %v6375_v26 = vcombine.low %v6353_v7, %v6360_v36  ;;  %v6374_v28 = vrot.slane %v6346_v62, %v17359_v27  ;;  %v25668_v30 = vld [vmem:[#allocation169_spill] sm:$0xff] }
 0x4d6   :  { %v22425_v47 = vpop.permute.xlu0 %11069  ;;  %v8058_v5 = vsel %vm7931_vm5, %v7599_v38, 0.0  ;;  %v9412_v22 = vmin.f32 %v22407_v1, 0.0  ;;  %v22433_v3 = vmul.f32 %v25666_v32, %v22268_v56  ;;  %v22435_v18 = vadd.f32 %v7958_v34, %v7957_v49  ;;  %v25669_v44 = vld [vmem:[#allocation153_spill] sm:$0xff] }
 0x4d7   :  { %11555 = vperm.xlu0 %16515, %v25665_v11   ;;  %v7972_v23 = vrot.slane %v7971_v46, 1  ;;  %v6367_v42 = vrot.slane %v6345_v55, %v17359_v27  ;;  %v25667_v21 = vrot.slane %v22275_v58, %v17359_v27  ;;  %v8040_v38 = vrot.slane %v8039_v25, 2  ;;  %v25670_v11 = vld [vmem:[#allocation160_spill] sm:$0xff] }
 0x4d8   :  { %v22437_v12 = vpop.permute.xlu1 %11078  ;;  %v7623_v62 = vcombine.low %v6948_v24, %v22413_v45  ;;  %v9404_v49 = vmin.f32 %v22418_v13, 0.0  ;;  %v8059_v7 = vrot.slane %v8058_v5, 4  ;;  %v6964_v48 = vcombine.high %v6948_v24, %v6948_v24 }
 0x4d9   :  { %v6538_v36 = vcombine.low %v25667_v21, %v6537_v29  ;;  %11564 = vperm.xlu1 %16514, %v25668_v30   ;;  %v6383_v55 = vrot.slane %v6375_v26, %v17359_v27  ;;  %v22453_v58 = vmul.f32 %v25669_v44, %v22144_v33  ;;  %v6376_v29 = vcombine.low %v6367_v42, %v6374_v28  ;;  %v25672_v33 = vld [vmem:[#allocation33_spill] sm:$0xff] }
 0x4da   :  { %v22448_v34 = vpop.permute.xlu0 %11231  ;;  %v22455_v16 = vadd.f32 %v8049_v63, %v8048_v40  ;;  %v9452_v32 = vmul.f32 1.442695, %v9412_v22  ;;  %v9413_v21 = vmin.f32 %v22433_v3, 0.0  ;;  %v22459_v30 = vadd.f32 %v7972_v23, %v7971_v46  ;;  %v25673_v46 = vld [vmem:[#allocation184_spill] sm:$0xff] }
 0x4db   :  { %11573 = vperm.xlu0 %16515, %v25670_v11   ;;  %v25671_v24 = vcombine.high %v22054_v9, %v22054_v9  ;;  %v6562_v44 = vmul.f32 %v25672_v33, %v6538_v36  ;;  %v22470_v28 = vadd.f32 %v8040_v38, %v8039_v25  ;;  %v22473_v40 = vrot.slane %v7623_v62, %v17359_v27 }
 0x4dc   :  { %v22467_v26 = vpop.permute.xlu1 %11240  ;;  %v10976_v63 = vrot.slane %v22197_v35, %v25395_v8  ;;  %v9436_v22 = vmul.f32 1.442695, %v9404_v49  ;;  %v22478_v23 = vadd.f32 %v8059_v7, %v8058_v5  ;;  %v22481_v9 = vrot.slane %v6964_v48, %v17359_v27  ;;  %v25674_v5 = vld [vmem:[#allocation64_spill] sm:$0xff] }
 0x4dd   :  { %v22465_v56 = vrot.slane %v25671_v24, %v17359_v27  ;;  %11582 = vperm.xlu1 %16514, %v25673_v46   ;;  %v10958_v42 = vrot.slane %v22181_v39, %v25395_v8  ;;  %v9414_v25 = vmin.f32 %v22453_v58, 0.0  ;;  %v6390_v38 = vrot.slane %v6376_v29, %v17359_v27  ;;  %v25675_v46 = vld [vmem:[#allocation70_spill] sm:$0xff] }
 0x4de   :  { %v22485_v36 = vpop.permute.xlu0 %11249  ;;  %v10967_v62 = vrot.slane %v22165_v43, %v25395_v8  ;;  %17028 = vpow2.f32 %v9452_v32  ;;  %v9454_v49 = vmul.f32 1.442695, %v9413_v21  ;;  %v22496_v7 = vmul.f32 %v21723_v31, %v22295_v2 }
 0x4df   :  { %11735 = vperm.xlu0 %16515, %v25674_v5   ;;  %v10949_v39 = vrot.slane %v22140_v37, %v25395_v8  ;;  %v7114_v29 = vcombine.high %v6562_v44, %v6562_v44  ;;  %17030 = vpow2.f32 %v9436_v22  ;;  %v22507_v32 = vrot.slane %v6562_v44, %v17359_v27 }
 0x4e0   :  { %v22500_v48 = vpop.permute.xlu1 %11258  ;;  %v11902_v43 = vcombine.low %v10967_v62, %v10976_v63  ;;  %v9456_v37 = vmul.f32 1.442695, %v9414_v25  ;;  %v6391_v5 = vcombine.low %v6383_v55, %v6390_v38  ;;  %v22514_v35 = vmul.f32 %v21730_v41, %v22176_v4  ;;  %v25676_v62 = vld [vmem:[#allocation36_spill] sm:$0xff] }
 0x4e1   :  { %11744 = vperm.xlu1 %16514, %v25675_v46   ;;  %v11901_v2 = vcombine.low %v10949_v39, %v10958_v42  ;;  %v10985_v63 = vrot.slane %v22209_v10, %v25395_v8  ;;  %17032 = vpow2.f32 %v9454_v49  ;;  %v11003_v22 = vrot.slane %v22234_v53, %v25395_v8  ;;  %v25677_v38 = vld [vmem:[#allocation16_spill] sm:$0xff] }
 0x4e2   :  { %v22510_v21 = vpop.permute.xlu0 %11267  ;;  %v11183_v42 = vrot.slane %v22302_v61, %v25395_v8  ;;  %v22527_v55 = vrot.slane %v7114_v29, %v17359_v27  ;;  %v11918_v41 = vrot.slane %v11902_v43, %v17359_v27  ;;  %v10994_v4 = vrot.slane %v22223_v52, %v25395_v8 }
 0x4e3   :  { %11753 = vperm.xlu0 %16515, %v25676_v62   ;;  %v11165_v10 = vrot.slane %v22280_v20, %v25395_v8  ;;  %v11911_v53 = vrot.slane %v11901_v2, %v17359_v27  ;;  %v11012_v61 = vrot.slane %v22242_v51, %v25395_v8  ;;  %v11192_v49 = vrot.slane %v22319_v14, %v25395_v8  ;;  %v25678_v2 = vld [vmem:[#allocation114_spill] sm:$0xff] }
 0x4e4   :  { %v22524_v25 = vpop.permute.xlu1 %11276  ;;  %v11201_v39 = vrot.slane %v22333_v17, %v25395_v8  ;;  %v11903_v43 = vcombine.low %v10985_v63, %v10994_v4  ;;  %v11174_v52 = vrot.slane %v22293_v60, %v25395_v8  ;;  %v11228_v20 = vrot.slane %v22372_v50, %v25395_v8  ;;  %v25679_v17 = vld [vmem:[#allocation94_spill] sm:$0xff]  ;;  %v25680_v60 = vld [vmem:[#allocation95_spill] sm:$0xff] }
 0x4e5   :  { %11762 = vperm.xlu1 %16514, %v25677_v38   ;;  %v11219_v46 = vrot.slane %v22359_v15, %v25395_v8  ;;  %v11904_v51 = vcombine.low %v11003_v22, %v11012_v61  ;;  %v11021_v14 = vrot.slane %v22256_v59, %v25395_v8  ;;  %v11210_v62 = vrot.slane %v25679_v17, %v25395_v8  ;;  %v25681_v50 = vld [vmem:[#allocation23_spill] sm:$0xff]  ;;  %v25682_v15 = vld [vmem:[#allocation93_spill] sm:$0xff] }
 0x4e6   :  { %v22542_v29 = vpop.permute.xlu0 %11285  ;;  %v12049_v38 = vcombine.low %v11183_v42, %v11192_v49  ;;  %v12048_v4 = vcombine.low %v11165_v10, %v11174_v52  ;;  %v11048_v24 = vrot.slane %v25680_v60, %v25395_v8  ;;  %v11039_v31 = vrot.slane %v25681_v50, %v25395_v8  ;;  %v25683_v59 = vld [vmem:[#allocation185_spill] sm:$0xff]  ;;  %v25684_v10 = vld [vmem:[#allocation40_spill] sm:$0xff]  ;;  %v25685_v17 = vld [vmem:[#allocation159_spill] sm:$0xff] }
 0x4e7   :  { %11771 = vperm.xlu0 %16515, %v25678_v2   ;;  %v12051_v11 = vcombine.low %v11219_v46, %v11228_v20  ;;  %17034 = vpow2.f32 %v9456_v37  ;;  %v11030_v61 = vrot.slane %v25683_v59, %v25395_v8  ;;  %v12050_v2 = vcombine.low %v11201_v39, %v11210_v62 }
 0x4e8   :  { %v11295_v63 = vpop.permute.xlu1 %11294  ;;  %v22567_v49 = vmul.f32 %v6391_v5, %v25684_v10  ;;  %v22569_v52 = vcombine.low %v11911_v53, %v11918_v41  ;;  %v11925_v20 = vrot.slane %v11903_v43, %v17359_v27  ;;  %v11951_v46 = vcombine.low %v11039_v31, %v11048_v24  ;;  %v25687_v53 = vld [vmem:[#allocation30_spill] sm:$0xff] }
 0x4e9   :  { %11780 = vperm.xlu1 %16514, %v25682_v15   ;;  %v11950_v60 = vcombine.low %v11021_v14, %v11030_v61  ;;  %v12065_v50 = vrot.slane %v12049_v38, %v17359_v27  ;;  %v12079_v37 = vrot.slane %v12051_v11, %v17359_v27  ;;  %v25686_v15 = vld [vmem:[#allocation66_spill] sm:$0xff]  ;;  %v11932_v5 = vrot.slane %v11904_v51, %v17359_v27 }
 0x4ea   :  { %v22564_v42 = vpop.permute.xlu0 %11375  ;;  %v11057_v39 = vrot.slane %v25686_v15, %v25395_v8  ;;  %v12058_v41 = vrot.slane %v12048_v4, %v17359_v27  ;;  %v11084_v24 = vrot.slane %v22437_v12, %v25395_v8  ;;  %v11075_v31 = vrot.slane %v22425_v47, %v25395_v8 }
 0x4eb   :  { %11789 = vperm.xlu0 %16515, %v25685_v17   ;;  %v22579_v59 = vpop.eup %17028  ;;  %v12072_v11 = vrot.slane %v12050_v2, %v17359_v27  ;;  %v11066_v43 = vrot.slane %v22409_v54, %v25395_v8  ;;  %v11967_v14 = vrot.slane %v11951_v46, %v17359_v27  ;;  %v11237_v51 = vrot.slane %v22448_v34, %v25395_v8 }
 0x4ec   :  { %v22577_v62 = vpop.permute.xlu1 %11384  ;;  %v22594_v4 = vpop.eup %17030  ;;  %v11246_v12 = vrot.slane %v22467_v26, %v25395_v8  ;;  %v11953_v61 = vcombine.low %v11075_v31, %v11084_v24  ;;  %v11264_v47 = vrot.slane %v22500_v48, %v25395_v8  ;;  %v11255_v2 = vrot.slane %v22485_v36, %v25395_v8 }
 0x4ed   :  { %11798 = vperm.xlu1 %16514, %v25687_v53   ;;  %v11960_v54 = vrot.slane %v11950_v60, %v17359_v27  ;;  %v12080_v17 = vcombine.low %v12058_v41, %v12065_v50  ;;  %v12081_v46 = vcombine.low %v12072_v11, %v12079_v37  ;;  %v11952_v15 = vcombine.low %v11057_v39, %v11066_v43 }
 0x4ee   :  { %v11394_v38 = vpop.permute.xlu0 %11393  ;;  %v22603_v34 = vpop.eup %17032  ;;  %v12097_v22 = vcombine.low %v11237_v51, %v11246_v12  ;;  %v11282_v44 = vrot.slane %v22524_v25, %v25395_v8  ;;  %v12098_v26 = vcombine.low %v11255_v2, %v11264_v47  ;;  %v11273_v24 = vrot.slane %v22510_v21, %v25395_v8 }
 0x4ef   :  { %v11934_v48 = vcombine.low %v11925_v20, %v11932_v5  ;;  %v11982_v31 = vcombine.low %v11960_v54, %v11967_v14  ;;  %v11300_v36 = vrot.slane %v11295_v63, %v25395_v8  ;;  %v11291_v60 = vrot.slane %v22542_v29, %v25395_v8 }
 0x4f0   :  { %v11403_v53 = vpop.permute.xlu1 %11402  ;;  %v11981_v37 = vrot.slane %v11953_v61, %v17359_v27  ;;  %v12114_v39 = vrot.slane %v12098_v26, %v17359_v27  ;;  %v12099_v41 = vcombine.low %v11273_v24, %v11282_v44  ;;  %v12088_v43 = vrot.slane %v12080_v17, %v17359_v27 }
 0x4f1   :  { %v11408_v11 = vrot.slane %v11403_v53, %v25395_v8  ;;  %v12100_v25 = vcombine.low %v11291_v60, %v11300_v36  ;;  %v12095_v21 = vrot.slane %v12081_v46, %v17359_v27  ;;  %v11399_v5 = vrot.slane %v11394_v38, %v25395_v8 }
 0x4f2   :  { %v11412_v50 = vpop.permute.xlu0 %11411  ;;  %v11974_v63 = vrot.slane %v11952_v15, %v17359_v27  ;;  %v12107_v29 = vrot.slane %v12097_v22, %v17359_v27  ;;  %v11390_v14 = vrot.slane %v22577_v62, %v25395_v8  ;;  %v11381_v44 = vrot.slane %v22564_v42, %v25395_v8  ;;  %v25688_v15 = vld [vmem:[#allocation56_spill] sm:$0xff]  ;;  %v25689_v42 = vld [vmem:[#allocation173_spill] sm:$0xff] }
 0x4f3   :  { %v12121_v51 = vrot.slane %v12099_v41, %v17359_v27  ;;  %v12128_v12 = vrot.slane %v12100_v25, %v17359_v27  ;;  %v12096_v61 = vcombine.low %v12088_v43, %v12095_v21  ;;  %v12196_v47 = vcombine.low %v11399_v5, %v11408_v11 }
 0x4f4   :  { %v11421_v20 = vpop.permute.xlu1 %11420  ;;  %v22626_v54 = vpop.eup %17034  ;;  %v11983_v38 = vcombine.low %v11974_v63, %v11981_v37  ;;  %v12129_v17 = vcombine.low %v12107_v29, %v12114_v39  ;;  %v11941_v22 = vrot.slane %v22569_v52, %v17359_v27  ;;  %v11948_v46 = vrot.slane %v11934_v48, %v17359_v27  ;;  %v25691_v37 = vld [vmem:[#allocation198_spill] sm:$0xff] }
 0x4f5   :  { %v9416_v62 = vmin.f32 %v22514_v35, 0.0  ;;  %v22634_v53 = vmul.f32 %v25689_v42, %v25688_v15  ;;  %v25690_v26 = vmin.f32 %v22496_v7, 0.0  ;;  %v12130_v36 = vcombine.low %v12121_v51, %v12128_v12  ;;  %12495 = vrot.lane.b32.xlu1 %v12096_v61, %s17224_s23  ;;  %v25692_v39 = vld [vmem:[#allocation170_spill] sm:$0xff] }
 0x4f6   :  { %v11430_v2 = vpop.permute.xlu0 %11429  ;;  %v22641_v41 = vmul.f32 %v25692_v39, %v25691_v37  ;;  %v12195_v52 = vcombine.low %v11381_v44, %v11390_v14  ;;  %v11426_v48 = vrot.slane %v11421_v20, %v25395_v8  ;;  %v11949_v11 = vcombine.low %v11941_v22, %v11948_v46 }
 0x4f7   :  { %v9438_v24 = vmul.f32 1.442695, %v25690_v26  ;;  %v12212_v25 = vrot.slane %v12196_v47, %v17359_v27  ;;  %v11417_v21 = vrot.slane %v11412_v50, %v25395_v8  ;;  %v11990_v5 = vrot.slane %v11982_v31, %v17359_v27 }
 0x4f8   :  { %v11439_v60 = vpop.permute.xlu1 %11438  ;;  %12489 = vrot.lane.b32.xlu0 %v11949_v11, %s17224_s23  ;;  %v11997_v29 = vrot.slane %v11983_v38, %v17359_v27  ;;  %v12137_v51 = vrot.slane %v12129_v17, %v17359_v27  ;;  %v12144_v14 = vrot.slane %v12130_v36, %v17359_v27  ;;  %v11435_v20 = vrot.slane %v11430_v2, %v25395_v8 }
 0x4f9   :  { %v11444_v43 = vrot.slane %v11439_v60, %v25395_v8  ;;  %v6967_v44 = vcombine.high %v22567_v49, %v22567_v49  ;;  %v22659_v50 = vrot.slane %v22567_v49, %v17359_v27  ;;  %v9460_v31 = vmul.f32 1.442695, %v9416_v62 }
 0x4fa   :  { %v22648_v63 = vpop.permute.xlu0 %11591  ;;  %v12197_v12 = vcombine.low %v11417_v21, %v11426_v48  ;;  %vm9380_vm11 = vcmp.gt.f32.partialorder %v22407_v1, 0.0  ;;  %v12205_v47 = vrot.slane %v12195_v52, %v17359_v27  ;;  %v11998_v38 = vcombine.low %v11990_v5, %v11997_v29  ;;  %v25694_v52 = vld [vmem:[#allocation118_spill] sm:$0xff] }
 0x4fb   :  { %v12145_v17 = vcombine.low %v12137_v51, %v12144_v14  ;;  %v12198_v22 = vcombine.low %v11435_v20, %v11444_v43  ;;  %v7130_v2 = vcombine.high %v22527_v55, %v22527_v55  ;;  %v22667_v46 = vrot.slane %v22507_v32, %v17359_v27  ;;  %v25696_v51 = vld [vmem:[#allocation77_spill] sm:$0xff]  ;;  %v25697_v20 = vld [vmem:[#allocation74_spill] sm:$0xff] }
 0x4fc   :  { %v11601_v61 = vpop.permute.xlu1 %11600  ;;  %v9406_v49 = vmin.f32 %v22634_v53, 0.0  ;;  %v25693_v62 = vrot.slane %v22478_v23, 2  ;;  %17036 = vpow2.f32 %v9438_v24  ;;  %v12227_v26 = vcombine.low %v12205_v47, %v12212_v25  ;;  %12491 = vrot.lane.b32.xlu0 %v11998_v38, %s17224_s23 }
 0x4fd   :  { %v12219_v36 = vrot.slane %v12197_v12, %v17359_v27  ;;  %12497 = vrot.lane.b32.xlu1 %v12145_v17, %s17224_s23  ;;  %v12226_v60 = vrot.slane %v12198_v22, %v17359_v27  ;;  %v22680_v37 = vrot.slane %v6967_v44, %v17359_v27  ;;  %v6982_v39 = vcombine.high %v22659_v50, %v22659_v50  ;;  %v25698_v22 = vld [vmem:[#allocation196_spill] sm:$0xff] }
 0x4fe   :  { %v22673_v15 = vadd.f32 %v25693_v62, %v22478_v23  ;;  %v11610_v42 = vpop.permute.xlu0 %11609  ;;  %v25695_v23 = vld [vmem:[#allocation165_spill] sm:$0xff]  ;;  %v9415_v24 = vmin.f32 %v22641_v41, 0.0  ;;  %v22691_v25 = vrot.slane %v22659_v50, %v17359_v27  ;;  %17038 = vpow2.f32 %v9460_v31  ;;  %v25706_v50 = vld [vmem:[#allocation60_spill] sm:$0xff] }
 0x4ff   :  { %v22686_v48 = vmul.f32 %v25695_v23, %v25694_v52  ;;  %v12228_v43 = vcombine.low %v12219_v36, %v12226_v60  ;;  %v11615_v21 = vrot.slane %v11610_v42, %v25395_v8  ;;  %v16351_v5 = vadd.f32 -1.0, %v22579_v59 }
 0x500   :  { %v11619_v11 = vpop.permute.xlu1 %11618  ;;  %v9440_v29 = vmul.f32 1.442695, %v9406_v49  ;;  %v22697_v14 = vmul.f32 %v25696_v51, %v22420_v0  ;;  %v22701_v44 = vmul.f32 %v25697_v20, %v22435_v18  ;;  %vm9372_vm15 = vcmp.gt.f32.partialorder %v22418_v13, 0.0  ;;  %v25699_v49 = vld [vmem:[#allocation22_spill] sm:$0xff] }
 0x501   :  { %vm9381_vm0 = vcmp.gt.f32.partialorder %v22433_v3, 0.0  ;;  %v11624_v31 = vrot.slane %v11619_v11, %v25395_v8  ;;  %v11597_v47 = vrot.slane %v22648_v63, %v25395_v8  ;;  %v12235_v59 = vrot.slane %v12227_v26, %v17359_v27 }
 0x502   :  { %v11628_v12 = vpop.permute.xlu0 %11627  ;;  %v12242_v38 = vrot.slane %v12228_v43, %v17359_v27  ;;  %v6983_v0 = vcombine.high %v22680_v37, %v22680_v37  ;;  %v9408_v18 = vmin.f32 %v22686_v48, 0.0  ;;  %v9458_v17 = vmul.f32 1.442695, %v9415_v24 }
 0x503   :  { %v22715_v62 = vmul.f32 %v25699_v49, %v25698_v22  ;;  %v11606_v36 = vrot.slane %v11601_v61, %v25395_v8  ;;  %v12343_v60 = vcombine.low %v11615_v21, %v11624_v31  ;;  %v11633_v63 = vrot.slane %v11628_v12, %v25395_v8 }
 0x504   :  { %v11637_v42 = vpop.permute.xlu1 %11636  ;;  %v12243_v26 = vcombine.low %v12235_v59, %v12242_v38  ;;  %v9540_v52 = vsel %vm9380_vm11, %v22407_v1, %v16351_v5  ;;  %vm9382_vm2 = vcmp.gt.f32.partialorder %v22453_v58, 0.0  ;;  %v9417_v23 = vmin.f32 %v22697_v14, 0.0 }
 0x505   :  { %v8063_v24 = vrot.slane %v22673_v15, 1  ;;  %v25700_v11 = vrot.slane %v22470_v28, 1  ;;  %v9407_v61 = vmin.f32 %v22701_v44, 0.0  ;;  %v12342_v21 = vcombine.low %v11597_v47, %v11606_v36 }
 0x506   :  { %v11646_v51 = vpop.permute.xlu0 %11645  ;;  %v11642_v20 = vrot.slane %v11637_v42, %v25395_v8  ;;  %12501 = vrot.lane.b32.xlu0 %v12243_v26, %s17224_s23  ;;  %v16343_v5 = vadd.f32 -1.0, %v22594_v4  ;;  %v16352_v12 = vadd.f32 -1.0, %v22603_v34  ;;  %17040 = vpow2.f32 %v9440_v29  ;;  %v25701_v42 = vld [vmem:[#allocation80_spill] sm:$0xff] }
 0x507   :  { %v8043_v43 = vadd.f32 %v25700_v11, %v22470_v28  ;;  %v11651_v1 = vrot.slane %v11646_v51, %v25395_v8  ;;  %v9418_v31 = vmin.f32 %v22715_v62, 0.0  ;;  %v9444_v28 = vmul.f32 1.442695, %v9408_v18 }
 0x508   :  { %v11655_v59 = vpop.permute.xlu1 %11654  ;;  %v12359_v38 = vrot.slane %v12343_v60, %v17359_v27  ;;  %v12344_v47 = vcombine.low %v11633_v63, %v11642_v20  ;;  %17042 = vpow2.f32 %v9458_v17  ;;  %v9462_v49 = vmul.f32 1.442695, %v9417_v23 }
 0x509   :  { %v11660_v22 = vrot.slane %v11655_v59, %v25395_v8  ;;  %v22739_v36 = vmul.f32 %v25701_v42, %v22459_v30  ;;  %v25702_v4 = vcombine.low %v22473_v40, %v22481_v9  ;;  %v16353_v18 = vadd.f32 -1.0, %v22626_v54  ;;  %v17037_v26 = vpop.eup %17036 }
 0x50a   :  { %v22745_v29 = vpop.permute.xlu0 %11087  ;;  %vm9373_vm4 = vcmp.gt.f32.partialorder %v22496_v7, 0.0  ;;  %v9442_v60 = vmul.f32 1.442695, %v9407_v61  ;;  %v12352_v63 = vrot.slane %v12342_v21, %v17359_v27  ;;  %v22753_v30 = vsel %vm9372_vm15, %v22418_v13, %v16343_v5  ;;  %v25703_v13 = vld [vmem:[#allocation103_spill] sm:$0xff] }
 0x50b   :  { %v7645_v34 = vrot.slane %v25702_v4, %v17359_v27  ;;  %v12345_v17 = vcombine.low %v11651_v1, %v11660_v22  ;;  %v9541_v40 = vsel %vm9381_vm0, %v22433_v3, %v16352_v12  ;;  %v9464_v9 = vmul.f32 1.442695, %v9418_v31  ;;  %v17039_v21 = vpop.eup %17038 }
 0x50c   :  { %v22759_v23 = vadd.f32 %v8063_v24, %v22673_v15  ;;  %v11097_v54 = vpop.permute.xlu1 %11096  ;;  %17044 = vpow2.f32 %v9444_v28  ;;  %v12374_v11 = vcombine.low %v12352_v63, %v12359_v38  ;;  %v12366_v51 = vrot.slane %v12344_v47, %v17359_v27 }
 0x50d   :  { %v12373_v61 = vrot.slane %v12345_v17, %v17359_v27  ;;  %17046 = vpow2.f32 %v9462_v49  ;;  %v22765_v20 = vmul.f32 %v25703_v13, %v22422_v19  ;;  %v9409_v1 = vmin.f32 %v22739_v36, 0.0 }
 0x50e   :  { %v8072_v3 = vsel %vm7931_vm5, %v7645_v34, 0.0  ;;  %v11106_v5 = vpop.permute.xlu0 %11105  ;;  %v9542_v15 = vsel %vm9382_vm2, %v22453_v58, %v16353_v18  ;;  %v15584_v24 = vsel %vm15570_vm1, %v9541_v40, %v9540_v52  ;;  %17048 = vpow2.f32 %v9442_v60 }
 0x50f   :  { %v12375_v12 = vcombine.low %v12366_v51, %v12373_v61  ;;  %v16344_v31 = vadd.f32 -1.0, %v17037_v26  ;;  %17050 = vpow2.f32 %v9464_v9  ;;  %v6721_v59 = vcombine.high %v22465_v56, %v22465_v56 }
 0x510   :  { %v25704_v19 = vcombine.high %v22201_v6, %v22201_v6  ;;  %v11115_v38 = vpop.permute.xlu1 %11114  ;;  %v22783_v58 = vrot.slane %v6982_v39, %v17359_v27  ;;  %v11111_v52 = vrot.slane %v11106_v5, %v25395_v8  ;;  %v12382_v22 = vrot.slane %v12374_v11, %v17359_v27 }
 0x511   :  { %v12389_v47 = vrot.slane %v12375_v12, %v17359_v27  ;;  %v22789_v49 = vsel %vm15572_vm3, %v9542_v15, %v15584_v24  ;;  %v9410_v6 = vmin.f32 %v22765_v20, 0.0  ;;  %v9446_v4 = vmul.f32 1.442695, %v9409_v1 }
 0x512   :  { %v7324_v28 = vcombine.low %v22465_v56, %v25704_v19  ;;  %v25705_v56 = vld [vmem:[#allocation135_spill] sm:$0xff]  ;;  %v11124_v34 = vpop.permute.xlu0 %11123  ;;  %v22797_v39 = vmul.f32 %v25706_v50, %v8043_v43  ;;  %v11120_v18 = vrot.slane %v11115_v38, %v25395_v8  ;;  %v11093_v60 = vrot.slane %v22745_v29, %v25395_v8  ;;  %v25707_v50 = vld [vmem:[#allocation180_spill] sm:$0xff] }
 0x513   :  { %v22794_v42 = vmul.f32 %v25705_v56, %v22455_v16  ;;  %v12390_v63 = vcombine.low %v12382_v22, %v12389_v47  ;;  %v9533_v17 = vsel %vm9373_vm4, %v22496_v7, %v16344_v31  ;;  %v8073_v26 = vrot.slane %v8072_v3, 4  ;;  %v17041_v11 = vpop.eup %17040 }
 0x514   :  { %v7331_v40 = vrot.slane %v7324_v28, %v17359_v27  ;;  %v7338_v16 = vrot.slane %v6721_v59, %v17359_v27  ;;  %v11133_v9 = vpop.permute.xlu1 %11132  ;;  %vm9384_vm6 = vcmp.gt.f32.partialorder %v22514_v35, 0.0  ;;  %vm9374_vm7 = vcmp.gt.f32.partialorder %v22634_v53, 0.0 }
 0x515   :  { %v16340_v43 = vcombine.high %v22691_v25, %v22783_v58  ;;  %v11102_v29 = vrot.slane %v11097_v54, %v25395_v8  ;;  %v12000_v51 = vcombine.low %v11111_v52, %v11120_v18  ;;  %v11129_v61 = vrot.slane %v11124_v34, %v25395_v8  ;;  %12507 = vrot.lane.b32.xlu1 %v12390_v63, %s17224_s23  ;;  %v17043_v15 = vpop.eup %17042 }
 0x516   :  { %v16355_v7 = vadd.f32 -1.0, %v17039_v21  ;;  %vm9383_vm8 = vcmp.gt.f32.partialorder %v22641_v41, 0.0  ;;  %v9448_v13 = vmul.f32 1.442695, %v9410_v6  ;;  %v9420_v1 = vmin.f32 %v22794_v42, 0.0  ;;  %v11142_v5 = vpop.permute.xlu0 %11141 }
 0x517   :  { %17052 = vpow2.f32 %v9446_v4  ;;  %v22818_v24 = vrot.slane %v22680_v37, %v17359_v27  ;;  %v11999_v54 = vcombine.low %v11093_v60, %v11102_v29  ;;  %v11138_v12 = vrot.slane %v11133_v9, %v25395_v8 }
 0x518   :  { %v11147_v31 = vrot.slane %v11142_v5, %v25395_v8  ;;  %v15571_v21 = vsel %vm15570_vm1, %v9533_v17, %v22753_v30  ;;  %v9419_v59 = vmin.f32 %v22797_v39, 0.0  ;;  %v8074_v19 = vadd.f32 %v8073_v26, %v8072_v3  ;;  %v11151_v38 = vpop.permute.xlu1 %11150  ;;  %v25708_v30 = vld [vmem:[#allocation117_spill] sm:$0xff] }
 0x519   :  { %v7339_v28 = vcombine.low %v7331_v40, %v7338_v16  ;;  %v7676_v52 = vrot.slane %v16340_v43, %v17359_v27  ;;  %v12016_v22 = vrot.slane %v12000_v51, %v17359_v27  ;;  %v11156_v47 = vrot.slane %v11151_v38, %v25395_v8  ;;  %v17045_v56 = vpop.eup %17044 }
 0x51a   :  { %v12001_v6 = vcombine.low %v11129_v61, %v11138_v12  ;;  %v16345_v4 = vadd.f32 -1.0, %v17041_v11  ;;  %v9468_v34 = vmul.f32 1.442695, %v9420_v1  ;;  %v22830_v18 = vmul.f32 %v25707_v50, %v22759_v23  ;;  %v22834_v3 = vpop.permute.xlu0 %11447  ;;  %v17047_v63 = vpop.eup %17046  ;;  %v25709_v12 = vld [vmem:[#allocation113_spill] sm:$0xff] }
 0x51b   :  { %v6916_v60 = vcombine.high %v25708_v30, %v25708_v30  ;;  %v16354_v17 = vadd.f32 -1.0, %v17043_v15  ;;  %v7683_v26 = vrot.slane %v22818_v24, %v17359_v27  ;;  %v12009_v40 = vrot.slane %v11999_v54, %v17359_v27  ;;  %v22839_v9 = vpop.eup %17048 }
 0x51c   :  { %v12002_v16 = vcombine.low %v11147_v31, %v11156_v47  ;;  %17054 = vpow2.f32 %v9448_v13  ;;  %v9466_v11 = vmul.f32 1.442695, %v9419_v59  ;;  %v8075_v43 = vrot.slane %v8074_v19, 2  ;;  %v11457_v29 = vpop.permute.xlu1 %11456  ;;  %v22842_v51 = vpop.eup %17050 }
 0x51d   :  { %v7346_v23 = vrot.slane %v7339_v28, %v17359_v27  ;;  %v7684_v61 = vcombine.low %v7676_v52, %v7683_v26  ;;  %v12031_v1 = vcombine.low %v12009_v40, %v12016_v22  ;;  %v12023_v5 = vrot.slane %v12001_v6, %v17359_v27 }
 0x51e   :  { %v12030_v15 = vrot.slane %v12002_v16, %v17359_v27  ;;  %v9544_v54 = vsel %vm9384_vm6, %v22514_v35, %v16355_v7  ;;  %v9534_v13 = vsel %vm9374_vm7, %v22634_v53, %v16345_v4  ;;  %17056 = vpow2.f32 %v9468_v34  ;;  %v11466_v59 = vpop.permute.xlu0 %11465  ;;  %v25713_v16 = vld [vmem:[#allocation89_spill] sm:$0xff] }
 0x51f   :  { %v7554_v31 = vcombine.low %v6916_v60, %v25709_v12  ;;  %v9543_v28 = vsel %vm9383_vm8, %v22641_v41, %v16354_v17  ;;  %v22857_v38 = vsel %vm15572_vm3, %v9534_v13, %v15571_v21  ;;  %v9422_v52 = vmin.f32 %v22830_v18, 0.0 }
 0x520   :  { %v12032_v22 = vcombine.low %v12023_v5, %v12030_v15  ;;  %v22860_v47 = vadd.f32 -1.0, %v17045_v56  ;;  %17058 = vpow2.f32 %v9466_v11  ;;  %v8076_v35 = vadd.f32 %v8075_v43, %v8074_v19  ;;  %v11475_v7 = vpop.permute.xlu1 %11474  ;;  %v25710_v19 = vld [vmem:[#allocation101_spill] sm:$0xff] }
 0x521   :  { %v7981_v53 = vsel %vm7931_vm5, %v7346_v23, 0.0  ;;  %vm9385_vm12 = vcmp.gt.f32.partialorder %v22697_v14, 0.0  ;;  %v7691_v6 = vrot.slane %v7684_v61, %v17359_v27  ;;  %v12039_v4 = vrot.slane %v12031_v1, %v17359_v27 }
 0x522   :  { %v12046_v41 = vrot.slane %v12032_v22, %v17359_v27  ;;  %v11471_v21 = vrot.slane %v11466_v59, %v25395_v8  ;;  %v15586_v34 = vsel %vm15574_vm9, %v9543_v28, %v22789_v49  ;;  %v7561_v56 = vrot.slane %v7554_v31, %v17359_v27  ;;  %v11484_v26 = vpop.permute.xlu0 %11483 }
 0x523   :  { %v25711_v50 = vcombine.high %v25710_v19, %v25710_v19  ;;  %v25712_v60 = vcombine.high %v22308_v57, %v22308_v57  ;;  %v6963_v49 = vcombine.high %v25713_v16, %v25713_v16  ;;  %v11480_v11 = vrot.slane %v11475_v7, %v25395_v8  ;;  %v25714_v57 = vld [vmem:[#allocation194_spill] sm:$0xff] }
 0x524   :  { %v22881_v40 = vpop.eup %17052  ;;  %v11453_v43 = vrot.slane %v22834_v3, %v25395_v8  ;;  %v12047_v23 = vcombine.low %v12039_v4, %v12046_v41  ;;  %v16356_v61 = vadd.f32 -1.0, %v17047_v63  ;;  %vm9375_vm14 = vcmp.gt.f32.partialorder %v22701_v44, 0.0  ;;  %v11493_v13 = vpop.permute.xlu1 %11492 }
 0x525   :  { %v22875_v30 = vrot.slane %v25711_v50, %v17359_v27  ;;  %v6955_v17 = vrot.slane %v25712_v60, %v17359_v27  ;;  %v9472_v1 = vmul.f32 1.442695, %v9422_v52  ;;  %v7982_v5 = vrot.slane %v7981_v53, 4  ;;  %v25715_v52 = vld [vmem:[#allocation57_spill] sm:$0xff] }
 0x526   :  { %v7568_v15 = vrot.slane %v25714_v57, %v17359_v27  ;;  %vm9376_vm11 = vcmp.gt.f32.partialorder %v22686_v48, 0.0  ;;  %v8086_v12 = vsel %vm7931_vm5, %v7691_v6, 0.0  ;;  %v11462_v31 = vrot.slane %v11457_v29, %v25395_v8  ;;  %12493 = vrot.lane.b32.xlu0 %v12047_v23, %s17224_s23  ;;  %v11502_v4 = vpop.permute.xlu0 %11501 }
 0x527   :  { %v12245_v59 = vcombine.low %v11471_v21, %v11480_v11  ;;  %v11489_v28 = vrot.slane %v11484_v26, %v25395_v8  ;;  %v8077_v3 = vrot.slane %v8076_v35, 1  ;;  %v7715_v22 = vcombine.low %v25715_v52, %v22875_v30 }
 0x528   :  { %v7569_v63 = vcombine.low %v7561_v56, %v7568_v15  ;;  %v6965_v7 = vcombine.high %v6955_v17, %v6955_v17  ;;  %vm9386_vm15 = vcmp.gt.f32.partialorder %v22715_v62, 0.0  ;;  %v7600_v41 = vcombine.low %v6955_v17, %v6963_v49  ;;  %v11511_v26 = vpop.permute.xlu1 %11510 }
 0x529   :  { %v12244_v19 = vcombine.low %v11453_v43, %v11462_v31  ;;  %v11498_v6 = vrot.slane %v11493_v13, %v25395_v8  ;;  %v11507_v29 = vrot.slane %v11502_v4, %v25395_v8  ;;  %v15587_v21 = vsel %vm15576_vm10, %v9544_v54, %v15586_v34  ;;  %v22904_v16 = vpop.eup %17054 }
 0x52a   :  { %v7983_v50 = vadd.f32 %v7982_v5, %v7981_v53  ;;  %v8087_v60 = vrot.slane %v8086_v12, 4  ;;  %v7061_v56 = vcombine.high %v25715_v52, %v25715_v52  ;;  %v16346_v11 = vadd.f32 -1.0, %v22839_v9  ;;  %v11304_v5 = vpop.permute.xlu0 %11303 }
 0x52b   :  { %v12261_v23 = vrot.slane %v12245_v59, %v17359_v27  ;;  %v11516_v17 = vrot.slane %v11511_v26, %v25395_v8  ;;  %v12246_v49 = vcombine.low %v11489_v28, %v11498_v6  ;;  %v9545_v43 = vsel %vm9385_vm12, %v22697_v14, %v16356_v61  ;;  %v22914_v57 = vpop.eup %17056  ;;  %v25717_v26 = vld [vmem:[#allocation96_spill] sm:$0xff] }
 0x52c   :  { %v8078_v54 = vadd.f32 %v8077_v3, %v8076_v35  ;;  %v7576_v53 = vrot.slane %v7569_v63, %v17359_v27  ;;  %v7722_v34 = vrot.slane %v7715_v22, %v17359_v27  ;;  %v7607_v15 = vrot.slane %v7600_v41, %v17359_v27  ;;  %v11313_v35 = vpop.permute.xlu1 %11312 }
 0x52d   :  { %v7614_v9 = vrot.slane %v6965_v7, %v17359_v27  ;;  %v12254_v13 = vrot.slane %v12244_v19, %v17359_v27  ;;  %v12247_v31 = vcombine.low %v11507_v29, %v11516_v17  ;;  %v16357_v59 = vadd.f32 -1.0, %v22842_v51  ;;  %v22921_v61 = vpop.eup %17058  ;;  %v25716_v19 = vld [vmem:[#allocation53_spill] sm:$0xff] }
 0x52e   :  { %v7984_v28 = vrot.slane %v7983_v50, 2  ;;  %v8088_v52 = vadd.f32 %v8087_v60, %v8086_v12  ;;  %v7729_v14 = vrot.slane %v7061_v56, %v17359_v27  ;;  %v9535_v3 = vsel %vm9375_vm14, %v22701_v44, %v16346_v11  ;;  %v11322_v41 = vpop.permute.xlu0 %11321 }
 0x52f   :  { %v12276_v63 = vcombine.low %v12254_v13, %v12261_v23  ;;  %v12268_v22 = vrot.slane %v12246_v49, %v17359_v27  ;;  %v12275_v7 = vrot.slane %v12247_v31, %v17359_v27  ;;  %v9536_v51 = vsel %vm9376_vm11, %v22686_v48, %v22860_v47 }
 0x530   :  { %v22933_v12 = vsel %vm15578_vm13, %v9545_v43, %v15587_v21  ;;  %17060 = vpow2.f32 %v9472_v1  ;;  %v7730_v4 = vcombine.low %v7722_v34, %v7729_v14  ;;  %v22936_v6 = vmul.f32 %v25716_v19, %v8078_v54  ;;  %v11331_v1 = vpop.permute.xlu1 %11330 }
 0x531   :  { %v8051_v44 = vsel %vm7931_vm5, %v7576_v53, 0.0  ;;  %v7615_v29 = vcombine.low %v7607_v15, %v7614_v9  ;;  %v12277_v60 = vcombine.low %v12268_v22, %v12275_v7  ;;  %v22942_v56 = vsel %vm9386_vm15, %v22715_v62, %v16357_v59 }
 0x532   :  { %v15575_v48 = vsel %vm15574_vm9, %v9535_v3, %v22857_v38  ;;  %v7985_v47 = vadd.f32 %v7984_v28, %v7983_v50  ;;  %v8089_v21 = vrot.slane %v8088_v52, 2  ;;  %v25718_v11 = vcombine.high %v25717_v26, %v25717_v26  ;;  %v25719_v50 = vld [vmem:[#allocation41_spill] sm:$0xff]  ;;  %v11340_v34 = vpop.permute.xlu0 %11339 }
 0x533   :  { %v12284_v17 = vrot.slane %v12276_v63, %v17359_v27  ;;  %v12291_v49 = vrot.slane %v12277_v60, %v17359_v27  ;;  %v11327_v43 = vrot.slane %v11322_v41, %v25395_v8  ;;  %v8052_v62 = vrot.slane %v8051_v44, 4 }
 0x534   :  { %v22950_v23 = vrot.slane %v25718_v11, %v17359_v27  ;;  %v7737_v54 = vrot.slane %v7730_v4, %v17359_v27  ;;  %v22958_v38 = vrot.slane %v25717_v26, %v17359_v27  ;;  %v22962_v53 = vrot.slane %v25719_v50, %v17359_v27  ;;  %v11349_v63 = vpop.permute.xlu1 %11348 }
 0x535   :  { %v7622_v15 = vrot.slane %v7615_v29, %v17359_v27  ;;  %v11336_v9 = vrot.slane %v11331_v1, %v25395_v8  ;;  %v11309_v13 = vrot.slane %v11304_v5, %v25395_v8  ;;  %v12292_v31 = vcombine.low %v12284_v17, %v12291_v49 }
 0x536   :  { %v22968_v59 = vsel %vm15576_vm10, %v9536_v51, %v15575_v48  ;;  %v9424_v28 = vmin.f32 %v22936_v6, 0.0  ;;  %v7986_v14 = vrot.slane %v7985_v47, 1  ;;  %v8090_v3 = vadd.f32 %v8089_v21, %v8088_v52  ;;  %v11358_v29 = vpop.permute.xlu0 %11357 }
 0x537   :  { %v16341_v22 = vcombine.high %v22958_v38, %v22950_v23  ;;  %v11318_v7 = vrot.slane %v11313_v35, %v25395_v8  ;;  %v12147_v4 = vcombine.low %v11327_v43, %v11336_v9  ;;  %v11345_v41 = vrot.slane %v11340_v34, %v25395_v8  ;;  %12503 = vrot.lane.b32.xlu1 %v12292_v31, %s17224_s23 }
 0x538   :  { %v8053_v5 = vadd.f32 %v8052_v62, %v8051_v44  ;;  %v8100_v19 = vsel %vm7931_vm5, %v7737_v54, 0.0  ;;  %v7775_v51 = vrot.slane %v22962_v53, %v17359_v27  ;;  %v6966_v52 = vcombine.high %v22413_v45, %v22413_v45  ;;  %v11367_v17 = vpop.permute.xlu1 %11366  ;;  %v25720_v54 = vld [vmem:[#allocation18_spill] sm:$0xff] }
 0x539   :  { %v8065_v60 = vsel %vm7931_vm5, %v7622_v15, 0.0  ;;  %v12146_v48 = vcombine.low %v11309_v13, %v11318_v7  ;;  %v11354_v35 = vrot.slane %v11349_v63, %v25395_v8  ;;  %v11363_v21 = vrot.slane %v11358_v29, %v25395_v8  ;;  %v25721_v7 = vld [vmem:[#allocation192_spill] sm:$0xff] }
 0x53a   :  { %v22985_v1 = vadd.f32 -1.0, %v22881_v40  ;;  %v9476_v44 = vmul.f32 1.442695, %v9424_v28  ;;  %v7987_v26 = vadd.f32 %v7986_v14, %v7985_v47  ;;  %v7646_v11 = vcombine.low %v6966_v52, %v22691_v25  ;;  %v11664_v40 = vpop.permute.xlu0 %11663 }
 0x53b   :  { %v7768_v49 = vrot.slane %v16341_v22, %v17359_v27  ;;  %v12163_v45 = vrot.slane %v12147_v4, %v17359_v27  ;;  %v11372_v43 = vrot.slane %v11367_v17, %v25395_v8  ;;  %v12148_v62 = vcombine.low %v11345_v41, %v11354_v35 }
 0x53c   :  { %v22992_v34 = vmul.f32 %v25720_v54, %v7987_v26  ;;  %v8054_v15 = vrot.slane %v8053_v5, 2  ;;  %v8101_v9 = vrot.slane %v8100_v19, 4  ;;  %v8066_v13 = vrot.slane %v8065_v60, 4  ;;  %v11673_v29 = vpop.permute.xlu1 %11672 }
 0x53d   :  { %v22994_v31 = vpop.eup %17060  ;;  %v8091_v47 = vrot.slane %v8090_v3, 1  ;;  %v7776_v28 = vcombine.low %v7768_v49, %v7775_v51  ;;  %v12156_v25 = vrot.slane %v12146_v48, %v17359_v27  ;;  %v12149_v14 = vcombine.low %v11363_v21, %v11372_v43 }
 0x53e   :  { %v7653_v63 = vrot.slane %v7646_v11, %v17359_v27  ;;  %v7660_v22 = vrot.slane %v22783_v58, %v17359_v27  ;;  %v25722_v4 = vcombine.high %v25721_v7, %v25721_v7  ;;  %v7063_v52 = vcombine.high %v22875_v30, %v22875_v30  ;;  %v11682_v17 = vpop.permute.xlu0 %11681 }
 0x53f   :  { %17062 = vpow2.f32 %v9476_v44  ;;  %v12178_v51 = vcombine.low %v12156_v25, %v12163_v45  ;;  %v12170_v48 = vrot.slane %v12148_v62, %v17359_v27  ;;  %v12177_v35 = vrot.slane %v12149_v14, %v17359_v27 }
 0x540   :  { %v23004_v41 = vrot.slane %v25722_v4, %v17359_v27  ;;  %v23010_v21 = vadd.f32 %v8054_v15, %v8053_v5  ;;  %v8102_v26 = vadd.f32 %v8101_v9, %v8100_v19  ;;  %v8067_v58 = vadd.f32 %v8066_v13, %v8065_v60  ;;  %v11691_v60 = vpop.permute.xlu1 %11690 }
 0x541   :  { %v7095_v11 = vrot.slane %v25721_v7, %v17359_v27  ;;  %v9411_v49 = vmin.f32 %v22992_v34, 0.0  ;;  %v23015_v43 = vadd.f32 %v8091_v47, %v8090_v3  ;;  %v7783_v30 = vrot.slane %v7776_v28, %v17359_v27 }
 0x542   :  { %v12179_v44 = vcombine.low %v12170_v48, %v12177_v35  ;;  %v7661_v45 = vcombine.low %v7653_v63, %v7660_v22  ;;  %v7011_v5 = vrot.slane %v6983_v0, %v17359_v27  ;;  %v7738_v19 = vcombine.low %v7063_v52, %v22958_v38  ;;  %v11700_v14 = vpop.permute.xlu0 %11699 }
 0x543   :  { %v7807_v62 = vcombine.low %v7095_v11, %v23004_v41  ;;  %v7013_v54 = vcombine.high %v22818_v24, %v22818_v24  ;;  %v12186_v3 = vrot.slane %v12178_v51, %v17359_v27  ;;  %v11687_v9 = vrot.slane %v11682_v17, %v25395_v8 }
 0x544   :  { %v12193_v15 = vrot.slane %v12179_v44, %v17359_v27  ;;  %v8056_v13 = vrot.slane %v23010_v21, 1  ;;  %v8103_v47 = vrot.slane %v8102_v26, 2  ;;  %v8068_v28 = vrot.slane %v8067_v58, 2  ;;  %v11709_v52 = vpop.permute.xlu1 %11708 }
 0x545   :  { %v7111_v25 = vcombine.high %v7095_v11, %v7095_v11  ;;  %v8114_v37 = vsel %vm7931_vm5, %v7783_v30, 0.0  ;;  %v11696_v0 = vrot.slane %v11691_v60, %v25395_v8  ;;  %v11669_v38 = vrot.slane %v11664_v40, %v25395_v8 }
 0x546   :  { %v12194_v63 = vcombine.low %v12186_v3, %v12193_v15  ;;  %v7668_v24 = vrot.slane %v7661_v45, %v17359_v27  ;;  %v7814_v22 = vrot.slane %v7807_v62, %v17359_v27  ;;  %v7015_v7 = vcombine.high %v7011_v5, %v7011_v5  ;;  %v11718_v62 = vpop.permute.xlu0 %11717 }
 0x547   :  { %v7745_v4 = vrot.slane %v7738_v19, %v17359_v27  ;;  %v7692_v51 = vcombine.low %v7011_v5, %v7013_v54  ;;  %v11678_v48 = vrot.slane %v11673_v29, %v25395_v8  ;;  %v12392_v35 = vcombine.low %v11687_v9, %v11696_v0 }
 0x548   :  { %v11705_v11 = vrot.slane %v11700_v14, %v25395_v8  ;;  %12499 = vrot.lane.b32.xlu0 %v12194_v63, %s17224_s23  ;;  %v7821_v17 = vrot.slane %v7111_v25, %v17359_v27  ;;  %v7752_v40 = vrot.slane %v22950_v23, %v17359_v27  ;;  %v25723_v30 = vcombine.high %v25719_v50, %v25719_v50  ;;  %v11727_v9 = vpop.permute.xlu1 %11726 }
 0x549   :  { %v7110_v45 = vcombine.high %v22962_v53, %v22962_v53  ;;  %v8115_v29 = vrot.slane %v8114_v37, 4  ;;  %v12391_v5 = vcombine.low %v11669_v38, %v11678_v48  ;;  %v11714_v19 = vrot.slane %v11709_v52, %v25395_v8 }
 0x54a   :  { %v7102_v44 = vrot.slane %v25723_v30, %v17359_v27  ;;  %v11723_v60 = vrot.slane %v11718_v62, %v25395_v8  ;;  %v8079_v54 = vsel %vm7931_vm5, %v7668_v24, 0.0  ;;  %v7822_v3 = vcombine.low %v7814_v22, %v7821_v17  ;;  %v11520_v24 = vpop.permute.xlu0 %11519 }
 0x54b   :  { %v7706_v23 = vrot.slane %v7015_v7, %v17359_v27  ;;  %v7753_v15 = vcombine.low %v7745_v4, %v7752_v40  ;;  %v7699_v50 = vrot.slane %v7692_v51, %v17359_v27  ;;  %v12408_v25 = vrot.slane %v12392_v35, %v17359_v27 }
 0x54c   :  { %v11732_v53 = vrot.slane %v11727_v9, %v25395_v8  ;;  %v12393_v14 = vcombine.low %v11705_v11, %v11714_v19  ;;  %v23055_v0 = vpop.eup %17062  ;;  %v23057_v38 = vmul.f32 1.442695, %v9411_v49  ;;  %v8069_v63 = vadd.f32 %v8068_v28, %v8067_v58  ;;  %v11529_v49 = vpop.permute.xlu1 %11528 }
 0x54d   :  { %v7112_v52 = vcombine.high %v7102_v44, %v7102_v44  ;;  %v7784_v48 = vcombine.low %v7102_v44, %v7110_v45  ;;  %v23059_v22 = vadd.f32 %v8103_v47, %v8102_v26  ;;  %v23061_v7 = vadd.f32 %v8115_v29, %v8114_v37  ;;  %v25724_v45 = vld [vmem:[#allocation46_spill] sm:$0xff] }
 0x54e   :  { %v12401_v4 = vrot.slane %v12391_v5, %v17359_v27  ;;  %v12394_v51 = vcombine.low %v11723_v60, %v11732_v53  ;;  %v8057_v35 = vadd.f32 %v8056_v13, %v23010_v21  ;;  %v8080_v17 = vrot.slane %v8079_v54, 4  ;;  %v11538_v13 = vpop.permute.xlu0 %11537 }
 0x54f   :  { %v7829_v11 = vrot.slane %v7822_v3, %v17359_v27  ;;  %v7760_v40 = vrot.slane %v7753_v15, %v17359_v27  ;;  %v7707_v30 = vcombine.low %v7699_v50, %v7706_v23  ;;  %v12415_v28 = vrot.slane %v12393_v14, %v17359_v27 }
 0x550   :  { %v12423_v58 = vcombine.low %v12401_v4, %v12408_v25  ;;  %v12422_v26 = vrot.slane %v12394_v51, %v17359_v27  ;;  %v8070_v47 = vrot.slane %v8069_v63, 1  ;;  %v23071_v37 = vrot.slane %v22527_v55, %v17359_v27  ;;  %v11547_v50 = vpop.permute.xlu1 %11546 }
 0x551   :  { %v7791_v44 = vrot.slane %v7784_v48, %v17359_v27  ;;  %v7798_v21 = vrot.slane %v7112_v52, %v17359_v27  ;;  %v23076_v62 = vmul.f32 %v25724_v45, %v8057_v35  ;;  %v8105_v29 = vrot.slane %v23059_v22, 1 }
 0x552   :  { %v8117_v5 = vrot.slane %v23061_v7, 2  ;;  %v12424_v19 = vcombine.low %v12415_v28, %v12422_v26  ;;  %v8081_v60 = vadd.f32 %v8080_v17, %v8079_v54  ;;  %v8128_v3 = vsel %vm7931_vm5, %v7829_v11, 0.0  ;;  %v11556_v51 = vpop.permute.xlu0 %11555 }
 0x553   :  { %v25725_v23 = vcombine.high %v22507_v32, %v22507_v32  ;;  %v8107_v9 = vsel %vm7931_vm5, %v7760_v40, 0.0  ;;  %v7714_v25 = vrot.slane %v7707_v30, %v17359_v27  ;;  %v12431_v53 = vrot.slane %v12423_v58, %v17359_v27 }
 0x554   :  { %v12438_v14 = vrot.slane %v12424_v19, %v17359_v27  ;;  %v11543_v52 = vrot.slane %v11538_v13, %v25395_v8  ;;  %v8071_v54 = vadd.f32 %v8070_v47, %v8069_v63  ;;  %v7799_v48 = vcombine.low %v7791_v44, %v7798_v21  ;;  %v11565_v55 = vpop.permute.xlu1 %11564 }
 0x555   :  { %v23085_v15 = vrot.slane %v25725_v23, %v17359_v27  ;;  %v7158_v32 = vrot.slane %v7130_v2, %v17359_v27  ;;  %v7160_v4 = vcombine.high %v23071_v37, %v23071_v37  ;;  %v8108_v35 = vrot.slane %v8107_v9, 4 }
 0x556   :  { %v11552_v17 = vrot.slane %v11547_v50, %v25395_v8  ;;  %v11525_v11 = vrot.slane %v11520_v24, %v25395_v8  ;;  %v12439_v40 = vcombine.low %v12431_v53, %v12438_v14  ;;  %v8082_v30 = vrot.slane %v8081_v60, 2  ;;  %v11574_v19 = vpop.permute.xlu0 %11573 }
 0x557   :  { %v8129_v58 = vrot.slane %v8128_v3, 4  ;;  %v16342_v63 = vcombine.high %v22667_v46, %v23085_v15  ;;  %v7113_v28 = vcombine.high %v23004_v41, %v23004_v41  ;;  %v8093_v2 = vsel %vm7931_vm5, %v7714_v25, 0.0 }
 0x558   :  { %v11534_v26 = vrot.slane %v11529_v49, %v25395_v8  ;;  %v12294_v47 = vcombine.low %v11543_v52, %v11552_v17  ;;  %v11561_v44 = vrot.slane %v11556_v51, %v25395_v8  ;;  %12509 = vrot.lane.b32.xlu1 %v12439_v40, %s17224_s23  ;;  %v7806_v24 = vrot.slane %v7799_v48, %v17359_v27  ;;  %v11583_v48 = vpop.permute.xlu1 %11582 }
 0x559   :  { %v7830_v21 = vcombine.low %v7113_v28, %v22667_v46  ;;  %v7162_v13 = vcombine.high %v7158_v32, %v7158_v32  ;;  %v7876_v45 = vcombine.low %v7158_v32, %v7160_v4  ;;  %v8109_v23 = vadd.f32 %v8108_v35, %v8107_v9 }
 0x55a   :  { %v12293_v50 = vcombine.low %v11525_v11, %v11534_v26  ;;  %v11570_v41 = vrot.slane %v11565_v55, %v25395_v8  ;;  %v11579_v25 = vrot.slane %v11574_v19, %v25395_v8  ;;  %vm15580_vm0 = vcmask 1046534   ;;  %v23123_v11 = vpop.permute.xlu0 %11735 }
 0x55b   :  { %v8130_v49 = vadd.f32 %v8129_v58, %v8128_v3  ;;  %v8094_v53 = vrot.slane %v8093_v2, 4  ;;  %v7860_v14 = vrot.slane %v16342_v63, %v17359_v27  ;;  %v7867_v52 = vrot.slane %v23071_v37, %v17359_v27 }
 0x55c   :  { %v7844_v46 = vrot.slane %v23085_v15, %v17359_v27  ;;  %v12310_v32 = vrot.slane %v12294_v47, %v17359_v27  ;;  %v11588_v9 = vrot.slane %v11583_v48, %v25395_v8  ;;  %v12295_v4 = vcombine.low %v11561_v44, %v11570_v41  ;;  %v23127_v47 = vpop.permute.xlu1 %11744 }
 0x55d   :  { %v8121_v51 = vsel %vm7931_vm5, %v7806_v24, 0.0  ;;  %v7837_v35 = vrot.slane %v7830_v21, %v17359_v27  ;;  %v7883_v3 = vrot.slane %v7876_v45, %v17359_v27  ;;  %v7890_v17 = vrot.slane %v7162_v13, %v17359_v27  ;;  %v25726_v45 = vld [vmem:[#allocation91_spill] sm:$0xff] }
 0x55e   :  { %v8118_v37 = vadd.f32 %v8117_v5, %v23061_v7  ;;  %v8110_v40 = vrot.slane %v8109_v23, 2  ;;  %v12303_v15 = vrot.slane %v12293_v50, %v17359_v27  ;;  %v12296_v58 = vcombine.low %v11579_v25, %v11588_v9  ;;  %v25727_v7 = vld [vmem:[#allocation186_spill] sm:$0xff] }
 0x55f   :  { %v8083_v63 = vadd.f32 %v8082_v30, %v8081_v60  ;;  %v8131_v28 = vrot.slane %v8130_v49, 2  ;;  %v8095_v55 = vadd.f32 %v8094_v53, %v8093_v2  ;;  %v7868_v26 = vcombine.low %v7860_v14, %v7867_v52  ;;  %v23138_v30 = vpop.permute.xlu0 %11753 }
 0x560   :  { %v8122_v44 = vrot.slane %v8121_v51, 4  ;;  %v12325_v24 = vcombine.low %v12303_v15, %v12310_v32  ;;  %v12317_v21 = vrot.slane %v12295_v4, %v17359_v27  ;;  %v12324_v13 = vrot.slane %v12296_v58, %v17359_v27  ;;  %v23145_v32 = vpop.permute.xlu1 %11762 }
 0x561   :  { %v23133_v19 = vmul.f32 %v25726_v45, %v23015_v43  ;;  %v23136_v5 = vmul.f32 %v25727_v7, %v8071_v54  ;;  %v7845_v50 = vcombine.low %v7837_v35, %v7844_v46  ;;  %v7891_v60 = vcombine.low %v7883_v3, %v7890_v17  ;;  %v25728_v35 = vld [vmem:[#allocation182_spill] sm:$0xff] }
 0x562   :  { %v9421_v2 = vmin.f32 %v23076_v62, 0.0  ;;  %v8106_v41 = vadd.f32 %v8105_v29, %v23059_v22  ;;  %v8111_v25 = vadd.f32 %v8110_v40, %v8109_v23  ;;  %v12326_v53 = vcombine.low %v12317_v21, %v12324_v13 }
 0x563   :  { %v8119_v14 = vrot.slane %v8118_v37, 1  ;;  %v8132_v52 = vadd.f32 %v8131_v28, %v8130_v49  ;;  %v8096_v48 = vrot.slane %v8095_v55, 2  ;;  %v7875_v43 = vrot.slane %v7868_v26, %v17359_v27  ;;  %v23155_v49 = vpop.permute.xlu0 %11771 }
 0x564   :  { %v8084_v54 = vrot.slane %v8083_v63, 1  ;;  %v8123_v46 = vadd.f32 %v8122_v44, %v8121_v51  ;;  %v12333_v9 = vrot.slane %v12325_v24, %v17359_v27  ;;  %v12340_v4 = vrot.slane %v12326_v53, %v17359_v27  ;;  %v11781_v44 = vpop.permute.xlu1 %11780 }
 0x565   :  { %v23150_v3 = vmul.f32 %v25728_v35, %v8106_v41  ;;  %v9423_v22 = vmin.f32 %v23136_v5, 0.0  ;;  %v7852_v29 = vrot.slane %v7845_v50, %v17359_v27  ;;  %v7898_v23 = vrot.slane %v7891_v60, %v17359_v27  ;;  %v25729_v50 = vld [vmem:[#allocation177_spill] sm:$0xff] }
 0x566   :  { %v23160_v17 = vsel %vm15580_vm0, %v22942_v56, %v22933_v12  ;;  %17064 = vpow2.f32 %v23057_v38  ;;  %v8112_v51 = vrot.slane %v8111_v25, 1  ;;  %v12341_v40 = vcombine.low %v12333_v9, %v12340_v4 }
 0x567   :  { %v9470_v15 = vmul.f32 1.442695, %v9421_v2  ;;  %v8133_v58 = vrot.slane %v8132_v52, 1  ;;  %v8097_v28 = vadd.f32 %v8096_v48, %v8095_v55  ;;  %v8142_v26 = vsel %vm7931_vm5, %v7875_v43, 0.0  ;;  %v25730_v55 = vld [vmem:[#allocation191_spill] sm:$0xff]  ;;  %v25731_v43 = vld [vmem:[#allocation156_spill] sm:$0xff] }
 0x568   :  { %v9426_v24 = vmin.f32 %v23133_v19, 0.0  ;;  %v8120_v21 = vadd.f32 %v8119_v14, %v8118_v37  ;;  %v8085_v13 = vadd.f32 %v8084_v54, %v8083_v63  ;;  %v8124_v45 = vrot.slane %v8123_v46, 2  ;;  %12505 = vrot.lane.b32.xlu0 %v12341_v40, %s17224_s23  ;;  %v11790_v37 = vpop.permute.xlu0 %11789 }
 0x569   :  { %v9428_v12 = vmin.f32 %v23150_v3, 0.0  ;;  %v9474_v56 = vmul.f32 1.442695, %v9423_v22  ;;  %v8135_v38 = vsel %vm7931_vm5, %v7852_v29, 0.0  ;;  %v8149_v7 = vsel %vm7931_vm5, %v7898_v23, 0.0  ;;  %v11799_v22 = vpop.permute.xlu1 %11798  ;;  %v25732_v29 = vld [vmem:[#allocation78_spill] sm:$0xff] }
 0x56a   :  { %v23170_v60 = vmul.f32 %v25729_v50, %v8120_v21  ;;  %v23173_v2 = vmul.f32 %v25730_v55, %v8085_v13  ;;  %v8143_v41 = vrot.slane %v8142_v26, 4  ;;  %v8113_v53 = vadd.f32 %v8112_v51, %v8111_v25  ;;  %v25735_v55 = vld [vmem:[#allocation72_spill] sm:$0xff] }
 0x56b   :  { %v23176_v63 = vadd.f32 -1.0, %v22904_v16  ;;  %17066 = vpow2.f32 %v9470_v15  ;;  %v8134_v14 = vadd.f32 %v8133_v58, %v8132_v52  ;;  %v8098_v48 = vrot.slane %v8097_v28, 1  ;;  %v25733_v52 = vld [vmem:[#allocation121_spill] sm:$0xff] }
 0x56c   :  { %v23179_v54 = vmul.f32 %v25731_v43, %v8113_v53  ;;  %v8125_v9 = vadd.f32 %v8124_v45, %v8123_v46  ;;  %v8136_v4 = vrot.slane %v8135_v38, 4  ;;  %v8150_v35 = vrot.slane %v8149_v7, 4  ;;  %15156 = vperm.xlu0 %16515, %v25732_v29  }
 0x56d   :  { %v9480_v23 = vmul.f32 1.442695, %v9426_v24  ;;  %v9484_v40 = vmul.f32 1.442695, %v9428_v12  ;;  %17068 = vpow2.f32 %v9474_v56  ;;  %v11795_v25 = vrot.slane %v11790_v37, %v25395_v8  ;;  %v25736_v37 = vld [vmem:[#allocation17_spill] sm:$0xff] }
 0x56e   :  { %v9430_v16 = vmin.f32 %v23170_v60, 0.0  ;;  %v9425_v51 = vmin.f32 %v23173_v2, 0.0  ;;  %v23186_v15 = vmul.f32 %v25733_v52, %v8134_v14  ;;  %v8144_v58 = vadd.f32 %v8143_v41, %v8142_v26 }
 0x56f   :  { %vm9377_vm5 = vcmp.gt.f32.partialorder %v22739_v36, 0.0  ;;  %v8099_v46 = vadd.f32 %v8098_v48, %v8097_v28  ;;  %v11759_v21 = vrot.slane %v23138_v30, %v25395_v8  ;;  %v11804_v24 = vrot.slane %v11799_v22, %v25395_v8 }
 0x570   :  { %25734 = vst [vmem:[#allocation43_spill] sm:$0xff] %v23186_v15  ;;  %v11777_v13 = vrot.slane %v23155_v49, %v25395_v8  ;;  %v9429_v45 = vmin.f32 %v23179_v54, 0.0  ;;  %v8126_v12 = vrot.slane %v8125_v9, 1  ;;  %v8137_v56 = vadd.f32 %v8136_v4, %v8135_v38  ;;  %15166 = vperm.xlu0 %16515, %v25735_v55  }
 0x571   :  { %v8151_v50 = vadd.f32 %v8150_v35, %v8149_v7  ;;  %vm9387_vm2 = vcmp.gt.f32.partialorder %v22797_v39, 0.0  ;;  %v11768_v28 = vrot.slane %v23145_v32, %v25395_v8  ;;  %v11741_v30 = vrot.slane %v23123_v11, %v25395_v8  ;;  %v25738_v35 = vld [vmem:[#allocation109_spill] sm:$0xff] }
 0x572   :  { %v11786_v26 = vrot.slane %v11781_v44, %v25395_v8  ;;  %v12443_v41 = vcombine.low %v11795_v25, %v11804_v24  ;;  %vm15582_vm4 = vcmask 1047559   ;;  %17070 = vpow2.f32 %v9480_v23 }
 0x573   :  { %v9488_v49 = vmul.f32 1.442695, %v9430_v16  ;;  %v9478_v53 = vmul.f32 1.442695, %v9425_v51  ;;  %v23203_v38 = vmul.f32 %v25736_v37, %v8099_v46  ;;  %v23205_v7 = vpop.eup %17064  ;;  %vm9378_vm6 = vcmp.gt.f32.partialorder %v22765_v20, 0.0  ;;  %v25739_v51 = vld [vmem:[#allocation105_spill] sm:$0xff] }
 0x574   :  { %vm9388_vm7 = vcmp.gt.f32.partialorder %v22794_v42, 0.0  ;;  %v8145_v32 = vrot.slane %v8144_v58, 2  ;;  %v11750_v11 = vrot.slane %v23127_v47, %v25395_v8  ;;  %v12441_v14 = vcombine.low %v11759_v21, %v11768_v28  ;;  %15201 = vperm.xlu0 %16515, %v25738_v35  }
 0x575   :  { %25737 = vst [vmem:[#allocation140_spill] sm:$0xff] %v23203_v38  ;;  %v12442_v44 = vcombine.low %v11777_v13, %v11786_v26  ;;  %17072 = vpow2.f32 %v9484_v40  ;;  %v9486_v48 = vmul.f32 1.442695, %v9429_v45  ;;  %v8127_v43 = vadd.f32 %v8126_v12, %v8125_v9  ;;  %v25740_v45 = vld [vmem:[#allocation55_spill] sm:$0xff] }
 0x576   :  { %v8138_v4 = vrot.slane %v8137_v56, 2  ;;  %vm9390_vm8 = vcmp.gt.f32.partialorder %v22830_v18, 0.0  ;;  %v9432_v22 = vmin.f32 %v23186_v15, 0.0  ;;  %v8152_v29 = vrot.slane %v8151_v50, 2 }
 0x577   :  { %v12440_v23 = vcombine.low %v11741_v30, %v11750_v11  ;;  %v12471_v25 = vrot.slane %v12443_v41, %v17359_v27  ;;  %v16358_v16 = vadd.f32 -1.0, %v22921_v61  ;;  %17074 = vpow2.f32 %v9488_v49 }
 0x578   :  { %v9427_v47 = vmin.f32 %v23203_v38, 0.0  ;;  %v23218_v40 = vmul.f32 %v25739_v51, %v8127_v43  ;;  %17076 = vpow2.f32 %v9478_v53  ;;  %v8146_v9 = vadd.f32 %v8145_v32, %v8144_v58  ;;  %v17067_v21 = vpop.eup %17066  ;;  %15206 = vperm.xlu0 %16515, %v25740_v45   ;;  %v25741_v32 = vld [vmem:[#allocation146_spill] sm:$0xff] }
 0x579   :  { %v12457_v52 = vrot.slane %v12441_v14, %v17359_v27  ;;  %v12464_v46 = vrot.slane %v12442_v44, %v17359_v27  ;;  %v16359_v24 = vadd.f32 -1.0, %v22914_v57  ;;  %v9537_v61 = vsel %vm9377_vm5, %v22739_v36, %v22985_v1  ;;  %v25743_v44 = vld [vmem:[#allocation6_spill] sm:$0xff] }
 0x57a   :  { %17078 = vpow2.f32 %v9486_v48  ;;  %v8139_v13 = vadd.f32 %v8138_v4, %v8137_v56  ;;  %v9492_v12 = vmul.f32 1.442695, %v9432_v22  ;;  %v8153_v55 = vadd.f32 %v8152_v29, %v8151_v50  ;;  %v17069_v30 = vpop.eup %17068  ;;  %v12496_v50 = vpop.permute.xlu1 %12495 }
 0x57b   :  { %v12450_v58 = vrot.slane %v12440_v23, %v17359_v27  ;;  %v12473_v28 = vcombine.low %v12464_v46, %v12471_v25  ;;  %v16361_v26 = vadd.f32 -1.0, %v22994_v31  ;;  %v9547_v57 = vsel %vm9387_vm2, %v22797_v39, %v16358_v16  ;;  %v25744_v23 = vld [vmem:[#allocation123_spill] sm:$0xff]  ;;  %v25745_v16 = vld [vmem:[#allocation116_spill] sm:$0xff] }
 0x57c   :  { %v9482_v41 = vmul.f32 1.442695, %v9427_v47  ;;  %v9431_v49 = vmin.f32 %v23218_v40, 0.0  ;;  %v23236_v36 = vsel %vm15578_vm13, %v9537_v61, %v22968_v59  ;;  %vm9392_vm12 = vcmp.gt.f32.partialorder %v22936_v6, 0.0  ;;  %15211 = vperm.xlu0 %16515, %v25741_v32   ;;  %v25754_v32 = vld [vmem:[#allocation143_spill] sm:$0xff] }
 0x57d   :  { %v8147_v1 = vrot.slane %v8146_v9, 1  ;;  %v12472_v56 = vcombine.low %v12450_v58, %v12457_v52  ;;  %v23243_v31 = vsel %vm9378_vm6, %v22765_v20, %v23176_v63  ;;  %v9548_v39 = vsel %vm9388_vm7, %v22794_v42, %v16359_v24  ;;  %v12490_v52 = vpop.permute.xlu0 %12489 }
 0x57e   :  { %v16360_v53 = vadd.f32 -1.0, %v17067_v21  ;;  %v8140_v37 = vrot.slane %v8139_v13, 1  ;;  %v23251_v59 = vsel %vm15582_vm4, %v9547_v57, %v23160_v17  ;;  %17080 = vpow2.f32 %v9492_v12 }
 0x57f   :  { %25742 = vst [vmem:[#allocation44_spill] sm:$0xff] %v23251_v59  ;;  %v8154_v11 = vrot.slane %v8153_v55, 1  ;;  %v12487_v14 = vrot.slane %v12473_v28, %v17359_v27  ;;  %v9550_v20 = vsel %vm9390_vm8, %v22830_v18, %v16361_v26  ;;  %17082 = vpow2.f32 %v9482_v41  ;;  %v17071_v48 = vpop.eup %17070  ;;  %v25751_v28 = vld [vmem:[#allocation5_spill] sm:$0xff] }
 0x580   :  { %v9490_v63 = vmul.f32 1.442695, %v9431_v49  ;;  %v12528_v42 = vmul.f32 %v25743_v44, %v12496_v50  ;;  %vm9379_vm14 = vcmp.gt.f32.partialorder %v22992_v34, 0.0  ;;  %vm9389_vm11 = vcmp.gt.f32.partialorder %v23076_v62, 0.0  ;;  %15216 = vperm.xlu0 %16515, %v25744_v23   ;;  %v25752_v26 = vld [vmem:[#allocation181_spill] sm:$0xff]  ;;  %v12498_v50 = vpop.permute.xlu1 %12497 }
 0x581   :  { %v8148_v43 = vadd.f32 %v8147_v1, %v8146_v9  ;;  %v12480_v17 = vrot.slane %v12472_v56, %v17359_v27  ;;  %v16363_v4 = vadd.f32 -1.0, %v23055_v0  ;;  %v9549_v35 = vsel %vm9389_vm11, %v23076_v62, %v16360_v53  ;;  %v25747_v9 = vld [vmem:[#allocation90_spill] sm:$0xff]  ;;  %v25755_v44 = vld [vmem:[#allocation149_spill] sm:$0xff] }
 0x582   :  { %v16362_v22 = vadd.f32 -1.0, %v17069_v30  ;;  %v8141_v29 = vadd.f32 %v8140_v37, %v8139_v13  ;;  %v17073_v18 = vpop.eup %17072  ;;  %v16350_v25 = vadd.f32 -1.0, %v23205_v7  ;;  %v8155_v51 = vadd.f32 %v8154_v11, %v8153_v55  ;;  %v25749_v7 = vld [vmem:[#allocation45_spill] sm:$0xff] }
 0x583   :  { %v23266_v47 = vmul.f32 %v25745_v16, %v8148_v43  ;;  %v12488_v46 = vcombine.low %v12480_v17, %v12487_v14  ;;  %vm9394_vm15 = vcmp.gt.f32.partialorder %v23133_v19, 0.0  ;;  %17084 = vpow2.f32 %v9490_v63  ;;  %v25759_v16 = vld [vmem:[#allocation31_spill] sm:$0xff] }
 0x584   :  { %v23270_v0 = vmul.f32 %v25747_v9, %v8141_v29  ;;  %v12696_v62 = vcombine.high %v12528_v42, %v12528_v42  ;;  %v17075_v21 = vpop.eup %17074  ;;  %v16365_v24 = vadd.f32 -1.0, %v17071_v48  ;;  %v15591_v61 = vsel %vm15570_vm1, %v9549_v35, %v9548_v39  ;;  %15241 = vperm.xlu0 %16515, %v25752_v26   ;;  %v25756_v48 = vld [vmem:[#allocation10_spill] sm:$0xff] }
 0x585   :  { %25746 = vst [vmem:[#allocation35_spill] sm:$0xff] %v23266_v47  ;;  %vm9391_vm5 = vcmp.gt.f32.partialorder %v23136_v5, 0.0  ;;  %v23275_v13 = vmul.f32 %v25749_v7, %v8155_v51  ;;  %12511 = vrot.lane.b32.xlu1 %v12488_v46, %s17224_s23  ;;  %v17077_v45 = vpop.eup %17076  ;;  %v9552_v12 = vsel %vm9392_vm12, %v22936_v6, %v16363_v4  ;;  %v12703_v58 = vrot.slane %v12528_v42, %v17359_v27 }
 0x586   :  { %25748 = vst [vmem:[#allocation68_spill] sm:$0xff] %v23270_v0  ;;  %v9551_v55 = vsel %vm9391_vm5, %v23136_v5, %v16362_v22  ;;  %v12525_v30 = vmul.f32 %v12490_v52, %v25751_v28  ;;  %v23288_v41 = vsel %vm9379_vm14, %v22992_v34, %v16350_v25  ;;  %vm9396_vm2 = vcmp.gt.f32.partialorder %v23150_v3, 0.0 }
 0x587   :  { %25750 = vst [vmem:[#allocation61_spill] sm:$0xff] %v23275_v13  ;;  %v17079_v57 = vpop.eup %17078  ;;  %v16367_v49 = vadd.f32 -1.0, %v17073_v18  ;;  %v9434_v1 = vmin.f32 %v23266_v47, 0.0  ;;  %v15592_v6 = vsel %vm15572_vm3, %v9550_v20, %v15591_v61  ;;  %vm9398_vm6 = vcmp.gt.f32.partialorder %v23170_v60, 0.0 }
 0x588   :  { %v9433_v5 = vmin.f32 %v23270_v0, 0.0  ;;  %v12710_v56 = vrot.slane %v12696_v62, %v17359_v27  ;;  %v23299_v39 = vsel %vm9394_vm15, %v23133_v19, %v16365_v24  ;;  %v15593_v34 = vsel %vm15574_vm9, %v9551_v55, %v15592_v6  ;;  %15221 = vperm.xlu0 %16515, %v25755_v44   ;;  %v12492_v62 = vpop.permute.xlu0 %12491 }
 0x589   :  { %25753 = vst [vmem:[#allocation127_spill] sm:$0xff] %v23299_v39  ;;  %v16369_v53 = vadd.f32 -1.0, %v17075_v21  ;;  %v9435_v37 = vmin.f32 %v23275_v13, 0.0  ;;  %15161 = vperm.xlu1 %16514, %v25754_v32   ;;  %v16364_v11 = vadd.f32 -1.0, %v17077_v45  ;;  %v16368_v14 = vadd.f32 -1.0, %v17079_v57  ;;  %v25761_v21 = vld [vmem:[#allocation176_spill] sm:$0xff] }
 0x58a   :  { %v12711_v20 = vcombine.high %v12703_v58, %v12703_v58  ;;  %v12549_v63 = vcombine.high %v12525_v30, %v12525_v30  ;;  %v9556_v42 = vsel %vm9396_vm2, %v23150_v3, %v16367_v49  ;;  %vm9393_vm7 = vcmp.gt.f32.partialorder %v23173_v2, 0.0  ;;  %v25766_v49 = vld [vmem:[#allocation4_spill] sm:$0xff] }
 0x58b   :  { %v9496_v19 = vmul.f32 1.442695, %v9434_v1  ;;  %v12529_v43 = vmul.f32 %v12498_v50, %v25756_v48  ;;  %v17081_v17 = vpop.eup %17080  ;;  %v23311_v4 = vsel %vm15576_vm10, %v9552_v12, %v15593_v34  ;;  %v9494_v35 = vmul.f32 1.442695, %v9433_v5  ;;  %v25767_v5 = vld [vmem:[#allocation172_spill] sm:$0xff] }
 0x58c   :  { %25757 = vst [vmem:[#allocation124_spill] sm:$0xff] %v23311_v4  ;;  %v12712_v22 = vcombine.high %v12710_v56, %v12710_v56  ;;  %v12556_v29 = vrot.slane %v12525_v30, %v17359_v27  ;;  %v17083_v23 = vpop.eup %17082  ;;  %v23317_v18 = vsel %vm9398_vm6, %v23170_v60, %v16369_v53  ;;  %vm9397_vm8 = vcmp.gt.f32.partialorder %v23179_v54, 0.0  ;;  %15276 = vperm.xlu0 %16515, %v25761_v21   ;;  %v12502_v6 = vpop.permute.xlu0 %12501 }
 0x58d   :  { %25758 = vst [vmem:[#allocation87_spill] sm:$0xff] %v23317_v18  ;;  %v9498_v3 = vmul.f32 1.442695, %v9435_v37  ;;  %v12719_v25 = vrot.slane %v12703_v58, %v17359_v27  ;;  %15196 = vperm.xlu1 %16514, %v25759_v16   ;;  %v23323_v51 = vsel %vm9393_vm7, %v23173_v2, %v16364_v11  ;;  %v9557_v52 = vsel %vm9397_vm8, %v23179_v54, %v16368_v14  ;;  %v25765_v58 = vld [vmem:[#allocation183_spill] sm:$0xff] }
 0x58e   :  { %25760 = vst [vmem:[#allocation98_spill] sm:$0xff] %v23323_v51  ;;  %v12733_v46 = vrot.slane %v12711_v20, %v17359_v27  ;;  %v12563_v9 = vrot.slane %v12549_v63, %v17359_v27  ;;  %v23329_v60 = vadd.f32 -1.0, %v17081_v17  ;;  %17086 = vpow2.f32 %v9496_v19  ;;  %v25769_v63 = vld [vmem:[#allocation51_spill] sm:$0xff] }
 0x58f   :  { %v12745_v24 = vcombine.high %v12529_v43, %v12529_v43  ;;  %v12752_v61 = vrot.slane %v12529_v43, %v17359_v27  ;;  %v23332_v7 = vadd.f32 -1.0, %v17083_v23  ;;  %17088 = vpow2.f32 %v9494_v35  ;;  %v25771_v17 = vld [vmem:[#allocation107_spill] sm:$0xff] }
 0x590   :  { %25762 = vst [vmem:[#allocation141_spill] sm:$0xff] %v23329_v60  ;;  %v23335_v2 = vrot.slane %v12712_v22, %v17359_v27  ;;  %v12564_v54 = vcombine.high %v12556_v29, %v12556_v29  ;;  %v17085_v45 = vpop.eup %17084  ;;  %v23338_v12 = vsel %vm15570_vm1, %v9557_v52, %v9556_v42  ;;  %17090 = vpow2.f32 %v9498_v3  ;;  %15191 = vperm.xlu0 %16515, %v25767_v5   ;;  %v25770_v42 = vld [vmem:[#allocation144_spill] sm:$0xff] }
 0x591   :  { %25763 = vst [vmem:[#allocation11_spill] sm:$0xff] %v23332_v7  ;;  %25764 = vst [vmem:[#allocation112_spill] sm:$0xff] %v23338_v12  ;;  %v12741_v55 = vcombine.high %v12719_v25, %v12719_v25  ;;  %15171 = vperm.xlu1 %16514, %v25765_v58   ;;  %v15581_v28 = vsel %vm15580_vm0, %v23243_v31, %v23236_v36  ;;  %v12726_v30 = vrot.slane %v12710_v56, %v17359_v27  ;;  %vm13905_vm12 = vcmask 124992  }
 0x592   :  { %v13321_v26 = vcombine.low %v12719_v25, %v12733_v46  ;;  %v12565_v57 = vcombine.high %v12563_v9, %v12563_v9  ;;  %v12526_v1 = vmul.f32 %v25766_v49, %v12492_v62  ;;  %v12743_v50 = vcombine.high %v12733_v46, %v12733_v46 }
 0x593   :  { %v12759_v34 = vrot.slane %v12745_v24, %v17359_v27  ;;  %v12760_v53 = vcombine.high %v12752_v61, %v12752_v61  ;;  %v12768_v37 = vrot.slane %v12752_v61, %v17359_v27  ;;  %v23349_v32 = vadd.f32 -1.0, %v17085_v45  ;;  %v25772_v24 = vld [vmem:[#allocation197_spill] sm:$0xff] }
 0x594   :  { %v16377_v11 = vcombine.high %v12726_v30, %v23335_v2  ;;  %v12586_v36 = vrot.slane %v12564_v54, %v17359_v27  ;;  %v23355_v31 = vsel %vm15582_vm4, %v23288_v41, %v15581_v28  ;;  %v23358_v56 = vrot.slane %v12741_v55, %v17359_v27  ;;  %15251 = vperm.xlu0 %16515, %v25771_v17   ;;  %v25773_v55 = vld [vmem:[#allocation158_spill] sm:$0xff] }
 0x595   :  { %25768 = vst [vmem:[#allocation76_spill] sm:$0xff] %v23349_v32  ;;  %v12572_v14 = vrot.slane %v12556_v29, %v17359_v27  ;;  %v12579_v20 = vrot.slane %v12563_v9, %v17359_v27  ;;  %v12531_v44 = vmul.f32 %v12502_v6, %v25769_v63  ;;  %15176 = vperm.xlu1 %16514, %v25770_v42  }
 0x596   :  { %v23365_v19 = vrot.slane %v13321_v26, %v17359_v27  ;;  %v23368_v48 = vrot.slane %v12565_v57, %v17359_v27  ;;  %v12598_v43 = vcombine.high %v12526_v1, %v12526_v1  ;;  %v12605_v41 = vrot.slane %v12526_v1, %v17359_v27 }
 0x597   :  { %v13344_v35 = vcombine.low %v12743_v50, %v12726_v30  ;;  %v12761_v22 = vcombine.high %v12759_v34, %v12759_v34  ;;  %v12782_v29 = vrot.slane %v12760_v53, %v17359_v27  ;;  %v12790_v23 = vcombine.high %v12768_v37, %v12768_v37 }
 0x598   :  { %v13358_v3 = vrot.slane %v23335_v2, %v17359_v27  ;;  %v13374_v25 = vrot.slane %v16377_v11, %v17359_v27  ;;  %v12775_v16 = vrot.slane %v12759_v34, %v17359_v27  ;;  %v13137_v52 = vcombine.low %v12572_v14, %v12586_v36  ;;  %15231 = vperm.xlu0 %16515, %v25773_v55  }
 0x599   :  { %v13381_v46 = vrot.slane %v12768_v37, %v17359_v27  ;;  %v12594_v9 = vcombine.high %v12572_v14, %v12572_v14  ;;  %v12843_v62 = vcombine.high %v12531_v44, %v12531_v44  ;;  %v12850_v21 = vrot.slane %v12531_v44, %v17359_v27  ;;  %15181 = vperm.xlu1 %16514, %v25772_v24   ;;  %v12508_v24 = vpop.permute.xlu1 %12507 }
 0x59a   :  { %v16375_v61 = vcombine.high %v12579_v20, %v23368_v48  ;;  %v12612_v54 = vrot.slane %v12598_v43, %v17359_v27  ;;  %v12613_v45 = vcombine.high %v12605_v41, %v12605_v41  ;;  %v12621_v2 = vrot.slane %v12605_v41, %v17359_v27 }
 0x59b   :  { %v23385_v58 = vrot.slane %v12761_v22, %v17359_v27  ;;  %v12792_v28 = vcombine.high %v12782_v29, %v12782_v29  ;;  %v23387_v30 = vcombine.low %v12782_v29, %v12790_v23  ;;  %v12596_v26 = vcombine.high %v12586_v36, %v12586_v36  ;;  %v23389_v57 = vpop.eup %17086  ;;  %v25776_v36 = vld [vmem:[#allocation154_spill] sm:$0xff] }
 0x59c   :  { %25774 = vst [vmem:[#allocation119_spill] sm:$0xff] %v23389_v57  ;;  %v13336_v49 = vcombine.low %v23365_v19, %v23358_v56  ;;  %v13351_v1 = vrot.slane %v13344_v35, %v17359_v27  ;;  %v12791_v6 = vcombine.high %v12775_v16, %v12775_v16  ;;  %v13144_v5 = vrot.slane %v13137_v52, %v17359_v27  ;;  %v23395_v50 = vpop.eup %17088  ;;  %v25778_v19 = vld [vmem:[#allocation75_spill] sm:$0xff] }
 0x59d   :  { %25775 = vst [vmem:[#allocation102_spill] sm:$0xff] %v23395_v50  ;;  %v23397_v34 = vcombine.low %v13374_v25, %v13381_v46  ;;  %v13151_v53 = vrot.slane %v12594_v9, %v17359_v27  ;;  %v12857_v37 = vrot.slane %v12843_v62, %v17359_v27  ;;  %v12858_v11 = vcombine.high %v12850_v21, %v12850_v21  ;;  %v23402_v14 = vpop.eup %17090 }
 0x59e   :  { %15236 = vperm.xlu1 %16514, %v25776_v36   ;;  %25777 = vst [vmem:[#allocation110_spill] sm:$0xff] %v23402_v14  ;;  %v13190_v56 = vrot.slane %v16375_v61, %v17359_v27  ;;  %v12614_v63 = vcombine.high %v12612_v54, %v12612_v54  ;;  %v12635_v44 = vrot.slane %v12613_v45, %v17359_v27  ;;  %v25779_v61 = vld [vmem:[#allocation147_spill] sm:$0xff] }
 0x59f   :  { %v12643_v42 = vcombine.high %v12621_v2, %v12621_v2  ;;  %15291 = vperm.xlu0 %16515, %v25778_v19   ;;  %v13397_v43 = vrot.slane %v23387_v30, %v17359_v27  ;;  %v23410_v41 = vrot.slane %v12792_v28, %v17359_v27  ;;  %v13413_v17 = vcombine.low %v12775_v16, %v23385_v58  ;;  %v25788_v28 = vld [vmem:[#allocation97_spill] sm:$0xff] }
 0x5a0   :  { %v13160_v35 = vcombine.low %v12596_v26, %v12579_v20  ;;  %v23414_v22 = vrot.slane %v12791_v6, %v17359_v27  ;;  %v13152_v29 = vcombine.low %v13144_v5, %v13151_v53  ;;  %v13197_v23 = vrot.slane %v12621_v2, %v17359_v27  ;;  %v25781_v26 = vld [vmem:[#allocation54_spill] sm:$0xff] }
 0x5a1   :  { %v13359_v25 = vcombine.low %v13351_v1, %v13358_v3  ;;  %v12628_v52 = vrot.slane %v12612_v54, %v17359_v27  ;;  %v12859_v46 = vcombine.high %v12857_v37, %v12857_v37  ;;  %v12866_v9 = vrot.slane %v12850_v21, %v17359_v27  ;;  %v25780_v3 = vld [vmem:[#allocation166_spill] sm:$0xff] }
 0x5a2   :  { %v12880_v62 = vrot.slane %v12858_v11, %v17359_v27  ;;  %15186 = vperm.xlu1 %16514, %v25779_v61   ;;  %v13174_v20 = vrot.slane %v23368_v48, %v17359_v27  ;;  %v23424_v16 = vrot.slane %v12614_v63, %v17359_v27  ;;  %v13198_v45 = vcombine.low %v13190_v56, %v13197_v23  ;;  %v12494_v48 = vpop.permute.xlu0 %12493  ;;  %v25784_v23 = vld [vmem:[#allocation7_spill] sm:$0xff] }
 0x5a3   :  { %v23426_v55 = vcombine.low %v12635_v44, %v12643_v42  ;;  %15296 = vperm.xlu0 %16515, %v25780_v3   ;;  %v23430_v54 = vrot.slane %v13413_v17, %v17359_v27  ;;  %v13167_v21 = vrot.slane %v13160_v35, %v17359_v27  ;;  %v12645_v2 = vcombine.high %v12635_v44, %v12635_v44  ;;  %v25782_v44 = vld [vmem:[#allocation174_spill] sm:$0xff]  ;;  %v25783_v35 = vld [vmem:[#allocation39_spill] sm:$0xff] }
 0x5a4   :  { %v12534_v1 = vmul.f32 %v25781_v26, %v12508_v24  ;;  %v13159_v6 = vrot.slane %v13152_v29, %v17359_v27  ;;  %v13366_v5 = vrot.slane %v13359_v25, %v17359_v27  ;;  %v23439_v53 = vrot.slane %v13336_v49, %v17359_v27 }
 0x5a5   :  { %v12644_v11 = vcombine.high %v12628_v52, %v12628_v52  ;;  %v23442_v36 = vrot.slane %v12859_v46, %v17359_v27  ;;  %v12888_v56 = vcombine.high %v12866_v9, %v12866_v9  ;;  %v12890_v63 = vcombine.high %v12880_v62, %v12880_v62 }
 0x5a6   :  { %15246 = vperm.xlu1 %16514, %v25782_v44   ;;  %v13229_v19 = vcombine.low %v12628_v52, %v23424_v16  ;;  %v12873_v17 = vrot.slane %v12857_v37, %v17359_v27  ;;  %v13205_v49 = vrot.slane %v13198_v45, %v17359_v27  ;;  %v23452_v29 = vrot.slane %v12645_v2, %v17359_v27  ;;  %v25785_v44 = vld [vmem:[#allocation37_spill] sm:$0xff] }
 0x5a7   :  { %15301 = vperm.xlu0 %16515, %v25783_v35   ;;  %v23455_v25 = vmul.f32 %v12494_v48, %v25784_v23  ;;  %v13389_v46 = vrot.slane %v23397_v34, %v17359_v27  ;;  %v13175_v24 = vcombine.low %v13167_v21, %v13174_v20  ;;  %v13505_v61 = vcombine.low %v12866_v9, %v12880_v62  ;;  %v25786_v62 = vld [vmem:[#allocation86_spill] sm:$0xff] }
 0x5a8   :  { %v12990_v3 = vcombine.high %v12534_v1, %v12534_v1  ;;  %v12997_v52 = vrot.slane %v12534_v1, %v17359_v27  ;;  %v13906_v37 = vsel %vm13905_vm12, %v13159_v6, 0.0  ;;  %v23462_v26 = vrot.slane %v12644_v11, %v17359_v27 }
 0x5a9   :  { %v23465_v45 = vrot.slane %v12888_v56, %v17359_v27  ;;  %v23467_v2 = vcombine.low %v12890_v63, %v12873_v17  ;;  %v23473_v34 = vrot.slane %v13229_v19, %v17359_v27  ;;  %v16379_v9 = vcombine.high %v12873_v17, %v23442_v36 }
 0x5aa   :  { %15281 = vperm.xlu1 %16514, %v25785_v44   ;;  %v13920_v20 = vsel %vm13905_vm12, %v13205_v49, 0.0  ;;  %v13969_v21 = vsel %vm13905_vm12, %v13366_v5, 0.0  ;;  %v12654_v1 = vrot.slane %v23455_v25, %v17359_v27  ;;  %v13907_v6 = vrot.slane %v13906_v37, 4  ;;  %v25787_v49 = vld [vmem:[#allocation157_spill] sm:$0xff] }
 0x5ab   :  { %15306 = vperm.xlu0 %16515, %v25786_v62   ;;  %v13976_v11 = vsel %vm13905_vm12, %v13389_v46, 0.0  ;;  %v13182_v56 = vrot.slane %v13175_v24, %v17359_v27  ;;  %v23484_v63 = vrot.slane %v13505_v61, %v17359_v27  ;;  %v13004_v19 = vrot.slane %v12990_v3, %v17359_v27 }
 0x5ac   :  { %v13005_v17 = vcombine.high %v12997_v52, %v12997_v52  ;;  %v13405_v35 = vcombine.low %v13397_v43, %v23410_v41  ;;  %v13013_v5 = vrot.slane %v12997_v52, %v17359_v27  ;;  %v13921_v23 = vrot.slane %v13920_v20, 4 }
 0x5ad   :  { %v13970_v44 = vrot.slane %v13969_v21, 4  ;;  %v13428_v46 = vcombine.low %v23430_v54, %v23414_v22  ;;  %v13535_v24 = vrot.slane %v23467_v2, %v17359_v27  ;;  %v12646_v61 = vcombine.high %v23424_v16, %v23424_v16 }
 0x5ae   :  { %15226 = vperm.xlu1 %16514, %v25787_v49   ;;  %v23500_v3 = vrot.slane %v16379_v9, %v17359_v27  ;;  %v13977_v30 = vrot.slane %v13976_v11, 4  ;;  %v12662_v43 = vcombine.high %v12654_v1, %v12654_v1  ;;  %v23503_v41 = vrot.slane %v12654_v1, %v17359_v27 }
 0x5af   :  { %v13908_v52 = vadd.f32 %v13907_v6, %v13906_v37  ;;  %v13913_v62 = vsel %vm13905_vm12, %v13182_v56, 0.0  ;;  %v13006_v54 = vcombine.high %v13004_v19, %v13004_v19  ;;  %v13027_v2 = vrot.slane %v13005_v17, %v17359_v27 }
 0x5b0   :  { %v13412_v49 = vrot.slane %v13405_v35, %v17359_v27  ;;  %v13035_v16 = vcombine.high %v13013_v5, %v13013_v5  ;;  %v13922_v9 = vadd.f32 %v13921_v23, %v13920_v20  ;;  %v13971_v48 = vadd.f32 %v13970_v44, %v13969_v21 }
 0x5b1   :  { %v13435_v42 = vrot.slane %v13428_v46, %v17359_v27  ;;  %v13020_v1 = vrot.slane %v13004_v19, %v17359_v27  ;;  %v12647_v37 = vcombine.high %v23455_v25, %v23455_v25  ;;  %v13978_v6 = vadd.f32 %v13977_v30, %v13976_v11  ;;  %v25789_v11 = vld [vmem:[#allocation195_spill] sm:$0xff] }
 0x5b2   :  { %15286 = vperm.xlu1 %16514, %v25788_v28   ;;  %v13914_v56 = vrot.slane %v13913_v62, 4  ;;  %v23516_v22 = vrot.slane %v12662_v43, %v17359_v27  ;;  %v13252_v17 = vcombine.low %v12646_v61, %v23503_v41  ;;  %v13909_v35 = vrot.slane %v13908_v52, 2 }
 0x5b3   :  { %v13962_v28 = vsel %vm13905_vm12, %v23439_v53, 0.0  ;;  %v23522_v20 = vrot.slane %v13006_v54, %v17359_v27  ;;  %v13037_v21 = vcombine.high %v13027_v2, %v13027_v2  ;;  %v13689_v23 = vcombine.low %v13013_v5, %v13027_v2 }
 0x5b4   :  { %v13983_v19 = vsel %vm13905_vm12, %v13412_v49, 0.0  ;;  %v23526_v25 = vrot.slane %v13035_v16, %v17359_v27  ;;  %v13923_v44 = vrot.slane %v13922_v9, 2  ;;  %v13972_v46 = vrot.slane %v13971_v48, 2 }
 0x5b5   :  { %v13990_v61 = vsel %vm13905_vm12, %v13435_v42, 0.0  ;;  %v12661_v30 = vrot.slane %v12647_v37, %v17359_v27  ;;  %v13979_v43 = vrot.slane %v13978_v6, 2  ;;  %v13915_v53 = vadd.f32 %v13914_v56, %v13913_v62 }
 0x5b6   :  { %15256 = vperm.xlu1 %16514, %v25789_v11   ;;  %v13963_v8 = vrot.slane %v13962_v28, 4  ;;  %v13259_v54 = vrot.slane %v13252_v17, %v17359_v27  ;;  %v13266_v5 = vrot.slane %v23516_v22, %v17359_v27  ;;  %v13984_v2 = vrot.slane %v13983_v19, 4  ;;  %v25791_v17 = vld [vmem:[#allocation65_spill] sm:$0xff] }
 0x5b7   :  { %v25790_v49 = vrot.slane %v23426_v55, %v17359_v27  ;;  %v23539_v11 = vrot.slane %v13689_v23, %v17359_v27  ;;  %v23541_v42 = vcombine.low %v13037_v21, %v13020_v1  ;;  %v13910_v37 = vadd.f32 %v13909_v35, %v13908_v52 }
 0x5b8   :  { %v13991_v47 = vrot.slane %v13990_v61, 4  ;;  %v16381_v56 = vcombine.high %v13020_v1, %v23522_v20  ;;  %v13924_v39 = vadd.f32 %v13923_v44, %v13922_v9  ;;  %v13973_v14 = vadd.f32 %v13972_v46, %v13971_v48 }
 0x5b9   :  { %v13221_v16 = vcombine.low %v25790_v49, %v23452_v29  ;;  %v12663_v13 = vcombine.high %v12661_v30, %v12661_v30  ;;  %v13980_v57 = vadd.f32 %v13979_v43, %v13978_v6  ;;  %v13916_v55 = vrot.slane %v13915_v53, 2 }
 0x5ba   :  { %15261 = vperm.xlu1 %16514, %v25791_v17   ;;  %v13964_v29 = vadd.f32 %v13963_v8, %v13962_v28  ;;  %v23548_v23 = vrot.slane %v12661_v30, %v17359_v27  ;;  %v13267_v21 = vcombine.low %v13259_v54, %v13266_v5  ;;  %v13985_v49 = vadd.f32 %v13984_v2, %v13983_v19  ;;  %v25793_v8 = vld [vmem:[#allocation189_spill] sm:$0xff]  ;;  %v12504_v30 = vpop.permute.xlu1 %12503 }
 0x5bb   :  { %v13228_v52 = vrot.slane %v13221_v16, %v17359_v27  ;;  %v13704_v35 = vcombine.low %v23539_v11, %v23526_v25  ;;  %v13911_v62 = vrot.slane %v13910_v37, 1  ;;  %v13992_v1 = vadd.f32 %v13991_v47, %v13990_v61  ;;  %v12500_v11 = vpop.permute.xlu0 %12499 }
 0x5bc   :  { %v25792_v9 = vrot.slane %v23442_v36, %v17359_v27  ;;  %v13925_v28 = vrot.slane %v13924_v39, 1  ;;  %v13974_v44 = vrot.slane %v13973_v14, 1  ;;  %v13244_v19 = vcombine.low %v23473_v34, %v23462_v26  ;;  %v25794_v34 = vld [vmem:[#allocation49_spill] sm:$0xff] }
 0x5bd   :  { %v12691_v46 = vrot.slane %v12663_v13, %v17359_v27  ;;  %v13981_v25 = vrot.slane %v13980_v57, 1  ;;  %v13917_v43 = vadd.f32 %v13916_v55, %v13915_v53  ;;  %v13965_v47 = vrot.slane %v13964_v29, 2  ;;  %v25795_v53 = vld [vmem:[#allocation175_spill] sm:$0xff] }
 0x5be   :  { %v13543_v48 = vcombine.low %v13535_v24, %v25792_v9  ;;  %15266 = vperm.xlu1 %16514, %v25793_v8   ;;  %v12693_v36 = vcombine.high %v23548_v23, %v23548_v23  ;;  %v13986_v24 = vrot.slane %v13985_v49, 2  ;;  %v13927_v61 = vsel %vm13905_vm12, %v13228_v52, 0.0 }
 0x5bf   :  { %v13274_v54 = vrot.slane %v13267_v21, %v17359_v27  ;;  %v23567_v5 = vrot.slane %v16381_v56, %v17359_v27  ;;  %v23569_v2 = vadd.f32 %v13911_v62, %v13910_v37  ;;  %v13993_v26 = vrot.slane %v13992_v1, 2 }
 0x5c0   :  { %v13550_v13 = vrot.slane %v13543_v48, %v17359_v27  ;;  %v12532_v16 = vmul.f32 %v25794_v34, %v12504_v30  ;;  %v23574_v17 = vadd.f32 %v13925_v28, %v13924_v39  ;;  %v23576_v55 = vadd.f32 %v13974_v44, %v13973_v14 }
 0x5c1   :  { %v13251_v52 = vrot.slane %v13244_v19, %v17359_v27  ;;  %v16376_v56 = vcombine.high %v23503_v41, %v23516_v22  ;;  %v23581_v21 = vadd.f32 %v13981_v25, %v13980_v57  ;;  %v13918_v37 = vrot.slane %v13917_v43, 1  ;;  %v25797_v41 = vld [vmem:[#allocation167_spill] sm:$0xff] }
 0x5c2   :  { %15271 = vperm.xlu1 %16514, %v25795_v53   ;;  %v13928_v62 = vrot.slane %v13927_v61, 4  ;;  %v13298_v9 = vcombine.low %v12691_v46, %v12693_v36  ;;  %v13987_v48 = vadd.f32 %v13986_v24, %v13985_v49  ;;  %v13966_v8 = vadd.f32 %v13965_v47, %v13964_v29  ;;  %v25796_v53 = vld [vmem:[#allocation9_spill] sm:$0xff] }
 0x5c3   :  { %v13941_v30 = vsel %vm13905_vm12, %v13274_v54, 0.0  ;;  %v12695_v34 = vcombine.high %v12691_v46, %v12691_v46  ;;  %v12530_v39 = vmul.f32 %v25796_v53, %v12500_v11  ;;  %v13994_v28 = vadd.f32 %v13993_v26, %v13992_v1 }
 0x5c4   :  { %v14025_v14 = vsel %vm13905_vm12, %v13550_v13, 0.0  ;;  %v13289_v44 = vrot.slane %v23548_v23, %v17359_v27  ;;  %v12892_v19 = vcombine.high %v12532_v16, %v12532_v16  ;;  %v12899_v57 = vrot.slane %v12532_v16, %v17359_v27 }
 0x5c5   :  { %v13934_v22 = vsel %vm13905_vm12, %v13251_v52, 0.0  ;;  %v13282_v29 = vrot.slane %v16376_v56, %v17359_v27  ;;  %v23592_v49 = vadd.f32 %v13918_v37, %v13917_v43  ;;  %v13929_v46 = vadd.f32 %v13928_v62, %v13927_v61 }
 0x5c6   :  { %15311 = vperm.xlu1 %16514, %v25797_v41   ;;  %v13942_v25 = vrot.slane %v13941_v30, 4  ;;  %v13305_v1 = vrot.slane %v13298_v9, %v17359_v27  ;;  %v13988_v47 = vrot.slane %v13987_v48, 1  ;;  %v13967_v36 = vrot.slane %v13966_v8, 1 }
 0x5c7   :  { %v14026_v24 = vrot.slane %v14025_v14, 4  ;;  %v13312_v23 = vrot.slane %v12695_v34, %v17359_v27  ;;  %v12794_v54 = vcombine.high %v12530_v39, %v12530_v39  ;;  %v13995_v26 = vrot.slane %v13994_v28, 1 }
 0x5c8   :  { %v13935_v13 = vrot.slane %v13934_v22, 4  ;;  %v12906_v16 = vrot.slane %v12892_v19, %v17359_v27  ;;  %v12907_v11 = vcombine.high %v12899_v57, %v12899_v57  ;;  %v12915_v52 = vrot.slane %v12899_v57, %v17359_v27 }
 0x5c9   :  { %v13711_v43 = vrot.slane %v13704_v35, %v17359_v27  ;;  %v13290_v56 = vcombine.low %v13282_v29, %v13289_v44  ;;  %v12801_v61 = vrot.slane %v12530_v39, %v17359_v27  ;;  %v13930_v37 = vrot.slane %v13929_v46, 2 }
 0x5ca   :  { %v13943_v62 = vadd.f32 %v13942_v25, %v13941_v30  ;;  %v23600_v9 = vadd.f32 %v13988_v47, %v13987_v48  ;;  %v23602_v53 = vadd.f32 %v13967_v36, %v13966_v8  ;;  %v14027_v34 = vadd.f32 %v14026_v24, %v14025_v14 }
 0x5cb   :  { %v25798_v41 = vcombine.low %v23484_v63, %v23465_v45  ;;  %v12808_v6 = vrot.slane %v12794_v54, %v17359_v27  ;;  %v23609_v57 = vadd.f32 %v13995_v26, %v13994_v28  ;;  %v13936_v35 = vadd.f32 %v13935_v13, %v13934_v22 }
 0x5cc   :  { %v13313_v44 = vcombine.low %v13305_v1, %v13312_v23  ;;  %v12908_v29 = vcombine.high %v12906_v16, %v12906_v16  ;;  %v12929_v39 = vrot.slane %v12907_v11, %v17359_v27  ;;  %v12937_v30 = vcombine.high %v12915_v52, %v12915_v52 }
 0x5cd   :  { %v13527_v19 = vrot.slane %v25798_v41, %v17359_v27  ;;  %v14074_v48 = vsel %vm13905_vm12, %v13711_v43, 0.0  ;;  %v12809_v8 = vcombine.high %v12801_v61, %v12801_v61  ;;  %v23614_v14 = vrot.slane %v12801_v61, %v17359_v27 }
 0x5ce   :  { %v13931_v25 = vadd.f32 %v13930_v37, %v13929_v46  ;;  %v13944_v47 = vrot.slane %v13943_v62, 2  ;;  %v12922_v45 = vrot.slane %v12906_v16, %v17359_v27  ;;  %v13565_v63 = vrot.slane %v12915_v52, %v17359_v27 }
 0x5cf   :  { %v14028_v28 = vrot.slane %v14027_v34, 2  ;;  %v14018_v22 = vsel %vm13905_vm12, %v13527_v19, 0.0  ;;  %v12810_v1 = vcombine.high %v12808_v6, %v12808_v6  ;;  %v23620_v36 = vrot.slane %v12808_v6, %v17359_v27 }
 0x5d0   :  { %v14075_v24 = vrot.slane %v14074_v48, 4  ;;  %v13320_v23 = vrot.slane %v13313_v44, %v17359_v27  ;;  %v23624_v54 = vrot.slane %v12908_v29, %v17359_v27  ;;  %v12939_v26 = vcombine.high %v12929_v39, %v12929_v39 }
 0x5d1   :  { %v13574_v46 = vcombine.low %v12929_v39, %v12937_v30  ;;  %v13937_v13 = vrot.slane %v13936_v35, 2  ;;  %v23627_v16 = vrot.slane %v12809_v8, %v17359_v27  ;;  %v25799_v11 = vcombine.high %v23385_v58, %v23385_v58  ;;  %v12510_v39 = vpop.permute.xlu1 %12509  ;;  %v15679_v58 = vld [vmem:[%s24302_s5 + $0x8] sm:$0xff] }
 0x5d2   :  { %v14019_v43 = vrot.slane %v14018_v22, 4  ;;  %v13297_v6 = vrot.slane %v13290_v56, %v17359_v27  ;;  %v12938_v61 = vcombine.high %v12922_v45, %v12922_v45  ;;  %v23635_v37 = vcombine.low %v23500_v3, %v13565_v63  ;;  %16487 = vmatprep.subr.mxu1 %v15679_v58 }
 0x5d3   :  { %v13436_v52 = vcombine.low %v25799_v11, %v23614_v14  ;;  %v13932_v41 = vrot.slane %v13931_v25, 1  ;;  %v14029_v19 = vadd.f32 %v14028_v28, %v14027_v34  ;;  %v12838_v44 = vrot.slane %v12810_v1, %v17359_v27  ;;  %16488 = vmatpush3.msra.mxu1 %v15679_v58 }
 0x5d4   :  { %v12840_v29 = vcombine.high %v23620_v36, %v23620_v36  ;;  %v14076_v30 = vadd.f32 %v14075_v24, %v14074_v48  ;;  %v13955_v8 = vsel %vm13905_vm12, %v13320_v23, 0.0  ;;  %v13581_v56 = vrot.slane %v13574_v46, %v17359_v27  ;;  %v25800_v23 = vld [vmem:[#allocation62_spill] sm:$0xff] }
 0x5d5   :  { %v13588_v3 = vrot.slane %v12939_v26, %v17359_v27  ;;  %v13597_v63 = vcombine.low %v12922_v45, %v23624_v54  ;;  %v13938_v34 = vadd.f32 %v13937_v13, %v13936_v35  ;;  %v13443_v28 = vrot.slane %v13436_v52, %v17359_v27  ;;  %v15678_v35 = vld [vmem:[%s24302_s5] sm:$0xff] }
 0x5d6   :  { %v13450_v1 = vrot.slane %v23627_v16, %v17359_v27  ;;  %v14020_v48 = vadd.f32 %v14019_v43, %v14018_v22  ;;  %v13948_v24 = vsel %vm13905_vm12, %v13297_v6, 0.0  ;;  %v12535_v11 = vmul.f32 %v12510_v39, %v25800_v23  ;;  %16489 = vmatprep.subr.mxu1 %v15678_v35 }
 0x5d7   :  { %v23652_v0 = vadd.f32 %v13932_v41, %v13931_v25  ;;  %v13945_v46 = vadd.f32 %v13944_v47, %v13943_v62  ;;  %v13956_v7 = vrot.slane %v13955_v8, 4  ;;  %v23658_v45 = vrot.slane %v12938_v61, %v17359_v27  ;;  %16490 = vmatpush3.msra.mxu1 %v15678_v35 }
 0x5d8   :  { %v12842_v26 = vcombine.high %v12838_v44, %v12838_v44  ;;  %v13482_v13 = vcombine.low %v12838_v44, %v12840_v29  ;;  %v14077_v52 = vrot.slane %v14076_v30, 2  ;;  %v14030_v43 = vrot.slane %v14029_v19, 1 }
 0x5d9   :  { %v13949_v6 = vrot.slane %v13948_v24, 4  ;;  %v13589_v25 = vcombine.low %v13581_v56, %v13588_v3  ;;  %v23663_v62 = vrot.slane %v13597_v63, %v17359_v27  ;;  %v13451_v47 = vcombine.low %v13443_v28, %v13450_v1 }
 0x5da   :  { %v13939_v41 = vrot.slane %v13938_v34, 1  ;;  %v14021_v39 = vrot.slane %v14020_v48, 2  ;;  %v13039_v58 = vcombine.high %v12535_v11, %v12535_v11  ;;  %v13046_v61 = vrot.slane %v12535_v11, %v17359_v27  ;;  %v12506_v22 = vpop.permute.xlu0 %12505 }
 0x5db   :  { %v13946_v23 = vrot.slane %v13945_v46, 1  ;;  %v13957_v44 = vadd.f32 %v13956_v7, %v13955_v8  ;;  %v13489_v29 = vrot.slane %v13482_v13, %v17359_v27  ;;  %v13496_v60 = vrot.slane %v12842_v26, %v17359_v27 }
 0x5dc   :  { %v14078_v59 = vadd.f32 %v14077_v52, %v14076_v30  ;;  %v13573_v56 = vrot.slane %v23635_v37, %v17359_v27  ;;  %v12533_v3 = vmul.f32 %v12506_v22, %v25684_v10  ;;  %v13950_v63 = vadd.f32 %v13949_v6, %v13948_v24 }
 0x5dd   :  { %v13596_v28 = vrot.slane %v13589_v25, %v17359_v27  ;;  %v23672_v1 = vadd.f32 %v14030_v43, %v14029_v19  ;;  %v23674_v35 = vadd.f32 %v13939_v41, %v13938_v34  ;;  %v13458_v7 = vrot.slane %v13451_v47, %v17359_v27 }
 0x5de   :  { %v14022_v8 = vadd.f32 %v14021_v39, %v14020_v48  ;;  %v24641_v11 = vmov 0.0   ;;  %v13053_v30 = vrot.slane %v13039_v58, %v17359_v27  ;;  %v13054_v26 = vcombine.high %v13046_v61, %v13046_v61 }
 0x5df   :  { %16497 = vmatprep.subr.mxu1 %v24641_v11  ;;  %v13062_v37 = vrot.slane %v13046_v61, %v17359_v27  ;;  %v13958_v13 = vrot.slane %v13957_v44, 2  ;;  %v12948_v10 = vrot.slane %v12533_v3, %v17359_v27  ;;  %v23681_v24 = vadd.f32 %v13946_v23, %v13945_v46 }
 0x5e0   :  { %v14079_v19 = vrot.slane %v14078_v59, 1  ;;  %v13497_v52 = vcombine.low %v13489_v29, %v13496_v60  ;;  %v16378_v34 = vcombine.high %v23614_v14, %v23627_v16  ;;  %v13951_v22 = vrot.slane %v13950_v63, 2 }
 0x5e1   :  { %v14039_v48 = vsel %vm13905_vm12, %v13596_v28, 0.0  ;;  %v14032_v43 = vsel %vm13905_vm12, %v13573_v56, 0.0  ;;  %v12941_v6 = vcombine.high %v12533_v3, %v12533_v3  ;;  %v13997_v25 = vsel %vm13905_vm12, %v13458_v7, 0.0 }
 0x5e2   :  { %v14023_v47 = vrot.slane %v14022_v8, 1  ;;  %v25801_v41 = vrot.slane %v23522_v20, %v17359_v27  ;;  %v25802_v46 = vrot.slane %v23541_v42, %v17359_v27  ;;  %v13055_v60 = vcombine.high %v13053_v30, %v13053_v30 }
 0x5e3   :  { %v13076_v58 = vrot.slane %v13054_v26, %v17359_v27  ;;  %v13084_v14 = vcombine.high %v13062_v37, %v13062_v37  ;;  %v23695_v16 = vadd.f32 %v13958_v13, %v13957_v44  ;;  %v12956_v61 = vcombine.high %v12948_v10, %v12948_v10 }
 0x5e4   :  { %v13727_v39 = vcombine.low %v25802_v46, %v25801_v41  ;;  %v23697_v23 = vadd.f32 %v14079_v19, %v14078_v59  ;;  %v14040_v29 = vrot.slane %v14039_v48, 4  ;;  %v13504_v56 = vrot.slane %v13497_v52, %v17359_v27 }
 0x5e5   :  { %v13466_v3 = vrot.slane %v16378_v34, %v17359_v27  ;;  %v13998_v28 = vrot.slane %v13997_v25, 4  ;;  %v23701_v20 = vadd.f32 %v13951_v22, %v13950_v63  ;;  %v14033_v7 = vrot.slane %v14032_v43, 4 }
 0x5e6   :  { %v13473_v42 = vrot.slane %v23620_v36, %v17359_v27  ;;  %v12955_v26 = vrot.slane %v12941_v6, %v17359_v27  ;;  %v23706_v41 = vadd.f32 %v14023_v47, %v14022_v8  ;;  %v13734_v44 = vrot.slane %v13727_v39, %v17359_v27 }
 0x5e7   :  { %v23710_v59 = vrot.slane %v13055_v60, %v17359_v27  ;;  %v13086_v13 = vcombine.high %v13076_v58, %v13076_v58  ;;  %v13758_v19 = vcombine.low %v13076_v58, %v13084_v14  ;;  %v13960_v52 = vrot.slane %v23695_v16, 1  ;;  %v23717_v6 = vpop.permute.xlu0 %15156 }
 0x5e8   :  { %v12964_v63 = vrot.slane %v12948_v10, %v17359_v27  ;;  %v12978_v34 = vrot.slane %v12956_v61, %v17359_v27  ;;  %v14041_v22 = vadd.f32 %v14040_v29, %v14039_v48  ;;  %v14011_v36 = vsel %vm13905_vm12, %v13504_v56, 0.0 }
 0x5e9   :  { %v13474_v46 = vcombine.low %v13466_v3, %v13473_v42  ;;  %v13069_v8 = vrot.slane %v13053_v30, %v17359_v27  ;;  %v13999_v47 = vadd.f32 %v13998_v28, %v13997_v25  ;;  %v14034_v39 = vadd.f32 %v14033_v7, %v14032_v43 }
 0x5ea   :  { %v13749_v60 = vrot.slane %v13062_v37, %v17359_v27  ;;  %v12957_v11 = vcombine.high %v12955_v26, %v12955_v26  ;;  %v12971_v58 = vrot.slane %v12955_v26, %v17359_v27  ;;  %v14081_v14 = vsel %vm13905_vm12, %v13734_v44, 0.0 }
 0x5eb   :  { %v13765_v10 = vrot.slane %v13758_v19, %v17359_v27  ;;  %v13772_v48 = vrot.slane %v13086_v13, %v17359_v27  ;;  %v13781_v61 = vcombine.low %v13069_v8, %v23710_v59  ;;  %v14012_v29 = vrot.slane %v14011_v36, 4  ;;  %v23729_v28 = vpop.permute.xlu0 %15166 }
 0x5ec   :  { %v25803_v30 = vcombine.high %v23624_v54, %v23624_v54  ;;  %v16380_v25 = vcombine.high %v12964_v63, %v12978_v34  ;;  %v13953_v43 = vrot.slane %v23701_v20, 1  ;;  %v14042_v37 = vrot.slane %v14041_v22, 2 }
 0x5ed   :  { %v13085_v3 = vcombine.high %v13069_v8, %v13069_v8  ;;  %v14035_v7 = vrot.slane %v14034_v39, 2  ;;  %v14082_v42 = vrot.slane %v14081_v14, 4  ;;  %v13481_v26 = vrot.slane %v13474_v46, %v17359_v27 }
 0x5ee   :  { %v13620_v56 = vcombine.low %v25803_v30, %v12964_v63  ;;  %v13750_v44 = vcombine.low %v23567_v5, %v13749_v60  ;;  %v12985_v13 = vrot.slane %v12957_v11, %v17359_v27  ;;  %v12987_v19 = vcombine.high %v12971_v58, %v12971_v58 }
 0x5ef   :  { %v13612_v54 = vcombine.low %v23663_v62, %v23658_v45  ;;  %v13788_v63 = vrot.slane %v13781_v61, %v17359_v27  ;;  %v14000_v30 = vrot.slane %v13999_v47, 2  ;;  %v14013_v18 = vadd.f32 %v14012_v29, %v14011_v36  ;;  %v23741_v60 = vpop.permute.xlu0 %15201 }
 0x5f0   :  { %v13773_v12 = vcombine.low %v13765_v10, %v13772_v48  ;;  %v13627_v8 = vrot.slane %v13620_v56, %v17359_v27  ;;  %v13634_v38 = vrot.slane %v12978_v34, %v17359_v27  ;;  %v13650_v51 = vrot.slane %v16380_v25, %v17359_v27 }
 0x5f1   :  { %v14043_v46 = vadd.f32 %v14042_v37, %v14041_v22  ;;  %v13795_v5 = vrot.slane %v13085_v3, %v17359_v27  ;;  %v14036_v11 = vadd.f32 %v14035_v7, %v14034_v39  ;;  %v14083_v4 = vadd.f32 %v14082_v42, %v14081_v14 }
 0x5f2   :  { %v14004_v45 = vsel %vm13905_vm12, %v13481_v26, 0.0  ;;  %v12989_v62 = vcombine.high %v12985_v13, %v12985_v13  ;;  %v13657_v61 = vrot.slane %v12971_v58, %v17359_v27  ;;  %v13666_v36 = vcombine.low %v12985_v13, %v12987_v19 }
 0x5f3   :  { %v13757_v10 = vrot.slane %v13750_v44, %v17359_v27  ;;  %v14001_v48 = vadd.f32 %v14000_v30, %v13999_v47  ;;  %v14014_v29 = vrot.slane %v14013_v18, 2  ;;  %v13780_v34 = vrot.slane %v13773_v12, %v17359_v27  ;;  %v23750_v14 = vpop.permute.xlu0 %15206 }
 0x5f4   :  { %v13796_v56 = vcombine.low %v13788_v63, %v13795_v5  ;;  %v13635_v22 = vcombine.low %v13627_v8, %v13634_v38  ;;  %v13658_v25 = vcombine.low %v13650_v51, %v13657_v61  ;;  %v23748_v37 = vadd.f32 %v13960_v52, %v23695_v16 }
 0x5f5   :  { %v14044_v39 = vrot.slane %v14043_v46, 1  ;;  %v23753_v3 = vadd.f32 %v13953_v43, %v23701_v20  ;;  %v14037_v58 = vrot.slane %v14036_v11, 1  ;;  %v14084_v7 = vrot.slane %v14083_v4, 2 }
 0x5f6   :  { %v14005_v42 = vrot.slane %v14004_v45, 4  ;;  %v13673_v47 = vrot.slane %v13666_v36, %v17359_v27  ;;  %v13680_v26 = vrot.slane %v12989_v62, %v17359_v27  ;;  %v14088_v12 = vsel %vm13905_vm12, %v13757_v10, 0.0 }
 0x5f7   :  { %v13619_v38 = vrot.slane %v13612_v54, %v17359_v27  ;;  %v12512_v51 = vpop.permute.xlu1 %12511  ;;  %v14002_v16 = vrot.slane %v14001_v48, 1  ;;  %v14015_v52 = vadd.f32 %v14014_v29, %v14013_v18  ;;  %v14095_v44 = vsel %vm13905_vm12, %v13780_v34, 0.0  ;;  %v23766_v30 = vpop.permute.xlu0 %15211 }
 0x5f8   :  { %v13803_v13 = vrot.slane %v13796_v56, %v17359_v27  ;;  %v12536_v20 = vmul.f32 %v25672_v33, %v12512_v51  ;;  %v23762_v43 = vadd.f32 %v14044_v39, %v14043_v46  ;;  %v13642_v19 = vrot.slane %v13635_v22, %v17359_v27 }
 0x5f9   :  { %v13665_v63 = vrot.slane %v13658_v25, %v17359_v27  ;;  %v23768_v8 = vadd.f32 %v14037_v58, %v14036_v11  ;;  %v14085_v54 = vadd.f32 %v14084_v7, %v14083_v4  ;;  %v14006_v5 = vadd.f32 %v14005_v42, %v14004_v45 }
 0x5fa   :  { %v14089_v62 = vrot.slane %v14088_v12, 4  ;;  %v13095_v18 = vrot.slane %v12536_v20, %v17359_v27  ;;  %v14096_v61 = vrot.slane %v14095_v44, 4  ;;  %v14046_v36 = vsel %vm13905_vm12, %v13619_v38, 0.0 }
 0x5fb   :  { %v13681_v10 = vcombine.low %v13673_v47, %v13680_v26  ;;  %v23774_v33 = vmul.f32 %v23717_v6, %v23569_v2  ;;  %v23776_v46 = vadd.f32 %v14002_v16, %v14001_v48  ;;  %v14016_v29 = vrot.slane %v14015_v52, 1  ;;  %v23782_v22 = vpop.permute.xlu0 %15216 }
 0x5fc   :  { %v14102_v34 = vsel %vm13905_vm12, %v13803_v13, 0.0  ;;  %v13103_v11 = vcombine.high %v13095_v18, %v13095_v18  ;;  %v13111_v4 = vrot.slane %v13095_v18, %v17359_v27  ;;  %v14053_v45 = vsel %vm13905_vm12, %v13642_v19, 0.0 }
 0x5fd   :  { %v14060_v56 = vsel %vm13905_vm12, %v13665_v63, 0.0  ;;  %v14086_v25 = vrot.slane %v14085_v54, 1  ;;  %v14007_v39 = vrot.slane %v14006_v5, 2  ;;  %v14090_v58 = vadd.f32 %v14089_v62, %v14088_v12 }
 0x5fe   :  { %v14047_v7 = vrot.slane %v14046_v36, 4  ;;  %v13087_v2 = vcombine.high %v23710_v59, %v23710_v59  ;;  %v23788_v6 = vmul.f32 %v23729_v28, %v23574_v17  ;;  %v14097_v48 = vadd.f32 %v14096_v61, %v14095_v44 }
 0x5ff   :  { %v13688_v42 = vrot.slane %v13681_v10, %v17359_v27  ;;  %v15378_v47 = vmin.f32 %v23774_v33, 0.0  ;;  %v14103_v26 = vrot.slane %v14102_v34, 4  ;;  %v14054_v38 = vrot.slane %v14053_v45, 4  ;;  %v23795_v63 = vpop.permute.xlu0 %15241 }
 0x600   :  { %v14061_v51 = vrot.slane %v14060_v56, 4  ;;  %v13088_v16 = vcombine.high %v12536_v20, %v12536_v20  ;;  %v13125_v13 = vrot.slane %v13103_v11, %v17359_v27  ;;  %v13804_v12 = vcombine.low %v13087_v2, %v13111_v4 }
 0x601   :  { %v23793_v19 = vadd.f32 %v14016_v29, %v14015_v52  ;;  %v23797_v59 = vadd.f32 %v14086_v25, %v14085_v54  ;;  %v14008_v17 = vadd.f32 %v14007_v39, %v14006_v5  ;;  %v14091_v28 = vrot.slane %v14090_v58, 2 }
 0x602   :  { %v14048_v44 = vadd.f32 %v14047_v7, %v14046_v36  ;;  %v15380_v62 = vmin.f32 %v23788_v6, 0.0  ;;  %v23802_v18 = vmul.f32 %v23741_v60, %v23576_v55  ;;  %v14098_v61 = vrot.slane %v14097_v48, 2 }
 0x603   :  { %v14067_v20 = vsel %vm13905_vm12, %v13688_v42, 0.0  ;;  %v15410_v10 = vmul.f32 1.442695, %v15378_v47  ;;  %v14104_v11 = vadd.f32 %v14103_v26, %v14102_v34  ;;  %v14055_v52 = vadd.f32 %v14054_v38, %v14053_v45  ;;  %v23817_v25 = vpop.permute.xlu0 %15221 }
 0x604   :  { %v14062_v29 = vadd.f32 %v14061_v51, %v14060_v56  ;;  %v23806_v2 = vrot.slane %v13088_v16, %v17359_v27  ;;  %v13811_v54 = vrot.slane %v13804_v12, %v17359_v27  ;;  %v13818_v5 = vrot.slane %v13125_v13, %v17359_v27  ;;  %v15162_v55 = vpop.permute.xlu1 %15161 }
 0x605   :  { %v23812_v36 = vmul.f32 %v23750_v14, %v23581_v21  ;;  %v23815_v60 = vmul.f32 %v15162_v55, %v23592_v49  ;;  %v14009_v34 = vrot.slane %v14008_v17, 1  ;;  %v14049_v45 = vrot.slane %v14048_v44, 2 }
 0x606   :  { %v14068_v56 = vrot.slane %v14067_v20, 4  ;;  %v16382_v39 = vcombine.high %v13111_v4, %v13125_v13  ;;  %v15414_v7 = vmul.f32 1.442695, %v15380_v62  ;;  %v15387_v42 = vmin.f32 %v23802_v18, 0.0 }
 0x607   :  { %v14092_v47 = vadd.f32 %v14091_v28, %v14090_v58  ;;  %17092 = vpow2.f32 %v15410_v10  ;;  %v14099_v26 = vadd.f32 %v14098_v61, %v14097_v48  ;;  %v14105_v38 = vrot.slane %v14104_v11, 2  ;;  %v23826_v4 = vpop.permute.xlu0 %15276 }
 0x608   :  { %v14056_v51 = vrot.slane %v14055_v52, 2  ;;  %v23822_v21 = vrot.slane %v23806_v2, %v17359_v27  ;;  %v13819_v49 = vcombine.low %v13811_v54, %v13818_v5  ;;  %v15388_v14 = vmin.f32 %v23812_v36, 0.0  ;;  %v15197_v16 = vpop.permute.xlu1 %15196 }
 0x609   :  { %v14063_v12 = vrot.slane %v14062_v29, 2  ;;  %v15379_v55 = vmin.f32 %v23815_v60, 0.0  ;;  %v23828_v13 = vadd.f32 %v14009_v34, %v14008_v17  ;;  %v14050_v58 = vadd.f32 %v14049_v45, %v14048_v44 }
 0x60a   :  { %v14069_v28 = vadd.f32 %v14068_v56, %v14067_v20  ;;  %v13834_v48 = vrot.slane %v16382_v39, %v17359_v27  ;;  %17094 = vpow2.f32 %v15414_v7  ;;  %v15428_v62 = vmul.f32 1.442695, %v15387_v42 }
 0x60b   :  { %v23833_v61 = vmul.f32 %v23766_v30, %v23600_v9  ;;  %v14100_v10 = vrot.slane %v14099_v26, 1  ;;  %v14106_v54 = vadd.f32 %v14105_v38, %v14104_v11  ;;  %v14093_v5 = vrot.slane %v14092_v47, 1  ;;  %v15192_v56 = vpop.permute.xlu0 %15191 }
 0x60c   :  { %v14057_v50 = vadd.f32 %v14056_v51, %v14055_v52  ;;  %v13841_v32 = vrot.slane %v23822_v21, %v17359_v27  ;;  %v15430_v15 = vmul.f32 1.442695, %v15388_v14  ;;  %v15172_v17 = vpop.permute.xlu1 %15171  ;;  %v13826_v44 = vrot.slane %v13819_v49, %v17359_v27 }
 0x60d   :  { %v14064_v20 = vadd.f32 %v14063_v12, %v14062_v29  ;;  %v15412_v34 = vmul.f32 1.442695, %v15379_v55  ;;  %v23839_v45 = vmul.f32 %v15197_v16, %v23602_v53  ;;  %v14051_v39 = vrot.slane %v14050_v58, 1 }
 0x60e   :  { %v14070_v9 = vrot.slane %v14069_v28, 2  ;;  %v13842_v30 = vcombine.low %v13834_v48, %v13841_v32  ;;  %17096 = vpow2.f32 %v15428_v62  ;;  %v15389_v11 = vmin.f32 %v23833_v61, 0.0 }
 0x60f   :  { %v23843_v52 = vmul.f32 %v15172_v17, %v23652_v0  ;;  %v13104_v7 = vcombine.high %v23806_v2, %v23806_v2  ;;  %v23847_v42 = vadd.f32 %v14100_v10, %v14099_v26  ;;  %v14107_v29 = vrot.slane %v14106_v54, 1  ;;  %v15252_v62 = vpop.permute.xlu0 %15251 }
 0x610   :  { %v23849_v38 = vadd.f32 %v14093_v5, %v14092_v47  ;;  %17098 = vpow2.f32 %v15430_v15  ;;  %v15177_v53 = vpop.permute.xlu1 %15176  ;;  %v14109_v51 = vsel %vm13905_vm12, %v13826_v44, 0.0  ;;  %v14058_v49 = vrot.slane %v14057_v50, 1 }
 0x611   :  { %v14065_v32 = vrot.slane %v14064_v20, 1  ;;  %17100 = vpow2.f32 %v15412_v34  ;;  %v15386_v14 = vmin.f32 %v23839_v45, 0.0  ;;  %v23854_v0 = vmul.f32 %v15177_v53, %v23674_v35 }
 0x612   :  { %v14071_v16 = vadd.f32 %v14070_v9, %v14069_v28  ;;  %v15432_v12 = vmul.f32 1.442695, %v15389_v11  ;;  %v15381_v2 = vmin.f32 %v23843_v52, 0.0  ;;  %v23857_v26 = vadd.f32 %v14051_v39, %v14050_v58 }
 0x613   :  { %v13849_v47 = vrot.slane %v13842_v30, %v17359_v27  ;;  %v13132_v15 = vrot.slane %v13104_v7, %v17359_v27  ;;  %v13134_v55 = vcombine.high %v23822_v21, %v23822_v21  ;;  %v15382_v48 = vmin.f32 %v23854_v0, 0.0 }
 0x614   :  { %v14110_v10 = vrot.slane %v14109_v51, 4  ;;  %v17093_v5 = vpop.eup %17092  ;;  %vm15346_vm14 = vcmp.gt.f32.partialorder %v23774_v33, 0.0  ;;  %v15182_v35 = vpop.permute.xlu1 %15181  ;;  %v23866_v28 = vmul.f32 %v15192_v56, %v23748_v37  ;;  %v23868_v58 = vadd.f32 %v14107_v29, %v14106_v54 }
 0x615   :  { %v23870_v17 = vadd.f32 %v14058_v49, %v14057_v50  ;;  %vm15348_vm11 = vcmp.gt.f32.partialorder %v23788_v6, 0.0  ;;  %v15426_v44 = vmul.f32 1.442695, %v15386_v14  ;;  %v23874_v21 = vmul.f32 %v15182_v35, %v23681_v24 }
 0x616   :  { %v23876_v34 = vadd.f32 %v14065_v32, %v14064_v20  ;;  %v14072_v39 = vrot.slane %v14071_v16, 1  ;;  %17102 = vpow2.f32 %v15432_v12  ;;  %v23880_v9 = vmul.f32 %v23782_v22, %v23609_v57  ;;  %v15232_v32 = vpop.permute.xlu0 %15231 }
 0x617   :  { %v15416_v37 = vmul.f32 1.442695, %v15381_v2  ;;  %v14116_v54 = vsel %vm13905_vm12, %v13849_v47, 0.0  ;;  %v17095_v56 = vpop.eup %17094  ;;  %v13850_v50 = vcombine.low %v13132_v15, %v13134_v55  ;;  %v15418_v30 = vmul.f32 1.442695, %v15382_v48 }
 0x618   :  { %v15383_v11 = vmin.f32 %v23874_v21, 0.0  ;;  %v14111_v7 = vadd.f32 %v14110_v10, %v14109_v51  ;;  %v16383_v29 = vadd.f32 -1.0, %v17093_v5  ;;  %v13136_v24 = vcombine.high %v13132_v15, %v13132_v15 }
 0x619   :  { %v23886_v20 = vmul.f32 %v23795_v63, %v23672_v1  ;;  %v15237_v53 = vpop.permute.xlu1 %15236  ;;  %v15385_v49 = vmin.f32 %v23866_v28, 0.0  ;;  %vm15355_vm15 = vcmp.gt.f32.partialorder %v23802_v18, 0.0  ;;  %17104 = vpow2.f32 %v15426_v44 }
 0x61a   :  { %v23892_v57 = vmul.f32 %v23817_v25, %v23776_v46  ;;  %v15420_v22 = vmul.f32 1.442695, %v15383_v11  ;;  %v14117_v14 = vrot.slane %v14116_v54, 4  ;;  %v16385_v51 = vadd.f32 -1.0, %v17095_v56 }
 0x61b   :  { %v15390_v12 = vmin.f32 %v23880_v9, 0.0  ;;  %17106 = vpow2.f32 %v15416_v37  ;;  %v23895_v2 = vadd.f32 %v14072_v39, %v14071_v16  ;;  %v17097_v1 = vpop.eup %17096  ;;  %v13857_v63 = vrot.slane %v13850_v50, %v17359_v27 }
 0x61c   :  { %17108 = vpow2.f32 %v15418_v30  ;;  %v23900_v47 = vmul.f32 %v23826_v4, %v23697_v23  ;;  %v14112_v15 = vrot.slane %v14111_v7, 2  ;;  %v13864_v46 = vrot.slane %v13136_v24, %v17359_v27 }
 0x61d   :  { %vm15356_vm5 = vcmp.gt.f32.partialorder %v23812_v36, 0.0  ;;  %v15395_v25 = vmin.f32 %v23886_v20, 0.0  ;;  %17110 = vpow2.f32 %v15420_v22  ;;  %v15424_v55 = vmul.f32 1.442695, %v15385_v49  ;;  %v15187_v48 = vpop.permute.xlu1 %15186  ;;  %v17099_v16 = vpop.eup %17098 }
 0x61e   :  { %v15506_v10 = vsel %vm15346_vm14, %v23774_v33, %v16383_v29  ;;  %v15391_v5 = vmin.f32 %v23892_v57, 0.0  ;;  %v23910_v23 = vmul.f32 %v15187_v48, %v23753_v3  ;;  %v14118_v4 = vadd.f32 %v14117_v14, %v14116_v54  ;;  %v17101_v35 = vpop.eup %17100  ;;  %v15292_v3 = vpop.permute.xlu0 %15291 }
 0x61f   :  { %v23915_v44 = vsel %vm15348_vm11, %v23788_v6, %v16385_v51  ;;  %v16392_v39 = vadd.f32 -1.0, %v17097_v1  ;;  %v15434_v37 = vmul.f32 1.442695, %v15390_v12  ;;  %v23918_v56 = vmul.f32 %v15232_v32, %v23793_v19 }
 0x620   :  { %v15402_v50 = vmin.f32 %v23900_v47, 0.0  ;;  %v15384_v33 = vmin.f32 %v23910_v23, 0.0  ;;  %v23923_v30 = vmul.f32 %v15252_v62, %v23762_v43  ;;  %v14113_v54 = vadd.f32 %v14112_v15, %v14111_v7 }
 0x621   :  { %v16393_v11 = vadd.f32 -1.0, %v17099_v16  ;;  %v15444_v29 = vmul.f32 1.442695, %v15395_v25  ;;  %17112 = vpow2.f32 %v15424_v55  ;;  %v15247_v24 = vpop.permute.xlu1 %15246  ;;  %v13865_v6 = vcombine.low %v13857_v63, %v13864_v46 }
 0x622   :  { %v16384_v49 = vadd.f32 -1.0, %v17101_v35  ;;  %v15436_v22 = vmul.f32 1.442695, %v15391_v5  ;;  %v15422_v14 = vmul.f32 1.442695, %v15384_v33  ;;  %v14119_v51 = vrot.slane %v14118_v4, 2  ;;  %v15297_v25 = vpop.permute.xlu0 %15296 }
 0x623   :  { %v23928_v19 = vsel %vm15355_vm15, %v23802_v18, %v16392_v39  ;;  %vm15347_vm2 = vcmp.gt.f32.partialorder %v23815_v60, 0.0  ;;  %17114 = vpow2.f32 %v15434_v37  ;;  %v15393_v43 = vmin.f32 %v23918_v56, 0.0  ;;  %v17103_v62 = vpop.eup %17102 }
 0x624   :  { %v15458_v7 = vmul.f32 1.442695, %v15402_v50  ;;  %17116 = vpow2.f32 %v15422_v14  ;;  %v15397_v32 = vmin.f32 %v23923_v30, 0.0  ;;  %v14114_v12 = vrot.slane %v14113_v54, 1 }
 0x625   :  { %vm15354_vm6 = vcmp.gt.f32.partialorder %v23839_v45, 0.0  ;;  %17118 = vpow2.f32 %v15444_v29  ;;  %v23935_v1 = vmul.f32 %v15237_v53, %v23706_v41  ;;  %v15282_v63 = vpop.permute.xlu1 %15281  ;;  %v13872_v18 = vrot.slane %v13865_v6, %v17359_v27 }
 0x626   :  { %v23941_v15 = vsel %vm15356_vm5, %v23812_v36, %v16393_v11  ;;  %v15507_v46 = vsel %vm15347_vm2, %v23815_v60, %v16384_v49  ;;  %17120 = vpow2.f32 %v15436_v22  ;;  %v14120_v55 = vadd.f32 %v14119_v51, %v14118_v4  ;;  %v17105_v48 = vpop.eup %17104  ;;  %v15302_v14 = vpop.permute.xlu0 %15301 }
 0x627   :  { %v23944_v16 = vadd.f32 -1.0, %v17103_v62  ;;  %vm15349_vm7 = vcmp.gt.f32.partialorder %v23843_v52, 0.0  ;;  %v15440_v41 = vmul.f32 1.442695, %v15393_v43  ;;  %v23948_v53 = vmul.f32 %v15282_v63, %v23797_v59 }
 0x628   :  { %v17107_v5 = vpop.eup %17106  ;;  %vm15350_vm8 = vcmp.gt.f32.partialorder %v23854_v0, 0.0  ;;  %17122 = vpow2.f32 %v15458_v7  ;;  %v23951_v36 = vmul.f32 1.442695, %v15397_v32  ;;  %v14115_v35 = vadd.f32 %v14114_v12, %v14113_v54 }
 0x629   :  { %v17109_v60 = vpop.eup %17108  ;;  %v15641_v39 = vsel %vm15570_vm1, %v15507_v46, %v15506_v10  ;;  %v15394_v4 = vmin.f32 %v23935_v1, 0.0  ;;  %v23956_v37 = vmul.f32 %v15292_v3, %v23847_v42  ;;  %v15227_v50 = vpop.permute.xlu1 %15226  ;;  %v14123_v33 = vsel %vm13905_vm12, %v13872_v18, 0.0 }
 0x62a   :  { %v17111_v59 = vpop.eup %17110  ;;  %v16391_v11 = vadd.f32 -1.0, %v17105_v48  ;;  %vm15351_vm14 = vcmp.gt.f32.partialorder %v23874_v21, 0.0  ;;  %v23961_v29 = vmul.f32 %v15227_v50, %v23828_v13  ;;  %v14121_v6 = vrot.slane %v14120_v55, 1 }
 0x62b   :  { %v16386_v54 = vadd.f32 -1.0, %v17107_v5  ;;  %v23964_v49 = vmul.f32 %v15247_v24, %v23768_v8  ;;  %17124 = vpow2.f32 %v15440_v41  ;;  %v15403_v10 = vmin.f32 %v23948_v53, 0.0 }
 0x62c   :  { %v15642_v42 = vsel %vm15572_vm3, %v23915_v44, %v15641_v39  ;;  %v16387_v3 = vadd.f32 -1.0, %v17109_v60  ;;  %vm15353_vm12 = vcmp.gt.f32.partialorder %v23866_v28, 0.0  ;;  %v15392_v22 = vmin.f32 %v23961_v29, 0.0 }
 0x62d   :  { %vm15673_vm11 = vcmask 64512   ;;  %v14124_v13 = vrot.slane %v14123_v33, 4  ;;  %v16388_v51 = vadd.f32 -1.0, %v17111_v59  ;;  %v15442_v43 = vmul.f32 1.442695, %v15394_v4  ;;  %v15287_v24 = vpop.permute.xlu1 %15286 }
 0x62e   :  { %v15405_v62 = vmin.f32 %v23956_v37, 0.0  ;;  %v23973_v8 = vmul.f32 %v15297_v25, %v23868_v58  ;;  %vm15680_vm15 = vcmask 130048   ;;  %v17113_v7 = vpop.eup %17112  ;;  %v15514_v44 = vsel %vm15354_vm6, %v23839_v45, %v16391_v11  ;;  %v15307_v11 = vpop.permute.xlu0 %15306 }
 0x62f   :  { %v15438_v32 = vmul.f32 1.442695, %v15392_v22  ;;  %v23979_v12 = vmul.f32 %v15287_v24, %v23849_v38  ;;  %v14122_v63 = vadd.f32 %v14121_v6, %v14120_v55  ;;  %v15509_v18 = vsel %vm15349_vm7, %v23843_v52, %v16386_v54 }
 0x630   :  { %vm15352_vm5 = vcmp.gt.f32.partialorder %v23910_v23, 0.0  ;;  %v15396_v58 = vmin.f32 %v23964_v49, 0.0  ;;  %v15460_v46 = vmul.f32 1.442695, %v15403_v10  ;;  %v17115_v25 = vpop.eup %17114  ;;  %v15510_v48 = vsel %vm15350_vm8, %v23854_v0, %v16387_v3 }
 0x631   :  { %17126 = vpow2.f32 %v15438_v32  ;;  %v15404_v45 = vmin.f32 %v23979_v12, 0.0  ;;  %v14125_v38 = vadd.f32 %v14124_v13, %v14123_v33  ;;  %v17117_v41 = vpop.eup %17116  ;;  %vm15357_vm2 = vcmp.gt.f32.partialorder %v23833_v61, 0.0  ;;  %v15257_v39 = vpop.permute.xlu1 %15256 }
 0x632   :  { %v15648_v52 = vsel %vm15570_vm1, %v23928_v19, %v15514_v44  ;;  %v15511_v55 = vsel %vm15351_vm14, %v23874_v21, %v16388_v51  ;;  %v16390_v5 = vadd.f32 -1.0, %v17113_v7  ;;  %v15406_v60 = vmin.f32 %v23973_v8, 0.0  ;;  %v23997_v4 = vpop.eup %17118 }
 0x633   :  { %v15643_v0 = vsel %vm15574_vm9, %v15509_v18, %v15642_v42  ;;  %v16389_v50 = vadd.f32 -1.0, %v17117_v41  ;;  %v15462_v33 = vmul.f32 1.442695, %v15404_v45  ;;  %v24001_v59 = vmul.f32 %v15257_v39, %v23857_v26  ;;  %v17121_v6 = vpop.eup %17120 }
 0x634   :  { %v15644_v19 = vsel %vm15576_vm10, %v15510_v48, %v15643_v0  ;;  %v15446_v54 = vmul.f32 1.442695, %v15396_v58  ;;  %17128 = vpow2.f32 %v15460_v46  ;;  %v24004_v21 = vmul.f32 %v15302_v14, %v14115_v35 }
 0x635   :  { %vm15358_vm6 = vcmp.gt.f32.partialorder %v23880_v9, 0.0  ;;  %v15645_v10 = vsel %vm15578_vm13, %v15511_v55, %v15644_v19  ;;  %v15512_v42 = vsel %vm15352_vm5, %v23910_v23, %v16389_v50  ;;  %v15398_v3 = vmin.f32 %v24001_v59, 0.0  ;;  %v24012_v22 = vpop.eup %17122  ;;  %v15262_v51 = vpop.permute.xlu1 %15261 }
 0x636   :  { %v14126_v26 = vrot.slane %v14125_v38, 2  ;;  %v15513_v13 = vsel %vm15353_vm12, %v23866_v28, %v16390_v5  ;;  %v15646_v35 = vsel %vm15580_vm0, %v15512_v42, %v15645_v10  ;;  %17130 = vpow2.f32 %v15462_v33  ;;  %v25805_v10 = vld [vmem:[#allocation76_spill] sm:$0xff] }
 0x637   :  { %v24018_v14 = vmul.f32 %v15307_v11, %v14122_v63  ;;  %17132 = vpow2.f32 %v15442_v43  ;;  %v15464_v24 = vmul.f32 1.442695, %v15405_v62  ;;  %v24021_v7 = vmul.f32 %v15262_v51, %v23870_v17 }
 0x638   :  { %v15647_v23 = vsel %vm15582_vm4, %v15513_v13, %v15646_v35  ;;  %17134 = vpow2.f32 %v15446_v54  ;;  %v15407_v44 = vmin.f32 %v24004_v21, 0.0  ;;  %v15450_v32 = vmul.f32 1.442695, %v15398_v3  ;;  %v17125_v18 = vpop.eup %17124  ;;  %v25806_v35 = vld [vmem:[#allocation102_spill] sm:$0xff] }
 0x639   :  { %v15674_v28 = vsel %vm15673_vm11, %v23355_v31, %v15647_v23  ;;  %vm9399_vm7 = vcmp.gt.f32.partialorder %v23218_v40, 0.0  ;;  %v15649_v63 = vsel %vm15572_vm3, %v23941_v15, %v15648_v52  ;;  %v16396_v43 = vadd.f32 -1.0, %v17121_v6  ;;  %v15267_v45 = vpop.permute.xlu1 %15266 }
 0x63a   :  { %v15399_v62 = vmin.f32 %v24021_v7, 0.0  ;;  %16491 = vmatprep.mubr.msk.f32.mxu1 %vm15680_vm15, %v15674_v28  ;;  %v14127_v17 = vadd.f32 %v14126_v26, %v14125_v38  ;;  %v16395_v58 = vadd.f32 -1.0, %v17115_v25  ;;  %17136 = vpow2.f32 %v23951_v36  ;;  %v25804_v36 = vld [vmem:[#allocation43_spill] sm:$0xff]  ;;  %v25808_v28 = vld [vmem:[#allocation98_spill] sm:$0xff] }
 0x63b   :  { %v15466_v46 = vmul.f32 1.442695, %v15406_v60  ;;  %v15408_v48 = vmin.f32 %v24018_v14, 0.0  ;;  %v15517_v31 = vsel %vm15357_vm2, %v23833_v61, %v23944_v16  ;;  %17138 = vpow2.f32 %v15464_v24 }
 0x63c   :  { %v15452_v15 = vmul.f32 1.442695, %v15399_v62  ;;  %v24039_v41 = vmul.f32 %v15267_v45, %v23876_v34  ;;  %v15650_v52 = vsel %vm15574_vm9, %v15517_v31, %v15649_v63  ;;  %vm15359_vm8 = vcmp.gt.f32.partialorder %v23892_v57, 0.0  ;;  %v25810_v63 = vld [vmem:[#allocation112_spill] sm:$0xff] }
 0x63d   :  { %v15468_v25 = vmul.f32 1.442695, %v15407_v44  ;;  %17140 = vpow2.f32 %v15450_v32  ;;  %vm9400_vm14 = vcmp.gt.f32.partialorder %v25804_v36, 0.0  ;;  %v15519_v38 = vsel %vm15359_vm8, %v23892_v57, %v16396_v43  ;;  %v15272_v39 = vpop.permute.xlu1 %15271  ;;  %v15780_v44 = vld [vmem:[%s24303_s6 + $0x8] sm:$0xff]  ;;  %v25811_v43 = vld [vmem:[#allocation87_spill] sm:$0xff] }
 0x63e   :  { %17142 = vpow2.f32 %v15452_v15  ;;  %v15400_v55 = vmin.f32 %v24039_v41, 0.0  ;;  %v14128_v5 = vrot.slane %v14127_v17, 1  ;;  %v17127_v61 = vpop.eup %17126  ;;  %v15518_v34 = vsel %vm15358_vm6, %v23880_v9, %v16395_v58  ;;  %v15779_v15 = vld [vmem:[%s24303_s6] sm:$0xff] }
 0x63f   :  { %v16398_v16 = vadd.f32 -1.0, %v17125_v18  ;;  %17144 = vpow2.f32 %v15466_v46  ;;  %v15470_v60 = vmul.f32 1.442695, %v15408_v48  ;;  %v15651_v0 = vsel %vm15576_vm10, %v15518_v34, %v15650_v52  ;;  %v25809_v18 = vld [vmem:[#allocation140_spill] sm:$0xff]  ;;  %v25813_v52 = vld [vmem:[#allocation141_spill] sm:$0xff] }
 0x640   :  { %v16397_v50 = vadd.f32 -1.0, %v17127_v61  ;;  %v15454_v33 = vmul.f32 1.442695, %v15400_v55  ;;  %v24051_v11 = vmul.f32 %v15272_v39, %v23895_v2  ;;  %v15652_v57 = vsel %vm15578_vm13, %v15519_v38, %v15651_v0  ;;  %v25814_v38 = vld [vmem:[#allocation11_spill] sm:$0xff] }
 0x641   :  { %vm15361_vm12 = vcmp.gt.f32.partialorder %v23918_v56, 0.0  ;;  %vm15360_vm5 = vcmp.gt.f32.partialorder %v23961_v29, 0.0  ;;  %17146 = vpow2.f32 %v15468_v25  ;;  %v17129_v6 = vpop.eup %17128  ;;  %v14129_v54 = vadd.f32 %v14128_v5, %v14127_v17  ;;  %v15312_v26 = vpop.permute.xlu1 %15311  ;;  %v25812_v17 = vld [vmem:[#allocation44_spill] sm:$0xff] }
 0x642   :  { %v15520_v9 = vsel %vm15360_vm5, %v23961_v29, %v16397_v50  ;;  %17148 = vpow2.f32 %v15454_v33  ;;  %v15401_v19 = vmin.f32 %v24051_v11, 0.0  ;;  %v9559_v2 = vsel %vm9399_vm7, %v23218_v40, %v25805_v10  ;;  %v25807_v40 = vld [vmem:[#allocation124_spill] sm:$0xff] }
 0x643   :  { %v15521_v42 = vsel %vm15361_vm12, %v23918_v56, %v16398_v16  ;;  %v15653_v3 = vsel %vm15580_vm0, %v15520_v9, %v15652_v57  ;;  %17150 = vpow2.f32 %v15470_v60  ;;  %v17131_v13 = vpop.eup %17130  ;;  %v16372_v51 = vadd.f32 -1.0, %v25806_v35  ;;  %v25815_v5 = vld [vmem:[#allocation68_spill] sm:$0xff]  ;;  %v25817_v57 = vld [vmem:[#allocation119_spill] sm:$0xff] }
 0x644   :  { %v15654_v29 = vsel %vm15582_vm4, %v15521_v42, %v15653_v3  ;;  %v15456_v24 = vmul.f32 1.442695, %v15401_v19  ;;  %v24066_v23 = vmul.f32 %v15312_v26, %v14129_v54  ;;  %v17133_v32 = vpop.eup %17132  ;;  %v24074_v56 = vsel %vm15578_vm13, %v25808_v28, %v25807_v40  ;;  %v25818_v40 = vld [vmem:[#allocation61_spill] sm:$0xff] }
 0x645   :  { %vm9395_vm2 = vcmp.gt.f32.partialorder %v25809_v18, 0.0  ;;  %v15599_v62 = vsel %vm15572_vm3, %v25811_v43, %v25810_v63  ;;  %v15675_v58 = vsel %vm15673_vm11, %v25812_v17, %v15654_v29  ;;  %v17135_v46 = vpop.eup %17134  ;;  %v16408_v45 = vadd.f32 -1.0, %v17129_v6 }
 0x646   :  { %v15600_v48 = vsel %vm15574_vm9, %v9559_v2, %v15599_v62  ;;  %17152 = vpow2.f32 %v15456_v24  ;;  %v15409_v31 = vmin.f32 %v24066_v23, 0.0  ;;  %16492 = vmatmul.mubr.msk.f32.vlgmr.msra.gmra.mxu1 %vm15680_vm15, %v15675_v58  ;;  %v9560_v25 = vsel %vm9400_vm14, %v25804_v36, %v25813_v52  ;;  %v25819_v52 = vld [vmem:[#allocation110_spill] sm:$0xff] }
 0x647   :  { %v24094_v55 = vsel %vm9395_vm2, %v25809_v18, %v25814_v38  ;;  %vm9401_vm6 = vcmp.gt.f32.partialorder %v25815_v5, 0.0  ;;  %v16409_v61 = vadd.f32 -1.0, %v17131_v13  ;;  %16498 = vmatpush3.msra.mxu1 %v15780_v44  ;;  %v17137_v34 = vpop.eup %17136  ;;  %v16407_v60 = vadd.f32 -1.0, %v24012_v22 }
 0x648   :  { %v9561_v16 = vsel %vm9401_vm6, %v25815_v5, %v16372_v51  ;;  %v16399_v39 = vadd.f32 -1.0, %v17133_v32  ;;  %v15472_v0 = vmul.f32 1.442695, %v15409_v31  ;;  %v25816_v50 = vmov 0.0   ;;  %v17139_v33 = vpop.eup %17138 }
 0x649   :  { %16499 = vmatprep.subr.mxu1 %v25816_v50  ;;  %v24101_v36 = vadd.f32 -1.0, %v25817_v57  ;;  %v15601_v6 = vsel %vm15576_vm10, %v9560_v25, %v15600_v48  ;;  %v16401_v9 = vadd.f32 -1.0, %v17135_v46  ;;  %vm15371_vm7 = vcmp.gt.f32.partialorder %v23948_v53, 0.0  ;;  %v25821_v57 = vld [vmem:[#allocation35_spill] sm:$0xff] }
 0x64a   :  { %16500 = vmatpush3.msra.mxu1 %v15779_v15  ;;  %v17141_v19 = vpop.eup %17140  ;;  %v16400_v54 = vadd.f32 -1.0, %v23997_v4  ;;  %v15531_v10 = vsel %vm15371_vm7, %v23948_v53, %v16408_v45  ;;  %vm15372_vm8 = vcmp.gt.f32.partialorder %v23979_v12, 0.0  ;;  %17154 = vpow2.f32 %v15472_v0 }
 0x64b   :  { %v17143_v22 = vpop.eup %17142  ;;  %v24109_v2 = vsel %vm15578_vm13, %v9561_v16, %v15601_v6  ;;  %vm15370_vm14 = vcmp.gt.f32.partialorder %v23900_v47, 0.0  ;;  %vm15362_vm12 = vcmp.gt.f32.partialorder %v23935_v1, 0.0  ;;  %v15532_v42 = vsel %vm15372_vm8, %v23979_v12, %v16409_v61 }
 0x64c   :  { %v17145_v3 = vpop.eup %17144  ;;  %v15530_v26 = vsel %vm15370_vm14, %v23900_v47, %v16407_v60  ;;  %v15522_v4 = vsel %vm15362_vm12, %v23935_v1, %v16399_v39  ;;  %vm15364_vm5 = vcmp.gt.f32.partialorder %v23964_v49, 0.0  ;;  %v16410_v53 = vadd.f32 -1.0, %v17139_v33 }
 0x64d   :  { %vm15363_vm2 = vcmp.gt.f32.partialorder %v23886_v20, 0.0  ;;  %v15524_v13 = vsel %vm15364_vm5, %v23964_v49, %v16401_v9  ;;  %v15662_v35 = vsel %vm15570_vm1, %v15531_v10, %v15530_v26  ;;  %v16403_v51 = vadd.f32 -1.0, %v17141_v19 }
 0x64e   :  { %v17147_v29 = vpop.eup %17146  ;;  %v15523_v24 = vsel %vm15363_vm2, %v23886_v20, %v16400_v54  ;;  %v16402_v44 = vadd.f32 -1.0, %v17137_v34  ;;  %v15663_v12 = vsel %vm15572_vm3, %v15532_v42, %v15662_v35  ;;  %v16404_v32 = vadd.f32 -1.0, %v17143_v22 }
 0x64f   :  { %v17149_v47 = vpop.eup %17148  ;;  %vm9403_vm6 = vcmp.gt.f32.partialorder %v25818_v40, 0.0  ;;  %v15655_v1 = vsel %vm15570_vm1, %v15523_v24, %v15522_v4  ;;  %vm15365_vm7 = vcmp.gt.f32.partialorder %v23923_v30, 0.0  ;;  %vm15373_vm8 = vcmp.gt.f32.partialorder %v23956_v37, 0.0 }
 0x650   :  { %v16411_v49 = vadd.f32 -1.0, %v17145_v3  ;;  %v17151_v28 = vpop.eup %17150  ;;  %v15656_v18 = vsel %vm15572_vm3, %v15524_v13, %v15655_v1  ;;  %v15533_v63 = vsel %vm15373_vm8, %v23956_v37, %v16410_v53  ;;  %vm15366_vm14 = vcmp.gt.f32.partialorder %v24001_v59, 0.0 }
 0x651   :  { %v16405_v20 = vadd.f32 -1.0, %v17149_v47  ;;  %vm15374_vm12 = vcmp.gt.f32.partialorder %v23973_v8, 0.0  ;;  %v15664_v43 = vsel %vm15574_vm9, %v15533_v63, %v15663_v12  ;;  %v15526_v62 = vsel %vm15366_vm14, %v24001_v59, %v16403_v51  ;;  %v25822_v12 = vld [vmem:[#allocation3_spill] sm:$0xff] }
 0x652   :  { %vm15367_vm5 = vcmp.gt.f32.partialorder %v24021_v7, 0.0  ;;  %v15525_v17 = vsel %vm15365_vm7, %v23923_v30, %v16402_v44  ;;  %v16412_v58 = vadd.f32 -1.0, %v17147_v29  ;;  %vm15368_vm2 = vcmp.gt.f32.partialorder %v24039_v41, 0.0 }
 0x653   :  { %v15527_v46 = vsel %vm15367_vm5, %v24021_v7, %v16404_v32  ;;  %v17153_v48 = vpop.eup %17152  ;;  %v15534_v37 = vsel %vm15374_vm12, %v23973_v8, %v16411_v49  ;;  %v15657_v45 = vsel %vm15574_vm9, %v15525_v17, %v15656_v18  ;;  %v16413_v31 = vadd.f32 -1.0, %v17151_v28  ;;  %v25820_v8 = vld [vmem:[#allocation127_spill] sm:$0xff] }
 0x654   :  { %v15528_v15 = vsel %vm15368_vm2, %v24039_v41, %v16405_v20  ;;  %v16374_v25 = vadd.f32 -1.0, %v25819_v52  ;;  %v15665_v59 = vsel %vm15576_vm10, %v15534_v37, %v15664_v43  ;;  %v15658_v38 = vsel %vm15576_vm10, %v15526_v62, %v15657_v45 }
 0x655   :  { %v16406_v30 = vadd.f32 -1.0, %v17153_v48  ;;  %vm15375_vm7 = vcmp.gt.f32.partialorder %v24004_v21, 0.0  ;;  %v15659_v7 = vsel %vm15578_vm13, %v15527_v46, %v15658_v38  ;;  %vm15369_vm8 = vcmp.gt.f32.partialorder %v24051_v11, 0.0 }
 0x656   :  { %v15596_v5 = vsel %vm15580_vm0, %v25820_v8, %v24074_v56  ;;  %v15535_v61 = vsel %vm15375_vm7, %v24004_v21, %v16412_v58  ;;  %vm15376_vm14 = vcmp.gt.f32.partialorder %v24018_v14, 0.0  ;;  %v15660_v41 = vsel %vm15580_vm0, %v15528_v15, %v15659_v7 }
 0x657   :  { %v15529_v34 = vsel %vm15369_vm8, %v24051_v11, %v16406_v30  ;;  %v17155_v16 = vpop.eup %17154  ;;  %v15666_v60 = vsel %vm15578_vm13, %v15535_v61, %v15665_v59  ;;  %v15536_v39 = vsel %vm15376_vm14, %v24018_v14, %v16413_v31  ;;  %v15597_v0 = vsel %vm15582_vm4, %v24094_v55, %v15596_v5 }
 0x658   :  { %v15661_v33 = vsel %vm15582_vm4, %v15529_v34, %v15660_v41  ;;  %vm9402_vm12 = vcmp.gt.f32.partialorder %v25821_v57, 0.0  ;;  %v9563_v21 = vsel %vm9403_vm6, %v25818_v40, %v16374_v25  ;;  %v16414_v56 = vadd.f32 -1.0, %v17155_v16 }
 0x659   :  { %v15676_v6 = vsel %vm15673_vm11, %v15597_v0, %v15661_v33  ;;  %v9562_v11 = vsel %vm9402_vm12, %v25821_v57, %v24101_v36  ;;  %vm15377_vm5 = vcmp.gt.f32.partialorder %v24066_v23, 0.0  ;;  %v15667_v14 = vsel %vm15580_vm0, %v15536_v39, %v15666_v60  ;;  %v15778_v36 = vld [vmem:[%s24304_s2] sm:$0xff] }
 0x65a   :  { %16494 = vmatprep.mubr.msk.f32.mxu1 %vm15680_vm15, %v15676_v6  ;;  %v15537_v55 = vsel %vm15377_vm5, %v24066_v23, %v16414_v56  ;;  %v15603_v9 = vsel %vm15580_vm0, %v9562_v11, %v24109_v2  ;;  %vm17226_vm6 = vmmov 0   ;;  %vm15988_vm8 = vcmask 3072  }
 0x65b   :  { %v15604_v19 = vsel %vm15582_vm4, %v9563_v21, %v15603_v9  ;;  %v15668_v54 = vsel %vm15582_vm4, %v15537_v55, %v15667_v14 }
 0x65c   :  { %v15677_v10 = vsel %vm15673_vm11, %v15604_v19, %v15668_v54 }
 0x65d   :  { %16495 = vmatmul.mubr.msk.f32.gmra.mxu1 %vm15680_vm15, %v15677_v10 }
 0x65e   :  { %16501 = vmatprep.mubr.msk.f32.mxu1 %vm17226_vm6, %v25816_v50 }
 0x661   :  { %16502 = vmatmul.mubr.msk.f32.vlgmr.msra.gmra.mxu1 %vm15680_vm15, %v15778_v36 }
 0x706   :  { %v16493_v23 = vpop.f32.mrf.mxu1 }
 0x707   :  { %v15859_v22 = vcombine.high %v16493_v23, %v16493_v23  ;;  %16073 = vrot.lane.b32.xlu0 %v16493_v23, %s17227_s9 }
 0x708   :  { %v15759_v2 = vpop.f32.mrf.mxu1 }
 0x709   :  { %16075 = vrot.lane.b32.xlu1 %v15859_v22, %s17227_s9  ;;  %v15858_v42 = vcombine.high %v15759_v2, %v15759_v2 }
 0x70b   :  { %16069 = vrot.lane.b32.xlu0 %v15759_v2, %s17227_s9 }
 0x70d   :  { %16071 = vrot.lane.b32.xlu1 %v15858_v42, %s17227_s9 }
 0x71d   :  { %v24179_v3 = vpop.f32.mrf.mxu1 }
 0x71e   :  { %v24184_v35 = vcombine.high %v24179_v3, %v24179_v3 }
 0x71f   :  { %v15769_v26 = vpop.f32.mrf.mxu1 }
 0x720   :  { %v15860_v4 = vcombine.high %v15769_v26, %v15769_v26  ;;  %16077 = vrot.lane.b32.xlu0 %v15769_v26, %s17227_s9 }
 0x721   :  { %v15850_v50 = vpop.f32.mrf.mxu1 }
 0x722   :  { %v15874_v53 = vrot.slane %v15850_v50, %v17359_v27  ;;  %16079 = vrot.lane.b32.xlu1 %v15860_v4, %s17227_s9  ;;  %v15867_v47 = vcombine.high %v15850_v50, %v15850_v50 }
 0x723   :  { %v16503_v13 = vpop.f32.mrf.mxu1 }
 0x724   :  { %v15882_v51 = vcombine.high %v15874_v53, %v15874_v53  ;;  %v15890_v29 = vrot.slane %v15874_v53, %v17359_v27  ;;  %16081 = vrot.lane.b32.xlu0 %v24179_v3, %s17227_s9  ;;  %v15881_v43 = vrot.slane %v15867_v47, %v17359_v27 }
 0x726   :  { %v15904_v24 = vrot.slane %v15882_v51, %v17359_v27  ;;  %v15912_v44 = vcombine.high %v15890_v29, %v15890_v29  ;;  %16083 = vrot.lane.b32.xlu1 %v24184_v35, %s17227_s9  ;;  %v15919_v32 = vrot.slane %v15890_v29, %v25822_v12  ;;  %v15883_v45 = vcombine.high %v15881_v43, %v15881_v43 }
 0x727   :  { %v15897_v31 = vrot.slane %v15881_v43, %v17359_v27 }
 0x728   :  { %v15914_v40 = vcombine.high %v15904_v24, %v15904_v24  ;;  %v15923_v1 = vrot.slane %v15904_v24, %v25822_v12  ;;  %v15927_v49 = vrot.slane %v15912_v44, %v25822_v12  ;;  %v15956_v28 = vadd.f32 %v15919_v32, %v15759_v2 }
 0x729   :  { %v15911_v8 = vrot.slane %v15883_v45, %v17359_v27  ;;  %v15935_v34 = vrot.slane %v15897_v31, %v25822_v12  ;;  %v15913_v0 = vcombine.high %v15897_v31, %v15897_v31 }
 0x72a   :  { %v15931_v18 = vrot.slane %v15914_v40, %v25822_v12  ;;  %v15957_v63 = vadd.f32 %v15923_v1, %v15858_v42  ;;  %v15958_v20 = vadd.f32 %v16493_v23, %v15927_v49  ;;  %vm15964_vm11 = vcmp.gt.f32.partialorder %v15956_v28, 0.0 }
 0x72b   :  { %v15972_v17 = vmul.f32 0.2, %v15956_v28  ;;  %v15939_v33 = vrot.slane %v15911_v8, %v25822_v12  ;;  %v15915_v56 = vcombine.high %v15911_v8, %v15911_v8  ;;  %v15960_v6 = vadd.f32 %v15935_v34, %v15769_v26 }
 0x72c   :  { %v15959_v62 = vadd.f32 %v15931_v18, %v15859_v22  ;;  %vm15965_vm15 = vcmp.gt.f32.partialorder %v15957_v63, 0.0  ;;  %vm15966_vm2 = vcmp.gt.f32.partialorder %v15958_v20, 0.0  ;;  %v15973_v58 = vmul.f32 0.2, %v15957_v63 }
 0x72d   :  { %v15974_v46 = vmul.f32 0.2, %v15958_v20  ;;  %v24195_v37 = vsel %vm15964_vm11, %v15956_v28, %v15972_v17  ;;  %v15943_v55 = vrot.slane %v15913_v0, %v25822_v12  ;;  %v15961_v27 = vadd.f32 %v15939_v33, %v15860_v4 }
 0x72e   :  { %vm15967_vm7 = vcmp.gt.f32.partialorder %v15959_v62, 0.0  ;;  %v15975_v48 = vmul.f32 0.2, %v15959_v62  ;;  %v24198_v15 = vsel %vm15965_vm15, %v15957_v63, %v15973_v58  ;;  %v15989_v25 = vsel %vm15988_vm8, %v24195_v37, -inf }
 0x72f   :  { %v15982_v52 = vsel %vm15966_vm2, %v15958_v20, %v15974_v46  ;;  %v15996_v38 = vsel %vm15988_vm8, %v24198_v15, -inf  ;;  %v15990_v5 = vrot.slane %v15989_v25, 4  ;;  %v15947_v54 = vrot.slane %v15915_v56, %v25822_v12 }
 0x730   :  { %v24202_v59 = vsel %vm15967_vm7, %v15959_v62, %v15975_v48  ;;  %v16003_v30 = vsel %vm15988_vm8, %v15982_v52, -inf  ;;  %v15997_v16 = vrot.slane %v15996_v38, 4  ;;  %v15976_v10 = vmul.f32 0.2, %v15960_v6 }
 0x731   :  { %v16010_v7 = vsel %vm15988_vm8, %v24202_v59, -inf  ;;  %v16004_v61 = vrot.slane %v16003_v30, 4  ;;  %v15991_v57 = vmax.f32 %v15989_v25, %v15990_v5  ;;  %vm15968_vm14 = vcmp.gt.f32.partialorder %v15960_v6, 0.0 }
 0x732   :  { %v16011_v41 = vrot.slane %v16010_v7, 4  ;;  %v15998_v11 = vmax.f32 %v15996_v38, %v15997_v16  ;;  %v15962_v22 = vadd.f32 %v24179_v3, %v15943_v55  ;;  %v15977_v2 = vmul.f32 0.2, %v15961_v27 }
 0x733   :  { %v16005_v60 = vmax.f32 %v16003_v30, %v16004_v61  ;;  %v15992_v9 = vrot.slane %v15991_v57, 2  ;;  %v15963_v26 = vadd.f32 %v15947_v54, %v24184_v35  ;;  %vm15969_vm12 = vcmp.gt.f32.partialorder %v15961_v27, 0.0 }
 0x734   :  { %v16012_v39 = vmax.f32 %v16010_v7, %v16011_v41  ;;  %v15999_v36 = vrot.slane %v15998_v11, 2  ;;  %v24216_v53 = vsel %vm15968_vm14, %v15960_v6, %v15976_v10  ;;  %vm15970_vm5 = vcmp.gt.f32.partialorder %v15962_v22, 0.0 }
 0x735   :  { %v16006_v21 = vrot.slane %v16005_v60, 2  ;;  %v15993_v42 = vmax.f32 %v15991_v57, %v15992_v9  ;;  %v15978_v51 = vmul.f32 0.2, %v15962_v22  ;;  %v24218_v29 = vsel %vm15969_vm12, %v15961_v27, %v15977_v2 }
 0x736   :  { %v16013_v14 = vrot.slane %v16012_v39, 2  ;;  %v16000_v13 = vmax.f32 %v15998_v11, %v15999_v36  ;;  %v16017_v12 = vsel %vm15988_vm8, %v24216_v53, -inf  ;;  %v15979_v3 = vmul.f32 0.2, %v15963_v26 }
 0x737   :  { %v16007_v19 = vmax.f32 %v16005_v60, %v16006_v21  ;;  %v15994_v24 = vrot.slane %v15993_v42, 1  ;;  %vm15971_vm6 = vcmp.gt.f32.partialorder %v15963_v26, 0.0  ;;  %v24222_v40 = vsel %vm15970_vm5, %v15962_v22, %v15978_v51 }
 0x738   :  { %v16014_v23 = vmax.f32 %v16012_v39, %v16013_v14  ;;  %v16001_v32 = vrot.slane %v16000_v13, 1  ;;  %v16018_v35 = vrot.slane %v16017_v12, 4  ;;  %v16024_v1 = vsel %vm15988_vm8, %v24218_v29, -inf }
 0x739   :  { %v16008_v50 = vrot.slane %v16007_v19, 1  ;;  %v15995_v49 = vmax.f32 %v15993_v42, %v15994_v24  ;;  %v24226_v18 = vsel %vm15971_vm6, %v15963_v26, %v15979_v3  ;;  %v16025_v20 = vrot.slane %v16024_v1, 4 }
 0x73a   :  { %v16015_v4 = vrot.slane %v16014_v23, 1  ;;  %v16002_v63 = vmax.f32 %v16000_v13, %v16001_v32  ;;  %v16031_v43 = vsel %vm15988_vm8, %v24222_v40, -inf  ;;  %v16019_v17 = vmax.f32 %v16017_v12, %v16018_v35 }
 0x73b   :  { %v16009_v44 = vmax.f32 %v16007_v19, %v16008_v50  ;;  %v16045_v58 = vsub.f32 %v24195_v37, %v15995_v49  ;;  %v16038_v48 = vsel %vm15988_vm8, %v24226_v18, -inf  ;;  %v16032_v45 = vrot.slane %v16031_v43, 4 }
 0x73c   :  { %v16016_v47 = vmax.f32 %v16014_v23, %v16015_v4  ;;  %v16026_v31 = vmax.f32 %v16024_v1, %v16025_v20  ;;  %v16020_v38 = vrot.slane %v16019_v17, 2  ;;  %v16039_v30 = vrot.slane %v16038_v48, 4 }
 0x73d   :  { %v16047_v28 = vsub.f32 %v15982_v52, %v16009_v44  ;;  %v16046_v52 = vsub.f32 %v24198_v15, %v16002_v63  ;;  %v16053_v7 = vmul.f32 1.442695, %v16045_v58  ;;  %v16033_v8 = vmax.f32 %v16031_v43, %v16032_v45 }
 0x73e   :  { %v16048_v62 = vsub.f32 %v24202_v59, %v16016_v47  ;;  %v16027_v5 = vrot.slane %v16026_v31, 2  ;;  %v16021_v61 = vmax.f32 %v16019_v17, %v16020_v38  ;;  %v16040_v41 = vmax.f32 %v16038_v48, %v16039_v30 }
 0x73f   :  { %v16057_v46 = vmul.f32 1.442695, %v16047_v28  ;;  %v16055_v59 = vmul.f32 1.442695, %v16046_v52  ;;  %v16034_v37 = vrot.slane %v16033_v8, 2 }
 0x740   :  { %v16059_v25 = vmul.f32 1.442695, %v16048_v62  ;;  %v16028_v34 = vmax.f32 %v16026_v31, %v16027_v5  ;;  %v16022_v16 = vrot.slane %v16021_v61, 1  ;;  %v16041_v60 = vrot.slane %v16040_v41, 2 }
 0x741   :  { %17156 = vpow2.f32 %v16057_v46  ;;  %v16035_v39 = vmax.f32 %v16033_v8, %v16034_v37 }
 0x742   :  { %17158 = vpow2.f32 %v16059_v25  ;;  %v16029_v0 = vrot.slane %v16028_v34, 1  ;;  %v16023_v15 = vmax.f32 %v16021_v61, %v16022_v16  ;;  %v16042_v33 = vmax.f32 %v16040_v41, %v16041_v60 }
 0x743   :  { %17160 = vpow2.f32 %v16053_v7  ;;  %v16036_v21 = vrot.slane %v16035_v39, 1 }
 0x744   :  { %17162 = vpow2.f32 %v16055_v59  ;;  %v16030_v56 = vmax.f32 %v16028_v34, %v16029_v0  ;;  %v16049_v11 = vsub.f32 %v24216_v53, %v16023_v15  ;;  %v16043_v14 = vrot.slane %v16042_v33, 1 }
 0x745   :  { %v16037_v9 = vmax.f32 %v16035_v39, %v16036_v21 }
 0x746   :  { %v16050_v54 = vsub.f32 %v24218_v29, %v16030_v56  ;;  %v16061_v23 = vmul.f32 1.442695, %v16049_v11  ;;  %v16044_v22 = vmax.f32 %v16042_v33, %v16043_v14 }
 0x747   :  { %v16051_v50 = vsub.f32 %v24222_v40, %v16037_v9 }
 0x748   :  { %v16063_v53 = vmul.f32 1.442695, %v16050_v54  ;;  %17164 = vpow2.f32 %v16061_v23  ;;  %v16052_v51 = vsub.f32 %v24226_v18, %v16044_v22 }
 0x749   :  { %v16065_v44 = vmul.f32 1.442695, %v16051_v50 }
 0x74a   :  { %17166 = vpow2.f32 %v16063_v53  ;;  %v16067_v32 = vmul.f32 1.442695, %v16052_v51 }
 0x74b   :  { %17168 = vpow2.f32 %v16065_v44 }
 0x74c   :  { %17170 = vpow2.f32 %v16067_v32 }
 0x74e   :  { %v17157_v57 = vpop.eup %17156 }
 0x74f   :  { %v17159_v6 = vpop.eup %17158  ;;  %v16171_v55 = vsel %vm15988_vm8, %v17157_v57, 0.0 }
 0x750   :  { %v17161_v27 = vpop.eup %17160  ;;  %v16178_v19 = vsel %vm15988_vm8, %v17159_v6, 0.0  ;;  %v16172_v36 = vrot.slane %v16171_v55, 4 }
 0x751   :  { %v24239_v10 = vpop.eup %17162  ;;  %v16157_v2 = vsel %vm15988_vm8, %v17161_v27, 0.0  ;;  %v16179_v42 = vrot.slane %v16178_v19, 4 }
 0x752   :  { %v16164_v26 = vsel %vm15988_vm8, %v24239_v10, 0.0  ;;  %v16158_v13 = vrot.slane %v16157_v2, 4  ;;  %v16173_v4 = vadd.f32 %v16172_v36, %v16171_v55 }
 0x753   :  { %v16180_v29 = vadd.f32 %v16179_v42, %v16178_v19  ;;  %v16165_v24 = vrot.slane %v16164_v26, 4 }
 0x754   :  { %v16174_v12 = vrot.slane %v16173_v4, 2  ;;  %v16159_v3 = vadd.f32 %v16158_v13, %v16157_v2 }
 0x755   :  { %v16181_v47 = vrot.slane %v16180_v29, 2  ;;  %v16166_v35 = vadd.f32 %v16165_v24, %v16164_v26  ;;  %v24246_v43 = vpop.eup %17164 }
 0x756   :  { %v16175_v40 = vadd.f32 %v16174_v12, %v16173_v4  ;;  %v16160_v1 = vrot.slane %v16159_v3, 2  ;;  %v16185_v46 = vsel %vm15988_vm8, %v24246_v43, 0.0 }
 0x757   :  { %v16182_v49 = vadd.f32 %v16181_v47, %v16180_v29  ;;  %v16167_v28 = vrot.slane %v16166_v35, 2  ;;  %v24250_v48 = vpop.eup %17166  ;;  %v16186_v30 = vrot.slane %v16185_v46, 4 }
 0x758   :  { %v16176_v63 = vrot.slane %v16175_v40, 1  ;;  %v16161_v20 = vadd.f32 %v16160_v1, %v16159_v3  ;;  %v24252_v25 = vpop.eup %17168  ;;  %v16192_v5 = vsel %vm15988_vm8, %v24250_v48, 0.0 }
 0x759   :  { %v16183_v18 = vrot.slane %v16182_v49, 1  ;;  %v16168_v62 = vadd.f32 %v16167_v28, %v16166_v35  ;;  %v24256_v59 = vpop.eup %17170  ;;  %v16199_v60 = vsel %vm15988_vm8, %v24252_v25, 0.0  ;;  %v16187_v15 = vadd.f32 %v16186_v30, %v16185_v46 }
 0x75a   :  { %v16177_v17 = vadd.f32 %v16176_v63, %v16175_v40  ;;  %v16162_v58 = vrot.slane %v16161_v20, 1  ;;  %v16193_v33 = vrot.slane %v16192_v5, 4  ;;  %v16206_v11 = vsel %vm15988_vm8, %v24256_v59, 0.0 }
 0x75b   :  { %v16184_v31 = vadd.f32 %v16183_v18, %v16182_v49  ;;  %v16169_v52 = vrot.slane %v16168_v62, 1  ;;  %v16200_v55 = vrot.slane %v16199_v60, 4  ;;  %v16188_v36 = vrot.slane %v16187_v15, 2 }
 0x75c   :  { %17172 = vrcp.f32 %v16177_v17  ;;  %v16163_v8 = vadd.f32 %v16162_v58, %v16161_v20  ;;  %v16194_v23 = vadd.f32 %v16193_v33, %v16192_v5  ;;  %v16207_v22 = vrot.slane %v16206_v11, 4 }
 0x75d   :  { %17174 = vrcp.f32 %v16184_v31  ;;  %v16170_v16 = vadd.f32 %v16169_v52, %v16168_v62  ;;  %v16201_v53 = vadd.f32 %v16200_v55, %v16199_v60  ;;  %v24270_v40 = vstv %s24305_s7 }
 0x75e   :  { %17176 = vrcp.f32 %v16163_v8  ;;  %v16195_v24 = vrot.slane %v16194_v23, 2  ;;  %v16208_v44 = vadd.f32 %v16207_v22, %v16206_v11 }
 0x75f   :  { %17178 = vrcp.f32 %v16170_v16  ;;  %v16202_v1 = vrot.slane %v16201_v53, 2 }
 0x760   :  { %v16196_v17 = vadd.f32 %v16195_v24, %v16194_v23  ;;  %v16209_v58 = vrot.slane %v16208_v44, 2 }
 0x761   :  { %v16203_v30 = vadd.f32 %v16202_v1, %v16201_v53 }
 0x762   :  { %v16210_v16 = vadd.f32 %v16209_v58, %v16208_v44 }
 0x763   :  { %v16204_v33 = vrot.slane %v16203_v30, 1 }
 0x769   :  { %v17173_v35 = vpop.eup %17172 }
 0x76a   :  { %v17175_v18 = vpop.eup %17174 }
 0x779   :  { %v16074_v45 = vpop.permute.xlu0 %16073 }
 0x77a   :  { %v16095_v38 = vmul.f32 %v17157_v57, %v16074_v45 }
 0x77b   :  { %v16076_v7 = vpop.permute.xlu1 %16075 }
 0x77c   :  { %v16115_v61 = vsel %vm15988_vm8, %v16095_v38, 0.0  ;;  %v16096_v41 = vmul.f32 %v17159_v6, %v16076_v7  ;;  %v17177_v38 = vpop.eup %17176 }
 0x77d   :  { %v16116_v37 = vrot.slane %v16115_v61, 4  ;;  %v16070_v34 = vpop.permute.xlu0 %16069 }
 0x77e   :  { %v16122_v39 = vsel %vm15988_vm8, %v16096_v41, 0.0  ;;  %v16093_v0 = vmul.f32 %v17161_v27, %v16070_v34  ;;  %v17179_v41 = vpop.eup %17178  ;;  %v16197_v34 = vrot.slane %v16196_v17, 1 }
 0x77f   :  { %v16117_v57 = vadd.f32 %v16116_v37, %v16115_v61  ;;  %v16123_v21 = vrot.slane %v16122_v39, 4  ;;  %v16072_v56 = vpop.permute.xlu1 %16071 }
 0x780   :  { %v16101_v6 = vsel %vm15988_vm8, %v16093_v0, 0.0  ;;  %v16094_v14 = vmul.f32 %v24239_v10, %v16072_v56  ;;  %v16189_v10 = vadd.f32 %v16188_v36, %v16187_v15 }
 0x781   :  { %v16118_v9 = vrot.slane %v16117_v57, 2  ;;  %v16124_v19 = vadd.f32 %v16123_v21, %v16122_v39  ;;  %v16102_v54 = vrot.slane %v16101_v6, 4 }
 0x782   :  { %v16108_v27 = vsel %vm15988_vm8, %v16094_v14, 0.0  ;;  %v16190_v62 = vrot.slane %v16189_v10, 1  ;;  %v16211_v14 = vrot.slane %v16210_v16, 1 }
 0x783   :  { %v16119_v2 = vadd.f32 %v16118_v9, %v16117_v57  ;;  %v16125_v42 = vrot.slane %v16124_v19, 2  ;;  %v16103_v50 = vadd.f32 %v16102_v54, %v16101_v6  ;;  %v16109_v26 = vrot.slane %v16108_v27, 4 }
 0x784   :  { %v16191_v37 = vadd.f32 %v16190_v62, %v16189_v10  ;;  %v16198_v6 = vadd.f32 %v16197_v34, %v16196_v17 }
 0x785   :  { %v16120_v13 = vrot.slane %v16119_v2, 1  ;;  %v16126_v4 = vadd.f32 %v16125_v42, %v16124_v19  ;;  %v16104_v51 = vrot.slane %v16103_v50, 2  ;;  %v16110_v29 = vadd.f32 %v16109_v26, %v16108_v27 }
 0x786   :  { %v16205_v27 = vadd.f32 %v16204_v33, %v16203_v30 }
 0x787   :  { %v16121_v12 = vadd.f32 %v16120_v13, %v16119_v2  ;;  %v16127_v3 = vrot.slane %v16126_v4, 1  ;;  %v16105_v32 = vadd.f32 %v16104_v51, %v16103_v50  ;;  %v16111_v47 = vrot.slane %v16110_v29, 2 }
 0x788   :  { %v16212_v50 = vadd.f32 %v16211_v14, %v16210_v16 }
 0x789   :  { %v16223_v49 = vmul.f32 %v17173_v35, %v16121_v12  ;;  %v16128_v28 = vadd.f32 %v16127_v3, %v16126_v4  ;;  %v16106_v63 = vrot.slane %v16105_v32, 1  ;;  %v16112_v20 = vadd.f32 %v16111_v47, %v16110_v29 }
 0x78b   :  { %v16241_v46 = vadd.f32 %v24270_v40, %v16223_v49  ;;  %v16224_v45 = vmul.f32 %v17175_v18, %v16128_v28  ;;  %v16107_v31 = vadd.f32 %v16106_v63, %v16105_v32  ;;  %v16113_v52 = vrot.slane %v16112_v20, 1 }
 0x78d   :  { %v16249_v7 = vsub.f32 0.0, %v16241_v46  ;;  %v16242_v8 = vadd.f32 %v24270_v40, %v16224_v45  ;;  %v16221_v5 = vmul.f32 %v17177_v38, %v16107_v31  ;;  %v16114_v61 = vadd.f32 %v16113_v52, %v16112_v20 }
 0x78f   :  { %v16259_v60 = vmul.f32 1.442695, %v16249_v7  ;;  %v16250_v39 = vsub.f32 0.0, %v16242_v8  ;;  %v16239_v0 = vadd.f32 %v24270_v40, %v16221_v5  ;;  %v16222_v15 = vmul.f32 %v17179_v41, %v16114_v61 }
 0x791   :  { %17180 = vpow2.f32 %v16259_v60  ;;  %v16261_v57 = vmul.f32 1.442695, %v16250_v39  ;;  %v16247_v21 = vsub.f32 0.0, %v16239_v0  ;;  %v16240_v56 = vadd.f32 %v24270_v40, %v16222_v15 }
 0x792   :  { %v16078_v11 = vpop.permute.xlu0 %16077  ;;  %17182 = vrcp.f32 %v16191_v37 }
 0x793   :  { %v16255_v55 = vmul.f32 1.442695, %v16247_v21  ;;  %v16248_v9 = vsub.f32 0.0, %v16240_v56  ;;  %v16097_v19 = vmul.f32 %v24246_v43, %v16078_v11  ;;  %17184 = vpow2.f32 %v16261_v57 }
 0x794   :  { %v16080_v54 = vpop.permute.xlu1 %16079 }
 0x795   :  { %17186 = vpow2.f32 %v16255_v55  ;;  %v16257_v36 = vmul.f32 1.442695, %v16248_v9  ;;  %v16129_v23 = vsel %vm15988_vm8, %v16097_v19, 0.0  ;;  %v16098_v22 = vmul.f32 %v24250_v48, %v16080_v54 }
 0x796   :  { %v16130_v2 = vrot.slane %v16129_v23, 4  ;;  %17188 = vrcp.f32 %v16198_v6  ;;  %v16082_v42 = vpop.permute.xlu0 %16081 }
 0x797   :  { %17190 = vpow2.f32 %v16257_v36  ;;  %v16136_v26 = vsel %vm15988_vm8, %v16098_v22, 0.0  ;;  %v16099_v53 = vmul.f32 %v24252_v25, %v16082_v42 }
 0x798   :  { %v16131_v13 = vadd.f32 %v16130_v2, %v16129_v23  ;;  %v16137_v43 = vrot.slane %v16136_v26, 4  ;;  %17192 = vrcp.f32 %v16205_v27  ;;  %v16084_v4 = vpop.permute.xlu1 %16083 }
 0x799   :  { %v16143_v51 = vsel %vm15988_vm8, %v16099_v53, 0.0  ;;  %v16100_v29 = vmul.f32 %v24256_v59, %v16084_v4  ;;  %17194 = vrcp.f32 %v16212_v50 }
 0x79a   :  { %v16132_v10 = vrot.slane %v16131_v13, 2  ;;  %v16138_v24 = vadd.f32 %v16137_v43, %v16136_v26  ;;  %v16144_v48 = vrot.slane %v16143_v51, 4 }
 0x79b   :  { %v16150_v44 = vsel %vm15988_vm8, %v16100_v29, 0.0 }
 0x79c   :  { %v16133_v12 = vadd.f32 %v16132_v10, %v16131_v13  ;;  %v16139_v3 = vrot.slane %v16138_v24, 2  ;;  %v16145_v32 = vadd.f32 %v16144_v48, %v16143_v51  ;;  %v16151_v47 = vrot.slane %v16150_v44, 4 }
 0x79e   :  { %v17181_v35 = vpop.eup %17180  ;;  %v16134_v25 = vrot.slane %v16133_v12, 1  ;;  %v16140_v1 = vadd.f32 %v16139_v3, %v16138_v24  ;;  %v16146_v49 = vrot.slane %v16145_v32, 2  ;;  %v16152_v28 = vadd.f32 %v16151_v47, %v16150_v44 }
 0x79f   :  { %v16273_v63 = vadd.f32 1.0, %v17181_v35  ;;  %v17183_v20 = vpop.eup %17182 }
 0x7a0   :  { %v16135_v18 = vadd.f32 %v16134_v25, %v16133_v12  ;;  %v16141_v62 = vrot.slane %v16140_v1, 1  ;;  %v16147_v59 = vadd.f32 %v16146_v49, %v16145_v32  ;;  %v16153_v17 = vrot.slane %v16152_v28, 2  ;;  %v17185_v58 = vpop.eup %17184 }
 0x7a1   :  { %17196 = vrcp.f32 %v16273_v63  ;;  %v16274_v16 = vadd.f32 1.0, %v17185_v58 }
 0x7a2   :  { %v17187_v46 = vpop.eup %17186  ;;  %v16225_v45 = vmul.f32 %v17183_v20, %v16135_v18  ;;  %v16142_v31 = vadd.f32 %v16141_v62, %v16140_v1  ;;  %v16148_v52 = vrot.slane %v16147_v59, 1  ;;  %v16154_v38 = vadd.f32 %v16153_v17, %v16152_v28 }
 0x7a3   :  { %v17189_v30 = vpop.eup %17188  ;;  %v16271_v7 = vadd.f32 1.0, %v17187_v46 }
 0x7a4   :  { %v17191_v8 = vpop.eup %17190  ;;  %v16243_v5 = vadd.f32 %v24270_v40, %v16225_v45  ;;  %v16226_v61 = vmul.f32 %v17189_v30, %v16142_v31  ;;  %v16149_v41 = vadd.f32 %v16148_v52, %v16147_v59  ;;  %v16155_v37 = vrot.slane %v16154_v38, 1 }
 0x7a5   :  { %v17193_v34 = vpop.eup %17192  ;;  %17198 = vrcp.f32 %v16271_v7  ;;  %v16272_v60 = vadd.f32 1.0, %v17191_v8 }
 0x7a6   :  { %v16251_v39 = vsub.f32 0.0, %v16243_v5  ;;  %v16244_v0 = vadd.f32 %v24270_v40, %v16226_v61  ;;  %v16227_v15 = vmul.f32 %v17193_v34, %v16149_v41  ;;  %v16156_v33 = vadd.f32 %v16155_v37, %v16154_v38  ;;  %v17195_v57 = vpop.eup %17194 }
 0x7a7   :  { %17200 = vrcp.f32 %v16272_v60 }
 0x7a8   :  { %v16263_v21 = vmul.f32 1.442695, %v16251_v39  ;;  %v16252_v56 = vsub.f32 0.0, %v16244_v0  ;;  %v16245_v11 = vadd.f32 %v24270_v40, %v16227_v15  ;;  %v16228_v6 = vmul.f32 %v17195_v57, %v16156_v33 }
 0x7a9   :  { %17202 = vrcp.f32 %v16274_v16 }
 0x7aa   :  { %17204 = vpow2.f32 %v16263_v21  ;;  %v16265_v14 = vmul.f32 1.442695, %v16252_v56  ;;  %v16253_v55 = vsub.f32 0.0, %v16245_v11  ;;  %v16246_v9 = vadd.f32 %v24270_v40, %v16228_v6 }
 0x7ac   :  { %17206 = vpow2.f32 %v16265_v14  ;;  %v16267_v19 = vmul.f32 1.442695, %v16253_v55  ;;  %v16254_v54 = vsub.f32 0.0, %v16246_v9 }
 0x7ae   :  { %17208 = vpow2.f32 %v16267_v19  ;;  %v16269_v27 = vmul.f32 1.442695, %v16254_v54  ;;  %v17197_v36 = vpop.eup %17196 }
 0x7b0   :  { %17210 = vpow2.f32 %v16269_v27 }
 0x7b2   :  { %v17199_v23 = vpop.eup %17198 }
 0x7b4   :  { %v17201_v22 = vpop.eup %17200 }
 0x7b5   :  { %v16303_v2 = vsel %vm15570_vm1, %v17201_v22, %v17199_v23  ;;  %vm16311_vm1 = vcmask 7168  }
 0x7b6   :  { %v17203_v42 = vpop.eup %17202  ;;  %v16304_v50 = vsel %vm15572_vm3, %v17197_v36, %v16303_v2 }
 0x7b7   :  { %v17205_v26 = vpop.eup %17204  ;;  %v16305_v53 = vsel %vm15574_vm9, %v17203_v42, %v16304_v50 }
 0x7b8   :  { %v16275_v13 = vadd.f32 1.0, %v17205_v26 }
 0x7b9   :  { %v17207_v43 = vpop.eup %17206 }
 0x7ba   :  { %17212 = vrcp.f32 %v16275_v13  ;;  %v16276_v40 = vadd.f32 1.0, %v17207_v43 }
 0x7bb   :  { %v17209_v4 = vpop.eup %17208 }
 0x7bc   :  { %17214 = vrcp.f32 %v16276_v40  ;;  %v16277_v51 = vadd.f32 1.0, %v17209_v4 }
 0x7bd   :  { %v17211_v29 = vpop.eup %17210 }
 0x7be   :  { %17216 = vrcp.f32 %v16277_v51  ;;  %v16278_v10 = vadd.f32 1.0, %v17211_v29 }
 0x7c0   :  { %17218 = vrcp.f32 %v16278_v10 }
 0x7c7   :  { %v17213_v24 = vpop.eup %17212 }
 0x7c8   :  { %v16306_v48 = vsel %vm15576_vm10, %v17213_v24, %v16305_v53 }
 0x7c9   :  { %v17215_v44 = vpop.eup %17214 }
 0x7ca   :  { %v16307_v12 = vsel %vm15578_vm13, %v17215_v44, %v16306_v48 }
 0x7cb   :  { %v17217_v3 = vpop.eup %17216 }
 0x7cc   :  { %v16308_v32 = vsel %vm15580_vm0, %v17217_v3, %v16307_v12 }
 0x7cd   :  { %v17219_v47 = vpop.eup %17218 }
 0x7ce   :  { %v16309_v35 = vsel %vm15582_vm4, %v17219_v47, %v16308_v32 }
 0x7cf   :  { %16312 = vst.msk [vmem:[%s24306_s8] sm:$0xff] %vm16311_vm1, %v16309_v35 }

</bundles_post_ra>
